<compile_context>
chip_gen: v6e
topology: v6e:2x2x1
jax: 0.10.0
libtpu: 0.0.40
codegen_flags: <defaults>
</compile_context>

<pallas_src>
import functools

import jax
import jax.numpy as jnp
from jax.experimental import pallas as pl
from jax.experimental.pallas import tpu as pltpu

IMG_C, IMG_H, IMG_W = 3, 128, 128
D_IMG = IMG_C * IMG_H * IMG_W          # 49152 image features
D_IN = D_IMG + 1                       # 49153 (+1 scalar feature `a`)
HID = 256
D_OUT = 2
N_PAD = 128                            # pad the 2-wide output to a full lane


def _tensorcores_per_chip():
    """2 on v7x (2 TensorCores/chip), else 1.  Defaults to 1 (always correct)."""
    try:
        kind = jax.devices()[0].device_kind.lower()
    except Exception:
        return 1
    return 2 if ("v7" in kind or "7x" in kind) else 1


NC = _tensorcores_per_chip()
# K tile of the bf16 W1 stream: 8 MiB/tile at NC=1 (3 steps), 6 MiB/tile at
# NC=2 (2 steps per core-slice).  Double-buffered this stays well inside the
# 40-48 MiB scoped-VMEM budgets below.
TK = 16384 if NC == 1 else 12288
KPC = D_IMG // (NC * TK)               # K tiles per core slice


# ---------------------------------------------------------------------------
# Fused single-TC kernel (NC == 1, v5e/v6e): streamed layer-1 matmul with the
# whole head run under pl.when on the last K step.  grid = (KPC,).
# ---------------------------------------------------------------------------
def fused_mlp_kernel(x_ref, w1_ref, a_ref, w1a_ref, b1_ref,
                     w2_ref, b2_ref, w3_ref, b3_ref, o_ref, acc_ref):
    k = pl.program_id(0)

    @pl.when(k == 0)
    def _():
        acc_ref[...] = jnp.zeros_like(acc_ref)

    off = pl.multiple_of(k * TK, TK)
    x_tile = x_ref[:, pl.ds(off, TK)]                 # bf16 (b_pad, TK), resident x
    acc_ref[...] += jnp.dot(x_tile, w1_ref[...],
                            preferred_element_type=jnp.float32)

    @pl.when(k == pl.num_programs(0) - 1)
    def _():
        # rank-1 correction for the '+1' feature, bias, ReLU, layers 2 & 3.
        s = acc_ref[...] + a_ref[...] * w1a_ref[...] + b1_ref[...]
        h1 = jnp.maximum(s, 0.0)
        h2 = jnp.maximum(
            jnp.dot(h1, w2_ref[...], preferred_element_type=jnp.float32)
            + b2_ref[...], 0.0)
        o_ref[...] = (jnp.dot(h2, w3_ref[...],
                              preferred_element_type=jnp.float32)
                      + b3_ref[...]).astype(o_ref.dtype)


# ---------------------------------------------------------------------------
# v7x path (NC == 2): per-core layer-1 partial sums.  grid = (NC, KPC).
# Accumulates directly into the output block (resident across k).
# ---------------------------------------------------------------------------
def layer1_kernel(x_ref, w1_ref, part_ref):
    c = pl.program_id(0)
    k = pl.program_id(1)

    @pl.when(k == 0)
    def _():
        part_ref[...] = jnp.zeros_like(part_ref)

    off = pl.multiple_of((c * KPC + k) * TK, TK)
    x_tile = x_ref[:, pl.ds(off, TK)]
    part_ref[...] += jnp.dot(x_tile, w1_ref[...],
                             preferred_element_type=jnp.float32)


# ---------------------------------------------------------------------------
# v7x head: combine per-core partials + rank-1 `a` term + b1, ReLU, layers 2-3.
# Single grid step, everything resident.
# ---------------------------------------------------------------------------
def head_kernel(part_ref, a_ref, w1a_ref, b1_ref, w2_ref, b2_ref,
                w3_ref, b3_ref, o_ref, *, b_pad):
    s = part_ref[0:b_pad, :]
    for c in range(1, NC):
        s = s + part_ref[c * b_pad:(c + 1) * b_pad, :]
    s = s + a_ref[...] * w1a_ref[...] + b1_ref[...]
    h1 = jnp.maximum(s, 0.0)
    h2 = jnp.maximum(
        jnp.dot(h1, w2_ref[...], preferred_element_type=jnp.float32)
        + b2_ref[...], 0.0)
    o_ref[...] = (jnp.dot(h2, w3_ref[...], preferred_element_type=jnp.float32)
                  + b3_ref[...]).astype(o_ref.dtype)


def prepare_params(w1, b1, w2, b2, w3, b3):
    """One-time weight prep (OUTSIDE jit): W1 image rows are cast to bf16 once
    (halves the per-call HBM stream); everything else stays fp32."""
    w1_img = w1[:D_IMG, :].astype(jnp.bfloat16)               # (49152, 256) bf16
    w1_a = w1[D_IMG:, :]                                      # (1, 256) fp32
    b1_r = b1.reshape(1, HID)
    b2_r = b2.reshape(1, HID)
    w3_p = jnp.zeros((HID, N_PAD), jnp.float32).at[:, :D_OUT].set(w3)
    b3_p = jnp.zeros((1, N_PAD), jnp.float32).at[:, :D_OUT].set(
        b3.reshape(1, D_OUT))
    return (w1_img, w1_a, b1_r, w2, b2_r, w3_p, b3_p)


@jax.jit
def mlp_forward(img, a, w1_img, w1_a, b1_r, w2, b2_r, w3_p, b3_p):
    B = img.shape[0]
    # Pad batch to 16 so the bf16 x block satisfies the bf16 sublane tile (16).
    b_pad = max(16, pl.cdiv(B, 16) * 16)

    # Glue: flatten NCHW image, cast to bf16, pad batch (tiny vs. the W1 stream).
    x = img.reshape(B, D_IMG).astype(jnp.bfloat16)
    x_p = jnp.zeros((b_pad, D_IMG), jnp.bfloat16).at[:B, :].set(x)
    a_p = jnp.zeros((b_pad, 1), jnp.float32).at[:B, :].set(a)

    if NC == 1:
        # Single fused kernel: stream W1, fuse the head into the last step.
        out = pl.pallas_call(
            fused_mlp_kernel,
            out_shape=jax.ShapeDtypeStruct((b_pad, N_PAD), jnp.float32),
            grid_spec=pltpu.PrefetchScalarGridSpec(
                num_scalar_prefetch=0,
                grid=(KPC,),
                in_specs=[
                    pl.BlockSpec((b_pad, D_IMG), lambda k: (0, 0)),  # x (resident)
                    pl.BlockSpec((TK, HID), lambda k: (k, 0)),       # W1 bf16 stream
                    pl.BlockSpec((b_pad, 1), lambda k: (0, 0)),      # a
                    pl.BlockSpec((1, HID), lambda k: (0, 0)),        # w1[-1,:]
                    pl.BlockSpec((1, HID), lambda k: (0, 0)),        # b1
                    pl.BlockSpec((HID, HID), lambda k: (0, 0)),      # W2
                    pl.BlockSpec((1, HID), lambda k: (0, 0)),        # b2
                    pl.BlockSpec((HID, N_PAD), lambda k: (0, 0)),    # W3 (padded)
                    pl.BlockSpec((1, N_PAD), lambda k: (0, 0)),      # b3 (padded)
                ],
                out_specs=pl.BlockSpec((b_pad, N_PAD), lambda k: (0, 0)),
                scratch_shapes=[pltpu.VMEM((b_pad, HID), jnp.float32)],
            ),
            compiler_params=pltpu.CompilerParams(
                dimension_semantics=("arbitrary",),
                vmem_limit_bytes=48 * 1024 * 1024),
        )(x_p, w1_img, a_p, w1_a, b1_r, w2, b2_r, w3_p, b3_p)
    else:
        # v7x: split the K stream across the two TensorCores, combine in a
        # tiny second kernel.
        partials = pl.pallas_call(
            layer1_kernel,
            out_shape=jax.ShapeDtypeStruct((NC * b_pad, HID), jnp.float32),
            grid_spec=pltpu.PrefetchScalarGridSpec(
                num_scalar_prefetch=0,
                grid=(NC, KPC),
                in_specs=[
                    pl.BlockSpec((b_pad, D_IMG), lambda c, k: (0, 0)),
                    pl.BlockSpec((TK, HID), lambda c, k: (c * KPC + k, 0)),
                ],
                out_specs=pl.BlockSpec((b_pad, HID), lambda c, k: (c, 0)),
            ),
            compiler_params=pltpu.CompilerParams(
                dimension_semantics=("parallel", "arbitrary"),
                vmem_limit_bytes=40 * 1024 * 1024),
        )(x_p, w1_img)

        out = pl.pallas_call(
            functools.partial(head_kernel, b_pad=b_pad),
            out_shape=jax.ShapeDtypeStruct((b_pad, N_PAD), jnp.float32),
            grid_spec=pltpu.PrefetchScalarGridSpec(
                num_scalar_prefetch=0,
                grid=(1,),
                in_specs=[
                    pl.BlockSpec((NC * b_pad, HID), lambda i: (0, 0)),  # partials
                    pl.BlockSpec((b_pad, 1), lambda i: (0, 0)),         # a
                    pl.BlockSpec((1, HID), lambda i: (0, 0)),           # w1[-1,:]
                    pl.BlockSpec((1, HID), lambda i: (0, 0)),           # b1
                    pl.BlockSpec((HID, HID), lambda i: (0, 0)),         # W2
                    pl.BlockSpec((1, HID), lambda i: (0, 0)),           # b2
                    pl.BlockSpec((HID, N_PAD), lambda i: (0, 0)),       # W3 (padded)
                    pl.BlockSpec((1, N_PAD), lambda i: (0, 0)),         # b3 (padded)
                ],
                out_specs=pl.BlockSpec((b_pad, N_PAD), lambda i: (0, 0)),
            ),
            compiler_params=pltpu.CompilerParams(
                dimension_semantics=("arbitrary",)),
        )(partials, a_p, w1_a, b1_r, w2, b2_r, w3_p, b3_p)

    return out[:B, :D_OUT]


def init_params(key):
    """Deterministic PyTorch-Linear-style init: U(-1/sqrt(fan_in), 1/sqrt(fan_in))."""
    ks = jax.random.split(key, 6)

    def lin(kw, kb, fan_in, fan_out):
        bound = 1.0 / jnp.sqrt(jnp.float32(fan_in))
        w = jax.random.uniform(kw, (fan_in, fan_out), jnp.float32, -bound, bound)
        b = jax.random.uniform(kb, (fan_out,), jnp.float32, -bound, bound)
        return w, b

    w1, b1 = lin(ks[0], ks[1], D_IN, HID)
    w2, b2 = lin(ks[2], ks[3], HID, HID)
    w3, b3 = lin(ks[4], ks[5], HID, D_OUT)
    return w1, b1, w2, b2, w3, b3


def reference_forward(img, a, w1, b1, w2, b2, w3, b3):
    B = img.shape[0]
    x = jnp.concatenate([img.reshape(B, -1), a], axis=1)
    hp = jax.lax.Precision.HIGHEST
    h1 = jnp.maximum(jnp.dot(x, w1, precision=hp) + b1, 0.0)
    h2 = jnp.maximum(jnp.dot(h1, w2, precision=hp) + b2, 0.0)
    return jnp.dot(h2, w3, precision=hp) + b3


if __name__ == "__main__":
    key = jax.random.PRNGKey(0)
    k_img, k_a, k_par = jax.random.split(key, 3)

    B = 2  # small batch; feature dims are fixed by the module (3*128*128 + 1)
    img = jax.random.normal(k_img, (B, IMG_C, IMG_H, IMG_W), jnp.float32)
    a = jax.random.normal(k_a, (B, 1), jnp.float32)
    params = init_params(k_par)
    prepped = prepare_params(*params)

    out = mlp_forward(img, a, *prepped)
    out = jax.block_until_ready(out)

    ref = reference_forward(img, a, *params)
    assert out.shape == (B, D_OUT)
    # Tolerance covers the bf16 W1/x stream (fp32 accumulation) and the MXU's
    # bf16-pass decomposition of the fp32 head matmuls vs. the HIGHEST-precision
    # XLA reference.  Expected output error is ~1e-3; margin is ~10x.
    assert jnp.allclose(out, ref, atol=1e-2, rtol=1e-2), (out, ref)

    print("KERNEL_OK")
</pallas_src>

<mosaic_0001>
module attributes {stable_mosaic.version = 11 : i64} {
  func.func @fused_mlp_kernel(%arg0: i32, %arg1: memref<16x49152xbf16, #tpu.memory_space<vmem>>, %arg2: memref<16384x256xbf16, #tpu.memory_space<vmem>>, %arg3: memref<16x1xf32, #tpu.memory_space<vmem>>, %arg4: memref<1x256xf32, #tpu.memory_space<vmem>>, %arg5: memref<1x256xf32, #tpu.memory_space<vmem>>, %arg6: memref<256x256xf32, #tpu.memory_space<vmem>>, %arg7: memref<1x256xf32, #tpu.memory_space<vmem>>, %arg8: memref<256x128xf32, #tpu.memory_space<vmem>>, %arg9: memref<1x128xf32, #tpu.memory_space<vmem>>, %arg10: memref<16x128xf32, #tpu.memory_space<vmem>>, %arg11: memref<16x256xf32, #tpu.memory_space<vmem>>) attributes {dimension_semantics = [#tpu.dimension_semantics<arbitrary>], iteration_bounds = array<i64: 3>, scalar_prefetch = 0 : i64, scratch_operands = 1 : i64, tpu.core_type = #tpu.core_type<tc>, window_params = [{pipeline_mode = #tpu.pipeline_mode<synchronous>, transform_indices = @transform_0, window_bounds = array<i64: 16, 49152>}, {transform_indices = @transform_1, window_bounds = array<i64: 16384, 256>}, {pipeline_mode = #tpu.pipeline_mode<synchronous>, transform_indices = @transform_2, window_bounds = array<i64: 16, 1>}, {pipeline_mode = #tpu.pipeline_mode<synchronous>, transform_indices = @transform_3, window_bounds = array<i64: 1, 256>}, {pipeline_mode = #tpu.pipeline_mode<synchronous>, transform_indices = @transform_4, window_bounds = array<i64: 1, 256>}, {pipeline_mode = #tpu.pipeline_mode<synchronous>, transform_indices = @transform_5, window_bounds = array<i64: 256, 256>}, {pipeline_mode = #tpu.pipeline_mode<synchronous>, transform_indices = @transform_6, window_bounds = array<i64: 1, 256>}, {pipeline_mode = #tpu.pipeline_mode<synchronous>, transform_indices = @transform_7, window_bounds = array<i64: 256, 128>}, {pipeline_mode = #tpu.pipeline_mode<synchronous>, transform_indices = @transform_8, window_bounds = array<i64: 1, 128>}, {pipeline_mode = #tpu.pipeline_mode<synchronous>, transform_indices = @transform_9, window_bounds = array<i64: 16, 128>}]} {
    %c0_i32 = arith.constant 0 : i32
    %0 = arith.cmpi eq, %arg0, %c0_i32 : i32
    %1 = arith.extui %0 : i1 to i32
    %c0_i32_0 = arith.constant 0 : i32
    %2 = arith.cmpi ne, %1, %c0_i32_0 : i32
    scf.if %2 {
      %cst_8 = arith.constant 0.000000e+00 : f32
      %15 = vector.broadcast %cst_8 : f32 to vector<16x256xf32>
      %c0_9 = arith.constant 0 : index
      %c0_10 = arith.constant 0 : index
      %16 = vector.load %arg11[%c0_9, %c0_10] : memref<16x256xf32, #tpu.memory_space<vmem>>, vector<16x256xf32>
      tpu.vector_store %arg11[%c0_9, %c0_10], %15 {strides = array<i32>} : memref<16x256xf32, #tpu.memory_space<vmem>>, vector<16x256xf32>,
    } else {
    }
    %c16384_i32 = arith.constant 16384 : i32
    %3 = arith.muli %arg0, %c16384_i32 : i32
    %4 = tpu.assume_multiple %3, 16384 : i32
    %c0 = arith.constant 0 : index
    %5 = arith.index_cast %4 : i32 to index
    %6 = vector.load %arg1[%c0, %5] : memref<16x49152xbf16, #tpu.memory_space<vmem>>, vector<16x16384xbf16>
    %c0_1 = arith.constant 0 : index
    %c0_2 = arith.constant 0 : index
    %7 = vector.load %arg11[%c0_1, %c0_2] : memref<16x256xf32, #tpu.memory_space<vmem>>, vector<16x256xf32>
    %c0_3 = arith.constant 0 : index
    %c0_4 = arith.constant 0 : index
    %8 = vector.load %arg2[%c0_3, %c0_4] : memref<16384x256xbf16, #tpu.memory_space<vmem>>, vector<16384x256xbf16>
    %cst = arith.constant dense<0.000000e+00> : vector<16x256xf32>
    %9 = tpu.matmul %6, %8, %cst {dimension_numbers = #tpu.dot_dimension_numbers<[1], [0], [0], [1], [0, 0, 1, 1], [], []>} : vector<16x16384xbf16>, vector<16384x256xbf16>, vector<16x256xf32> -> vector<16x256xf32>
    %10 = arith.addf %7, %9 : vector<16x256xf32>
    %c0_5 = arith.constant 0 : index
    %c0_6 = arith.constant 0 : index
    %11 = vector.load %arg11[%c0_5, %c0_6] : memref<16x256xf32, #tpu.memory_space<vmem>>, vector<16x256xf32>
    tpu.vector_store %arg11[%c0_5, %c0_6], %10 {strides = array<i32>} : memref<16x256xf32, #tpu.memory_space<vmem>>, vector<16x256xf32>,
    %c2_i32 = arith.constant 2 : i32
    %12 = arith.cmpi eq, %arg0, %c2_i32 : i32
    %13 = arith.extui %12 : i1 to i32
    %c0_i32_7 = arith.constant 0 : i32
    %14 = arith.cmpi ne, %13, %c0_i32_7 : i32
    scf.if %14 {
      %c0_8 = arith.constant 0 : index
      %c0_9 = arith.constant 0 : index
      %15 = vector.load %arg11[%c0_8, %c0_9] : memref<16x256xf32, #tpu.memory_space<vmem>>, vector<16x256xf32>
      %c0_10 = arith.constant 0 : index
      %c0_11 = arith.constant 0 : index
      %16 = vector.load %arg3[%c0_10, %c0_11] : memref<16x1xf32, #tpu.memory_space<vmem>>, vector<16x1xf32>
      %c0_12 = arith.constant 0 : index
      %c0_13 = arith.constant 0 : index
      %17 = vector.load %arg4[%c0_12, %c0_13] : memref<1x256xf32, #tpu.memory_space<vmem>>, vector<1x256xf32>
      %18 = vector.broadcast %16 : vector<16x1xf32> to vector<16x256xf32>
      %19 = vector.broadcast %17 : vector<1x256xf32> to vector<16x256xf32>
      %20 = arith.mulf %18, %19 : vector<16x256xf32>
      %21 = arith.addf %15, %20 : vector<16x256xf32>
      %c0_14 = arith.constant 0 : index
      %c0_15 = arith.constant 0 : index
      %22 = vector.load %arg5[%c0_14, %c0_15] : memref<1x256xf32, #tpu.memory_space<vmem>>, vector<1x256xf32>
      %23 = vector.broadcast %22 : vector<1x256xf32> to vector<16x256xf32>
      %24 = arith.addf %21, %23 : vector<16x256xf32>
      %cst_16 = arith.constant 0.000000e+00 : f32
      %25 = vector.broadcast %cst_16 : f32 to vector<16x256xf32>
      %26 = arith.maximumf %24, %25 : vector<16x256xf32>
      %c0_17 = arith.constant 0 : index
      %c0_18 = arith.constant 0 : index
      %27 = vector.load %arg6[%c0_17, %c0_18] : memref<256x256xf32, #tpu.memory_space<vmem>>, vector<256x256xf32>
      %cst_19 = arith.constant dense<0.000000e+00> : vector<16x256xf32>
      %28 = tpu.matmul %26, %27, %cst_19 {dimension_numbers = #tpu.dot_dimension_numbers<[1], [0], [0], [1], [0, 0, 1, 1], [], []>} : vector<16x256xf32>, vector<256x256xf32>, vector<16x256xf32> -> vector<16x256xf32>
      %c0_20 = arith.constant 0 : index
      %c0_21 = arith.constant 0 : index
      %29 = vector.load %arg7[%c0_20, %c0_21] : memref<1x256xf32, #tpu.memory_space<vmem>>, vector<1x256xf32>
      %30 = vector.broadcast %29 : vector<1x256xf32> to vector<16x256xf32>
      %31 = arith.addf %28, %30 : vector<16x256xf32>
      %cst_22 = arith.constant 0.000000e+00 : f32
      %32 = vector.broadcast %cst_22 : f32 to vector<16x256xf32>
      %33 = arith.maximumf %31, %32 : vector<16x256xf32>
      %c0_23 = arith.constant 0 : index
      %c0_24 = arith.constant 0 : index
      %34 = vector.load %arg8[%c0_23, %c0_24] : memref<256x128xf32, #tpu.memory_space<vmem>>, vector<256x128xf32>
      %cst_25 = arith.constant dense<0.000000e+00> : vector<16x128xf32>
      %35 = tpu.matmul %33, %34, %cst_25 {dimension_numbers = #tpu.dot_dimension_numbers<[1], [0], [0], [1], [0, 0, 1, 1], [], []>} : vector<16x256xf32>, vector<256x128xf32>, vector<16x128xf32> -> vector<16x128xf32>
      %c0_26 = arith.constant 0 : index
      %c0_27 = arith.constant 0 : index
      %36 = vector.load %arg9[%c0_26, %c0_27] : memref<1x128xf32, #tpu.memory_space<vmem>>, vector<1x128xf32>
      %37 = vector.broadcast %36 : vector<1x128xf32> to vector<16x128xf32>
      %38 = arith.addf %35, %37 : vector<16x128xf32>
      %c0_28 = arith.constant 0 : index
      %c0_29 = arith.constant 0 : index
      %39 = vector.load %arg10[%c0_28, %c0_29] : memref<16x128xf32, #tpu.memory_space<vmem>>, vector<16x128xf32>
      tpu.vector_store %arg10[%c0_28, %c0_29], %38 {strides = array<i32>} : memref<16x128xf32, #tpu.memory_space<vmem>>, vector<16x128xf32>,
    } else {
    }
    return
  }
  func.func @transform_0(%arg0: i32) -> (i32, i32) {
    %c0_i32 = arith.constant 0 : i32
    %c0_i32_0 = arith.constant 0 : i32
    %c0_i32_1 = arith.constant 0 : i32
    return %c0_i32, %c0_i32_0 : i32, i32
  }
  func.func @transform_1(%arg0: i32) -> (i32, i32) {
    %c0_i32 = arith.constant 0 : i32
    %c0_i32_0 = arith.constant 0 : i32
    return %arg0, %c0_i32 : i32, i32
  }
  func.func @transform_2(%arg0: i32) -> (i32, i32) {
    %c0_i32 = arith.constant 0 : i32
    %c0_i32_0 = arith.constant 0 : i32
    %c0_i32_1 = arith.constant 0 : i32
    return %c0_i32, %c0_i32_0 : i32, i32
  }
  func.func @transform_3(%arg0: i32) -> (i32, i32) {
    %c0_i32 = arith.constant 0 : i32
    %c0_i32_0 = arith.constant 0 : i32
    %c0_i32_1 = arith.constant 0 : i32
    return %c0_i32, %c0_i32_0 : i32, i32
  }
  func.func @transform_4(%arg0: i32) -> (i32, i32) {
    %c0_i32 = arith.constant 0 : i32
    %c0_i32_0 = arith.constant 0 : i32
    %c0_i32_1 = arith.constant 0 : i32
    return %c0_i32, %c0_i32_0 : i32, i32
  }
  func.func @transform_5(%arg0: i32) -> (i32, i32) {
    %c0_i32 = arith.constant 0 : i32
    %c0_i32_0 = arith.constant 0 : i32
    %c0_i32_1 = arith.constant 0 : i32
    return %c0_i32, %c0_i32_0 : i32, i32
  }
  func.func @transform_6(%arg0: i32) -> (i32, i32) {
    %c0_i32 = arith.constant 0 : i32
    %c0_i32_0 = arith.constant 0 : i32
    %c0_i32_1 = arith.constant 0 : i32
    return %c0_i32, %c0_i32_0 : i32, i32
  }
  func.func @transform_7(%arg0: i32) -> (i32, i32) {
    %c0_i32 = arith.constant 0 : i32
    %c0_i32_0 = arith.constant 0 : i32
    %c0_i32_1 = arith.constant 0 : i32
    return %c0_i32, %c0_i32_0 : i32, i32
  }
  func.func @transform_8(%arg0: i32) -> (i32, i32) {
    %c0_i32 = arith.constant 0 : i32
    %c0_i32_0 = arith.constant 0 : i32
    %c0_i32_1 = arith.constant 0 : i32
    return %c0_i32, %c0_i32_0 : i32, i32
  }
  func.func @transform_9(%arg0: i32) -> (i32, i32) {
    %c0_i32 = arith.constant 0 : i32
    %c0_i32_0 = arith.constant 0 : i32
    %c0_i32_1 = arith.constant 0 : i32
    return %c0_i32, %c0_i32_0 : i32, i32
  }
}

</mosaic_0001>

<bundles_post_ra>
// kernel: mlp_forward.1
= control target key start
LH: loop header
LB: loop body
LE: loop exit
PB: predicated region body
PF: predicated region fallthrough
CT: control target
= control target key end

     0   :  { %14 = vsyncpa [#allocation4], 0  ;;  %s25761_s0 = inlined_call_operand.vmem [shape: bf16[16,49152], index: 0, kind: input, shape index: {}]   ;;  %s25762_s1 = inlined_call_operand.hbm [shape: bf16[49152,256], index: 1, kind: input, shape index: {}]   ;;  %s25763_s2 = inlined_call_operand.vmem [shape: f32[16,1], index: 2, kind: input, shape index: {}]   ;;  %s25764_s3 = inlined_call_operand.hbm [shape: f32[1,256], index: 3, kind: input, shape index: {}]   ;;  %s25765_s4 = inlined_call_operand.hbm [shape: f32[1,256], index: 4, kind: input, shape index: {}]   ;;  %s25766_s5 = inlined_call_operand.hbm [shape: f32[256,256], index: 5, kind: input, shape index: {}]   ;;  %s25767_s6 = inlined_call_operand.hbm [shape: f32[1,256], index: 6, kind: input, shape index: {}]   ;;  %s25768_s7 = inlined_call_operand.hbm [shape: f32[256,128], index: 7, kind: input, shape index: {}]   ;;  %s25769_s8 = inlined_call_operand.hbm [shape: f32[1,128], index: 8, kind: input, shape index: {}]   ;;  %s25770_s9 = inlined_call_operand.vmem [shape: f32[16,128], index: 9, kind: output, shape index: {}]  }
   0x1   :  { %16 = vsyncpa [#allocation4 + $0x1], 0 }
   0x2   :  { %17 = vsyncpa [#allocation6], 0 }
   0x3   :  { %18 = vsyncpa [#allocation9], 0 }
   0x4   :  { %19 = vsyncpa [#allocation12], 0  ;;  %s22401_s30 = smov 0   ;;  %s22403_s10 = smov 0  }
   0x5   :  { %s22405_s11 = smov 0   ;;  %s22407_s12 = smov 0  }
   0x6 LB: > { %s22338_s13 = smov [#allocation5]   ;;  %s22422_s15 = sadd.s32 4294967295, %s22336_s12   ;;  %s22336_s12 = sphi %s22407_s12, %s25834_s12   ;;  %s22332_s11 = sphi %s22405_s11, %s25833_s11   ;;  %s22328_s10 = sphi %s22403_s10, %s25832_s10   ;;  %s22324_s30 = sphi %s22401_s30, %s25831_s30  }
   0x7   : > { %s264_s14 = sshll.u32 %s22338_s13, 4  ;;  %p16684_p0 = scmp.ge.s32.totalorder %s22336_s12, 1  ;;  %s265_s14 = int_to_ptr.vmem [resolvable:$true] %s264_s14 }
   0x8   : > { %p25771_p1 = scmp.eq.s32.totalorder %s22422_s15, 0  ;;  %p245_p2 = scmp.lt.s32.totalorder %s22336_s12, 4 }
   0x9   : > { %s22339_s17 = smov [#allocation8]   ;;  %s22340_s20 = smov [#allocation11]  }
   0xa   : > { %p22428_p4 = pnand %p16684_p0, %p245_p2  ;;  %s285_s18 = sshll.u32 %s22339_s17, 4  ;;  %s22434_s18 = int_to_ptr.vmem [resolvable:$true] %s285_s18 }
   0xb   : > { %s309_s21 = sshll.u32 %s22340_s20, 4  ;;  %s22117_s23 = scalar_lea.vmem %s265_s14, 32  ;;  %s22442_s21 = int_to_ptr.vmem [resolvable:$true] %s309_s21 }
   0xc   : > { %s25775_s16 = scalar_select %p22428_p4, 1, 0 }
   0xd   : > { %p18953_p5 = pneg %p22428_p4  ;;  %p22118_p8 = scmp.ne.s32.totalorder %s265_s14, %s22117_s23 }
   0xe   : > { %p22125_p11 = scmp.lt.s32.totalorder %s265_s14, %s265_s14  ;;  %p22126_p12 = scmp.lt.s32.totalorder %s22117_s23, %s22117_s23 }
   0xf   : > { %p22438_p6 = pnand %p18953_p5, %p25771_p1 }
  0x10   : > { %p22127_p13 = por %p22126_p12, %p22125_p11 }
  0x11   : > { %p22446_p7 = pneg %p22438_p6 }
  0x13   : > { %p22120_p9 = pnand %p22118_p8, %p22446_p7 }
  0x15   : > { %p22121_p10 = pneg %p22120_p9 }
  0x17   : > { %p22128_p0 = pnand %p22127_p13, %p22121_p10 }
  0x19   : > { %22131 = shalt.err (!%p22128_p0)
}
  0x1a   : > { %18956 = dma.hbm_to_vmem [thread:$0]  (!%p22438_p6), %s25764_s3, 32, %s265_s14, [#allocation6]  }
  0x1b   : > { %s22143_s26 = scalar_lea.vmem %s22434_s18, 8192  ;;  %p22151_p9 = scmp.lt.s32.totalorder %s22434_s18, %s22434_s18 }
  0x1c   : > { %p22144_p2 = scmp.ne.s32.totalorder %s22434_s18, %s22143_s26  ;;  %p22152_p11 = scmp.lt.s32.totalorder %s22143_s26, %s22143_s26 }
  0x1e   : > { %p22146_p5 = pnand %p22144_p2, %p22446_p7  ;;  %p22153_p10 = por %p22152_p11, %p22151_p9 }
  0x20   : > { %p22147_p8 = pneg %p22146_p5 }
  0x22   : > { %p22154_p12 = pnand %p22153_p10, %p22147_p8 }
  0x24   : > { %22157 = shalt.err (!%p22154_p12)
}
  0x25   : > { %s22341_s27 = smov 256   ;;  %s22342_s28 = smov 16  }
  0x26   : > { %18962 = dma.hbm_to_vmem [thread:$0]  (!%p22438_p6), %s25766_s5, 8192, %s22434_s18, [#allocation9], %s22341_s27, %s22341_s27, %s22342_s28  }
  0x27   : > { %s22169_s14 = scalar_lea.vmem %s22442_s21, 4096  ;;  %p22177_p5 = scmp.lt.s32.totalorder %s22442_s21, %s22442_s21 }
  0x28   : > { %p22170_p13 = scmp.ne.s32.totalorder %s22442_s21, %s22169_s14  ;;  %p22178_p8 = scmp.lt.s32.totalorder %s22169_s14, %s22169_s14 }
  0x2a   : > { %p22172_p0 = pnand %p22170_p13, %p22446_p7  ;;  %p22179_p9 = por %p22178_p8, %p22177_p5 }
  0x2c   : > { %p22173_p2 = pneg %p22172_p0 }
  0x2e   : > { %p22180_p11 = pnand %p22179_p9, %p22173_p2 }
  0x30   : > { %22183 = shalt.err (!%p22180_p11)
}
  0x31   : > { %s25773_s17 = smov 128   ;;  %s22344_s20 = smov 8  }
  0x32   : > { %18968 = dma.hbm_to_vmem [thread:$0]  (!%p22438_p6), %s25768_s7, 4096, %s22442_s21, [#allocation12], %s25773_s17, %s25773_s17, %s22344_s20  }
  0x33   : > { %s22345_s24 = smov [#allocation7]   ;;  %s22346_s26 = smov [#allocation10]  }
  0x34   : > { %s275_s25 = sshll.u32 %s22345_s24, 4  ;;  %s299_s27 = sshll.u32 %s22346_s26, 4  ;;  %s276_s25 = int_to_ptr.vmem [resolvable:$true] %s275_s25  ;;  %s300_s27 = int_to_ptr.vmem [resolvable:$true] %s299_s27 }
  0x35   : > { %s22195_s28 = scalar_lea.vmem %s276_s25, 32  ;;  %p22203_p0 = scmp.lt.s32.totalorder %s276_s25, %s276_s25 }
  0x36   : > { %p22196_p10 = scmp.ne.s32.totalorder %s276_s25, %s22195_s28  ;;  %p22204_p2 = scmp.lt.s32.totalorder %s22195_s28, %s22195_s28 }
  0x38   : > { %p22198_p12 = pnand %p22196_p10, %p22446_p7  ;;  %p22205_p5 = por %p22204_p2, %p22203_p0 }
  0x3a   : > { %p22199_p13 = pneg %p22198_p12 }
  0x3c   : > { %p22206_p8 = pnand %p22205_p5, %p22199_p13 }
  0x3e   : > { %22209 = shalt.err (!%p22206_p8)
}
  0x3f   : > { %18959 = dma.hbm_to_vmem [thread:$0]  (!%p22438_p6), %s25765_s4, 32, %s276_s25, [#allocation6]  }
  0x40   : > { %s22221_s21 = scalar_lea.vmem %s300_s27, 32  ;;  %p22229_p10 = scmp.lt.s32.totalorder %s300_s27, %s300_s27 }
  0x41   : > { %p22222_p9 = scmp.ne.s32.totalorder %s300_s27, %s22221_s21  ;;  %p22230_p12 = scmp.lt.s32.totalorder %s22221_s21, %s22221_s21 }
  0x43   : > { %p22224_p11 = pnand %p22222_p9, %p22446_p7  ;;  %p22231_p1 = por %p22230_p12, %p22229_p10 }
  0x45   : > { %p22225_p3 = pneg %p22224_p11 }
  0x47   : > { %p22232_p4 = pnand %p22231_p1, %p22225_p3 }
  0x49   : > { %22235 = shalt.err (!%p22232_p4)
}
  0x4a   : > { %18965 = dma.hbm_to_vmem [thread:$0]  (!%p22438_p6), %s25767_s6, 32, %s300_s27, [#allocation9]  }
  0x4b   : > { %s22347_s23 = smov [#allocation13]  }
  0x4c   : > { %s323_s24 = sshll.u32 %s22347_s23, 4  ;;  %s324_s24 = int_to_ptr.vmem [resolvable:$true] %s323_s24 }
  0x4d   : > { %s22247_s25 = scalar_lea.vmem %s324_s24, 16  ;;  %s22254_s26 = scalar_lea.vmem %s324_s24, 32 }
  0x4e   : > { %p22248_p13 = scmp.ne.s32.totalorder %s324_s24, %s22247_s25  ;;  %p22255_p5 = scmp.lt.s32.totalorder %s324_s24, %s324_s24 }
  0x4f   : > { %p22256_p8 = scmp.lt.s32.totalorder %s22254_s26, %s22247_s25 }
  0x50   : > { %p22250_p0 = pnand %p22248_p13, %p22446_p7 }
  0x51   : > { %p22257_p1 = por %p22256_p8, %p22255_p5 }
  0x52   : > { %p22251_p2 = pneg %p22250_p0 }
  0x54   : > { %p22258_p3 = pnand %p22257_p1, %p22251_p2 }
  0x56   : > { %22261 = shalt.err (!%p22258_p3)
}
  0x57   : > { %18971 = dma.hbm_to_vmem [thread:$0]  (!%p22438_p6), %s25769_s8, 16, %s324_s24, [#allocation12]  }
  0x58   : > { %s22506_s22 = sadd.s32 1, %s22336_s12   ;;  %s53_s19 = sadd.s32 1, %s22332_s11 }
  0x59   : > { %s50_s27 = ssub.s32 %s22336_s12, %s22506_s22  ;;  %p60_p4 = scmp.ne.s32.totalorder %s22332_s11, %s22328_s10 }
  0x5a   : > { %p51_p7 = scmp.eq.s32.totalorder %s50_s27, 0  ;;  %p61_p9 = scmp.eq.s32.totalorder %s22336_s12, 0 }
  0x5b   : > { %p66_p11 = scmp.ne.s32.totalorder %s22328_s10, %s22324_s30  ;;  %p18982_p10 = scmp.lt.s32.totalorder %s22336_s12, 3 }
  0x5c   : > { %s22518_s13 = scalar_select %p51_p7, %s22332_s11, %s53_s19  }
  0x5d   : > { %p62_p12 = por %p61_p9, %p60_p4  ;;  %p25778_p13 = scmp.eq.s32.totalorder %s22422_s15, 0 }
  0x5e   : > { %s334_s14 = sand.u32 1, %s22332_s11   ;;  %s18888_s18 = sshll.u32 %s22336_s12, 18 }
  0x5f   : > { %p22522_p0 = por %p25778_p13, %p66_p11  ;;  %s16692_s23 = sshll.u32 %s334_s14, 14 }
  0x60   : > { %s22531_s26 = scalar_lea.hbm %s25762_s1, %s18888_s18  ;;  %s338_s30 = scalar_lea.vmem [#allocation3], %s16692_s23 }
  0x61   : > { %s25779_s21 = scalar_select %p22522_p0, 1, 0 }
  0x62   : > { %s346_s28 = sshll.u32 %s338_s30, 4  ;;  %p22533_p6 = pnand %p18982_p10, %p62_p12  ;;  %s22537_s28 = int_to_ptr.vmem [resolvable:$true] %s346_s28 }
  0x63   : > { %s22539_s19 = scalar_lea.sflag [#allocation4], %s334_s14  ;;  %s22262_s12 = scalar_lea.hbm %s22531_s26, 262144 }
  0x64   : > { %p22263_p2 = scmp.ne.s32.totalorder %s22531_s26, %s22262_s12  ;;  %p22264_p5 = pneg %p22533_p6 }
  0x65   : > { %s22267_s23 = scalar_lea.hbm %s25762_s1, 786432  ;;  %p22268_p3 = scmp.lt.s32.totalorder %s22531_s26, %s25762_s1 }
  0x66   : > { %p22265_p8 = pnand %p22264_p5, %p22263_p2  ;;  %p22269_p4 = scmp.lt.s32.totalorder %s22267_s23, %s22262_s12 }
  0x68   : > { %p22266_p1 = pneg %p22265_p8  ;;  %p22270_p7 = por %p22269_p4, %p22268_p3 }
  0x6a   : > { %p22271_p9 = pnand %p22270_p7, %p22266_p1 }
  0x6c   : > { %22274 = shalt.err (!%p22271_p9)
}
  0x6d   : > { %s22275_s14 = scalar_lea.vmem %s22537_s28, 262144  ;;  %s22348_s30 = smov [#allocation3]  }
  0x6e   : > { %p22276_p11 = scmp.ne.s32.totalorder %s22537_s28, %s22275_s14  ;;  %s22280_s17 = sshll.u32 %s22348_s30, 4  ;;  %s22281_s17 = int_to_ptr.vmem [resolvable:$false] %s22280_s17 }
  0x6f   : > { %s22282_s27 = scalar_lea.vmem %s22281_s17, 524288  ;;  %p22283_p13 = scmp.lt.s32.totalorder %s22537_s28, %s22281_s17 }
  0x70   : > { %p22278_p10 = pnand %p22276_p11, %p22264_p5  ;;  %p22284_p2 = scmp.lt.s32.totalorder %s22282_s27, %s22275_s14 }
  0x72   : > { %p22279_p12 = pneg %p22278_p10  ;;  %p22285_p8 = por %p22284_p2, %p22283_p13 }
  0x74   : > { %p22286_p0 = pnand %p22285_p8, %p22279_p12 }
  0x76   : > { %22289 = shalt.err (!%p22286_p0)
}
  0x77   : > { %s25781_s12 = smov 128   ;;  %p25782_p5 = scmp.ne.s32.totalorder %s25775_s16, 0 }
  0x78   : > { %18975 = dma.hbm_to_vmem [thread:$0]  (!%p22533_p6), %s22531_s26, 262144, %s22537_s28, %s22539_s19, %s25781_s12, %s25781_s12, %s22344_s20  }
  0x79   : > { %358 = sbr.rel (%p25782_p5) target bundleno = 2943 (0xb7f), region = 56 }
  0x7e   : > { %s360_s18 = sand.u32 1, %s22328_s10   ;;  %p25783_p0 = scmp.ne.s32.totalorder %s25779_s21, 0 }
  0x7f   : > { %s16697_s17 = sshll.u32 %s360_s18, 14  ;;  %s361_s23 = scalar_lea.sflag [#allocation4], %s360_s18 }
  0x80   : > { %s22566_s24 = scalar_lea.vmem [#allocation3], %s16697_s17 }
  0x81   : > { %22307 = dma.done.wait (%p25783_p0), %s361_s23, 262144  }
  0x82   : > { %22309 = vsyncadd (%p25783_p0), %s361_s23, 4294705152  ;;  %p25784_p1 = scmp.eq.s32.totalorder %s22422_s15, 0 }
  0x84   : > { %22311 = dma.done.wait (%p25784_p1), [#allocation6], 64   ;;  %p25785_p6 = pmov %p25784_p1 }
  0x85   : > { %p25786_p3 = pmov %p25784_p1 }
  0x86   : > { %22313 = vsyncadd (%p25785_p6), [#allocation6], 4294967232 }
  0x87   : > { %22315 = dma.done.wait (%p25786_p3), [#allocation9], 8224   ;;  %p25787_p4 = pmov %p25784_p1 }
  0x88   : > { %p25788_p7 = pmov %p25784_p1 }
  0x89   : > { %22317 = vsyncadd (%p25787_p4), [#allocation9], 4294959072 }
  0x8a   : > { %22319 = dma.done.wait (%p25788_p7), [#allocation12], 4112   ;;  %p25789_p9 = pmov %p25784_p1 }
  0x8b   : > { %p25790_p11 = scmp.ne.s32.totalorder %s22422_s15, 0 }
  0x8c   : > { %22321 = vsyncadd (%p25789_p9), [#allocation12], 4294963184 }
  0x8d   : > { %422 = sbr.rel (%p25790_p11) target bundleno = 149 (0x95), region = 88 }
  0x92   : > { %v22349_v0 = vmov 0.0  }
  0x93   : > { %423 = vst [vmem:[#allocation2 + $0x10] sm:$0xff] %v22349_v0  ;;  %424 = vst [vmem:[#allocation2] sm:$0xff] %v22349_v0 }
  0x94   : > { %425 = vst [vmem:[#allocation2 + $0x18] sm:$0xff] %v22349_v0  ;;  %426 = vst [vmem:[#allocation2 + $0x8] sm:$0xff] %v22349_v0 }
  0x95 PF: > { %v19033_v1 = vld [vmem:[%s22566_s24 + $0x74] ss:$8 sps:$4 sm:$0xff]   ;;  %v19037_v3 = vld [vmem:[%s22566_s24 + $0x70] ss:$8 sps:$4 sm:$0xff]   ;;  %v19039_v5 = vld [vmem:[%s22566_s24 + $0x64] ss:$8 sps:$4 sm:$0xff]  }
  0x96   : > { %v19035_v2 = vld [vmem:[%s22566_s24 + $0x174] ss:$8 sps:$4 sm:$0xff]   ;;  %13492 = vmatprep.subr.bf16.mxu0 %v19033_v1  ;;  %v19038_v4 = vld [vmem:[%s22566_s24 + $0x170] ss:$8 sps:$4 sm:$0xff]   ;;  %v19041_v6 = vld [vmem:[%s22566_s24 + $0x164] ss:$8 sps:$4 sm:$0xff]  }
  0x97   : > { %13535 = vmatprep.subr.bf16.mxu1 %v19035_v2  ;;  %13493 = vmatpush1.bf16.msra.mxu0 %v19037_v3  ;;  %v19043_v7 = vld [vmem:[%s22566_s24 + $0x60] ss:$8 sps:$4 sm:$0xff]   ;;  %v19045_v9 = vld [vmem:[%s22566_s24 + $0x54] ss:$8 sps:$4 sm:$0xff]   ;;  %v19049_v11 = vld [vmem:[%s22566_s24 + $0x50] ss:$8 sps:$4 sm:$0xff]  }
  0x98   : > { %13536 = vmatpush1.bf16.msra.mxu1 %v19038_v4  ;;  %13494 = vmatprep.subr.bf16.mxu0 %v19039_v5  ;;  %v19044_v8 = vld [vmem:[%s22566_s24 + $0x160] ss:$8 sps:$4 sm:$0xff]   ;;  %v19047_v10 = vld [vmem:[%s22566_s24 + $0x154] ss:$8 sps:$4 sm:$0xff]   ;;  %v19050_v12 = vld [vmem:[%s22566_s24 + $0x150] ss:$8 sps:$4 sm:$0xff]  }
  0x99   : > { %13537 = vmatprep.subr.bf16.mxu1 %v19041_v6  ;;  %v19051_v13 = vld [vmem:[%s22566_s24 + $0x44] ss:$8 sps:$4 sm:$0xff]   ;;  %v19055_v15 = vld [vmem:[%s22566_s24 + $0x40] ss:$8 sps:$4 sm:$0xff]   ;;  %v19057_v17 = vld [vmem:[%s22566_s24 + $0x34] ss:$8 sps:$4 sm:$0xff]  }
  0x9a   : > { %v19053_v14 = vld [vmem:[%s22566_s24 + $0x144] ss:$8 sps:$4 sm:$0xff]   ;;  %v19056_v16 = vld [vmem:[%s22566_s24 + $0x140] ss:$8 sps:$4 sm:$0xff]   ;;  %v19059_v18 = vld [vmem:[%s22566_s24 + $0x134] ss:$8 sps:$4 sm:$0xff]  }
  0x9b   : > { %13495 = vmatpush1.bf16.msra.mxu0 %v19043_v7  ;;  %v19061_v19 = vld [vmem:[%s22566_s24 + $0x30] ss:$8 sps:$4 sm:$0xff]   ;;  %v19063_v21 = vld [vmem:[%s22566_s24 + $0x24] ss:$8 sps:$4 sm:$0xff]   ;;  %v19067_v23 = vld [vmem:[%s22566_s24 + $0x20] ss:$8 sps:$4 sm:$0xff]  }
  0x9c   : > { %13538 = vmatpush1.bf16.msra.mxu1 %v19044_v8  ;;  %13496 = vmatprep.subr.bf16.mxu0 %v19045_v9  ;;  %v19062_v20 = vld [vmem:[%s22566_s24 + $0x130] ss:$8 sps:$4 sm:$0xff]   ;;  %v19065_v22 = vld [vmem:[%s22566_s24 + $0x124] ss:$8 sps:$4 sm:$0xff]   ;;  %v19068_v24 = vld [vmem:[%s22566_s24 + $0x120] ss:$8 sps:$4 sm:$0xff]  }
  0x9d   : > { %13539 = vmatprep.subr.bf16.mxu1 %v19047_v10  ;;  %v19069_v25 = vld [vmem:[%s22566_s24 + $0x14] ss:$8 sps:$4 sm:$0xff]   ;;  %v19073_v27 = vld [vmem:[%s22566_s24 + $0x10] ss:$8 sps:$4 sm:$0xff]   ;;  %v19075_v29 = vld [vmem:[%s22566_s24 + $0x4] ss:$8 sps:$4 sm:$0xff]  }
  0x9e   : > { %v19071_v26 = vld [vmem:[%s22566_s24 + $0x114] ss:$8 sps:$4 sm:$0xff]   ;;  %v19074_v28 = vld [vmem:[%s22566_s24 + $0x110] ss:$8 sps:$4 sm:$0xff]   ;;  %v19077_v30 = vld [vmem:[%s22566_s24 + $0x104] ss:$8 sps:$4 sm:$0xff]  }
  0x9f   : > { %13497 = vmatpush1.bf16.msra.mxu0 %v19049_v11  ;;  %v19079_v31 = vld [vmem:[%s22566_s24] ss:$8 sps:$4 sm:$0xff]   ;;  %v19081_v33 = vld [vmem:[%s22566_s24 + $0xf4] ss:$8 sps:$4 sm:$0xff]   ;;  %s16705_s16 = sshll.u32 %s22422_s15, 14  ;;  %p18883_p10 = scmp.ne.s32.totalorder %s22422_s15, 2 }
  0xa0   : > { %13540 = vmatpush1.bf16.msra.mxu1 %v19050_v12  ;;  %13498 = vmatprep.subr.bf16.mxu0 %v19051_v13  ;;  %v19080_v32 = vld [vmem:[%s22566_s24 + $0x100] ss:$8 sps:$4 sm:$0xff]   ;;  %v19083_v34 = vld [vmem:[%s22566_s24 + $0x1f4] ss:$8 sps:$4 sm:$0xff]   ;;  %v19085_v35 = vld [vmem:[%s22566_s24 + $0xf0] ss:$8 sps:$4 sm:$0xff]  }
  0xa1   : > { %13541 = vmatprep.subr.bf16.mxu1 %v19053_v14  ;;  %v19086_v36 = vld [vmem:[%s22566_s24 + $0x1f0] ss:$8 sps:$4 sm:$0xff]   ;;  %v19087_v37 = vld [vmem:[%s22566_s24 + $0xe4] ss:$8 sps:$4 sm:$0xff]   ;;  %s428_s20 = sshra.s32 %s16705_s16, 7 }
  0xa2   : > { %v19089_v38 = vld [vmem:[%s22566_s24 + $0x1e4] ss:$8 sps:$4 sm:$0xff]   ;;  %v19091_v39 = vld [vmem:[%s22566_s24 + $0xe0] ss:$8 sps:$4 sm:$0xff]   ;;  %v19093_v41 = vld [vmem:[%s22566_s24 + $0xd4] ss:$8 sps:$4 sm:$0xff]  }
  0xa3   : > { %13499 = vmatpush1.bf16.msra.mxu0 %v19055_v15  ;;  %v19092_v40 = vld [vmem:[%s22566_s24 + $0x1e0] ss:$8 sps:$4 sm:$0xff]   ;;  %s16706_s21 = sshll.u32 %s428_s20, 2  ;;  %v19095_v42 = vld [vmem:[%s22566_s24 + $0x1d4] ss:$8 sps:$4 sm:$0xff]  }
  0xa4   : > { %13542 = vmatpush1.bf16.msra.mxu1 %v19056_v16  ;;  %13500 = vmatprep.subr.bf16.mxu0 %v19057_v17  ;;  %v19097_v43 = vld [vmem:[%s22566_s24 + $0xd0] ss:$8 sps:$4 sm:$0xff]   ;;  %s22634_s29 = scalar_lea.vmem %s25761_s0, %s16706_s21  ;;  %v19099_v45 = vld [vmem:[%s22566_s24 + $0xc4] ss:$8 sps:$4 sm:$0xff]   ;;  %v19103_v47 = vld [vmem:[%s22566_s24 + $0xc0] ss:$8 sps:$4 sm:$0xff]  }
  0xa5   : > { %13543 = vmatprep.subr.bf16.mxu1 %v19059_v18  ;;  %v19098_v44 = vld [vmem:[%s22566_s24 + $0x1d0] ss:$8 sps:$4 sm:$0xff]   ;;  %v19101_v46 = vld [vmem:[%s22566_s24 + $0x1c4] ss:$8 sps:$4 sm:$0xff]   ;;  %v19104_v48 = vld [vmem:[%s22566_s24 + $0x1c0] ss:$8 sps:$4 sm:$0xff]  }
  0xa6   : > { %v432_v49 = vld [vmem:[%s22634_s29] sm:$0xff]  ;;  %v433_v51 = vld [vmem:[%s22634_s29 + $0x8] sm:$0xff]  ;;  %v19105_v53 = vld [vmem:[%s22566_s24 + $0xb4] ss:$8 sps:$4 sm:$0xff]  }
  0xa7   : > { %13501 = vmatpush1.bf16.msra.mxu0 %v19061_v19  ;;  %v496_v50 = vld [vmem:[%s22634_s29 + $0x600] sm:$0xff]  ;;  %v497_v52 = vld [vmem:[%s22634_s29 + $0x608] sm:$0xff]  ;;  %v19107_v55 = vld [vmem:[%s22566_s24 + $0x1b4] ss:$8 sps:$4 sm:$0xff]  }
  0xa8   : > { %13544 = vmatpush1.bf16.msra.mxu1 %v19062_v20  ;;  %13502 = vmatprep.subr.bf16.mxu0 %v19063_v21  ;;  %v16708_v54 = vcombine.high %v432_v49, %v496_v50  ;;  %v16710_v56 = vcombine.high %v433_v51, %v497_v52  ;;  %v19109_v57 = vld [vmem:[%s22566_s24 + $0xb0] ss:$8 sps:$4 sm:$0xff]   ;;  %v19111_v59 = vld [vmem:[%s22566_s24 + $0xa4] ss:$8 sps:$4 sm:$0xff]   ;;  %v19115_v61 = vld [vmem:[%s22566_s24 + $0xa0] ss:$8 sps:$4 sm:$0xff]   ;;  %v16707_v9 = vcombine.low %v432_v49, %v496_v50 }
  0xa9   : > { %13545 = vmatprep.subr.bf16.mxu1 %v19065_v22  ;;  %v19110_v58 = vld [vmem:[%s22566_s24 + $0x1b0] ss:$8 sps:$4 sm:$0xff]   ;;  %v19113_v60 = vld [vmem:[%s22566_s24 + $0x1a4] ss:$8 sps:$4 sm:$0xff]   ;;  %v19116_v62 = vld [vmem:[%s22566_s24 + $0x1a0] ss:$8 sps:$4 sm:$0xff]   ;;  %v16709_v10 = vcombine.low %v433_v51, %v497_v52 }
  0xaa   : > { %13524 = vmatprep.mubr.bf16.mxu0 %v16708_v54  ;;  %13567 = vmatprep.mubr.bf16.mxu1 %v16710_v56  ;;  %v19117_v63 = vld [vmem:[%s22566_s24 + $0x94] ss:$8 sps:$4 sm:$0xff]   ;;  %v19121_v1 = vld [vmem:[%s22566_s24 + $0x90] ss:$8 sps:$4 sm:$0xff]   ;;  %v19123_v3 = vld [vmem:[%s22566_s24 + $0x84] ss:$8 sps:$4 sm:$0xff]  }
  0xab   : > { %13503 = vmatpush1.bf16.msra.mxu0 %v19067_v23  ;;  %v19119_v0 = vld [vmem:[%s22566_s24 + $0x194] ss:$8 sps:$4 sm:$0xff]   ;;  %v19122_v2 = vld [vmem:[%s22566_s24 + $0x190] ss:$8 sps:$4 sm:$0xff]   ;;  %v19125_v4 = vld [vmem:[%s22566_s24 + $0x184] ss:$8 sps:$4 sm:$0xff]  }
  0xac   : > { %13546 = vmatpush1.bf16.msra.mxu1 %v19068_v24  ;;  %13504 = vmatprep.subr.bf16.mxu0 %v19069_v25  ;;  %v19127_v5 = vld [vmem:[%s22566_s24 + $0x80] ss:$8 sps:$4 sm:$0xff]   ;;  %v19131_v7 = vld [vmem:[%s22566_s24 + $0x274] ss:$8 sps:$4 sm:$0xff]   ;;  %v19129_v11 = vld [vmem:[%s22566_s24 + $0x270] ss:$8 sps:$4 sm:$0xff]  }
  0xad   : > { %13547 = vmatprep.subr.bf16.mxu1 %v19071_v26  ;;  %v19128_v6 = vld [vmem:[%s22566_s24 + $0x180] ss:$8 sps:$4 sm:$0xff]   ;;  %v19134_v8 = vld [vmem:[%s22566_s24 + $0x374] ss:$8 sps:$4 sm:$0xff]   ;;  %v19132_v12 = vld [vmem:[%s22566_s24 + $0x370] ss:$8 sps:$4 sm:$0xff]  }
  0xae   : > { %v19137_v13 = vld [vmem:[%s22566_s24 + $0x264] ss:$8 sps:$4 sm:$0xff]   ;;  %v19135_v15 = vld [vmem:[%s22566_s24 + $0x260] ss:$8 sps:$4 sm:$0xff]   ;;  %v19143_v17 = vld [vmem:[%s22566_s24 + $0x254] ss:$8 sps:$4 sm:$0xff]  }
  0xaf   : > { %13505 = vmatpush1.bf16.msra.mxu0 %v19073_v27  ;;  %v19140_v14 = vld [vmem:[%s22566_s24 + $0x364] ss:$8 sps:$4 sm:$0xff]   ;;  %v19138_v16 = vld [vmem:[%s22566_s24 + $0x360] ss:$8 sps:$4 sm:$0xff]   ;;  %v19146_v18 = vld [vmem:[%s22566_s24 + $0x354] ss:$8 sps:$4 sm:$0xff]  }
  0xb0   : > { %13548 = vmatpush1.bf16.msra.mxu1 %v19074_v28  ;;  %13506 = vmatprep.subr.bf16.mxu0 %v19075_v29  ;;  %v19141_v19 = vld [vmem:[%s22566_s24 + $0x250] ss:$8 sps:$4 sm:$0xff]   ;;  %v19149_v21 = vld [vmem:[%s22566_s24 + $0x244] ss:$8 sps:$4 sm:$0xff]   ;;  %v19147_v23 = vld [vmem:[%s22566_s24 + $0x240] ss:$8 sps:$4 sm:$0xff]  }
  0xb1   : > { %13549 = vmatprep.subr.bf16.mxu1 %v19077_v30  ;;  %v19144_v20 = vld [vmem:[%s22566_s24 + $0x350] ss:$8 sps:$4 sm:$0xff]   ;;  %v19152_v22 = vld [vmem:[%s22566_s24 + $0x344] ss:$8 sps:$4 sm:$0xff]   ;;  %v19150_v24 = vld [vmem:[%s22566_s24 + $0x340] ss:$8 sps:$4 sm:$0xff]  }
  0xb2   : > { %v19155_v25 = vld [vmem:[%s22566_s24 + $0x234] ss:$8 sps:$4 sm:$0xff]   ;;  %v19153_v27 = vld [vmem:[%s22566_s24 + $0x230] ss:$8 sps:$4 sm:$0xff]   ;;  %v19161_v29 = vld [vmem:[%s22566_s24 + $0x224] ss:$8 sps:$4 sm:$0xff]  }
  0xb3   : > { %13507 = vmatpush1.bf16.msra.mxu0 %v19079_v31  ;;  %v19158_v26 = vld [vmem:[%s22566_s24 + $0x334] ss:$8 sps:$4 sm:$0xff]   ;;  %v19156_v28 = vld [vmem:[%s22566_s24 + $0x330] ss:$8 sps:$4 sm:$0xff]   ;;  %v19164_v30 = vld [vmem:[%s22566_s24 + $0x324] ss:$8 sps:$4 sm:$0xff]  }
  0xb4   : > { %13550 = vmatpush1.bf16.msra.mxu1 %v19080_v32  ;;  %13508 = vmatprep.subr.bf16.mxu0 %v19081_v33  ;;  %v19159_v31 = vld [vmem:[%s22566_s24 + $0x220] ss:$8 sps:$4 sm:$0xff]   ;;  %v19167_v33 = vld [vmem:[%s22566_s24 + $0x214] ss:$8 sps:$4 sm:$0xff]   ;;  %v19177_v49 = vld [vmem:[%s22566_s24 + $0x2f0] ss:$8 sps:$4 sm:$0xff]  }
  0xb5   : > { %13551 = vmatprep.subr.bf16.mxu1 %v19083_v34  ;;  %v19162_v32 = vld [vmem:[%s22566_s24 + $0x320] ss:$8 sps:$4 sm:$0xff]   ;;  %v19170_v34 = vld [vmem:[%s22566_s24 + $0x314] ss:$8 sps:$4 sm:$0xff]   ;;  %v19180_v50 = vld [vmem:[%s22566_s24 + $0x3f0] ss:$8 sps:$4 sm:$0xff]  }
  0xb6   : > { %v19185_v51 = vld [vmem:[%s22566_s24 + $0x2e4] ss:$8 sps:$4 sm:$0xff]   ;;  %v19186_v54 = vld [vmem:[%s22566_s24 + $0x3e0] ss:$8 sps:$4 sm:$0xff]   ;;  %v19194_v56 = vld [vmem:[%s22566_s24 + $0x3d4] ss:$8 sps:$4 sm:$0xff]  }
  0xb7   : > { %13509 = vmatpush2.bf16.msra.mxu0 %v19085_v35  ;;  %v19165_v35 = vld [vmem:[%s22566_s24 + $0x210] ss:$8 sps:$4 sm:$0xff]   ;;  %v19188_v52 = vld [vmem:[%s22566_s24 + $0x3e4] ss:$8 sps:$4 sm:$0xff]  }
  0xb8   : > { %13552 = vmatpush2.bf16.msra.mxu1 %v19086_v36  ;;  %13510 = vmatprep.subr.bf16.mxu0 %v19087_v37  ;;  %v19168_v36 = vld [vmem:[%s22566_s24 + $0x310] ss:$8 sps:$4 sm:$0xff]  }
  0xb9   : > { %13553 = vmatprep.subr.bf16.mxu1 %v19089_v38  ;;  %v22689_v37 = vld [vmem:[%s22634_s29 + $0x10] sm:$0xff] }
  0xba   : > { %v22692_v38 = vld [vmem:[%s22634_s29 + $0x610] sm:$0xff] }
  0xbb   : > { %13511 = vmatpush2.bf16.msra.mxu0 %v19091_v39  ;;  %v22695_v39 = vld [vmem:[%s22634_s29 + $0x18] sm:$0xff] }
  0xbc   : > { %13554 = vmatpush2.bf16.msra.mxu1 %v19092_v40  ;;  %13512 = vmatprep.subr.bf16.mxu0 %v19093_v41  ;;  %v22698_v40 = vld [vmem:[%s22634_s29 + $0x618] sm:$0xff]  ;;  %v19173_v41 = vld [vmem:[%s22566_s24 + $0x204] ss:$8 sps:$4 sm:$0xff]  }
  0xbd   : > { %13555 = vmatprep.subr.bf16.mxu1 %v19095_v42  ;;  %v16712_v42 = vcombine.high %v22689_v37, %v22692_v38 }
  0xbf   : > { %13513 = vmatpush2.bf16.msra.mxu0 %v19097_v43  ;;  %v19176_v43 = vld [vmem:[%s22566_s24 + $0x304] ss:$8 sps:$4 sm:$0xff]  }
  0xc0   : > { %13556 = vmatpush2.bf16.msra.mxu1 %v19098_v44  ;;  %13514 = vmatprep.subr.bf16.mxu0 %v19099_v45  ;;  %v16714_v44 = vcombine.high %v22695_v39, %v22698_v40  ;;  %v19171_v45 = vld [vmem:[%s22566_s24 + $0x200] ss:$8 sps:$4 sm:$0xff]  }
  0xc1   : > { %13557 = vmatprep.subr.bf16.mxu1 %v19101_v46  ;;  %v19174_v46 = vld [vmem:[%s22566_s24 + $0x300] ss:$8 sps:$4 sm:$0xff]  }
  0xc3   : > { %13515 = vmatpush2.bf16.msra.mxu0 %v19103_v47  ;;  %v19179_v47 = vld [vmem:[%s22566_s24 + $0x2f4] ss:$8 sps:$4 sm:$0xff]  }
  0xc4   : > { %13558 = vmatpush2.bf16.msra.mxu1 %v19104_v48  ;;  %13516 = vmatprep.subr.bf16.mxu0 %v19105_v53  ;;  %v19182_v48 = vld [vmem:[%s22566_s24 + $0x3f4] ss:$8 sps:$4 sm:$0xff]   ;;  %v19183_v53 = vld [vmem:[%s22566_s24 + $0x2e0] ss:$8 sps:$4 sm:$0xff]  }
  0xc5   : > { %13559 = vmatprep.subr.bf16.mxu1 %v19107_v55  ;;  %v19191_v55 = vld [vmem:[%s22566_s24 + $0x2d4] ss:$8 sps:$4 sm:$0xff]  }
  0xc7   : > { %13517 = vmatpush2.bf16.msra.mxu0 %v19109_v57  ;;  %v19189_v57 = vld [vmem:[%s22566_s24 + $0x2d0] ss:$8 sps:$4 sm:$0xff]  }
  0xc8   : > { %13560 = vmatpush2.bf16.msra.mxu1 %v19110_v58  ;;  %13518 = vmatprep.subr.bf16.mxu0 %v19111_v59  ;;  %v19192_v58 = vld [vmem:[%s22566_s24 + $0x3d0] ss:$8 sps:$4 sm:$0xff]   ;;  %v19197_v59 = vld [vmem:[%s22566_s24 + $0x2c4] ss:$8 sps:$4 sm:$0xff]  }
  0xc9   : > { %13561 = vmatprep.subr.bf16.mxu1 %v19113_v60  ;;  %v19200_v60 = vld [vmem:[%s22566_s24 + $0x3c4] ss:$8 sps:$4 sm:$0xff]  }
  0xcb   : > { %13519 = vmatpush2.bf16.msra.mxu0 %v19115_v61  ;;  %v19195_v61 = vld [vmem:[%s22566_s24 + $0x2c0] ss:$8 sps:$4 sm:$0xff]  }
  0xcc   : > { %13562 = vmatpush2.bf16.msra.mxu1 %v19116_v62  ;;  %13520 = vmatprep.subr.bf16.mxu0 %v19117_v63  ;;  %v19198_v62 = vld [vmem:[%s22566_s24 + $0x3c0] ss:$8 sps:$4 sm:$0xff]   ;;  %v19203_v63 = vld [vmem:[%s22566_s24 + $0x2b4] ss:$8 sps:$4 sm:$0xff]  }
  0xcd   : > { %13563 = vmatprep.subr.bf16.mxu1 %v19119_v0  ;;  %v19206_v0 = vld [vmem:[%s22566_s24 + $0x3b4] ss:$8 sps:$4 sm:$0xff]  }
  0xcf   : > { %13521 = vmatpush2.bf16.msra.mxu0 %v19121_v1  ;;  %v19201_v1 = vld [vmem:[%s22566_s24 + $0x2b0] ss:$8 sps:$4 sm:$0xff]  }
  0xd0   : > { %13564 = vmatpush2.bf16.msra.mxu1 %v19122_v2  ;;  %13522 = vmatprep.subr.bf16.mxu0 %v19123_v3  ;;  %v19204_v2 = vld [vmem:[%s22566_s24 + $0x3b0] ss:$8 sps:$4 sm:$0xff]   ;;  %v19209_v3 = vld [vmem:[%s22566_s24 + $0x2a4] ss:$8 sps:$4 sm:$0xff]  }
  0xd1   : > { %13565 = vmatprep.subr.bf16.mxu1 %v19125_v4  ;;  %v19212_v4 = vld [vmem:[%s22566_s24 + $0x3a4] ss:$8 sps:$4 sm:$0xff]  }
  0xd3   : > { %13523 = vmatpush2.bf16.msra.mxu0 %v19127_v5  ;;  %v19207_v5 = vld [vmem:[%s22566_s24 + $0x2a0] ss:$8 sps:$4 sm:$0xff]  }
  0xd4   : > { %13566 = vmatpush2.bf16.msra.mxu1 %v19128_v6  ;;  %13578 = vmatprep.subr.bf16.mxu0 %v19131_v7  ;;  %v19210_v6 = vld [vmem:[%s22566_s24 + $0x3a0] ss:$8 sps:$4 sm:$0xff]   ;;  %v19215_v7 = vld [vmem:[%s22566_s24 + $0x294] ss:$8 sps:$4 sm:$0xff]  }
  0xd5   : > { %13621 = vmatprep.subr.bf16.mxu1 %v19134_v8  ;;  %v19218_v8 = vld [vmem:[%s22566_s24 + $0x394] ss:$8 sps:$4 sm:$0xff]  }
  0xd6   : > { %13525 = vmatmul.mubr.bf16.vlgmr.msra.gmra.mxu0 %v16707_v9  ;;  %v19213_v9 = vld [vmem:[%s22566_s24 + $0x290] ss:$8 sps:$4 sm:$0xff]  }
  0xd7   : > { %13568 = vmatmul.mubr.bf16.vlgmr.msra.gmra.mxu1 %v16709_v10  ;;  %13579 = vmatpush1.bf16.msra.mxu0 %v19129_v11  ;;  %v19216_v10 = vld [vmem:[%s22566_s24 + $0x390] ss:$8 sps:$4 sm:$0xff]   ;;  %v19221_v11 = vld [vmem:[%s22566_s24 + $0x284] ss:$8 sps:$4 sm:$0xff]  }
  0xd8   : > { %13622 = vmatpush1.bf16.msra.mxu1 %v19132_v12  ;;  %13580 = vmatprep.subr.bf16.mxu0 %v19137_v13  ;;  %v19224_v12 = vld [vmem:[%s22566_s24 + $0x384] ss:$8 sps:$4 sm:$0xff]   ;;  %v19219_v13 = vld [vmem:[%s22566_s24 + $0x280] ss:$8 sps:$4 sm:$0xff]  }
  0xd9   : > { %13623 = vmatprep.subr.bf16.mxu1 %v19140_v14  ;;  %13610 = vmatprep.mubr.bf16.mxu0 %v16712_v42  ;;  %v19222_v14 = vld [vmem:[%s22566_s24 + $0x380] ss:$8 sps:$4 sm:$0xff]   ;;  %v19252_v42 = vld [vmem:[%s22566_s24 + $0x530] ss:$8 sps:$4 sm:$0xff]  }
  0xda   : > { %13653 = vmatprep.mubr.bf16.mxu1 %v16714_v44  ;;  %v19260_v44 = vld [vmem:[%s22566_s24 + $0x524] ss:$8 sps:$4 sm:$0xff]  }
  0xdb   : > { %13581 = vmatpush1.bf16.msra.mxu0 %v19135_v15  ;;  %v19227_v15 = vld [vmem:[%s22566_s24 + $0x474] ss:$8 sps:$4 sm:$0xff]  }
  0xdc   : > { %13624 = vmatpush1.bf16.msra.mxu1 %v19138_v16  ;;  %13582 = vmatprep.subr.bf16.mxu0 %v19143_v17  ;;  %v19230_v16 = vld [vmem:[%s22566_s24 + $0x574] ss:$8 sps:$4 sm:$0xff]   ;;  %v16711_v17 = vcombine.low %v22689_v37, %v22692_v38  ;;  %v19243_v37 = vld [vmem:[%s22566_s24 + $0x440] ss:$8 sps:$4 sm:$0xff]  }
  0xdd   : > { %13625 = vmatprep.subr.bf16.mxu1 %v19146_v18  ;;  %v16713_v18 = vcombine.low %v22695_v39, %v22698_v40  ;;  %v19246_v38 = vld [vmem:[%s22566_s24 + $0x540] ss:$8 sps:$4 sm:$0xff]   ;;  %v19251_v39 = vld [vmem:[%s22566_s24 + $0x434] ss:$8 sps:$4 sm:$0xff]  }
  0xde   : > { %v19254_v40 = vld [vmem:[%s22566_s24 + $0x534] ss:$8 sps:$4 sm:$0xff]  }
  0xdf   : > { %13583 = vmatpush1.bf16.msra.mxu0 %v19141_v19  ;;  %v19225_v19 = vld [vmem:[%s22566_s24 + $0x470] ss:$8 sps:$4 sm:$0xff]  }
  0xe0   : > { %13626 = vmatpush1.bf16.msra.mxu1 %v19144_v20  ;;  %13584 = vmatprep.subr.bf16.mxu0 %v19149_v21  ;;  %v19228_v20 = vld [vmem:[%s22566_s24 + $0x570] ss:$8 sps:$4 sm:$0xff]   ;;  %v19233_v21 = vld [vmem:[%s22566_s24 + $0x464] ss:$8 sps:$4 sm:$0xff]  }
  0xe1   : > { %13627 = vmatprep.subr.bf16.mxu1 %v19152_v22  ;;  %v19236_v22 = vld [vmem:[%s22566_s24 + $0x564] ss:$8 sps:$4 sm:$0xff]  }
  0xe3   : > { %13585 = vmatpush1.bf16.msra.mxu0 %v19147_v23  ;;  %v19231_v23 = vld [vmem:[%s22566_s24 + $0x460] ss:$8 sps:$4 sm:$0xff]  }
  0xe4   : > { %13628 = vmatpush1.bf16.msra.mxu1 %v19150_v24  ;;  %13586 = vmatprep.subr.bf16.mxu0 %v19155_v25  ;;  %v19234_v24 = vld [vmem:[%s22566_s24 + $0x560] ss:$8 sps:$4 sm:$0xff]  }
  0xe5   : > { %13629 = vmatprep.subr.bf16.mxu1 %v19158_v26  ;;  %v22753_v25 = vld [vmem:[%s22634_s29 + $0x20] sm:$0xff] }
  0xe6   : > { %v22756_v26 = vld [vmem:[%s22634_s29 + $0x620] sm:$0xff] }
  0xe7   : > { %13587 = vmatpush1.bf16.msra.mxu0 %v19153_v27  ;;  %v22759_v27 = vld [vmem:[%s22634_s29 + $0x28] sm:$0xff] }
  0xe8   : > { %13630 = vmatpush1.bf16.msra.mxu1 %v19156_v28  ;;  %13588 = vmatprep.subr.bf16.mxu0 %v19161_v29  ;;  %v22762_v28 = vld [vmem:[%s22634_s29 + $0x628] sm:$0xff]  ;;  %v19239_v29 = vld [vmem:[%s22566_s24 + $0x454] ss:$8 sps:$4 sm:$0xff]  }
  0xe9   : > { %13631 = vmatprep.subr.bf16.mxu1 %v19164_v30  ;;  %v16716_v30 = vcombine.high %v22753_v25, %v22756_v26 }
  0xeb   : > { %13589 = vmatpush1.bf16.msra.mxu0 %v19159_v31  ;;  %v19242_v31 = vld [vmem:[%s22566_s24 + $0x554] ss:$8 sps:$4 sm:$0xff]  }
  0xec   : > { %13632 = vmatpush1.bf16.msra.mxu1 %v19162_v32  ;;  %13590 = vmatprep.subr.bf16.mxu0 %v19167_v33  ;;  %v16718_v32 = vcombine.high %v22759_v27, %v22762_v28  ;;  %v19237_v33 = vld [vmem:[%s22566_s24 + $0x450] ss:$8 sps:$4 sm:$0xff]  }
  0xed   : > { %13633 = vmatprep.subr.bf16.mxu1 %v19170_v34  ;;  %v19240_v34 = vld [vmem:[%s22566_s24 + $0x550] ss:$8 sps:$4 sm:$0xff]  }
  0xef   : > { %13591 = vmatpush1.bf16.msra.mxu0 %v19165_v35  ;;  %v19245_v35 = vld [vmem:[%s22566_s24 + $0x444] ss:$8 sps:$4 sm:$0xff]  }
  0xf0   : > { %13634 = vmatpush1.bf16.msra.mxu1 %v19168_v36  ;;  %13592 = vmatprep.subr.bf16.mxu0 %v19173_v41  ;;  %v19248_v36 = vld [vmem:[%s22566_s24 + $0x544] ss:$8 sps:$4 sm:$0xff]   ;;  %v19249_v41 = vld [vmem:[%s22566_s24 + $0x430] ss:$8 sps:$4 sm:$0xff]  }
  0xf1   : > { %13635 = vmatprep.subr.bf16.mxu1 %v19176_v43  ;;  %v19257_v43 = vld [vmem:[%s22566_s24 + $0x424] ss:$8 sps:$4 sm:$0xff]  }
  0xf3   : > { %13593 = vmatpush1.bf16.msra.mxu0 %v19171_v45  ;;  %v19255_v45 = vld [vmem:[%s22566_s24 + $0x420] ss:$8 sps:$4 sm:$0xff]  }
  0xf4   : > { %13636 = vmatpush1.bf16.msra.mxu1 %v19174_v46  ;;  %13594 = vmatprep.subr.bf16.mxu0 %v19179_v47  ;;  %v19258_v46 = vld [vmem:[%s22566_s24 + $0x520] ss:$8 sps:$4 sm:$0xff]   ;;  %v19263_v47 = vld [vmem:[%s22566_s24 + $0x414] ss:$8 sps:$4 sm:$0xff]  }
  0xf5   : > { %13637 = vmatprep.subr.bf16.mxu1 %v19182_v48  ;;  %v19266_v48 = vld [vmem:[%s22566_s24 + $0x514] ss:$8 sps:$4 sm:$0xff]  }
  0xf7   : > { %13595 = vmatpush2.bf16.msra.mxu0 %v19177_v49  ;;  %v19261_v49 = vld [vmem:[%s22566_s24 + $0x410] ss:$8 sps:$4 sm:$0xff]  }
  0xf8   : > { %13638 = vmatpush2.bf16.msra.mxu1 %v19180_v50  ;;  %13596 = vmatprep.subr.bf16.mxu0 %v19185_v51  ;;  %v19264_v50 = vld [vmem:[%s22566_s24 + $0x510] ss:$8 sps:$4 sm:$0xff]   ;;  %v19269_v51 = vld [vmem:[%s22566_s24 + $0x404] ss:$8 sps:$4 sm:$0xff]  }
  0xf9   : > { %13639 = vmatprep.subr.bf16.mxu1 %v19188_v52  ;;  %v19272_v52 = vld [vmem:[%s22566_s24 + $0x504] ss:$8 sps:$4 sm:$0xff]  }
  0xfb   : > { %13597 = vmatpush2.bf16.msra.mxu0 %v19183_v53  ;;  %v19267_v53 = vld [vmem:[%s22566_s24 + $0x400] ss:$8 sps:$4 sm:$0xff]  }
  0xfc   : > { %13640 = vmatpush2.bf16.msra.mxu1 %v19186_v54  ;;  %13598 = vmatprep.subr.bf16.mxu0 %v19191_v55  ;;  %v19270_v54 = vld [vmem:[%s22566_s24 + $0x500] ss:$8 sps:$4 sm:$0xff]   ;;  %v19275_v55 = vld [vmem:[%s22566_s24 + $0x4f4] ss:$8 sps:$4 sm:$0xff]  }
  0xfd   : > { %13641 = vmatprep.subr.bf16.mxu1 %v19194_v56  ;;  %v19278_v56 = vld [vmem:[%s22566_s24 + $0x5f4] ss:$8 sps:$4 sm:$0xff]  }
  0xff   : > { %13599 = vmatpush2.bf16.msra.mxu0 %v19189_v57  ;;  %v19273_v57 = vld [vmem:[%s22566_s24 + $0x4f0] ss:$8 sps:$4 sm:$0xff]  }
 0x100   : > { %13642 = vmatpush2.bf16.msra.mxu1 %v19192_v58  ;;  %13600 = vmatprep.subr.bf16.mxu0 %v19197_v59  ;;  %v19276_v58 = vld [vmem:[%s22566_s24 + $0x5f0] ss:$8 sps:$4 sm:$0xff]   ;;  %v19281_v59 = vld [vmem:[%s22566_s24 + $0x4e4] ss:$8 sps:$4 sm:$0xff]  }
 0x101   : > { %13643 = vmatprep.subr.bf16.mxu1 %v19200_v60  ;;  %v19284_v60 = vld [vmem:[%s22566_s24 + $0x5e4] ss:$8 sps:$4 sm:$0xff]  }
 0x103   : > { %13601 = vmatpush2.bf16.msra.mxu0 %v19195_v61  ;;  %v19279_v61 = vld [vmem:[%s22566_s24 + $0x4e0] ss:$8 sps:$4 sm:$0xff]  }
 0x104   : > { %13644 = vmatpush2.bf16.msra.mxu1 %v19198_v62  ;;  %13602 = vmatprep.subr.bf16.mxu0 %v19203_v63  ;;  %v19282_v62 = vld [vmem:[%s22566_s24 + $0x5e0] ss:$8 sps:$4 sm:$0xff]   ;;  %v19287_v63 = vld [vmem:[%s22566_s24 + $0x4d4] ss:$8 sps:$4 sm:$0xff]  }
 0x105   : > { %13645 = vmatprep.subr.bf16.mxu1 %v19206_v0  ;;  %v19290_v0 = vld [vmem:[%s22566_s24 + $0x5d4] ss:$8 sps:$4 sm:$0xff]  }
 0x107   : > { %13603 = vmatpush2.bf16.msra.mxu0 %v19201_v1  ;;  %v19285_v1 = vld [vmem:[%s22566_s24 + $0x4d0] ss:$8 sps:$4 sm:$0xff]  }
 0x108   : > { %13646 = vmatpush2.bf16.msra.mxu1 %v19204_v2  ;;  %13604 = vmatprep.subr.bf16.mxu0 %v19209_v3  ;;  %v19288_v2 = vld [vmem:[%s22566_s24 + $0x5d0] ss:$8 sps:$4 sm:$0xff]   ;;  %v19293_v3 = vld [vmem:[%s22566_s24 + $0x4c4] ss:$8 sps:$4 sm:$0xff]  }
 0x109   : > { %13647 = vmatprep.subr.bf16.mxu1 %v19212_v4  ;;  %v19296_v4 = vld [vmem:[%s22566_s24 + $0x5c4] ss:$8 sps:$4 sm:$0xff]  }
 0x10b   : > { %13605 = vmatpush2.bf16.msra.mxu0 %v19207_v5  ;;  %v19291_v5 = vld [vmem:[%s22566_s24 + $0x4c0] ss:$8 sps:$4 sm:$0xff]  }
 0x10c   : > { %13648 = vmatpush2.bf16.msra.mxu1 %v19210_v6  ;;  %13606 = vmatprep.subr.bf16.mxu0 %v19215_v7  ;;  %v19294_v6 = vld [vmem:[%s22566_s24 + $0x5c0] ss:$8 sps:$4 sm:$0xff]   ;;  %v19299_v7 = vld [vmem:[%s22566_s24 + $0x4b4] ss:$8 sps:$4 sm:$0xff]  }
 0x10d   : > { %13649 = vmatprep.subr.bf16.mxu1 %v19218_v8  ;;  %v19302_v8 = vld [vmem:[%s22566_s24 + $0x5b4] ss:$8 sps:$4 sm:$0xff]  }
 0x10f   : > { %13607 = vmatpush2.bf16.msra.mxu0 %v19213_v9  ;;  %v19297_v9 = vld [vmem:[%s22566_s24 + $0x4b0] ss:$8 sps:$4 sm:$0xff]  }
 0x110   : > { %13650 = vmatpush2.bf16.msra.mxu1 %v19216_v10  ;;  %13608 = vmatprep.subr.bf16.mxu0 %v19221_v11  ;;  %v19300_v10 = vld [vmem:[%s22566_s24 + $0x5b0] ss:$8 sps:$4 sm:$0xff]   ;;  %v19305_v11 = vld [vmem:[%s22566_s24 + $0x4a4] ss:$8 sps:$4 sm:$0xff]  }
 0x111   : > { %13651 = vmatprep.subr.bf16.mxu1 %v19224_v12  ;;  %v19308_v12 = vld [vmem:[%s22566_s24 + $0x5a4] ss:$8 sps:$4 sm:$0xff]  }
 0x113   : > { %13609 = vmatpush2.bf16.msra.mxu0 %v19219_v13  ;;  %v19303_v13 = vld [vmem:[%s22566_s24 + $0x4a0] ss:$8 sps:$4 sm:$0xff]  }
 0x114   : > { %13652 = vmatpush2.bf16.msra.mxu1 %v19222_v14  ;;  %13664 = vmatprep.subr.bf16.mxu0 %v19227_v15  ;;  %v19306_v14 = vld [vmem:[%s22566_s24 + $0x5a0] ss:$8 sps:$4 sm:$0xff]   ;;  %v19311_v15 = vld [vmem:[%s22566_s24 + $0x494] ss:$8 sps:$4 sm:$0xff]  }
 0x115   : > { %13707 = vmatprep.subr.bf16.mxu1 %v19230_v16  ;;  %v19314_v16 = vld [vmem:[%s22566_s24 + $0x594] ss:$8 sps:$4 sm:$0xff]  }
 0x116   : > { %13611 = vmatmul.mubr.bf16.vlgmr.msra.gmra.mxu0 %v16711_v17  ;;  %v19309_v17 = vld [vmem:[%s22566_s24 + $0x490] ss:$8 sps:$4 sm:$0xff]  }
 0x117   : > { %13654 = vmatmul.mubr.bf16.vlgmr.msra.gmra.mxu1 %v16713_v18  ;;  %13665 = vmatpush1.bf16.msra.mxu0 %v19225_v19  ;;  %v19312_v18 = vld [vmem:[%s22566_s24 + $0x590] ss:$8 sps:$4 sm:$0xff]   ;;  %v19317_v19 = vld [vmem:[%s22566_s24 + $0x484] ss:$8 sps:$4 sm:$0xff]  }
 0x118   : > { %13708 = vmatpush1.bf16.msra.mxu1 %v19228_v20  ;;  %13666 = vmatprep.subr.bf16.mxu0 %v19233_v21  ;;  %v19320_v20 = vld [vmem:[%s22566_s24 + $0x584] ss:$8 sps:$4 sm:$0xff]   ;;  %v19315_v21 = vld [vmem:[%s22566_s24 + $0x480] ss:$8 sps:$4 sm:$0xff]  }
 0x119   : > { %13709 = vmatprep.subr.bf16.mxu1 %v19236_v22  ;;  %13696 = vmatprep.mubr.bf16.mxu0 %v16716_v30  ;;  %v19318_v22 = vld [vmem:[%s22566_s24 + $0x580] ss:$8 sps:$4 sm:$0xff]   ;;  %v19324_v30 = vld [vmem:[%s22566_s24 + $0x770] ss:$8 sps:$4 sm:$0xff]  }
 0x11a   : > { %13739 = vmatprep.mubr.bf16.mxu1 %v16718_v32  ;;  %v22832_v32 = vld [vmem:[%s22634_s29 + $0x630] sm:$0xff] }
 0x11b   : > { %13667 = vmatpush1.bf16.msra.mxu0 %v19231_v23  ;;  %v19323_v23 = vld [vmem:[%s22566_s24 + $0x674] ss:$8 sps:$4 sm:$0xff]  }
 0x11c   : > { %13710 = vmatpush1.bf16.msra.mxu1 %v19234_v24  ;;  %13668 = vmatprep.subr.bf16.mxu0 %v19239_v29  ;;  %v19326_v24 = vld [vmem:[%s22566_s24 + $0x774] ss:$8 sps:$4 sm:$0xff]   ;;  %v19321_v29 = vld [vmem:[%s22566_s24 + $0x670] ss:$8 sps:$4 sm:$0xff]  }
 0x11d   : > { %13711 = vmatprep.subr.bf16.mxu1 %v19242_v31  ;;  %v22829_v31 = vld [vmem:[%s22634_s29 + $0x30] sm:$0xff] }
 0x11f   : > { %13669 = vmatpush1.bf16.msra.mxu0 %v19237_v33  ;;  %v16715_v33 = vcombine.low %v22753_v25, %v22756_v26  ;;  %v16720_v25 = vcombine.high %v22829_v31, %v22832_v32 }
 0x120   : > { %13712 = vmatpush1.bf16.msra.mxu1 %v19240_v34  ;;  %13670 = vmatprep.subr.bf16.mxu0 %v19245_v35  ;;  %v16717_v34 = vcombine.low %v22759_v27, %v22762_v28  ;;  %v22839_v35 = vld [vmem:[%s22634_s29 + $0x38] sm:$0xff]  ;;  %v19327_v27 = vld [vmem:[%s22566_s24 + $0x660] ss:$8 sps:$4 sm:$0xff]  }
 0x121   : > { %13713 = vmatprep.subr.bf16.mxu1 %v19248_v36  ;;  %v22842_v36 = vld [vmem:[%s22634_s29 + $0x638] sm:$0xff]  ;;  %v19330_v28 = vld [vmem:[%s22566_s24 + $0x760] ss:$8 sps:$4 sm:$0xff]  }
 0x122   : > { %v16722_v26 = vcombine.high %v22839_v35, %v22842_v36 }
 0x123   : > { %13671 = vmatpush1.bf16.msra.mxu0 %v19243_v37  ;;  %v19329_v37 = vld [vmem:[%s22566_s24 + $0x664] ss:$8 sps:$4 sm:$0xff]  }
 0x124   : > { %13714 = vmatpush1.bf16.msra.mxu1 %v19246_v38  ;;  %13672 = vmatprep.subr.bf16.mxu0 %v19251_v39  ;;  %v19332_v38 = vld [vmem:[%s22566_s24 + $0x764] ss:$8 sps:$4 sm:$0xff]   ;;  %v19335_v39 = vld [vmem:[%s22566_s24 + $0x654] ss:$8 sps:$4 sm:$0xff]  }
 0x125   : > { %13715 = vmatprep.subr.bf16.mxu1 %v19254_v40  ;;  %v19338_v40 = vld [vmem:[%s22566_s24 + $0x754] ss:$8 sps:$4 sm:$0xff]  }
 0x127   : > { %13673 = vmatpush1.bf16.msra.mxu0 %v19249_v41  ;;  %v19333_v41 = vld [vmem:[%s22566_s24 + $0x650] ss:$8 sps:$4 sm:$0xff]  }
 0x128   : > { %13716 = vmatpush1.bf16.msra.mxu1 %v19252_v42  ;;  %13674 = vmatprep.subr.bf16.mxu0 %v19257_v43  ;;  %v19336_v42 = vld [vmem:[%s22566_s24 + $0x750] ss:$8 sps:$4 sm:$0xff]   ;;  %v19341_v43 = vld [vmem:[%s22566_s24 + $0x644] ss:$8 sps:$4 sm:$0xff]  }
 0x129   : > { %13717 = vmatprep.subr.bf16.mxu1 %v19260_v44  ;;  %v19344_v44 = vld [vmem:[%s22566_s24 + $0x744] ss:$8 sps:$4 sm:$0xff]  }
 0x12b   : > { %13675 = vmatpush1.bf16.msra.mxu0 %v19255_v45  ;;  %v19339_v45 = vld [vmem:[%s22566_s24 + $0x640] ss:$8 sps:$4 sm:$0xff]  }
 0x12c   : > { %13718 = vmatpush1.bf16.msra.mxu1 %v19258_v46  ;;  %13676 = vmatprep.subr.bf16.mxu0 %v19263_v47  ;;  %v19342_v46 = vld [vmem:[%s22566_s24 + $0x740] ss:$8 sps:$4 sm:$0xff]   ;;  %v19347_v47 = vld [vmem:[%s22566_s24 + $0x634] ss:$8 sps:$4 sm:$0xff]  }
 0x12d   : > { %13719 = vmatprep.subr.bf16.mxu1 %v19266_v48  ;;  %v19350_v48 = vld [vmem:[%s22566_s24 + $0x734] ss:$8 sps:$4 sm:$0xff]  }
 0x12f   : > { %13677 = vmatpush1.bf16.msra.mxu0 %v19261_v49  ;;  %v19345_v49 = vld [vmem:[%s22566_s24 + $0x630] ss:$8 sps:$4 sm:$0xff]  }
 0x130   : > { %13720 = vmatpush1.bf16.msra.mxu1 %v19264_v50  ;;  %13678 = vmatprep.subr.bf16.mxu0 %v19269_v51  ;;  %v19348_v50 = vld [vmem:[%s22566_s24 + $0x730] ss:$8 sps:$4 sm:$0xff]   ;;  %v19353_v51 = vld [vmem:[%s22566_s24 + $0x624] ss:$8 sps:$4 sm:$0xff]  }
 0x131   : > { %13721 = vmatprep.subr.bf16.mxu1 %v19272_v52  ;;  %v19356_v52 = vld [vmem:[%s22566_s24 + $0x724] ss:$8 sps:$4 sm:$0xff]  }
 0x133   : > { %13679 = vmatpush1.bf16.msra.mxu0 %v19267_v53  ;;  %v19351_v53 = vld [vmem:[%s22566_s24 + $0x620] ss:$8 sps:$4 sm:$0xff]  }
 0x134   : > { %13722 = vmatpush1.bf16.msra.mxu1 %v19270_v54  ;;  %13680 = vmatprep.subr.bf16.mxu0 %v19275_v55  ;;  %v19354_v54 = vld [vmem:[%s22566_s24 + $0x720] ss:$8 sps:$4 sm:$0xff]   ;;  %v19359_v55 = vld [vmem:[%s22566_s24 + $0x614] ss:$8 sps:$4 sm:$0xff]  }
 0x135   : > { %13723 = vmatprep.subr.bf16.mxu1 %v19278_v56  ;;  %v19362_v56 = vld [vmem:[%s22566_s24 + $0x714] ss:$8 sps:$4 sm:$0xff]  }
 0x137   : > { %13681 = vmatpush2.bf16.msra.mxu0 %v19273_v57  ;;  %v19357_v57 = vld [vmem:[%s22566_s24 + $0x610] ss:$8 sps:$4 sm:$0xff]  }
 0x138   : > { %13724 = vmatpush2.bf16.msra.mxu1 %v19276_v58  ;;  %13682 = vmatprep.subr.bf16.mxu0 %v19281_v59  ;;  %v19360_v58 = vld [vmem:[%s22566_s24 + $0x710] ss:$8 sps:$4 sm:$0xff]   ;;  %v19365_v59 = vld [vmem:[%s22566_s24 + $0x604] ss:$8 sps:$4 sm:$0xff]  }
 0x139   : > { %13725 = vmatprep.subr.bf16.mxu1 %v19284_v60  ;;  %v19368_v60 = vld [vmem:[%s22566_s24 + $0x704] ss:$8 sps:$4 sm:$0xff]  }
 0x13b   : > { %13683 = vmatpush2.bf16.msra.mxu0 %v19279_v61  ;;  %v19363_v61 = vld [vmem:[%s22566_s24 + $0x600] ss:$8 sps:$4 sm:$0xff]  }
 0x13c   : > { %13726 = vmatpush2.bf16.msra.mxu1 %v19282_v62  ;;  %13684 = vmatprep.subr.bf16.mxu0 %v19287_v63  ;;  %v19366_v62 = vld [vmem:[%s22566_s24 + $0x700] ss:$8 sps:$4 sm:$0xff]   ;;  %v19371_v63 = vld [vmem:[%s22566_s24 + $0x6f4] ss:$8 sps:$4 sm:$0xff]  }
 0x13d   : > { %13727 = vmatprep.subr.bf16.mxu1 %v19290_v0  ;;  %v19374_v0 = vld [vmem:[%s22566_s24 + $0x7f4] ss:$8 sps:$4 sm:$0xff]  }
 0x13f   : > { %13685 = vmatpush2.bf16.msra.mxu0 %v19285_v1  ;;  %v19369_v1 = vld [vmem:[%s22566_s24 + $0x6f0] ss:$8 sps:$4 sm:$0xff]  }
 0x140   : > { %13728 = vmatpush2.bf16.msra.mxu1 %v19288_v2  ;;  %13686 = vmatprep.subr.bf16.mxu0 %v19293_v3  ;;  %v19372_v2 = vld [vmem:[%s22566_s24 + $0x7f0] ss:$8 sps:$4 sm:$0xff]   ;;  %v19377_v3 = vld [vmem:[%s22566_s24 + $0x6e4] ss:$8 sps:$4 sm:$0xff]  }
 0x141   : > { %13729 = vmatprep.subr.bf16.mxu1 %v19296_v4  ;;  %v19380_v4 = vld [vmem:[%s22566_s24 + $0x7e4] ss:$8 sps:$4 sm:$0xff]  }
 0x143   : > { %13687 = vmatpush2.bf16.msra.mxu0 %v19291_v5  ;;  %v19375_v5 = vld [vmem:[%s22566_s24 + $0x6e0] ss:$8 sps:$4 sm:$0xff]  }
 0x144   : > { %13730 = vmatpush2.bf16.msra.mxu1 %v19294_v6  ;;  %13688 = vmatprep.subr.bf16.mxu0 %v19299_v7  ;;  %v19378_v6 = vld [vmem:[%s22566_s24 + $0x7e0] ss:$8 sps:$4 sm:$0xff]   ;;  %v19383_v7 = vld [vmem:[%s22566_s24 + $0x6d4] ss:$8 sps:$4 sm:$0xff]  }
 0x145   : > { %13731 = vmatprep.subr.bf16.mxu1 %v19302_v8  ;;  %v19386_v8 = vld [vmem:[%s22566_s24 + $0x7d4] ss:$8 sps:$4 sm:$0xff]  }
 0x147   : > { %13689 = vmatpush2.bf16.msra.mxu0 %v19297_v9  ;;  %v19381_v9 = vld [vmem:[%s22566_s24 + $0x6d0] ss:$8 sps:$4 sm:$0xff]  }
 0x148   : > { %13732 = vmatpush2.bf16.msra.mxu1 %v19300_v10  ;;  %13690 = vmatprep.subr.bf16.mxu0 %v19305_v11  ;;  %v19384_v10 = vld [vmem:[%s22566_s24 + $0x7d0] ss:$8 sps:$4 sm:$0xff]   ;;  %v19389_v11 = vld [vmem:[%s22566_s24 + $0x6c4] ss:$8 sps:$4 sm:$0xff]  }
 0x149   : > { %13733 = vmatprep.subr.bf16.mxu1 %v19308_v12  ;;  %v19392_v12 = vld [vmem:[%s22566_s24 + $0x7c4] ss:$8 sps:$4 sm:$0xff]  }
 0x14b   : > { %13691 = vmatpush2.bf16.msra.mxu0 %v19303_v13  ;;  %v19387_v13 = vld [vmem:[%s22566_s24 + $0x6c0] ss:$8 sps:$4 sm:$0xff]  }
 0x14c   : > { %13734 = vmatpush2.bf16.msra.mxu1 %v19306_v14  ;;  %13692 = vmatprep.subr.bf16.mxu0 %v19311_v15  ;;  %v19390_v14 = vld [vmem:[%s22566_s24 + $0x7c0] ss:$8 sps:$4 sm:$0xff]   ;;  %v19395_v15 = vld [vmem:[%s22566_s24 + $0x6b4] ss:$8 sps:$4 sm:$0xff]  }
 0x14d   : > { %13735 = vmatprep.subr.bf16.mxu1 %v19314_v16  ;;  %v19398_v16 = vld [vmem:[%s22566_s24 + $0x7b4] ss:$8 sps:$4 sm:$0xff]  }
 0x14f   : > { %13693 = vmatpush2.bf16.msra.mxu0 %v19309_v17  ;;  %v19393_v17 = vld [vmem:[%s22566_s24 + $0x6b0] ss:$8 sps:$4 sm:$0xff]  }
 0x150   : > { %13736 = vmatpush2.bf16.msra.mxu1 %v19312_v18  ;;  %13694 = vmatprep.subr.bf16.mxu0 %v19317_v19  ;;  %v19396_v18 = vld [vmem:[%s22566_s24 + $0x7b0] ss:$8 sps:$4 sm:$0xff]   ;;  %v19401_v19 = vld [vmem:[%s22566_s24 + $0x6a4] ss:$8 sps:$4 sm:$0xff]  }
 0x151   : > { %13737 = vmatprep.subr.bf16.mxu1 %v19320_v20  ;;  %v19404_v20 = vld [vmem:[%s22566_s24 + $0x7a4] ss:$8 sps:$4 sm:$0xff]  }
 0x153   : > { %13695 = vmatpush2.bf16.msra.mxu0 %v19315_v21  ;;  %v19399_v21 = vld [vmem:[%s22566_s24 + $0x6a0] ss:$8 sps:$4 sm:$0xff]  }
 0x154   : > { %13738 = vmatpush2.bf16.msra.mxu1 %v19318_v22  ;;  %13750 = vmatprep.subr.bf16.mxu0 %v19323_v23  ;;  %v19402_v22 = vld [vmem:[%s22566_s24 + $0x7a0] ss:$8 sps:$4 sm:$0xff]   ;;  %v19407_v23 = vld [vmem:[%s22566_s24 + $0x694] ss:$8 sps:$4 sm:$0xff]  }
 0x155   : > { %13793 = vmatprep.subr.bf16.mxu1 %v19326_v24  ;;  %v19410_v24 = vld [vmem:[%s22566_s24 + $0x794] ss:$8 sps:$4 sm:$0xff]  }
 0x156   : > { %13697 = vmatmul.mubr.bf16.vlgmr.msra.gmra.mxu0 %v16715_v33  ;;  %v19413_v33 = vld [vmem:[%s22566_s24 + $0x684] ss:$8 sps:$4 sm:$0xff]  }
 0x157   : > { %13740 = vmatmul.mubr.bf16.vlgmr.msra.gmra.mxu1 %v16717_v34  ;;  %13751 = vmatpush1.bf16.msra.mxu0 %v19321_v29  ;;  %v19405_v29 = vld [vmem:[%s22566_s24 + $0x690] ss:$8 sps:$4 sm:$0xff]   ;;  %v19416_v34 = vld [vmem:[%s22566_s24 + $0x784] ss:$8 sps:$4 sm:$0xff]  }
 0x158   : > { %13794 = vmatpush1.bf16.msra.mxu1 %v19324_v30  ;;  %13752 = vmatprep.subr.bf16.mxu0 %v19329_v37  ;;  %v19408_v30 = vld [vmem:[%s22566_s24 + $0x790] ss:$8 sps:$4 sm:$0xff]   ;;  %v19411_v37 = vld [vmem:[%s22566_s24 + $0x680] ss:$8 sps:$4 sm:$0xff]  }
 0x159   : > { %13795 = vmatprep.subr.bf16.mxu1 %v19332_v38  ;;  %13782 = vmatprep.mubr.bf16.mxu0 %v16720_v25  ;;  %v19414_v38 = vld [vmem:[%s22566_s24 + $0x780] ss:$8 sps:$4 sm:$0xff]   ;;  %v19419_v25 = vld [vmem:[%s22566_s24 + $0x874] ss:$8 sps:$4 sm:$0xff]  }
 0x15a   : > { %13825 = vmatprep.mubr.bf16.mxu1 %v16722_v26  ;;  %v19422_v26 = vld [vmem:[%s22566_s24 + $0x974] ss:$8 sps:$4 sm:$0xff]  }
 0x15b   : > { %13753 = vmatpush1.bf16.msra.mxu0 %v19327_v27  ;;  %v19417_v27 = vld [vmem:[%s22566_s24 + $0x870] ss:$8 sps:$4 sm:$0xff]  }
 0x15c   : > { %13796 = vmatpush1.bf16.msra.mxu1 %v19330_v28  ;;  %13754 = vmatprep.subr.bf16.mxu0 %v19335_v39  ;;  %v19420_v28 = vld [vmem:[%s22566_s24 + $0x970] ss:$8 sps:$4 sm:$0xff]   ;;  %v22913_v39 = vld [vmem:[%s22634_s29 + $0x40] sm:$0xff] }
 0x15d   : > { %13797 = vmatprep.subr.bf16.mxu1 %v19338_v40  ;;  %v22916_v40 = vld [vmem:[%s22634_s29 + $0x640] sm:$0xff] }
 0x15f   : > { %13755 = vmatpush1.bf16.msra.mxu0 %v19333_v41  ;;  %v16719_v41 = vcombine.low %v22829_v31, %v22832_v32 }
 0x160   : > { %13798 = vmatpush1.bf16.msra.mxu1 %v19336_v42  ;;  %13756 = vmatprep.subr.bf16.mxu0 %v19341_v43  ;;  %v16721_v42 = vcombine.low %v22839_v35, %v22842_v36  ;;  %v22923_v43 = vld [vmem:[%s22634_s29 + $0x48] sm:$0xff] }
 0x161   : > { %13799 = vmatprep.subr.bf16.mxu1 %v19344_v44  ;;  %v22926_v44 = vld [vmem:[%s22634_s29 + $0x648] sm:$0xff] }
 0x162   : > { %v16726_v31 = vcombine.high %v22923_v43, %v22926_v44  ;;  %v19423_v36 = vld [vmem:[%s22566_s24 + $0x860] ss:$8 sps:$4 sm:$0xff]  }
 0x163   : > { %13757 = vmatpush1.bf16.msra.mxu0 %v19339_v45  ;;  %v19425_v45 = vld [vmem:[%s22566_s24 + $0x864] ss:$8 sps:$4 sm:$0xff]  }
 0x164   : > { %13800 = vmatpush1.bf16.msra.mxu1 %v19342_v46  ;;  %13758 = vmatprep.subr.bf16.mxu0 %v19347_v47  ;;  %v19428_v46 = vld [vmem:[%s22566_s24 + $0x964] ss:$8 sps:$4 sm:$0xff]   ;;  %v16724_v47 = vcombine.high %v22913_v39, %v22916_v40 }
 0x165   : > { %13801 = vmatprep.subr.bf16.mxu1 %v19350_v48  ;;  %v19426_v48 = vld [vmem:[%s22566_s24 + $0x960] ss:$8 sps:$4 sm:$0xff]  }
 0x167   : > { %13759 = vmatpush1.bf16.msra.mxu0 %v19345_v49 }
 0x168   : > { %13802 = vmatpush1.bf16.msra.mxu1 %v19348_v50  ;;  %13760 = vmatprep.subr.bf16.mxu0 %v19353_v51  ;;  %v19431_v50 = vld [vmem:[%s22566_s24 + $0x854] ss:$8 sps:$4 sm:$0xff]  }
 0x169   : > { %13803 = vmatprep.subr.bf16.mxu1 %v19356_v52 }
 0x16b   : > { %13761 = vmatpush1.bf16.msra.mxu0 %v19351_v53  ;;  %v19434_v53 = vld [vmem:[%s22566_s24 + $0x954] ss:$8 sps:$4 sm:$0xff]  }
 0x16c   : > { %13804 = vmatpush1.bf16.msra.mxu1 %v19354_v54  ;;  %13762 = vmatprep.subr.bf16.mxu0 %v19359_v55 }
 0x16d   : > { %13805 = vmatprep.subr.bf16.mxu1 %v19362_v56 }
 0x16f   : > { %13763 = vmatpush1.bf16.msra.mxu0 %v19357_v57  ;;  %v19429_v57 = vld [vmem:[%s22566_s24 + $0x850] ss:$8 sps:$4 sm:$0xff]  }
 0x170   : > { %13806 = vmatpush1.bf16.msra.mxu1 %v19360_v58  ;;  %13764 = vmatprep.subr.bf16.mxu0 %v19365_v59  ;;  %v19432_v58 = vld [vmem:[%s22566_s24 + $0x950] ss:$8 sps:$4 sm:$0xff]  }
 0x171   : > { %13807 = vmatprep.subr.bf16.mxu1 %v19368_v60  ;;  %v19437_v60 = vld [vmem:[%s22566_s24 + $0x844] ss:$8 sps:$4 sm:$0xff]  }
 0x173   : > { %13765 = vmatpush1.bf16.msra.mxu0 %v19363_v61  ;;  %v19440_v61 = vld [vmem:[%s22566_s24 + $0x944] ss:$8 sps:$4 sm:$0xff]  }
 0x174   : > { %13808 = vmatpush1.bf16.msra.mxu1 %v19366_v62  ;;  %13766 = vmatprep.subr.bf16.mxu0 %v19371_v63  ;;  %v19435_v62 = vld [vmem:[%s22566_s24 + $0x840] ss:$8 sps:$4 sm:$0xff]  }
 0x175   : > { %13809 = vmatprep.subr.bf16.mxu1 %v19374_v0  ;;  %v19438_v63 = vld [vmem:[%s22566_s24 + $0x940] ss:$8 sps:$4 sm:$0xff]   ;;  %v19443_v0 = vld [vmem:[%s22566_s24 + $0x834] ss:$8 sps:$4 sm:$0xff]  }
 0x177   : > { %13767 = vmatpush2.bf16.msra.mxu0 %v19369_v1  ;;  %v19446_v1 = vld [vmem:[%s22566_s24 + $0x934] ss:$8 sps:$4 sm:$0xff]  }
 0x178   : > { %13810 = vmatpush2.bf16.msra.mxu1 %v19372_v2  ;;  %13768 = vmatprep.subr.bf16.mxu0 %v19377_v3  ;;  %v19441_v2 = vld [vmem:[%s22566_s24 + $0x830] ss:$8 sps:$4 sm:$0xff]  }
 0x179   : > { %13811 = vmatprep.subr.bf16.mxu1 %v19380_v4  ;;  %v19444_v3 = vld [vmem:[%s22566_s24 + $0x930] ss:$8 sps:$4 sm:$0xff]   ;;  %v19449_v4 = vld [vmem:[%s22566_s24 + $0x824] ss:$8 sps:$4 sm:$0xff]  }
 0x17b   : > { %13769 = vmatpush2.bf16.msra.mxu0 %v19375_v5  ;;  %v19452_v5 = vld [vmem:[%s22566_s24 + $0x924] ss:$8 sps:$4 sm:$0xff]  }
 0x17c   : > { %13812 = vmatpush2.bf16.msra.mxu1 %v19378_v6  ;;  %13770 = vmatprep.subr.bf16.mxu0 %v19383_v7  ;;  %v19447_v6 = vld [vmem:[%s22566_s24 + $0x820] ss:$8 sps:$4 sm:$0xff]  }
 0x17d   : > { %13813 = vmatprep.subr.bf16.mxu1 %v19386_v8  ;;  %v19450_v7 = vld [vmem:[%s22566_s24 + $0x920] ss:$8 sps:$4 sm:$0xff]   ;;  %v19455_v8 = vld [vmem:[%s22566_s24 + $0x814] ss:$8 sps:$4 sm:$0xff]  }
 0x17f   : > { %13771 = vmatpush2.bf16.msra.mxu0 %v19381_v9  ;;  %v19458_v9 = vld [vmem:[%s22566_s24 + $0x914] ss:$8 sps:$4 sm:$0xff]  }
 0x180   : > { %13814 = vmatpush2.bf16.msra.mxu1 %v19384_v10  ;;  %13772 = vmatprep.subr.bf16.mxu0 %v19389_v11  ;;  %v19453_v10 = vld [vmem:[%s22566_s24 + $0x810] ss:$8 sps:$4 sm:$0xff]  }
 0x181   : > { %13815 = vmatprep.subr.bf16.mxu1 %v19392_v12  ;;  %v19456_v11 = vld [vmem:[%s22566_s24 + $0x910] ss:$8 sps:$4 sm:$0xff]   ;;  %v19461_v12 = vld [vmem:[%s22566_s24 + $0x804] ss:$8 sps:$4 sm:$0xff]  }
 0x183   : > { %13773 = vmatpush2.bf16.msra.mxu0 %v19387_v13  ;;  %v19464_v13 = vld [vmem:[%s22566_s24 + $0x904] ss:$8 sps:$4 sm:$0xff]  }
 0x184   : > { %13816 = vmatpush2.bf16.msra.mxu1 %v19390_v14  ;;  %13774 = vmatprep.subr.bf16.mxu0 %v19395_v15  ;;  %v19459_v14 = vld [vmem:[%s22566_s24 + $0x800] ss:$8 sps:$4 sm:$0xff]  }
 0x185   : > { %13817 = vmatprep.subr.bf16.mxu1 %v19398_v16  ;;  %v19462_v15 = vld [vmem:[%s22566_s24 + $0x900] ss:$8 sps:$4 sm:$0xff]   ;;  %v19467_v16 = vld [vmem:[%s22566_s24 + $0x8f4] ss:$8 sps:$4 sm:$0xff]  }
 0x187   : > { %13775 = vmatpush2.bf16.msra.mxu0 %v19393_v17  ;;  %v19470_v17 = vld [vmem:[%s22566_s24 + $0x9f4] ss:$8 sps:$4 sm:$0xff]  }
 0x188   : > { %13818 = vmatpush2.bf16.msra.mxu1 %v19396_v18  ;;  %13776 = vmatprep.subr.bf16.mxu0 %v19401_v19  ;;  %v19465_v18 = vld [vmem:[%s22566_s24 + $0x8f0] ss:$8 sps:$4 sm:$0xff]  }
 0x189   : > { %13819 = vmatprep.subr.bf16.mxu1 %v19404_v20  ;;  %v19468_v19 = vld [vmem:[%s22566_s24 + $0x9f0] ss:$8 sps:$4 sm:$0xff]   ;;  %v19473_v20 = vld [vmem:[%s22566_s24 + $0x8e4] ss:$8 sps:$4 sm:$0xff]  }
 0x18b   : > { %13777 = vmatpush2.bf16.msra.mxu0 %v19399_v21  ;;  %v19476_v21 = vld [vmem:[%s22566_s24 + $0x9e4] ss:$8 sps:$4 sm:$0xff]  }
 0x18c   : > { %13820 = vmatpush2.bf16.msra.mxu1 %v19402_v22  ;;  %13778 = vmatprep.subr.bf16.mxu0 %v19407_v23  ;;  %v19471_v22 = vld [vmem:[%s22566_s24 + $0x8e0] ss:$8 sps:$4 sm:$0xff]  }
 0x18d   : > { %13821 = vmatprep.subr.bf16.mxu1 %v19410_v24  ;;  %v19474_v23 = vld [vmem:[%s22566_s24 + $0x9e0] ss:$8 sps:$4 sm:$0xff]   ;;  %v19479_v24 = vld [vmem:[%s22566_s24 + $0x8d4] ss:$8 sps:$4 sm:$0xff]  }
 0x18f   : > { %13779 = vmatpush2.bf16.msra.mxu0 %v19405_v29  ;;  %v19482_v29 = vld [vmem:[%s22566_s24 + $0x9d4] ss:$8 sps:$4 sm:$0xff]  }
 0x190   : > { %13822 = vmatpush2.bf16.msra.mxu1 %v19408_v30  ;;  %13780 = vmatprep.subr.bf16.mxu0 %v19413_v33  ;;  %v19477_v30 = vld [vmem:[%s22566_s24 + $0x8d0] ss:$8 sps:$4 sm:$0xff]  }
 0x191   : > { %13823 = vmatprep.subr.bf16.mxu1 %v19416_v34  ;;  %v19480_v33 = vld [vmem:[%s22566_s24 + $0x9d0] ss:$8 sps:$4 sm:$0xff]   ;;  %v19485_v34 = vld [vmem:[%s22566_s24 + $0x8c4] ss:$8 sps:$4 sm:$0xff]  }
 0x193   : > { %13781 = vmatpush2.bf16.msra.mxu0 %v19411_v37  ;;  %v19488_v37 = vld [vmem:[%s22566_s24 + $0x9c4] ss:$8 sps:$4 sm:$0xff]  }
 0x194   : > { %13824 = vmatpush2.bf16.msra.mxu1 %v19414_v38  ;;  %13836 = vmatprep.subr.bf16.mxu0 %v19419_v25  ;;  %v19483_v38 = vld [vmem:[%s22566_s24 + $0x8c0] ss:$8 sps:$4 sm:$0xff]  }
 0x195   : > { %13879 = vmatprep.subr.bf16.mxu1 %v19422_v26  ;;  %v19486_v25 = vld [vmem:[%s22566_s24 + $0x9c0] ss:$8 sps:$4 sm:$0xff]   ;;  %v19491_v26 = vld [vmem:[%s22566_s24 + $0x8b4] ss:$8 sps:$4 sm:$0xff]  }
 0x196   : > { %v13526_v32 = vpop.f32.mrf.mxu0  ;;  %13783 = vmatmul.mubr.bf16.vlgmr.msra.gmra.mxu0 %v16719_v41  ;;  %v19492_v41 = vld [vmem:[%s22566_s24 + $0x9b0] ss:$8 sps:$4 sm:$0xff]  }
 0x197   : > { %v13569_v35 = vpop.f32.mrf.mxu1  ;;  %13826 = vmatmul.mubr.bf16.vlgmr.msra.gmra.mxu1 %v16721_v42  ;;  %13837 = vmatpush1.bf16.msra.mxu0 %v19417_v27  ;;  %v19494_v27 = vld [vmem:[%s22566_s24 + $0x9b4] ss:$8 sps:$4 sm:$0xff]   ;;  %v19497_v42 = vld [vmem:[%s22566_s24 + $0x8a4] ss:$8 sps:$4 sm:$0xff]  }
 0x198   : > { %v22936_v49 = vadd.f32 %v13569_v35, %v13526_v32  ;;  %13880 = vmatpush1.bf16.msra.mxu1 %v19420_v28  ;;  %v13528_v51 = vpop.f32.mrf.mxu0  ;;  %13838 = vmatprep.subr.bf16.mxu0 %v19425_v45  ;;  %v19489_v28 = vld [vmem:[%s22566_s24 + $0x8b0] ss:$8 sps:$4 sm:$0xff]   ;;  %v19500_v45 = vld [vmem:[%s22566_s24 + $0x9a4] ss:$8 sps:$4 sm:$0xff]   ;;  %v19506_v32 = vld [vmem:[%s22566_s24 + $0x994] ss:$8 sps:$4 sm:$0xff]  }
 0x199   : > { %v13571_v52 = vpop.f32.mrf.mxu1  ;;  %13881 = vmatprep.subr.bf16.mxu1 %v19428_v46  ;;  %13868 = vmatprep.mubr.bf16.mxu0 %v16724_v47  ;;  %v19495_v46 = vld [vmem:[%s22566_s24 + $0x8a0] ss:$8 sps:$4 sm:$0xff]   ;;  %v19501_v35 = vld [vmem:[%s22566_s24 + $0x890] ss:$8 sps:$4 sm:$0xff]  }
 0x19a   : > { %v22940_v54 = vadd.f32 %v13571_v52, %v13528_v51  ;;  %13911 = vmatprep.mubr.bf16.mxu1 %v16726_v31  ;;  %v13530_v55 = vpop.f32.mrf.mxu0  ;;  %v19498_v47 = vld [vmem:[%s22566_s24 + $0x9a0] ss:$8 sps:$4 sm:$0xff]   ;;  %v19503_v31 = vld [vmem:[%s22566_s24 + $0x894] ss:$8 sps:$4 sm:$0xff]  }
 0x19b   : > { %v13573_v56 = vpop.f32.mrf.mxu1  ;;  %13839 = vmatpush1.bf16.msra.mxu0 %v19423_v36  ;;  %v19504_v36 = vld [vmem:[%s22566_s24 + $0x990] ss:$8 sps:$4 sm:$0xff]   ;;  %v19507_v51 = vld [vmem:[%s22566_s24 + $0x880] ss:$8 sps:$4 sm:$0xff]  }
 0x19c   : > { %v22944_v59 = vadd.f32 %v13573_v56, %v13530_v55  ;;  %13882 = vmatpush1.bf16.msra.mxu1 %v19426_v48  ;;  %13840 = vmatprep.subr.bf16.mxu0 %v19431_v50  ;;  %v19509_v48 = vld [vmem:[%s22566_s24 + $0x884] ss:$8 sps:$4 sm:$0xff]   ;;  %v19510_v52 = vld [vmem:[%s22566_s24 + $0x980] ss:$8 sps:$4 sm:$0xff]   ;;  %v19518_v55 = vld [vmem:[%s22566_s24 + $0xb74] ss:$8 sps:$4 sm:$0xff]  }
 0x19d   : > { %13883 = vmatprep.subr.bf16.mxu1 %v19434_v53  ;;  %v19512_v50 = vld [vmem:[%s22566_s24 + $0x984] ss:$8 sps:$4 sm:$0xff]   ;;  %v19515_v53 = vld [vmem:[%s22566_s24 + $0xa74] ss:$8 sps:$4 sm:$0xff]  }
 0x19e   : > { %v23001_v56 = vld [vmem:[%s22634_s29 + $0x50] sm:$0xff] }
 0x19f   : > { %13841 = vmatpush1.bf16.msra.mxu0 %v19429_v57  ;;  %v19513_v57 = vld [vmem:[%s22566_s24 + $0xa70] ss:$8 sps:$4 sm:$0xff]  }
 0x1a0   : > { %13884 = vmatpush1.bf16.msra.mxu1 %v19432_v58  ;;  %13842 = vmatprep.subr.bf16.mxu0 %v19437_v60  ;;  %v16723_v58 = vcombine.low %v22913_v39, %v22916_v40  ;;  %v16725_v60 = vcombine.low %v22923_v43, %v22926_v44  ;;  %v19524_v39 = vld [vmem:[%s22566_s24 + $0xb64] ss:$8 sps:$4 sm:$0xff]   ;;  %v19519_v40 = vld [vmem:[%s22566_s24 + $0xa60] ss:$8 sps:$4 sm:$0xff]  }
 0x1a1   : > { %13885 = vmatprep.subr.bf16.mxu1 %v19440_v61  ;;  %v23009_v61 = vld [vmem:[%s22634_s29 + $0x650] sm:$0xff]  ;;  %v19522_v43 = vld [vmem:[%s22566_s24 + $0xb60] ss:$8 sps:$4 sm:$0xff]  }
 0x1a2   : > { %v16728_v44 = vcombine.high %v23001_v56, %v23009_v61 }
 0x1a3   : > { %13843 = vmatpush1.bf16.msra.mxu0 %v19435_v62  ;;  %v23012_v62 = vld [vmem:[%s22634_s29 + $0x58] sm:$0xff] }
 0x1a4   : > { %13886 = vmatpush1.bf16.msra.mxu1 %v19438_v63  ;;  %13844 = vmatprep.subr.bf16.mxu0 %v19443_v0  ;;  %v23015_v63 = vld [vmem:[%s22634_s29 + $0x658] sm:$0xff] }
 0x1a5   : > { %13887 = vmatprep.subr.bf16.mxu1 %v19446_v1  ;;  %v19516_v0 = vld [vmem:[%s22566_s24 + $0xb70] ss:$8 sps:$4 sm:$0xff]   ;;  %v23018_v1 = vpop.f32.mrf.mxu0 }
 0x1a7   : > { %13845 = vmatpush1.bf16.msra.mxu0 %v19441_v2  ;;  %v23020_v2 = vpop.f32.mrf.mxu1 }
 0x1a8   : > { %13888 = vmatpush1.bf16.msra.mxu1 %v19444_v3  ;;  %13846 = vmatprep.subr.bf16.mxu0 %v19449_v4  ;;  %v19521_v3 = vld [vmem:[%s22566_s24 + $0xa64] ss:$8 sps:$4 sm:$0xff]   ;;  %v16730_v4 = vcombine.high %v23012_v62, %v23015_v63 }
 0x1a9   : > { %13889 = vmatprep.subr.bf16.mxu1 %v19452_v5 }
 0x1ab   : > { %13847 = vmatpush1.bf16.msra.mxu0 %v19447_v6 }
 0x1ac   : > { %13890 = vmatpush1.bf16.msra.mxu1 %v19450_v7  ;;  %13848 = vmatprep.subr.bf16.mxu0 %v19455_v8 }
 0x1ad   : > { %13891 = vmatprep.subr.bf16.mxu1 %v19458_v9 }
 0x1af   : > { %13849 = vmatpush1.bf16.msra.mxu0 %v19453_v10  ;;  %v19527_v10 = vld [vmem:[%s22566_s24 + $0xa54] ss:$8 sps:$4 sm:$0xff]  }
 0x1b0   : > { %13892 = vmatpush1.bf16.msra.mxu1 %v19456_v11  ;;  %13850 = vmatprep.subr.bf16.mxu0 %v19461_v12  ;;  %v19530_v11 = vld [vmem:[%s22566_s24 + $0xb54] ss:$8 sps:$4 sm:$0xff]  }
 0x1b1   : > { %13893 = vmatprep.subr.bf16.mxu1 %v19464_v13 }
 0x1b3   : > { %13851 = vmatpush1.bf16.msra.mxu0 %v19459_v14  ;;  %v19525_v14 = vld [vmem:[%s22566_s24 + $0xa50] ss:$8 sps:$4 sm:$0xff]  }
 0x1b4   : > { %13894 = vmatpush1.bf16.msra.mxu1 %v19462_v15  ;;  %13852 = vmatprep.subr.bf16.mxu0 %v19467_v16  ;;  %v19528_v15 = vld [vmem:[%s22566_s24 + $0xb50] ss:$8 sps:$4 sm:$0xff]  }
 0x1b5   : > { %13895 = vmatprep.subr.bf16.mxu1 %v19470_v17 }
 0x1b7   : > { %13853 = vmatpush2.bf16.msra.mxu0 %v19465_v18 }
 0x1b8   : > { %13896 = vmatpush2.bf16.msra.mxu1 %v19468_v19  ;;  %13854 = vmatprep.subr.bf16.mxu0 %v19473_v20  ;;  %v19536_v19 = vld [vmem:[%s22566_s24 + $0xb44] ss:$8 sps:$4 sm:$0xff]  }
 0x1b9   : > { %13897 = vmatprep.subr.bf16.mxu1 %v19476_v21  ;;  %v19531_v21 = vld [vmem:[%s22566_s24 + $0xa40] ss:$8 sps:$4 sm:$0xff]  }
 0x1bb   : > { %13855 = vmatpush2.bf16.msra.mxu0 %v19471_v22  ;;  %v19534_v22 = vld [vmem:[%s22566_s24 + $0xb40] ss:$8 sps:$4 sm:$0xff]  }
 0x1bc   : > { %13898 = vmatpush2.bf16.msra.mxu1 %v19474_v23  ;;  %13856 = vmatprep.subr.bf16.mxu0 %v19479_v24  ;;  %v19542_v23 = vld [vmem:[%s22566_s24 + $0xb34] ss:$8 sps:$4 sm:$0xff]   ;;  %v19537_v24 = vld [vmem:[%s22566_s24 + $0xa30] ss:$8 sps:$4 sm:$0xff]  }
 0x1bd   : > { %13899 = vmatprep.subr.bf16.mxu1 %v19482_v29  ;;  %v19540_v29 = vld [vmem:[%s22566_s24 + $0xb30] ss:$8 sps:$4 sm:$0xff]  }
 0x1bf   : > { %13857 = vmatpush2.bf16.msra.mxu0 %v19477_v30  ;;  %v19545_v30 = vld [vmem:[%s22566_s24 + $0xa24] ss:$8 sps:$4 sm:$0xff]  }
 0x1c0   : > { %13900 = vmatpush2.bf16.msra.mxu1 %v19480_v33  ;;  %13858 = vmatprep.subr.bf16.mxu0 %v19485_v34  ;;  %v19548_v33 = vld [vmem:[%s22566_s24 + $0xb24] ss:$8 sps:$4 sm:$0xff]   ;;  %v19543_v34 = vld [vmem:[%s22566_s24 + $0xa20] ss:$8 sps:$4 sm:$0xff]  }
 0x1c1   : > { %13901 = vmatprep.subr.bf16.mxu1 %v19488_v37  ;;  %v19546_v37 = vld [vmem:[%s22566_s24 + $0xb20] ss:$8 sps:$4 sm:$0xff]  }
 0x1c3   : > { %13859 = vmatpush2.bf16.msra.mxu0 %v19483_v38  ;;  %v19551_v38 = vld [vmem:[%s22566_s24 + $0xa14] ss:$8 sps:$4 sm:$0xff]  }
 0x1c4   : > { %13902 = vmatpush2.bf16.msra.mxu1 %v19486_v25  ;;  %13860 = vmatprep.subr.bf16.mxu0 %v19491_v26  ;;  %v19554_v25 = vld [vmem:[%s22566_s24 + $0xb14] ss:$8 sps:$4 sm:$0xff]   ;;  %v19549_v26 = vld [vmem:[%s22566_s24 + $0xa10] ss:$8 sps:$4 sm:$0xff]  }
 0x1c5   : > { %13903 = vmatprep.subr.bf16.mxu1 %v19494_v27  ;;  %v19552_v27 = vld [vmem:[%s22566_s24 + $0xb10] ss:$8 sps:$4 sm:$0xff]  }
 0x1c7   : > { %13861 = vmatpush2.bf16.msra.mxu0 %v19489_v28  ;;  %v19557_v28 = vld [vmem:[%s22566_s24 + $0xa04] ss:$8 sps:$4 sm:$0xff]  }
 0x1c8   : > { %13904 = vmatpush2.bf16.msra.mxu1 %v19492_v41  ;;  %13862 = vmatprep.subr.bf16.mxu0 %v19497_v42  ;;  %v19560_v41 = vld [vmem:[%s22566_s24 + $0xb04] ss:$8 sps:$4 sm:$0xff]   ;;  %v19555_v42 = vld [vmem:[%s22566_s24 + $0xa00] ss:$8 sps:$4 sm:$0xff]  }
 0x1c9   : > { %13905 = vmatprep.subr.bf16.mxu1 %v19500_v45  ;;  %v19558_v45 = vld [vmem:[%s22566_s24 + $0xb00] ss:$8 sps:$4 sm:$0xff]  }
 0x1cb   : > { %13863 = vmatpush2.bf16.msra.mxu0 %v19495_v46  ;;  %v19563_v46 = vld [vmem:[%s22566_s24 + $0xaf4] ss:$8 sps:$4 sm:$0xff]  }
 0x1cc   : > { %13906 = vmatpush2.bf16.msra.mxu1 %v19498_v47  ;;  %13864 = vmatprep.subr.bf16.mxu0 %v19503_v31  ;;  %v19566_v47 = vld [vmem:[%s22566_s24 + $0xbf4] ss:$8 sps:$4 sm:$0xff]   ;;  %v19561_v31 = vld [vmem:[%s22566_s24 + $0xaf0] ss:$8 sps:$4 sm:$0xff]  }
 0x1cd   : > { %13907 = vmatprep.subr.bf16.mxu1 %v19506_v32  ;;  %v19564_v32 = vld [vmem:[%s22566_s24 + $0xbf0] ss:$8 sps:$4 sm:$0xff]  }
 0x1cf   : > { %13865 = vmatpush2.bf16.msra.mxu0 %v19501_v35  ;;  %v19569_v35 = vld [vmem:[%s22566_s24 + $0xae4] ss:$8 sps:$4 sm:$0xff]  }
 0x1d0   : > { %13908 = vmatpush2.bf16.msra.mxu1 %v19504_v36  ;;  %13866 = vmatprep.subr.bf16.mxu0 %v19509_v48  ;;  %v19572_v36 = vld [vmem:[%s22566_s24 + $0xbe4] ss:$8 sps:$4 sm:$0xff]   ;;  %v19567_v48 = vld [vmem:[%s22566_s24 + $0xae0] ss:$8 sps:$4 sm:$0xff]  }
 0x1d1   : > { %13909 = vmatprep.subr.bf16.mxu1 %v19512_v50  ;;  %v19570_v50 = vld [vmem:[%s22566_s24 + $0xbe0] ss:$8 sps:$4 sm:$0xff]  }
 0x1d3   : > { %13867 = vmatpush2.bf16.msra.mxu0 %v19507_v51  ;;  %v19575_v51 = vld [vmem:[%s22566_s24 + $0xad4] ss:$8 sps:$4 sm:$0xff]  }
 0x1d4   : > { %13910 = vmatpush2.bf16.msra.mxu1 %v19510_v52  ;;  %13922 = vmatprep.subr.bf16.mxu0 %v19515_v53  ;;  %v19578_v52 = vld [vmem:[%s22566_s24 + $0xbd4] ss:$8 sps:$4 sm:$0xff]   ;;  %v19573_v53 = vld [vmem:[%s22566_s24 + $0xad0] ss:$8 sps:$4 sm:$0xff]  }
 0x1d5   : > { %13965 = vmatprep.subr.bf16.mxu1 %v19518_v55  ;;  %v19576_v55 = vld [vmem:[%s22566_s24 + $0xbd0] ss:$8 sps:$4 sm:$0xff]  }
 0x1d6   : > { %v13612_v5 = vpop.f32.mrf.mxu0  ;;  %13869 = vmatmul.mubr.bf16.vlgmr.msra.gmra.mxu0 %v16723_v58  ;;  %v19584_v58 = vld [vmem:[%s22566_s24 + $0xbc4] ss:$8 sps:$4 sm:$0xff]  }
 0x1d7   : > { %v13655_v6 = vpop.f32.mrf.mxu1  ;;  %13912 = vmatmul.mubr.bf16.vlgmr.msra.gmra.mxu1 %v16725_v60  ;;  %v13613_v7 = vadd.f32 %v13612_v5, %v22936_v49  ;;  %13923 = vmatpush1.bf16.msra.mxu0 %v19513_v57  ;;  %v19581_v57 = vld [vmem:[%s22566_s24 + $0xac4] ss:$8 sps:$4 sm:$0xff]   ;;  %v19579_v60 = vld [vmem:[%s22566_s24 + $0xac0] ss:$8 sps:$4 sm:$0xff]  }
 0x1d8   : > { %13966 = vmatpush1.bf16.msra.mxu1 %v19516_v0  ;;  %v13614_v8 = vpop.f32.mrf.mxu0  ;;  %13924 = vmatprep.subr.bf16.mxu0 %v19521_v3  ;;  %v19582_v0 = vld [vmem:[%s22566_s24 + $0xbc0] ss:$8 sps:$4 sm:$0xff]   ;;  %v19587_v3 = vld [vmem:[%s22566_s24 + $0xab4] ss:$8 sps:$4 sm:$0xff]  }
 0x1d9   : > { %v13657_v9 = vpop.f32.mrf.mxu1  ;;  %13967 = vmatprep.subr.bf16.mxu1 %v19524_v39  ;;  %v23033_v12 = vadd.f32 %v13655_v6, %v13613_v7  ;;  %v13615_v13 = vadd.f32 %v13614_v8, %v22940_v54  ;;  %13954 = vmatprep.mubr.bf16.mxu0 %v16728_v44  ;;  %v19533_v54 = vld [vmem:[%s22566_s24 + $0xa44] ss:$8 sps:$4 sm:$0xff]   ;;  %v19590_v39 = vld [vmem:[%s22566_s24 + $0xbb4] ss:$8 sps:$4 sm:$0xff]   ;;  %v19591_v5 = vld [vmem:[%s22566_s24 + $0xaa0] ss:$8 sps:$4 sm:$0xff]  }
 0x1da   : > { %13997 = vmatprep.mubr.bf16.mxu1 %v16730_v4  ;;  %v13616_v49 = vpop.f32.mrf.mxu0  ;;  %v19593_v44 = vld [vmem:[%s22566_s24 + $0xaa4] ss:$8 sps:$4 sm:$0xff]   ;;  %v19594_v6 = vld [vmem:[%s22566_s24 + $0xba0] ss:$8 sps:$4 sm:$0xff]   ;;  %v19599_v7 = vld [vmem:[%s22566_s24 + $0xa94] ss:$8 sps:$4 sm:$0xff]  }
 0x1db   : > { %v23038_v16 = vadd.f32 %v13657_v9, %v13615_v13  ;;  %v13617_v17 = vadd.f32 %v13616_v49, %v22944_v59  ;;  %13925 = vmatpush1.bf16.msra.mxu0 %v19519_v40  ;;  %v13659_v18 = vpop.f32.mrf.mxu1  ;;  %v19539_v59 = vld [vmem:[%s22566_s24 + $0xa34] ss:$8 sps:$4 sm:$0xff]   ;;  %v19585_v40 = vld [vmem:[%s22566_s24 + $0xab0] ss:$8 sps:$4 sm:$0xff]   ;;  %v19596_v4 = vld [vmem:[%s22566_s24 + $0xba4] ss:$8 sps:$4 sm:$0xff]  }
 0x1dc   : > { %13968 = vmatpush1.bf16.msra.mxu1 %v19522_v43  ;;  %13926 = vmatprep.subr.bf16.mxu0 %v19527_v10  ;;  %v19588_v43 = vld [vmem:[%s22566_s24 + $0xbb0] ss:$8 sps:$4 sm:$0xff]   ;;  %v19602_v8 = vld [vmem:[%s22566_s24 + $0xb94] ss:$8 sps:$4 sm:$0xff]   ;;  %v19608_v13 = vld [vmem:[%s22566_s24 + $0xb84] ss:$8 sps:$4 sm:$0xff]  }
 0x1dd   : > { %13969 = vmatprep.subr.bf16.mxu1 %v19530_v11  ;;  %v23043_v20 = vadd.f32 %v13659_v18, %v13617_v17  ;;  %v19597_v9 = vld [vmem:[%s22566_s24 + $0xa90] ss:$8 sps:$4 sm:$0xff]   ;;  %v19605_v11 = vld [vmem:[%s22566_s24 + $0xa84] ss:$8 sps:$4 sm:$0xff]   ;;  %v19611_v49 = vld [vmem:[%s22566_s24 + $0xc74] ss:$8 sps:$4 sm:$0xff]  }
 0x1de   : > { %v19600_v10 = vld [vmem:[%s22566_s24 + $0xb90] ss:$8 sps:$4 sm:$0xff]   ;;  %v19614_v17 = vld [vmem:[%s22566_s24 + $0xd74] ss:$8 sps:$4 sm:$0xff]   ;;  %v23098_v18 = vld [vmem:[%s22634_s29 + $0x60] sm:$0xff] }
 0x1df   : > { %13927 = vmatpush1.bf16.msra.mxu0 %v19525_v14  ;;  %v19603_v14 = vld [vmem:[%s22566_s24 + $0xa80] ss:$8 sps:$4 sm:$0xff]  }
 0x1e0   : > { %13970 = vmatpush1.bf16.msra.mxu1 %v19528_v15  ;;  %13928 = vmatprep.subr.bf16.mxu0 %v19533_v54  ;;  %v19606_v15 = vld [vmem:[%s22566_s24 + $0xb80] ss:$8 sps:$4 sm:$0xff]   ;;  %v19609_v54 = vld [vmem:[%s22566_s24 + $0xc70] ss:$8 sps:$4 sm:$0xff]  }
 0x1e1   : > { %13971 = vmatprep.subr.bf16.mxu1 %v19536_v19  ;;  %v16727_v19 = vcombine.low %v23001_v56, %v23009_v61  ;;  %v19620_v56 = vld [vmem:[%s22566_s24 + $0xd64] ss:$8 sps:$4 sm:$0xff]   ;;  %v19615_v61 = vld [vmem:[%s22566_s24 + $0xc60] ss:$8 sps:$4 sm:$0xff]  }
 0x1e3   : > { %13929 = vmatpush1.bf16.msra.mxu0 %v19531_v21  ;;  %v16729_v21 = vcombine.low %v23012_v62, %v23015_v63  ;;  %v19618_v62 = vld [vmem:[%s22566_s24 + $0xd60] ss:$8 sps:$4 sm:$0xff]  }
 0x1e4   : > { %13972 = vmatpush1.bf16.msra.mxu1 %v19534_v22  ;;  %13930 = vmatprep.subr.bf16.mxu0 %v19539_v59  ;;  %v23106_v22 = vld [vmem:[%s22634_s29 + $0x660] sm:$0xff]  ;;  %v23109_v59 = vld [vmem:[%s22634_s29 + $0x68] sm:$0xff] }
 0x1e5   : > { %13973 = vmatprep.subr.bf16.mxu1 %v19542_v23  ;;  %v23112_v23 = vld [vmem:[%s22634_s29 + $0x668] sm:$0xff]  ;;  %v16732_v63 = vcombine.high %v23098_v18, %v23106_v22 }
 0x1e7   : > { %13931 = vmatpush1.bf16.msra.mxu0 %v19537_v24  ;;  %v19612_v24 = vld [vmem:[%s22566_s24 + $0xd70] ss:$8 sps:$4 sm:$0xff]  }
 0x1e8   : > { %13974 = vmatpush1.bf16.msra.mxu1 %v19540_v29  ;;  %13932 = vmatprep.subr.bf16.mxu0 %v19545_v30  ;;  %v23115_v29 = vpop.f32.mrf.mxu0  ;;  %v23117_v30 = vpop.f32.mrf.mxu1 }
 0x1e9   : > { %13975 = vmatprep.subr.bf16.mxu1 %v19548_v33  ;;  %v19617_v33 = vld [vmem:[%s22566_s24 + $0xc64] ss:$8 sps:$4 sm:$0xff]  }
 0x1eb   : > { %13933 = vmatpush1.bf16.msra.mxu0 %v19543_v34  ;;  %v16734_v34 = vcombine.high %v23109_v59, %v23112_v23 }
 0x1ec   : > { %13976 = vmatpush1.bf16.msra.mxu1 %v19546_v37  ;;  %13934 = vmatprep.subr.bf16.mxu0 %v19551_v38 }
 0x1ed   : > { %13977 = vmatprep.subr.bf16.mxu1 %v19554_v25 }
 0x1ef   : > { %13935 = vmatpush1.bf16.msra.mxu0 %v19549_v26 }
 0x1f0   : > { %13978 = vmatpush1.bf16.msra.mxu1 %v19552_v27  ;;  %13936 = vmatprep.subr.bf16.mxu0 %v19557_v28  ;;  %v19623_v28 = vld [vmem:[%s22566_s24 + $0xc54] ss:$8 sps:$4 sm:$0xff]  }
 0x1f1   : > { %13979 = vmatprep.subr.bf16.mxu1 %v19560_v41  ;;  %v19626_v41 = vld [vmem:[%s22566_s24 + $0xd54] ss:$8 sps:$4 sm:$0xff]  }
 0x1f3   : > { %13937 = vmatpush1.bf16.msra.mxu0 %v19555_v42 }
 0x1f4   : > { %13980 = vmatpush1.bf16.msra.mxu1 %v19558_v45  ;;  %13938 = vmatprep.subr.bf16.mxu0 %v19563_v46  ;;  %v19621_v46 = vld [vmem:[%s22566_s24 + $0xc50] ss:$8 sps:$4 sm:$0xff]  }
 0x1f5   : > { %13981 = vmatprep.subr.bf16.mxu1 %v19566_v47  ;;  %v19624_v47 = vld [vmem:[%s22566_s24 + $0xd50] ss:$8 sps:$4 sm:$0xff]  }
 0x1f7   : > { %13939 = vmatpush2.bf16.msra.mxu0 %v19561_v31 }
 0x1f8   : > { %13982 = vmatpush2.bf16.msra.mxu1 %v19564_v32  ;;  %13940 = vmatprep.subr.bf16.mxu0 %v19569_v35 }
 0x1f9   : > { %13983 = vmatprep.subr.bf16.mxu1 %v19572_v36  ;;  %v19632_v36 = vld [vmem:[%s22566_s24 + $0xd44] ss:$8 sps:$4 sm:$0xff]  }
 0x1fb   : > { %13941 = vmatpush2.bf16.msra.mxu0 %v19567_v48 }
 0x1fc   : > { %13984 = vmatpush2.bf16.msra.mxu1 %v19570_v50  ;;  %13942 = vmatprep.subr.bf16.mxu0 %v19575_v51  ;;  %v19627_v50 = vld [vmem:[%s22566_s24 + $0xc40] ss:$8 sps:$4 sm:$0xff]  }
 0x1fd   : > { %13985 = vmatprep.subr.bf16.mxu1 %v19578_v52  ;;  %v19630_v51 = vld [vmem:[%s22566_s24 + $0xd40] ss:$8 sps:$4 sm:$0xff]   ;;  %v19638_v52 = vld [vmem:[%s22566_s24 + $0xd34] ss:$8 sps:$4 sm:$0xff]  }
 0x1ff   : > { %13943 = vmatpush2.bf16.msra.mxu0 %v19573_v53  ;;  %v19633_v53 = vld [vmem:[%s22566_s24 + $0xc30] ss:$8 sps:$4 sm:$0xff]  }
 0x200   : > { %13986 = vmatpush2.bf16.msra.mxu1 %v19576_v55  ;;  %13944 = vmatprep.subr.bf16.mxu0 %v19581_v57  ;;  %v19636_v55 = vld [vmem:[%s22566_s24 + $0xd30] ss:$8 sps:$4 sm:$0xff]   ;;  %v19641_v57 = vld [vmem:[%s22566_s24 + $0xc24] ss:$8 sps:$4 sm:$0xff]  }
 0x201   : > { %13987 = vmatprep.subr.bf16.mxu1 %v19584_v58  ;;  %v19644_v58 = vld [vmem:[%s22566_s24 + $0xd24] ss:$8 sps:$4 sm:$0xff]  }
 0x203   : > { %13945 = vmatpush2.bf16.msra.mxu0 %v19579_v60  ;;  %v19639_v60 = vld [vmem:[%s22566_s24 + $0xc20] ss:$8 sps:$4 sm:$0xff]  }
 0x204   : > { %13988 = vmatpush2.bf16.msra.mxu1 %v19582_v0  ;;  %13946 = vmatprep.subr.bf16.mxu0 %v19587_v3  ;;  %v19642_v0 = vld [vmem:[%s22566_s24 + $0xd20] ss:$8 sps:$4 sm:$0xff]   ;;  %v19647_v3 = vld [vmem:[%s22566_s24 + $0xc14] ss:$8 sps:$4 sm:$0xff]  }
 0x205   : > { %13989 = vmatprep.subr.bf16.mxu1 %v19590_v39  ;;  %v19650_v39 = vld [vmem:[%s22566_s24 + $0xd14] ss:$8 sps:$4 sm:$0xff]  }
 0x207   : > { %13947 = vmatpush2.bf16.msra.mxu0 %v19585_v40  ;;  %v19645_v40 = vld [vmem:[%s22566_s24 + $0xc10] ss:$8 sps:$4 sm:$0xff]  }
 0x208   : > { %13990 = vmatpush2.bf16.msra.mxu1 %v19588_v43  ;;  %13948 = vmatprep.subr.bf16.mxu0 %v19593_v44  ;;  %v19648_v43 = vld [vmem:[%s22566_s24 + $0xd10] ss:$8 sps:$4 sm:$0xff]   ;;  %v19653_v44 = vld [vmem:[%s22566_s24 + $0xc04] ss:$8 sps:$4 sm:$0xff]  }
 0x209   : > { %13991 = vmatprep.subr.bf16.mxu1 %v19596_v4  ;;  %v19656_v4 = vld [vmem:[%s22566_s24 + $0xd04] ss:$8 sps:$4 sm:$0xff]  }
 0x20b   : > { %13949 = vmatpush2.bf16.msra.mxu0 %v19591_v5  ;;  %v19651_v5 = vld [vmem:[%s22566_s24 + $0xc00] ss:$8 sps:$4 sm:$0xff]  }
 0x20c   : > { %13992 = vmatpush2.bf16.msra.mxu1 %v19594_v6  ;;  %13950 = vmatprep.subr.bf16.mxu0 %v19599_v7  ;;  %v19654_v6 = vld [vmem:[%s22566_s24 + $0xd00] ss:$8 sps:$4 sm:$0xff]   ;;  %v19659_v7 = vld [vmem:[%s22566_s24 + $0xcf4] ss:$8 sps:$4 sm:$0xff]  }
 0x20d   : > { %13993 = vmatprep.subr.bf16.mxu1 %v19602_v8  ;;  %v19662_v8 = vld [vmem:[%s22566_s24 + $0xdf4] ss:$8 sps:$4 sm:$0xff]  }
 0x20f   : > { %13951 = vmatpush2.bf16.msra.mxu0 %v19597_v9  ;;  %v19657_v9 = vld [vmem:[%s22566_s24 + $0xcf0] ss:$8 sps:$4 sm:$0xff]  }
 0x210   : > { %13994 = vmatpush2.bf16.msra.mxu1 %v19600_v10  ;;  %13952 = vmatprep.subr.bf16.mxu0 %v19605_v11  ;;  %v19660_v10 = vld [vmem:[%s22566_s24 + $0xdf0] ss:$8 sps:$4 sm:$0xff]   ;;  %v19665_v11 = vld [vmem:[%s22566_s24 + $0xce4] ss:$8 sps:$4 sm:$0xff]  }
 0x211   : > { %13995 = vmatprep.subr.bf16.mxu1 %v19608_v13  ;;  %v19668_v13 = vld [vmem:[%s22566_s24 + $0xde4] ss:$8 sps:$4 sm:$0xff]  }
 0x213   : > { %13953 = vmatpush2.bf16.msra.mxu0 %v19603_v14  ;;  %v19663_v14 = vld [vmem:[%s22566_s24 + $0xce0] ss:$8 sps:$4 sm:$0xff]  }
 0x214   : > { %13996 = vmatpush2.bf16.msra.mxu1 %v19606_v15  ;;  %14008 = vmatprep.subr.bf16.mxu0 %v19611_v49  ;;  %v19666_v15 = vld [vmem:[%s22566_s24 + $0xde0] ss:$8 sps:$4 sm:$0xff]   ;;  %v19671_v49 = vld [vmem:[%s22566_s24 + $0xcd4] ss:$8 sps:$4 sm:$0xff]  }
 0x215   : > { %14051 = vmatprep.subr.bf16.mxu1 %v19614_v17  ;;  %v19674_v17 = vld [vmem:[%s22566_s24 + $0xdd4] ss:$8 sps:$4 sm:$0xff]  }
 0x216   : > { %v13698_v37 = vpop.f32.mrf.mxu0  ;;  %13955 = vmatmul.mubr.bf16.vlgmr.msra.gmra.mxu0 %v16727_v19  ;;  %v19672_v19 = vld [vmem:[%s22566_s24 + $0xdd0] ss:$8 sps:$4 sm:$0xff]  }
 0x217   : > { %v13741_v38 = vpop.f32.mrf.mxu1  ;;  %13998 = vmatmul.mubr.bf16.vlgmr.msra.gmra.mxu1 %v16729_v21  ;;  %v13699_v25 = vadd.f32 %v13698_v37, %v23033_v12  ;;  %14009 = vmatpush1.bf16.msra.mxu0 %v19609_v54  ;;  %v19669_v54 = vld [vmem:[%s22566_s24 + $0xcd0] ss:$8 sps:$4 sm:$0xff]   ;;  %v19677_v21 = vld [vmem:[%s22566_s24 + $0xcc4] ss:$8 sps:$4 sm:$0xff]  }
 0x218   : > { %14052 = vmatpush1.bf16.msra.mxu1 %v19612_v24  ;;  %v13700_v26 = vpop.f32.mrf.mxu0  ;;  %14010 = vmatprep.subr.bf16.mxu0 %v19617_v33  ;;  %v19680_v24 = vld [vmem:[%s22566_s24 + $0xdc4] ss:$8 sps:$4 sm:$0xff]   ;;  %v19675_v33 = vld [vmem:[%s22566_s24 + $0xcc0] ss:$8 sps:$4 sm:$0xff]  }
 0x219   : > { %v13743_v27 = vpop.f32.mrf.mxu1  ;;  %14053 = vmatprep.subr.bf16.mxu1 %v19620_v56  ;;  %v23130_v42 = vadd.f32 %v13741_v38, %v13699_v25  ;;  %v13701_v45 = vadd.f32 %v13700_v26, %v23038_v16  ;;  %14040 = vmatprep.mubr.bf16.mxu0 %v16732_v63  ;;  %v19629_v16 = vld [vmem:[%s22566_s24 + $0xc44] ss:$8 sps:$4 sm:$0xff]   ;;  %v19678_v56 = vld [vmem:[%s22566_s24 + $0xdc0] ss:$8 sps:$4 sm:$0xff]   ;;  %v19681_v63 = vld [vmem:[%s22566_s24 + $0xcb0] ss:$8 sps:$4 sm:$0xff]  }
 0x21a   : > { %14083 = vmatprep.mubr.bf16.mxu1 %v16734_v34  ;;  %v13702_v12 = vpop.f32.mrf.mxu0  ;;  %v19684_v34 = vld [vmem:[%s22566_s24 + $0xdb0] ss:$8 sps:$4 sm:$0xff]   ;;  %v19689_v37 = vld [vmem:[%s22566_s24 + $0xca4] ss:$8 sps:$4 sm:$0xff]   ;;  %v19687_v25 = vld [vmem:[%s22566_s24 + $0xca0] ss:$8 sps:$4 sm:$0xff]  }
 0x21b   : > { %v23135_v31 = vadd.f32 %v13743_v27, %v13701_v45  ;;  %v13703_v32 = vadd.f32 %v13702_v12, %v23043_v20  ;;  %14011 = vmatpush1.bf16.msra.mxu0 %v19615_v61  ;;  %v13745_v35 = vpop.f32.mrf.mxu1  ;;  %v19635_v20 = vld [vmem:[%s22566_s24 + $0xc34] ss:$8 sps:$4 sm:$0xff]   ;;  %v19692_v38 = vld [vmem:[%s22566_s24 + $0xda4] ss:$8 sps:$4 sm:$0xff]   ;;  %v19690_v26 = vld [vmem:[%s22566_s24 + $0xda0] ss:$8 sps:$4 sm:$0xff]  }
 0x21c   : > { %14054 = vmatpush1.bf16.msra.mxu1 %v19618_v62  ;;  %14012 = vmatprep.subr.bf16.mxu0 %v19623_v28  ;;  %v19683_v61 = vld [vmem:[%s22566_s24 + $0xcb4] ss:$8 sps:$4 sm:$0xff]   ;;  %v19696_v45 = vld [vmem:[%s22566_s24 + $0xd90] ss:$8 sps:$4 sm:$0xff]   ;;  %v19699_v12 = vld [vmem:[%s22566_s24 + $0xc80] ss:$8 sps:$4 sm:$0xff]  }
 0x21d   : > { %14055 = vmatprep.subr.bf16.mxu1 %v19626_v41  ;;  %v23140_v48 = vadd.f32 %v13745_v35, %v13703_v32  ;;  %v19686_v62 = vld [vmem:[%s22566_s24 + $0xdb4] ss:$8 sps:$4 sm:$0xff]   ;;  %v19693_v41 = vld [vmem:[%s22566_s24 + $0xc90] ss:$8 sps:$4 sm:$0xff]   ;;  %v19702_v32 = vld [vmem:[%s22566_s24 + $0xd80] ss:$8 sps:$4 sm:$0xff]  }
 0x21e   : > { %v19695_v27 = vld [vmem:[%s22566_s24 + $0xc94] ss:$8 sps:$4 sm:$0xff]  }
 0x21f   : > { %14013 = vmatpush1.bf16.msra.mxu0 %v19621_v46  ;;  %v19698_v28 = vld [vmem:[%s22566_s24 + $0xd94] ss:$8 sps:$4 sm:$0xff]   ;;  %v19701_v46 = vld [vmem:[%s22566_s24 + $0xc84] ss:$8 sps:$4 sm:$0xff]  }
 0x220   : > { %14056 = vmatpush1.bf16.msra.mxu1 %v19624_v47  ;;  %14014 = vmatprep.subr.bf16.mxu0 %v19629_v16  ;;  %v19704_v47 = vld [vmem:[%s22566_s24 + $0xd84] ss:$8 sps:$4 sm:$0xff]   ;;  %v19707_v35 = vld [vmem:[%s22566_s24 + $0xe74] ss:$8 sps:$4 sm:$0xff]  }
 0x221   : > { %14057 = vmatprep.subr.bf16.mxu1 %v19632_v36  ;;  %v19710_v16 = vld [vmem:[%s22566_s24 + $0xf74] ss:$8 sps:$4 sm:$0xff]  }
 0x222   : > { %v23195_v36 = vld [vmem:[%s22634_s29 + $0x70] sm:$0xff] }
 0x223   : > { %14015 = vmatpush1.bf16.msra.mxu0 %v19627_v50  ;;  %v19705_v50 = vld [vmem:[%s22566_s24 + $0xe70] ss:$8 sps:$4 sm:$0xff]  }
 0x224   : > { %14058 = vmatpush1.bf16.msra.mxu1 %v19630_v51  ;;  %14016 = vmatprep.subr.bf16.mxu0 %v19635_v20  ;;  %v16731_v51 = vcombine.low %v23098_v18, %v23106_v22  ;;  %v16733_v20 = vcombine.low %v23109_v59, %v23112_v23  ;;  %v19716_v18 = vld [vmem:[%s22566_s24 + $0xf64] ss:$8 sps:$4 sm:$0xff]   ;;  %v19711_v22 = vld [vmem:[%s22566_s24 + $0xe60] ss:$8 sps:$4 sm:$0xff]  }
 0x225   : > { %14059 = vmatprep.subr.bf16.mxu1 %v19638_v52  ;;  %v23203_v52 = vld [vmem:[%s22634_s29 + $0x670] sm:$0xff]  ;;  %v19714_v59 = vld [vmem:[%s22566_s24 + $0xf60] ss:$8 sps:$4 sm:$0xff]  }
 0x226   : > { %v16736_v23 = vcombine.high %v23195_v36, %v23203_v52 }
 0x227   : > { %14017 = vmatpush1.bf16.msra.mxu0 %v19633_v53  ;;  %v23206_v53 = vld [vmem:[%s22634_s29 + $0x78] sm:$0xff] }
 0x228   : > { %14060 = vmatpush1.bf16.msra.mxu1 %v19636_v55  ;;  %14018 = vmatprep.subr.bf16.mxu0 %v19641_v57  ;;  %v23209_v55 = vld [vmem:[%s22634_s29 + $0x678] sm:$0xff] }
 0x229   : > { %14061 = vmatprep.subr.bf16.mxu1 %v19644_v58  ;;  %v19708_v57 = vld [vmem:[%s22566_s24 + $0xf70] ss:$8 sps:$4 sm:$0xff]   ;;  %v23212_v58 = vpop.f32.mrf.mxu0 }
 0x22b   : > { %14019 = vmatpush1.bf16.msra.mxu0 %v19639_v60  ;;  %v23214_v60 = vpop.f32.mrf.mxu1 }
 0x22c   : > { %14062 = vmatpush1.bf16.msra.mxu1 %v19642_v0  ;;  %14020 = vmatprep.subr.bf16.mxu0 %v19647_v3  ;;  %v19713_v0 = vld [vmem:[%s22566_s24 + $0xe64] ss:$8 sps:$4 sm:$0xff]   ;;  %v16738_v3 = vcombine.high %v23206_v53, %v23209_v55 }
 0x22d   : > { %14063 = vmatprep.subr.bf16.mxu1 %v19650_v39 }
 0x22f   : > { %14021 = vmatpush1.bf16.msra.mxu0 %v19645_v40 }
 0x230   : > { %14064 = vmatpush1.bf16.msra.mxu1 %v19648_v43  ;;  %14022 = vmatprep.subr.bf16.mxu0 %v19653_v44 }
 0x231   : > { %14065 = vmatprep.subr.bf16.mxu1 %v19656_v4 }
 0x233   : > { %14023 = vmatpush1.bf16.msra.mxu0 %v19651_v5  ;;  %v19719_v5 = vld [vmem:[%s22566_s24 + $0xe54] ss:$8 sps:$4 sm:$0xff]  }
 0x234   : > { %14066 = vmatpush1.bf16.msra.mxu1 %v19654_v6  ;;  %14024 = vmatprep.subr.bf16.mxu0 %v19659_v7  ;;  %v19722_v6 = vld [vmem:[%s22566_s24 + $0xf54] ss:$8 sps:$4 sm:$0xff]  }
 0x235   : > { %14067 = vmatprep.subr.bf16.mxu1 %v19662_v8 }
 0x237   : > { %14025 = vmatpush2.bf16.msra.mxu0 %v19657_v9  ;;  %v19717_v9 = vld [vmem:[%s22566_s24 + $0xe50] ss:$8 sps:$4 sm:$0xff]  }
 0x238   : > { %14068 = vmatpush2.bf16.msra.mxu1 %v19660_v10  ;;  %14026 = vmatprep.subr.bf16.mxu0 %v19665_v11  ;;  %v19720_v10 = vld [vmem:[%s22566_s24 + $0xf50] ss:$8 sps:$4 sm:$0xff]  }
 0x239   : > { %14069 = vmatprep.subr.bf16.mxu1 %v19668_v13 }
 0x23b   : > { %14027 = vmatpush2.bf16.msra.mxu0 %v19663_v14 }
 0x23c   : > { %14070 = vmatpush2.bf16.msra.mxu1 %v19666_v15  ;;  %14028 = vmatprep.subr.bf16.mxu0 %v19671_v49  ;;  %v19728_v15 = vld [vmem:[%s22566_s24 + $0xf44] ss:$8 sps:$4 sm:$0xff]  }
 0x23d   : > { %14071 = vmatprep.subr.bf16.mxu1 %v19674_v17  ;;  %v19723_v17 = vld [vmem:[%s22566_s24 + $0xe40] ss:$8 sps:$4 sm:$0xff]  }
 0x23f   : > { %14029 = vmatpush2.bf16.msra.mxu0 %v19669_v54  ;;  %v19726_v54 = vld [vmem:[%s22566_s24 + $0xf40] ss:$8 sps:$4 sm:$0xff]  }
 0x240   : > { %14072 = vmatpush2.bf16.msra.mxu1 %v19672_v19  ;;  %14030 = vmatprep.subr.bf16.mxu0 %v19677_v21  ;;  %v19734_v19 = vld [vmem:[%s22566_s24 + $0xf34] ss:$8 sps:$4 sm:$0xff]   ;;  %v19729_v21 = vld [vmem:[%s22566_s24 + $0xe30] ss:$8 sps:$4 sm:$0xff]  }
 0x241   : > { %14073 = vmatprep.subr.bf16.mxu1 %v19680_v24  ;;  %v19732_v24 = vld [vmem:[%s22566_s24 + $0xf30] ss:$8 sps:$4 sm:$0xff]  }
 0x243   : > { %14031 = vmatpush2.bf16.msra.mxu0 %v19675_v33  ;;  %v19737_v33 = vld [vmem:[%s22566_s24 + $0xe24] ss:$8 sps:$4 sm:$0xff]  }
 0x244   : > { %14074 = vmatpush2.bf16.msra.mxu1 %v19678_v56  ;;  %14032 = vmatprep.subr.bf16.mxu0 %v19683_v61  ;;  %v19740_v56 = vld [vmem:[%s22566_s24 + $0xf24] ss:$8 sps:$4 sm:$0xff]   ;;  %v19735_v61 = vld [vmem:[%s22566_s24 + $0xe20] ss:$8 sps:$4 sm:$0xff]  }
 0x245   : > { %14075 = vmatprep.subr.bf16.mxu1 %v19686_v62  ;;  %v19738_v62 = vld [vmem:[%s22566_s24 + $0xf20] ss:$8 sps:$4 sm:$0xff]  }
 0x247   : > { %14033 = vmatpush2.bf16.msra.mxu0 %v19681_v63  ;;  %v19743_v63 = vld [vmem:[%s22566_s24 + $0xe14] ss:$8 sps:$4 sm:$0xff]  }
 0x248   : > { %14076 = vmatpush2.bf16.msra.mxu1 %v19684_v34  ;;  %14034 = vmatprep.subr.bf16.mxu0 %v19689_v37  ;;  %v19746_v34 = vld [vmem:[%s22566_s24 + $0xf14] ss:$8 sps:$4 sm:$0xff]   ;;  %v19741_v37 = vld [vmem:[%s22566_s24 + $0xe10] ss:$8 sps:$4 sm:$0xff]  }
 0x249   : > { %14077 = vmatprep.subr.bf16.mxu1 %v19692_v38  ;;  %v19744_v38 = vld [vmem:[%s22566_s24 + $0xf10] ss:$8 sps:$4 sm:$0xff]  }
 0x24b   : > { %14035 = vmatpush2.bf16.msra.mxu0 %v19687_v25  ;;  %v19749_v25 = vld [vmem:[%s22566_s24 + $0xe04] ss:$8 sps:$4 sm:$0xff]  }
 0x24c   : > { %14078 = vmatpush2.bf16.msra.mxu1 %v19690_v26  ;;  %14036 = vmatprep.subr.bf16.mxu0 %v19695_v27  ;;  %v19752_v26 = vld [vmem:[%s22566_s24 + $0xf04] ss:$8 sps:$4 sm:$0xff]   ;;  %v19747_v27 = vld [vmem:[%s22566_s24 + $0xe00] ss:$8 sps:$4 sm:$0xff]  }
 0x24d   : > { %14079 = vmatprep.subr.bf16.mxu1 %v19698_v28  ;;  %v19750_v28 = vld [vmem:[%s22566_s24 + $0xf00] ss:$8 sps:$4 sm:$0xff]  }
 0x24f   : > { %14037 = vmatpush2.bf16.msra.mxu0 %v19693_v41  ;;  %v19755_v41 = vld [vmem:[%s22566_s24 + $0xef4] ss:$8 sps:$4 sm:$0xff]  }
 0x250   : > { %14080 = vmatpush2.bf16.msra.mxu1 %v19696_v45  ;;  %14038 = vmatprep.subr.bf16.mxu0 %v19701_v46  ;;  %v19758_v45 = vld [vmem:[%s22566_s24 + $0xff4] ss:$8 sps:$4 sm:$0xff]   ;;  %v19753_v46 = vld [vmem:[%s22566_s24 + $0xef0] ss:$8 sps:$4 sm:$0xff]  }
 0x251   : > { %14081 = vmatprep.subr.bf16.mxu1 %v19704_v47  ;;  %v19756_v47 = vld [vmem:[%s22566_s24 + $0xff0] ss:$8 sps:$4 sm:$0xff]  }
 0x253   : > { %14039 = vmatpush2.bf16.msra.mxu0 %v19699_v12  ;;  %v19761_v12 = vld [vmem:[%s22566_s24 + $0xee4] ss:$8 sps:$4 sm:$0xff]  }
 0x254   : > { %14082 = vmatpush2.bf16.msra.mxu1 %v19702_v32  ;;  %14094 = vmatprep.subr.bf16.mxu0 %v19707_v35  ;;  %v19764_v32 = vld [vmem:[%s22566_s24 + $0xfe4] ss:$8 sps:$4 sm:$0xff]   ;;  %v19759_v35 = vld [vmem:[%s22566_s24 + $0xee0] ss:$8 sps:$4 sm:$0xff]  }
 0x255   : > { %14137 = vmatprep.subr.bf16.mxu1 %v19710_v16  ;;  %v19762_v16 = vld [vmem:[%s22566_s24 + $0xfe0] ss:$8 sps:$4 sm:$0xff]  }
 0x256   : > { %v13784_v39 = vpop.f32.mrf.mxu0  ;;  %14041 = vmatmul.mubr.bf16.vlgmr.msra.gmra.mxu0 %v16731_v51  ;;  %v19770_v51 = vld [vmem:[%s22566_s24 + $0xfd4] ss:$8 sps:$4 sm:$0xff]  }
 0x257   : > { %v13827_v40 = vpop.f32.mrf.mxu1  ;;  %14084 = vmatmul.mubr.bf16.vlgmr.msra.gmra.mxu1 %v16733_v20  ;;  %v13785_v43 = vadd.f32 %v13784_v39, %v23130_v42  ;;  %14095 = vmatpush1.bf16.msra.mxu0 %v19705_v50  ;;  %v19767_v50 = vld [vmem:[%s22566_s24 + $0xed4] ss:$8 sps:$4 sm:$0xff]   ;;  %v19765_v20 = vld [vmem:[%s22566_s24 + $0xed0] ss:$8 sps:$4 sm:$0xff]  }
 0x258   : > { %14138 = vmatpush1.bf16.msra.mxu1 %v19708_v57  ;;  %v13786_v44 = vpop.f32.mrf.mxu0  ;;  %14096 = vmatprep.subr.bf16.mxu0 %v19713_v0  ;;  %v19768_v57 = vld [vmem:[%s22566_s24 + $0xfd0] ss:$8 sps:$4 sm:$0xff]   ;;  %v19773_v0 = vld [vmem:[%s22566_s24 + $0xec4] ss:$8 sps:$4 sm:$0xff]  }
 0x259   : > { %v13829_v4 = vpop.f32.mrf.mxu1  ;;  %14139 = vmatprep.subr.bf16.mxu1 %v19716_v18  ;;  %v23227_v7 = vadd.f32 %v13827_v40, %v13785_v43  ;;  %v13787_v8 = vadd.f32 %v13786_v44, %v23135_v31  ;;  %14126 = vmatprep.mubr.bf16.mxu0 %v16736_v23  ;;  %v19725_v31 = vld [vmem:[%s22566_s24 + $0xe44] ss:$8 sps:$4 sm:$0xff]   ;;  %v19779_v23 = vld [vmem:[%s22566_s24 + $0xeb4] ss:$8 sps:$4 sm:$0xff]   ;;  %v19777_v39 = vld [vmem:[%s22566_s24 + $0xeb0] ss:$8 sps:$4 sm:$0xff]  }
 0x25a   : > { %14169 = vmatprep.mubr.bf16.mxu1 %v16738_v3  ;;  %v13788_v42 = vpop.f32.mrf.mxu0  ;;  %v19776_v18 = vld [vmem:[%s22566_s24 + $0xfc4] ss:$8 sps:$4 sm:$0xff]   ;;  %v19782_v3 = vld [vmem:[%s22566_s24 + $0xfb4] ss:$8 sps:$4 sm:$0xff]   ;;  %v19780_v40 = vld [vmem:[%s22566_s24 + $0xfb0] ss:$8 sps:$4 sm:$0xff]  }
 0x25b   : > { %v23232_v11 = vadd.f32 %v13829_v4, %v13787_v8  ;;  %v13789_v13 = vadd.f32 %v13788_v42, %v23140_v48  ;;  %14097 = vmatpush1.bf16.msra.mxu0 %v19711_v22  ;;  %v13831_v14 = vpop.f32.mrf.mxu1  ;;  %v19731_v48 = vld [vmem:[%s22566_s24 + $0xe34] ss:$8 sps:$4 sm:$0xff]   ;;  %v19771_v22 = vld [vmem:[%s22566_s24 + $0xec0] ss:$8 sps:$4 sm:$0xff]   ;;  %v19785_v43 = vld [vmem:[%s22566_s24 + $0xea4] ss:$8 sps:$4 sm:$0xff]  }
 0x25c   : > { %14140 = vmatpush1.bf16.msra.mxu1 %v19714_v59  ;;  %14098 = vmatprep.subr.bf16.mxu0 %v19719_v5  ;;  %v19774_v59 = vld [vmem:[%s22566_s24 + $0xfc0] ss:$8 sps:$4 sm:$0xff]   ;;  %v19788_v44 = vld [vmem:[%s22566_s24 + $0xfa4] ss:$8 sps:$4 sm:$0xff]   ;;  %v19794_v8 = vld [vmem:[%s22566_s24 + $0xf94] ss:$8 sps:$4 sm:$0xff]  }
 0x25d   : > { %14141 = vmatprep.subr.bf16.mxu1 %v19722_v6  ;;  %v23237_v49 = vadd.f32 %v13831_v14, %v13789_v13  ;;  %v19783_v4 = vld [vmem:[%s22566_s24 + $0xea0] ss:$8 sps:$4 sm:$0xff]   ;;  %v19791_v6 = vld [vmem:[%s22566_s24 + $0xe94] ss:$8 sps:$4 sm:$0xff]   ;;  %v19789_v42 = vld [vmem:[%s22566_s24 + $0xe90] ss:$8 sps:$4 sm:$0xff]  }
 0x25e   : > { %v19786_v5 = vld [vmem:[%s22566_s24 + $0xfa0] ss:$8 sps:$4 sm:$0xff]   ;;  %v19792_v13 = vld [vmem:[%s22566_s24 + $0xf90] ss:$8 sps:$4 sm:$0xff]   ;;  %v19797_v14 = vld [vmem:[%s22566_s24 + $0xe84] ss:$8 sps:$4 sm:$0xff]  }
 0x25f   : > { %14099 = vmatpush1.bf16.msra.mxu0 %v19717_v9  ;;  %v13576_v9 = vadd.f32 %v23020_v2, %v23018_v1  ;;  %v19798_v1 = vld [vmem:[%s22566_s24 + $0xf80] ss:$8 sps:$4 sm:$0xff]   ;;  %v19803_v2 = vld [vmem:[%s22566_s24 + $0x1074] ss:$8 sps:$4 sm:$0xff]  }
 0x260   : > { %14142 = vmatpush1.bf16.msra.mxu1 %v19720_v10  ;;  %14100 = vmatprep.subr.bf16.mxu0 %v19725_v31  ;;  %v19800_v31 = vld [vmem:[%s22566_s24 + $0xf84] ss:$8 sps:$4 sm:$0xff]  }
 0x261   : > { %14143 = vmatprep.subr.bf16.mxu1 %v19728_v15  ;;  %v13619_v10 = vadd.f32 %v23115_v29, %v13576_v9  ;;  %v19795_v15 = vld [vmem:[%s22566_s24 + $0xe80] ss:$8 sps:$4 sm:$0xff]   ;;  %v19806_v29 = vld [vmem:[%s22566_s24 + $0x1174] ss:$8 sps:$4 sm:$0xff]  }
 0x262   : > { %v19842_v9 = vld [vmem:[%s22566_s24 + $0x1114] ss:$8 sps:$4 sm:$0xff]  }
 0x263   : > { %14101 = vmatpush1.bf16.msra.mxu0 %v19723_v17  ;;  %v13662_v17 = vadd.f32 %v23117_v30, %v13619_v10  ;;  %v16737_v30 = vcombine.low %v23206_v53, %v23209_v55  ;;  %v19810_v53 = vld [vmem:[%s22566_s24 + $0x1160] ss:$8 sps:$4 sm:$0xff]   ;;  %v19837_v10 = vld [vmem:[%s22566_s24 + $0x1010] ss:$8 sps:$4 sm:$0xff]  }
 0x264   : > { %14144 = vmatpush1.bf16.msra.mxu1 %v19726_v54  ;;  %14102 = vmatprep.subr.bf16.mxu0 %v19731_v48  ;;  %v23296_v54 = vld [vmem:[%s22634_s29 + $0x80] sm:$0xff] }
 0x265   : > { %14145 = vmatprep.subr.bf16.mxu1 %v19734_v19  ;;  %v13705_v48 = vadd.f32 %v23212_v58, %v13662_v17  ;;  %v19801_v19 = vld [vmem:[%s22566_s24 + $0x1070] ss:$8 sps:$4 sm:$0xff]   ;;  %v13833_v58 = vpop.f32.mrf.mxu1  ;;  %v19851_v17 = vld [vmem:[%s22566_s24 + $0x10f4] ss:$8 sps:$4 sm:$0xff]  }
 0x267   : > { %14103 = vmatpush1.bf16.msra.mxu0 %v19729_v21  ;;  %v16735_v21 = vcombine.low %v23195_v36, %v23203_v52  ;;  %v13748_v36 = vadd.f32 %v23214_v60, %v13705_v48  ;;  %v19807_v52 = vld [vmem:[%s22566_s24 + $0x1060] ss:$8 sps:$4 sm:$0xff]   ;;  %v19857_v48 = vld [vmem:[%s22566_s24 + $0x10e4] ss:$8 sps:$4 sm:$0xff]  }
 0x268   : > { %14146 = vmatpush1.bf16.msra.mxu1 %v19732_v24  ;;  %14104 = vmatprep.subr.bf16.mxu0 %v19737_v33  ;;  %v23305_v24 = vld [vmem:[%s22634_s29 + $0x680] sm:$0xff]  ;;  %v23308_v33 = vld [vmem:[%s22634_s29 + $0x88] sm:$0xff] }
 0x269   : > { %14147 = vmatprep.subr.bf16.mxu1 %v19740_v56  ;;  %v23311_v56 = vld [vmem:[%s22634_s29 + $0x688] sm:$0xff]  ;;  %v16740_v55 = vcombine.high %v23296_v54, %v23305_v24 }
 0x26b   : > { %14105 = vmatpush1.bf16.msra.mxu0 %v19735_v61  ;;  %v19804_v61 = vld [vmem:[%s22566_s24 + $0x1170] ss:$8 sps:$4 sm:$0xff]  }
 0x26c   : > { %14148 = vmatpush1.bf16.msra.mxu1 %v19738_v62  ;;  %14106 = vmatprep.subr.bf16.mxu0 %v19743_v63  ;;  %v13790_v62 = vpop.f32.mrf.mxu0  ;;  %v19809_v63 = vld [vmem:[%s22566_s24 + $0x1064] ss:$8 sps:$4 sm:$0xff]  }
 0x26d   : > { %14149 = vmatprep.subr.bf16.mxu1 %v19746_v34  ;;  %v19812_v34 = vld [vmem:[%s22566_s24 + $0x1164] ss:$8 sps:$4 sm:$0xff]  }
 0x26f   : > { %14107 = vmatpush1.bf16.msra.mxu0 %v19741_v37  ;;  %v16742_v37 = vcombine.high %v23308_v33, %v23311_v56 }
 0x270   : > { %14150 = vmatpush1.bf16.msra.mxu1 %v19744_v38  ;;  %14108 = vmatprep.subr.bf16.mxu0 %v19749_v25 }
 0x271   : > { %14151 = vmatprep.subr.bf16.mxu1 %v19752_v26  ;;  %v13791_v26 = vadd.f32 %v13790_v62, %v13748_v36  ;;  %v19866_v62 = vld [vmem:[%s22566_s24 + $0x11d4] ss:$8 sps:$4 sm:$0xff]   ;;  %v19872_v36 = vld [vmem:[%s22566_s24 + $0x11c4] ss:$8 sps:$4 sm:$0xff]  }
 0x273   : > { %14109 = vmatpush1.bf16.msra.mxu0 %v19747_v27 }
 0x274   : > { %14152 = vmatpush1.bf16.msra.mxu1 %v19750_v28  ;;  %14110 = vmatprep.subr.bf16.mxu0 %v19755_v41  ;;  %v19815_v41 = vld [vmem:[%s22566_s24 + $0x1054] ss:$8 sps:$4 sm:$0xff]  }
 0x275   : > { %14153 = vmatprep.subr.bf16.mxu1 %v19758_v45  ;;  %v19818_v45 = vld [vmem:[%s22566_s24 + $0x1154] ss:$8 sps:$4 sm:$0xff]  }
 0x277   : > { %14111 = vmatpush2.bf16.msra.mxu0 %v19753_v46 }
 0x278   : > { %14154 = vmatpush2.bf16.msra.mxu1 %v19756_v47  ;;  %14112 = vmatprep.subr.bf16.mxu0 %v19761_v12  ;;  %v19813_v12 = vld [vmem:[%s22566_s24 + $0x1050] ss:$8 sps:$4 sm:$0xff]  }
 0x279   : > { %14155 = vmatprep.subr.bf16.mxu1 %v19764_v32  ;;  %v19816_v32 = vld [vmem:[%s22566_s24 + $0x1150] ss:$8 sps:$4 sm:$0xff]  }
 0x27b   : > { %14113 = vmatpush2.bf16.msra.mxu0 %v19759_v35 }
 0x27c   : > { %14156 = vmatpush2.bf16.msra.mxu1 %v19762_v16  ;;  %14114 = vmatprep.subr.bf16.mxu0 %v19767_v50  ;;  %v13834_v16 = vadd.f32 %v13833_v58, %v13791_v26  ;;  %v19861_v58 = vld [vmem:[%s22566_s24 + $0x10d0] ss:$8 sps:$4 sm:$0xff]   ;;  %v19881_v26 = vld [vmem:[%s22566_s24 + $0x10a4] ss:$8 sps:$4 sm:$0xff]  }
 0x27d   : > { %14157 = vmatprep.subr.bf16.mxu1 %v19770_v51 }
 0x27f   : > { %14115 = vmatpush2.bf16.msra.mxu0 %v19765_v20 }
 0x280   : > { %14158 = vmatpush2.bf16.msra.mxu1 %v19768_v57  ;;  %14116 = vmatprep.subr.bf16.mxu0 %v19773_v0  ;;  %v19824_v57 = vld [vmem:[%s22566_s24 + $0x1144] ss:$8 sps:$4 sm:$0xff]  }
 0x281   : > { %14159 = vmatprep.subr.bf16.mxu1 %v19776_v18 }
 0x283   : > { %14117 = vmatpush2.bf16.msra.mxu0 %v19771_v22 }
 0x284   : > { %14160 = vmatpush2.bf16.msra.mxu1 %v19774_v59  ;;  %14118 = vmatprep.subr.bf16.mxu0 %v19779_v23  ;;  %v19822_v23 = vld [vmem:[%s22566_s24 + $0x1140] ss:$8 sps:$4 sm:$0xff]  }
 0x285   : > { %14161 = vmatprep.subr.bf16.mxu1 %v19782_v3  ;;  %v19827_v3 = vld [vmem:[%s22566_s24 + $0x1034] ss:$8 sps:$4 sm:$0xff]  }
 0x287   : > { %14119 = vmatpush2.bf16.msra.mxu0 %v19777_v39  ;;  %v19830_v39 = vld [vmem:[%s22566_s24 + $0x1134] ss:$8 sps:$4 sm:$0xff]  }
 0x288   : > { %14162 = vmatpush2.bf16.msra.mxu1 %v19780_v40  ;;  %14120 = vmatprep.subr.bf16.mxu0 %v19785_v43  ;;  %v19825_v40 = vld [vmem:[%s22566_s24 + $0x1030] ss:$8 sps:$4 sm:$0xff]  }
 0x289   : > { %14163 = vmatprep.subr.bf16.mxu1 %v19788_v44  ;;  %v19828_v43 = vld [vmem:[%s22566_s24 + $0x1130] ss:$8 sps:$4 sm:$0xff]   ;;  %v19833_v44 = vld [vmem:[%s22566_s24 + $0x1024] ss:$8 sps:$4 sm:$0xff]  }
 0x28b   : > { %14121 = vmatpush2.bf16.msra.mxu0 %v19783_v4  ;;  %v19836_v4 = vld [vmem:[%s22566_s24 + $0x1124] ss:$8 sps:$4 sm:$0xff]  }
 0x28c   : > { %14164 = vmatpush2.bf16.msra.mxu1 %v19786_v5  ;;  %14122 = vmatprep.subr.bf16.mxu0 %v19791_v6  ;;  %v19831_v5 = vld [vmem:[%s22566_s24 + $0x1020] ss:$8 sps:$4 sm:$0xff]  }
 0x28d   : > { %14165 = vmatprep.subr.bf16.mxu1 %v19794_v8  ;;  %v19834_v6 = vld [vmem:[%s22566_s24 + $0x1120] ss:$8 sps:$4 sm:$0xff]   ;;  %v19839_v8 = vld [vmem:[%s22566_s24 + $0x1014] ss:$8 sps:$4 sm:$0xff]  }
 0x28f   : > { %14123 = vmatpush2.bf16.msra.mxu0 %v19789_v42  ;;  %v19840_v42 = vld [vmem:[%s22566_s24 + $0x1110] ss:$8 sps:$4 sm:$0xff]  }
 0x290   : > { %14166 = vmatpush2.bf16.msra.mxu1 %v19792_v13  ;;  %14124 = vmatprep.subr.bf16.mxu0 %v19797_v14  ;;  %v19845_v13 = vld [vmem:[%s22566_s24 + $0x1004] ss:$8 sps:$4 sm:$0xff]  }
 0x291   : > { %14167 = vmatprep.subr.bf16.mxu1 %v19800_v31  ;;  %v19848_v14 = vld [vmem:[%s22566_s24 + $0x1104] ss:$8 sps:$4 sm:$0xff]   ;;  %v19843_v31 = vld [vmem:[%s22566_s24 + $0x1000] ss:$8 sps:$4 sm:$0xff]  }
 0x293   : > { %14125 = vmatpush2.bf16.msra.mxu0 %v19795_v15  ;;  %v19846_v15 = vld [vmem:[%s22566_s24 + $0x1100] ss:$8 sps:$4 sm:$0xff]  }
 0x294   : > { %14168 = vmatpush2.bf16.msra.mxu1 %v19798_v1  ;;  %14180 = vmatprep.subr.bf16.mxu0 %v19803_v2  ;;  %v19854_v1 = vld [vmem:[%s22566_s24 + $0x11f4] ss:$8 sps:$4 sm:$0xff]   ;;  %v19849_v2 = vld [vmem:[%s22566_s24 + $0x10f0] ss:$8 sps:$4 sm:$0xff]  }
 0x295   : > { %14223 = vmatprep.subr.bf16.mxu1 %v19806_v29  ;;  %v19852_v29 = vld [vmem:[%s22566_s24 + $0x11f0] ss:$8 sps:$4 sm:$0xff]  }
 0x296   : > { %v13870_v38 = vpop.f32.mrf.mxu0  ;;  %14127 = vmatmul.mubr.bf16.vlgmr.msra.gmra.mxu0 %v16735_v21  ;;  %v19855_v21 = vld [vmem:[%s22566_s24 + $0x10e0] ss:$8 sps:$4 sm:$0xff]  }
 0x297   : > { %v13913_v25 = vpop.f32.mrf.mxu1  ;;  %14170 = vmatmul.mubr.bf16.vlgmr.msra.gmra.mxu1 %v16737_v30  ;;  %v13871_v27 = vadd.f32 %v13870_v38, %v23227_v7  ;;  %14181 = vmatpush1.bf16.msra.mxu0 %v19801_v19  ;;  %v19860_v19 = vld [vmem:[%s22566_s24 + $0x11e4] ss:$8 sps:$4 sm:$0xff]   ;;  %v19858_v30 = vld [vmem:[%s22566_s24 + $0x11e0] ss:$8 sps:$4 sm:$0xff]   ;;  %v19873_v38 = vld [vmem:[%s22566_s24 + $0x10b0] ss:$8 sps:$4 sm:$0xff]  }
 0x298   : > { %14224 = vmatpush1.bf16.msra.mxu1 %v19804_v61  ;;  %v13872_v60 = vpop.f32.mrf.mxu0  ;;  %14182 = vmatprep.subr.bf16.mxu0 %v19809_v63  ;;  %v19863_v61 = vld [vmem:[%s22566_s24 + $0x10d4] ss:$8 sps:$4 sm:$0xff]   ;;  %v19864_v63 = vld [vmem:[%s22566_s24 + $0x11d0] ss:$8 sps:$4 sm:$0xff]  }
 0x299   : > { %v13915_v28 = vpop.f32.mrf.mxu1  ;;  %14225 = vmatprep.subr.bf16.mxu1 %v19812_v34  ;;  %v23326_v46 = vadd.f32 %v13913_v25, %v13871_v27  ;;  %v13873_v47 = vadd.f32 %v13872_v60, %v23232_v11  ;;  %14212 = vmatprep.mubr.bf16.mxu0 %v16740_v55  ;;  %v19821_v11 = vld [vmem:[%s22566_s24 + $0x1044] ss:$8 sps:$4 sm:$0xff]   ;;  %v19875_v55 = vld [vmem:[%s22566_s24 + $0x10b4] ss:$8 sps:$4 sm:$0xff]   ;;  %v19876_v25 = vld [vmem:[%s22566_s24 + $0x11b0] ss:$8 sps:$4 sm:$0xff]  }
 0x29a   : > { %14255 = vmatprep.mubr.bf16.mxu1 %v16742_v37  ;;  %v13874_v35 = vpop.f32.mrf.mxu0  ;;  %v19869_v34 = vld [vmem:[%s22566_s24 + $0x10c4] ss:$8 sps:$4 sm:$0xff]   ;;  %v19878_v37 = vld [vmem:[%s22566_s24 + $0x11b4] ss:$8 sps:$4 sm:$0xff]   ;;  %v19879_v60 = vld [vmem:[%s22566_s24 + $0x10a0] ss:$8 sps:$4 sm:$0xff]  }
 0x29b   : > { %v13917_v7 = vpop.f32.mrf.mxu1  ;;  %v23331_v50 = vadd.f32 %v13915_v28, %v13873_v47  ;;  %v13875_v51 = vadd.f32 %v13874_v35, %v23237_v49  ;;  %14183 = vmatpush1.bf16.msra.mxu0 %v19807_v52  ;;  %v19819_v49 = vld [vmem:[%s22566_s24 + $0x1040] ss:$8 sps:$4 sm:$0xff]   ;;  %v19884_v27 = vld [vmem:[%s22566_s24 + $0x11a4] ss:$8 sps:$4 sm:$0xff]   ;;  %v19885_v47 = vld [vmem:[%s22566_s24 + $0x1090] ss:$8 sps:$4 sm:$0xff]  }
 0x29c   : > { %14226 = vmatpush1.bf16.msra.mxu1 %v19810_v53  ;;  %v13876_v20 = vpop.f32.mrf.mxu0  ;;  %14184 = vmatprep.subr.bf16.mxu0 %v19815_v41  ;;  %v19867_v52 = vld [vmem:[%s22566_s24 + $0x10c0] ss:$8 sps:$4 sm:$0xff]   ;;  %v19887_v41 = vld [vmem:[%s22566_s24 + $0x1094] ss:$8 sps:$4 sm:$0xff]   ;;  %v19896_v35 = vld [vmem:[%s22566_s24 + $0x1184] ss:$8 sps:$4 sm:$0xff]  }
 0x29d   : > { %14227 = vmatprep.subr.bf16.mxu1 %v19818_v45  ;;  %v23336_v0 = vadd.f32 %v13917_v7, %v13875_v51  ;;  %v13877_v18 = vadd.f32 %v13876_v20, %v13834_v16  ;;  %v13919_v22 = vpop.f32.mrf.mxu1  ;;  %v19870_v53 = vld [vmem:[%s22566_s24 + $0x11c0] ss:$8 sps:$4 sm:$0xff]   ;;  %v19890_v45 = vld [vmem:[%s22566_s24 + $0x1194] ss:$8 sps:$4 sm:$0xff]  }
 0x29e   : > { %v19882_v28 = vld [vmem:[%s22566_s24 + $0x11a0] ss:$8 sps:$4 sm:$0xff]   ;;  %v19899_v51 = vld [vmem:[%s22566_s24 + $0x1274] ss:$8 sps:$4 sm:$0xff]  }
 0x29f   : > { %v23338_v59 = vadd.f32 %v13919_v22, %v13877_v18  ;;  %14185 = vmatpush1.bf16.msra.mxu0 %v19813_v12  ;;  %v19888_v12 = vld [vmem:[%s22566_s24 + $0x1190] ss:$8 sps:$4 sm:$0xff]   ;;  %v19891_v7 = vld [vmem:[%s22566_s24 + $0x1080] ss:$8 sps:$4 sm:$0xff]   ;;  %v19902_v20 = vld [vmem:[%s22566_s24 + $0x1374] ss:$8 sps:$4 sm:$0xff]   ;;  %v16739_v18 = vcombine.low %v23296_v54, %v23305_v24  ;;  %v16741_v22 = vcombine.low %v23308_v33, %v23311_v56 }
 0x2a0   : > { %14228 = vmatpush1.bf16.msra.mxu1 %v19816_v32  ;;  %14186 = vmatprep.subr.bf16.mxu0 %v19821_v11  ;;  %v19893_v32 = vld [vmem:[%s22566_s24 + $0x1084] ss:$8 sps:$4 sm:$0xff]   ;;  %v19894_v16 = vld [vmem:[%s22566_s24 + $0x1180] ss:$8 sps:$4 sm:$0xff]   ;;  %v23393_v11 = vld [vmem:[%s22634_s29 + $0x90] sm:$0xff] }
 0x2a1   : > { %14229 = vmatprep.subr.bf16.mxu1 %v19824_v57  ;;  %v19897_v57 = vld [vmem:[%s22566_s24 + $0x1270] ss:$8 sps:$4 sm:$0xff]   ;;  %v19906_v54 = vld [vmem:[%s22566_s24 + $0x1360] ss:$8 sps:$4 sm:$0xff]  }
 0x2a3   : > { %14187 = vmatpush1.bf16.msra.mxu0 %v19819_v49  ;;  %v23401_v49 = vld [vmem:[%s22634_s29 + $0x690] sm:$0xff] }
 0x2a4   : > { %14230 = vmatpush1.bf16.msra.mxu1 %v19822_v23  ;;  %14188 = vmatprep.subr.bf16.mxu0 %v19827_v3  ;;  %v23404_v23 = vld [vmem:[%s22634_s29 + $0x98] sm:$0xff]  ;;  %v16744_v24 = vcombine.high %v23393_v11, %v23401_v49 }
 0x2a5   : > { %14231 = vmatprep.subr.bf16.mxu1 %v19830_v39  ;;  %v23407_v3 = vld [vmem:[%s22634_s29 + $0x698] sm:$0xff] }
 0x2a6   : > { %v19900_v39 = vld [vmem:[%s22566_s24 + $0x1370] ss:$8 sps:$4 sm:$0xff]   ;;  %v16746_v33 = vcombine.high %v23404_v23, %v23407_v3 }
 0x2a7   : > { %14189 = vmatpush1.bf16.msra.mxu0 %v19825_v40  ;;  %v19905_v40 = vld [vmem:[%s22566_s24 + $0x1264] ss:$8 sps:$4 sm:$0xff]  }
 0x2a8   : > { %14232 = vmatpush1.bf16.msra.mxu1 %v19828_v43  ;;  %14190 = vmatprep.subr.bf16.mxu0 %v19833_v44  ;;  %v19908_v43 = vld [vmem:[%s22566_s24 + $0x1364] ss:$8 sps:$4 sm:$0xff]   ;;  %v19903_v44 = vld [vmem:[%s22566_s24 + $0x1260] ss:$8 sps:$4 sm:$0xff]  }
 0x2a9   : > { %14233 = vmatprep.subr.bf16.mxu1 %v19836_v4 }
 0x2ab   : > { %14191 = vmatpush1.bf16.msra.mxu0 %v19831_v5 }
 0x2ac   : > { %14234 = vmatpush1.bf16.msra.mxu1 %v19834_v6  ;;  %14192 = vmatprep.subr.bf16.mxu0 %v19839_v8 }
 0x2ad   : > { %14235 = vmatprep.subr.bf16.mxu1 %v19842_v9  ;;  %v19911_v9 = vld [vmem:[%s22566_s24 + $0x1254] ss:$8 sps:$4 sm:$0xff]  }
 0x2af   : > { %14193 = vmatpush1.bf16.msra.mxu0 %v19837_v10  ;;  %v19914_v10 = vld [vmem:[%s22566_s24 + $0x1354] ss:$8 sps:$4 sm:$0xff]  }
 0x2b0   : > { %14236 = vmatpush1.bf16.msra.mxu1 %v19840_v42  ;;  %14194 = vmatprep.subr.bf16.mxu0 %v19845_v13 }
 0x2b1   : > { %14237 = vmatprep.subr.bf16.mxu1 %v19848_v14  ;;  %v19909_v14 = vld [vmem:[%s22566_s24 + $0x1250] ss:$8 sps:$4 sm:$0xff]  }
 0x2b3   : > { %14195 = vmatpush1.bf16.msra.mxu0 %v19843_v31  ;;  %v19912_v31 = vld [vmem:[%s22566_s24 + $0x1350] ss:$8 sps:$4 sm:$0xff]  }
 0x2b4   : > { %14238 = vmatpush1.bf16.msra.mxu1 %v19846_v15  ;;  %14196 = vmatprep.subr.bf16.mxu0 %v19851_v17 }
 0x2b5   : > { %14239 = vmatprep.subr.bf16.mxu1 %v19854_v1 }
 0x2b7   : > { %14197 = vmatpush2.bf16.msra.mxu0 %v19849_v2 }
 0x2b8   : > { %14240 = vmatpush2.bf16.msra.mxu1 %v19852_v29  ;;  %14198 = vmatprep.subr.bf16.mxu0 %v19857_v48  ;;  %v19920_v29 = vld [vmem:[%s22566_s24 + $0x1344] ss:$8 sps:$4 sm:$0xff]  }
 0x2b9   : > { %14241 = vmatprep.subr.bf16.mxu1 %v19860_v19 }
 0x2bb   : > { %14199 = vmatpush2.bf16.msra.mxu0 %v19855_v21 }
 0x2bc   : > { %14242 = vmatpush2.bf16.msra.mxu1 %v19858_v30  ;;  %14200 = vmatprep.subr.bf16.mxu0 %v19863_v61  ;;  %v19918_v61 = vld [vmem:[%s22566_s24 + $0x1340] ss:$8 sps:$4 sm:$0xff]  }
 0x2bd   : > { %14243 = vmatprep.subr.bf16.mxu1 %v19866_v62  ;;  %v19923_v62 = vld [vmem:[%s22566_s24 + $0x1234] ss:$8 sps:$4 sm:$0xff]  }
 0x2bf   : > { %14201 = vmatpush2.bf16.msra.mxu0 %v19861_v58  ;;  %v19926_v58 = vld [vmem:[%s22566_s24 + $0x1334] ss:$8 sps:$4 sm:$0xff]  }
 0x2c0   : > { %14244 = vmatpush2.bf16.msra.mxu1 %v19864_v63  ;;  %14202 = vmatprep.subr.bf16.mxu0 %v19869_v34  ;;  %v19924_v63 = vld [vmem:[%s22566_s24 + $0x1330] ss:$8 sps:$4 sm:$0xff]   ;;  %v19929_v34 = vld [vmem:[%s22566_s24 + $0x1224] ss:$8 sps:$4 sm:$0xff]  }
 0x2c1   : > { %14245 = vmatprep.subr.bf16.mxu1 %v19872_v36  ;;  %v19932_v36 = vld [vmem:[%s22566_s24 + $0x1324] ss:$8 sps:$4 sm:$0xff]  }
 0x2c3   : > { %14203 = vmatpush2.bf16.msra.mxu0 %v19867_v52  ;;  %v19927_v52 = vld [vmem:[%s22566_s24 + $0x1220] ss:$8 sps:$4 sm:$0xff]  }
 0x2c4   : > { %14246 = vmatpush2.bf16.msra.mxu1 %v19870_v53  ;;  %14204 = vmatprep.subr.bf16.mxu0 %v19875_v55  ;;  %v19930_v53 = vld [vmem:[%s22566_s24 + $0x1320] ss:$8 sps:$4 sm:$0xff]   ;;  %v19935_v55 = vld [vmem:[%s22566_s24 + $0x1214] ss:$8 sps:$4 sm:$0xff]  }
 0x2c5   : > { %14247 = vmatprep.subr.bf16.mxu1 %v19878_v37  ;;  %v19938_v37 = vld [vmem:[%s22566_s24 + $0x1314] ss:$8 sps:$4 sm:$0xff]  }
 0x2c7   : > { %14205 = vmatpush2.bf16.msra.mxu0 %v19873_v38  ;;  %v19933_v38 = vld [vmem:[%s22566_s24 + $0x1210] ss:$8 sps:$4 sm:$0xff]  }
 0x2c8   : > { %14248 = vmatpush2.bf16.msra.mxu1 %v19876_v25  ;;  %14206 = vmatprep.subr.bf16.mxu0 %v19881_v26  ;;  %v19936_v25 = vld [vmem:[%s22566_s24 + $0x1310] ss:$8 sps:$4 sm:$0xff]   ;;  %v19941_v26 = vld [vmem:[%s22566_s24 + $0x1204] ss:$8 sps:$4 sm:$0xff]  }
 0x2c9   : > { %14249 = vmatprep.subr.bf16.mxu1 %v19884_v27  ;;  %v19944_v27 = vld [vmem:[%s22566_s24 + $0x1304] ss:$8 sps:$4 sm:$0xff]  }
 0x2cb   : > { %14207 = vmatpush2.bf16.msra.mxu0 %v19879_v60  ;;  %v19939_v60 = vld [vmem:[%s22566_s24 + $0x1200] ss:$8 sps:$4 sm:$0xff]  }
 0x2cc   : > { %14250 = vmatpush2.bf16.msra.mxu1 %v19882_v28  ;;  %14208 = vmatprep.subr.bf16.mxu0 %v19887_v41  ;;  %v19942_v28 = vld [vmem:[%s22566_s24 + $0x1300] ss:$8 sps:$4 sm:$0xff]   ;;  %v19947_v41 = vld [vmem:[%s22566_s24 + $0x12f4] ss:$8 sps:$4 sm:$0xff]  }
 0x2cd   : > { %14251 = vmatprep.subr.bf16.mxu1 %v19890_v45  ;;  %v19950_v45 = vld [vmem:[%s22566_s24 + $0x13f4] ss:$8 sps:$4 sm:$0xff]  }
 0x2cf   : > { %14209 = vmatpush2.bf16.msra.mxu0 %v19885_v47  ;;  %v19945_v47 = vld [vmem:[%s22566_s24 + $0x12f0] ss:$8 sps:$4 sm:$0xff]  }
 0x2d0   : > { %14252 = vmatpush2.bf16.msra.mxu1 %v19888_v12  ;;  %14210 = vmatprep.subr.bf16.mxu0 %v19893_v32  ;;  %v19948_v12 = vld [vmem:[%s22566_s24 + $0x13f0] ss:$8 sps:$4 sm:$0xff]   ;;  %v19953_v32 = vld [vmem:[%s22566_s24 + $0x12e4] ss:$8 sps:$4 sm:$0xff]  }
 0x2d1   : > { %14253 = vmatprep.subr.bf16.mxu1 %v19896_v35  ;;  %v19956_v35 = vld [vmem:[%s22566_s24 + $0x13e4] ss:$8 sps:$4 sm:$0xff]  }
 0x2d3   : > { %14211 = vmatpush2.bf16.msra.mxu0 %v19891_v7  ;;  %v19951_v7 = vld [vmem:[%s22566_s24 + $0x12e0] ss:$8 sps:$4 sm:$0xff]  }
 0x2d4   : > { %14254 = vmatpush2.bf16.msra.mxu1 %v19894_v16  ;;  %14266 = vmatprep.subr.bf16.mxu0 %v19899_v51  ;;  %v19954_v16 = vld [vmem:[%s22566_s24 + $0x13e0] ss:$8 sps:$4 sm:$0xff]   ;;  %v19959_v51 = vld [vmem:[%s22566_s24 + $0x12d4] ss:$8 sps:$4 sm:$0xff]  }
 0x2d5   : > { %14309 = vmatprep.subr.bf16.mxu1 %v19902_v20  ;;  %v19962_v20 = vld [vmem:[%s22566_s24 + $0x13d4] ss:$8 sps:$4 sm:$0xff]  }
 0x2d6   : > { %v13956_v56 = vpop.f32.mrf.mxu0  ;;  %14213 = vmatmul.mubr.bf16.vlgmr.msra.gmra.mxu0 %v16739_v18  ;;  %v19960_v18 = vld [vmem:[%s22566_s24 + $0x13d0] ss:$8 sps:$4 sm:$0xff]  }
 0x2d7   : > { %v13999_v4 = vpop.f32.mrf.mxu1  ;;  %14256 = vmatmul.mubr.bf16.vlgmr.msra.gmra.mxu1 %v16741_v22  ;;  %v13957_v5 = vadd.f32 %v13956_v56, %v23326_v46  ;;  %14267 = vmatpush1.bf16.msra.mxu0 %v19897_v57  ;;  %v19957_v57 = vld [vmem:[%s22566_s24 + $0x12d0] ss:$8 sps:$4 sm:$0xff]   ;;  %v19965_v22 = vld [vmem:[%s22566_s24 + $0x12c4] ss:$8 sps:$4 sm:$0xff]  }
 0x2d8   : > { %14310 = vmatpush1.bf16.msra.mxu1 %v19900_v39  ;;  %v13958_v6 = vpop.f32.mrf.mxu0  ;;  %14268 = vmatprep.subr.bf16.mxu0 %v19905_v40  ;;  %v19968_v39 = vld [vmem:[%s22566_s24 + $0x13c4] ss:$8 sps:$4 sm:$0xff]   ;;  %v19963_v40 = vld [vmem:[%s22566_s24 + $0x12c0] ss:$8 sps:$4 sm:$0xff]  }
 0x2d9   : > { %v14001_v8 = vpop.f32.mrf.mxu1  ;;  %14311 = vmatprep.subr.bf16.mxu1 %v19908_v43  ;;  %v23421_v42 = vadd.f32 %v13999_v4, %v13957_v5  ;;  %v13959_v13 = vadd.f32 %v13958_v6, %v23331_v50  ;;  %14298 = vmatprep.mubr.bf16.mxu0 %v16744_v24  ;;  %v19917_v50 = vld [vmem:[%s22566_s24 + $0x1244] ss:$8 sps:$4 sm:$0xff]   ;;  %v19966_v43 = vld [vmem:[%s22566_s24 + $0x13c0] ss:$8 sps:$4 sm:$0xff]   ;;  %v19969_v24 = vld [vmem:[%s22566_s24 + $0x12b0] ss:$8 sps:$4 sm:$0xff]  }
 0x2da   : > { %14341 = vmatprep.mubr.bf16.mxu1 %v16746_v33  ;;  %v13960_v15 = vpop.f32.mrf.mxu0  ;;  %v19972_v33 = vld [vmem:[%s22566_s24 + $0x13b0] ss:$8 sps:$4 sm:$0xff]   ;;  %v19977_v56 = vld [vmem:[%s22566_s24 + $0x12a4] ss:$8 sps:$4 sm:$0xff]   ;;  %v19975_v5 = vld [vmem:[%s22566_s24 + $0x12a0] ss:$8 sps:$4 sm:$0xff]  }
 0x2db   : > { %v14003_v46 = vpop.f32.mrf.mxu1  ;;  %v23426_v17 = vadd.f32 %v14001_v8, %v13959_v13  ;;  %v13961_v1 = vadd.f32 %v13960_v15, %v23336_v0  ;;  %14269 = vmatpush1.bf16.msra.mxu0 %v19903_v44  ;;  %v19915_v0 = vld [vmem:[%s22566_s24 + $0x1240] ss:$8 sps:$4 sm:$0xff]   ;;  %v19971_v44 = vld [vmem:[%s22566_s24 + $0x12b4] ss:$8 sps:$4 sm:$0xff]   ;;  %v19980_v4 = vld [vmem:[%s22566_s24 + $0x13a4] ss:$8 sps:$4 sm:$0xff]  }
 0x2dc   : > { %14312 = vmatpush1.bf16.msra.mxu1 %v19906_v54  ;;  %v13962_v2 = vpop.f32.mrf.mxu0  ;;  %14270 = vmatprep.subr.bf16.mxu0 %v19911_v9  ;;  %v19974_v54 = vld [vmem:[%s22566_s24 + $0x13b4] ss:$8 sps:$4 sm:$0xff]   ;;  %v19978_v6 = vld [vmem:[%s22566_s24 + $0x13a0] ss:$8 sps:$4 sm:$0xff]   ;;  %v19984_v13 = vld [vmem:[%s22566_s24 + $0x1390] ss:$8 sps:$4 sm:$0xff]  }
 0x2dd   : > { %14313 = vmatprep.subr.bf16.mxu1 %v19914_v10  ;;  %v23431_v48 = vadd.f32 %v14003_v46, %v13961_v1  ;;  %v13963_v19 = vadd.f32 %v13962_v2, %v23338_v59  ;;  %v14005_v21 = vpop.f32.mrf.mxu1  ;;  %v19921_v59 = vld [vmem:[%s22566_s24 + $0x1230] ss:$8 sps:$4 sm:$0xff]   ;;  %v19983_v8 = vld [vmem:[%s22566_s24 + $0x1294] ss:$8 sps:$4 sm:$0xff]   ;;  %v19987_v15 = vld [vmem:[%s22566_s24 + $0x1280] ss:$8 sps:$4 sm:$0xff]  }
 0x2de   : > { %v19986_v9 = vld [vmem:[%s22566_s24 + $0x1394] ss:$8 sps:$4 sm:$0xff]   ;;  %v19981_v10 = vld [vmem:[%s22566_s24 + $0x1290] ss:$8 sps:$4 sm:$0xff]   ;;  %v19990_v46 = vld [vmem:[%s22566_s24 + $0x1380] ss:$8 sps:$4 sm:$0xff]  }
 0x2df   : > { %v23434_v30 = vadd.f32 %v14005_v21, %v13963_v19  ;;  %14271 = vmatpush1.bf16.msra.mxu0 %v19909_v14  ;;  %v19989_v14 = vld [vmem:[%s22566_s24 + $0x1284] ss:$8 sps:$4 sm:$0xff]   ;;  %v19995_v1 = vld [vmem:[%s22566_s24 + $0x1474] ss:$8 sps:$4 sm:$0xff]   ;;  %v16743_v19 = vcombine.low %v23393_v11, %v23401_v49  ;;  %v16745_v21 = vcombine.low %v23404_v23, %v23407_v3  ;;  %v20002_v11 = vld [vmem:[%s22566_s24 + $0x1560] ss:$8 sps:$4 sm:$0xff]  }
 0x2e0   : > { %14314 = vmatpush1.bf16.msra.mxu1 %v19912_v31  ;;  %14272 = vmatprep.subr.bf16.mxu0 %v19917_v50  ;;  %v19992_v31 = vld [vmem:[%s22566_s24 + $0x1384] ss:$8 sps:$4 sm:$0xff]   ;;  %v19998_v2 = vld [vmem:[%s22566_s24 + $0x1574] ss:$8 sps:$4 sm:$0xff]  }
 0x2e1   : > { %14315 = vmatprep.subr.bf16.mxu1 %v19920_v29  ;;  %v23489_v50 = vld [vmem:[%s22634_s29 + $0xa0] sm:$0xff]  ;;  %v19993_v29 = vld [vmem:[%s22566_s24 + $0x1470] ss:$8 sps:$4 sm:$0xff]  }
 0x2e3   : > { %14273 = vmatpush1.bf16.msra.mxu0 %v19915_v0  ;;  %v23497_v0 = vld [vmem:[%s22634_s29 + $0x6a0] sm:$0xff] }
 0x2e4   : > { %14316 = vmatpush1.bf16.msra.mxu1 %v19918_v61  ;;  %14274 = vmatprep.subr.bf16.mxu0 %v19923_v62  ;;  %v23500_v61 = vld [vmem:[%s22634_s29 + $0xa8] sm:$0xff]  ;;  %v16748_v49 = vcombine.high %v23489_v50, %v23497_v0 }
 0x2e5   : > { %14317 = vmatprep.subr.bf16.mxu1 %v19926_v58  ;;  %v23503_v62 = vld [vmem:[%s22634_s29 + $0x6a8] sm:$0xff]  ;;  %v19996_v58 = vld [vmem:[%s22566_s24 + $0x1570] ss:$8 sps:$4 sm:$0xff]  }
 0x2e6   : > { %v16750_v23 = vcombine.high %v23500_v61, %v23503_v62 }
 0x2e7   : > { %14275 = vmatpush1.bf16.msra.mxu0 %v19921_v59  ;;  %v20001_v59 = vld [vmem:[%s22566_s24 + $0x1464] ss:$8 sps:$4 sm:$0xff]  }
 0x2e8   : > { %14318 = vmatpush1.bf16.msra.mxu1 %v19924_v63  ;;  %14276 = vmatprep.subr.bf16.mxu0 %v19929_v34  ;;  %v20004_v63 = vld [vmem:[%s22566_s24 + $0x1564] ss:$8 sps:$4 sm:$0xff]   ;;  %v19999_v34 = vld [vmem:[%s22566_s24 + $0x1460] ss:$8 sps:$4 sm:$0xff]  }
 0x2e9   : > { %14319 = vmatprep.subr.bf16.mxu1 %v19932_v36 }
 0x2eb   : > { %14277 = vmatpush1.bf16.msra.mxu0 %v19927_v52 }
 0x2ec   : > { %14320 = vmatpush1.bf16.msra.mxu1 %v19930_v53  ;;  %14278 = vmatprep.subr.bf16.mxu0 %v19935_v55 }
 0x2ed   : > { %14321 = vmatprep.subr.bf16.mxu1 %v19938_v37  ;;  %v20007_v37 = vld [vmem:[%s22566_s24 + $0x1454] ss:$8 sps:$4 sm:$0xff]  }
 0x2ef   : > { %14279 = vmatpush1.bf16.msra.mxu0 %v19933_v38  ;;  %v20010_v38 = vld [vmem:[%s22566_s24 + $0x1554] ss:$8 sps:$4 sm:$0xff]  }
 0x2f0   : > { %14322 = vmatpush1.bf16.msra.mxu1 %v19936_v25  ;;  %14280 = vmatprep.subr.bf16.mxu0 %v19941_v26 }
 0x2f1   : > { %14323 = vmatprep.subr.bf16.mxu1 %v19944_v27  ;;  %v20005_v27 = vld [vmem:[%s22566_s24 + $0x1450] ss:$8 sps:$4 sm:$0xff]  }
 0x2f3   : > { %14281 = vmatpush1.bf16.msra.mxu0 %v19939_v60  ;;  %v20008_v60 = vld [vmem:[%s22566_s24 + $0x1550] ss:$8 sps:$4 sm:$0xff]  }
 0x2f4   : > { %14324 = vmatpush1.bf16.msra.mxu1 %v19942_v28  ;;  %14282 = vmatprep.subr.bf16.mxu0 %v19947_v41 }
 0x2f5   : > { %14325 = vmatprep.subr.bf16.mxu1 %v19950_v45 }
 0x2f7   : > { %14283 = vmatpush2.bf16.msra.mxu0 %v19945_v47 }
 0x2f8   : > { %14326 = vmatpush2.bf16.msra.mxu1 %v19948_v12  ;;  %14284 = vmatprep.subr.bf16.mxu0 %v19953_v32  ;;  %v20016_v12 = vld [vmem:[%s22566_s24 + $0x1544] ss:$8 sps:$4 sm:$0xff]  }
 0x2f9   : > { %14327 = vmatprep.subr.bf16.mxu1 %v19956_v35 }
 0x2fb   : > { %14285 = vmatpush2.bf16.msra.mxu0 %v19951_v7 }
 0x2fc   : > { %14328 = vmatpush2.bf16.msra.mxu1 %v19954_v16  ;;  %14286 = vmatprep.subr.bf16.mxu0 %v19959_v51  ;;  %v20014_v51 = vld [vmem:[%s22566_s24 + $0x1540] ss:$8 sps:$4 sm:$0xff]  }
 0x2fd   : > { %14329 = vmatprep.subr.bf16.mxu1 %v19962_v20  ;;  %v20019_v20 = vld [vmem:[%s22566_s24 + $0x1434] ss:$8 sps:$4 sm:$0xff]  }
 0x2ff   : > { %14287 = vmatpush2.bf16.msra.mxu0 %v19957_v57  ;;  %v20022_v57 = vld [vmem:[%s22566_s24 + $0x1534] ss:$8 sps:$4 sm:$0xff]  }
 0x300   : > { %14330 = vmatpush2.bf16.msra.mxu1 %v19960_v18  ;;  %14288 = vmatprep.subr.bf16.mxu0 %v19965_v22  ;;  %v20020_v18 = vld [vmem:[%s22566_s24 + $0x1530] ss:$8 sps:$4 sm:$0xff]   ;;  %v20025_v22 = vld [vmem:[%s22566_s24 + $0x1424] ss:$8 sps:$4 sm:$0xff]  }
 0x301   : > { %14331 = vmatprep.subr.bf16.mxu1 %v19968_v39  ;;  %v20028_v39 = vld [vmem:[%s22566_s24 + $0x1524] ss:$8 sps:$4 sm:$0xff]  }
 0x303   : > { %14289 = vmatpush2.bf16.msra.mxu0 %v19963_v40  ;;  %v20023_v40 = vld [vmem:[%s22566_s24 + $0x1420] ss:$8 sps:$4 sm:$0xff]  }
 0x304   : > { %14332 = vmatpush2.bf16.msra.mxu1 %v19966_v43  ;;  %14290 = vmatprep.subr.bf16.mxu0 %v19971_v44  ;;  %v20026_v43 = vld [vmem:[%s22566_s24 + $0x1520] ss:$8 sps:$4 sm:$0xff]   ;;  %v20031_v44 = vld [vmem:[%s22566_s24 + $0x1414] ss:$8 sps:$4 sm:$0xff]  }
 0x305   : > { %14333 = vmatprep.subr.bf16.mxu1 %v19974_v54  ;;  %v20034_v54 = vld [vmem:[%s22566_s24 + $0x1514] ss:$8 sps:$4 sm:$0xff]  }
 0x307   : > { %14291 = vmatpush2.bf16.msra.mxu0 %v19969_v24  ;;  %v20029_v24 = vld [vmem:[%s22566_s24 + $0x1410] ss:$8 sps:$4 sm:$0xff]  }
 0x308   : > { %14334 = vmatpush2.bf16.msra.mxu1 %v19972_v33  ;;  %14292 = vmatprep.subr.bf16.mxu0 %v19977_v56  ;;  %v20032_v33 = vld [vmem:[%s22566_s24 + $0x1510] ss:$8 sps:$4 sm:$0xff]   ;;  %v20037_v56 = vld [vmem:[%s22566_s24 + $0x1404] ss:$8 sps:$4 sm:$0xff]  }
 0x309   : > { %14335 = vmatprep.subr.bf16.mxu1 %v19980_v4  ;;  %v20040_v4 = vld [vmem:[%s22566_s24 + $0x1504] ss:$8 sps:$4 sm:$0xff]  }
 0x30b   : > { %14293 = vmatpush2.bf16.msra.mxu0 %v19975_v5  ;;  %v20035_v5 = vld [vmem:[%s22566_s24 + $0x1400] ss:$8 sps:$4 sm:$0xff]  }
 0x30c   : > { %14336 = vmatpush2.bf16.msra.mxu1 %v19978_v6  ;;  %14294 = vmatprep.subr.bf16.mxu0 %v19983_v8  ;;  %v20038_v6 = vld [vmem:[%s22566_s24 + $0x1500] ss:$8 sps:$4 sm:$0xff]   ;;  %v20043_v8 = vld [vmem:[%s22566_s24 + $0x14f4] ss:$8 sps:$4 sm:$0xff]  }
 0x30d   : > { %14337 = vmatprep.subr.bf16.mxu1 %v19986_v9  ;;  %v20046_v9 = vld [vmem:[%s22566_s24 + $0x15f4] ss:$8 sps:$4 sm:$0xff]  }
 0x30f   : > { %14295 = vmatpush2.bf16.msra.mxu0 %v19981_v10  ;;  %v20041_v10 = vld [vmem:[%s22566_s24 + $0x14f0] ss:$8 sps:$4 sm:$0xff]  }
 0x310   : > { %14338 = vmatpush2.bf16.msra.mxu1 %v19984_v13  ;;  %14296 = vmatprep.subr.bf16.mxu0 %v19989_v14  ;;  %v20044_v13 = vld [vmem:[%s22566_s24 + $0x15f0] ss:$8 sps:$4 sm:$0xff]   ;;  %v20049_v14 = vld [vmem:[%s22566_s24 + $0x14e4] ss:$8 sps:$4 sm:$0xff]  }
 0x311   : > { %14339 = vmatprep.subr.bf16.mxu1 %v19992_v31  ;;  %v20052_v31 = vld [vmem:[%s22566_s24 + $0x15e4] ss:$8 sps:$4 sm:$0xff]  }
 0x313   : > { %14297 = vmatpush2.bf16.msra.mxu0 %v19987_v15  ;;  %v20047_v15 = vld [vmem:[%s22566_s24 + $0x14e0] ss:$8 sps:$4 sm:$0xff]  }
 0x314   : > { %14340 = vmatpush2.bf16.msra.mxu1 %v19990_v46  ;;  %14352 = vmatprep.subr.bf16.mxu0 %v19995_v1  ;;  %v20050_v46 = vld [vmem:[%s22566_s24 + $0x15e0] ss:$8 sps:$4 sm:$0xff]   ;;  %v20055_v1 = vld [vmem:[%s22566_s24 + $0x14d4] ss:$8 sps:$4 sm:$0xff]  }
 0x315   : > { %14395 = vmatprep.subr.bf16.mxu1 %v19998_v2  ;;  %v20058_v2 = vld [vmem:[%s22566_s24 + $0x15d4] ss:$8 sps:$4 sm:$0xff]  }
 0x316   : > { %v14042_v3 = vpop.f32.mrf.mxu0  ;;  %14299 = vmatmul.mubr.bf16.vlgmr.msra.gmra.mxu0 %v16743_v19  ;;  %v20056_v19 = vld [vmem:[%s22566_s24 + $0x15d0] ss:$8 sps:$4 sm:$0xff]  }
 0x317   : > { %v14085_v36 = vpop.f32.mrf.mxu1  ;;  %14342 = vmatmul.mubr.bf16.vlgmr.msra.gmra.mxu1 %v16745_v21  ;;  %v14043_v52 = vadd.f32 %v14042_v3, %v23421_v42  ;;  %14353 = vmatpush1.bf16.msra.mxu0 %v19993_v29  ;;  %v20053_v29 = vld [vmem:[%s22566_s24 + $0x14d0] ss:$8 sps:$4 sm:$0xff]   ;;  %v20061_v21 = vld [vmem:[%s22566_s24 + $0x14c4] ss:$8 sps:$4 sm:$0xff]  }
 0x318   : > { %14396 = vmatpush1.bf16.msra.mxu1 %v19996_v58  ;;  %v14044_v53 = vpop.f32.mrf.mxu0  ;;  %14354 = vmatprep.subr.bf16.mxu0 %v20001_v59  ;;  %v20064_v58 = vld [vmem:[%s22566_s24 + $0x15c4] ss:$8 sps:$4 sm:$0xff]   ;;  %v20059_v59 = vld [vmem:[%s22566_s24 + $0x14c0] ss:$8 sps:$4 sm:$0xff]  }
 0x319   : > { %v14087_v55 = vpop.f32.mrf.mxu1  ;;  %14397 = vmatprep.subr.bf16.mxu1 %v20004_v63  ;;  %v23517_v25 = vadd.f32 %v14085_v36, %v14043_v52  ;;  %v14045_v26 = vadd.f32 %v14044_v53, %v23426_v17  ;;  %14384 = vmatprep.mubr.bf16.mxu0 %v16748_v49  ;;  %v20013_v17 = vld [vmem:[%s22566_s24 + $0x1444] ss:$8 sps:$4 sm:$0xff]   ;;  %v20062_v63 = vld [vmem:[%s22566_s24 + $0x15c0] ss:$8 sps:$4 sm:$0xff]   ;;  %v20065_v49 = vld [vmem:[%s22566_s24 + $0x14b0] ss:$8 sps:$4 sm:$0xff]  }
 0x31a   : > { %14427 = vmatprep.mubr.bf16.mxu1 %v16750_v23  ;;  %v14046_v28 = vpop.f32.mrf.mxu0  ;;  %v20068_v23 = vld [vmem:[%s22566_s24 + $0x15b0] ss:$8 sps:$4 sm:$0xff]   ;;  %v20073_v3 = vld [vmem:[%s22566_s24 + $0x14a4] ss:$8 sps:$4 sm:$0xff]   ;;  %v20071_v52 = vld [vmem:[%s22566_s24 + $0x14a0] ss:$8 sps:$4 sm:$0xff]  }
 0x31b   : > { %v14089_v42 = vpop.f32.mrf.mxu1  ;;  %v23522_v41 = vadd.f32 %v14087_v55, %v14045_v26  ;;  %v14047_v45 = vadd.f32 %v14046_v28, %v23431_v48  ;;  %14355 = vmatpush1.bf16.msra.mxu0 %v19999_v34  ;;  %v20011_v48 = vld [vmem:[%s22566_s24 + $0x1440] ss:$8 sps:$4 sm:$0xff]   ;;  %v20067_v34 = vld [vmem:[%s22566_s24 + $0x14b4] ss:$8 sps:$4 sm:$0xff]   ;;  %v20076_v36 = vld [vmem:[%s22566_s24 + $0x15a4] ss:$8 sps:$4 sm:$0xff]  }
 0x31c   : > { %14398 = vmatpush1.bf16.msra.mxu1 %v20002_v11  ;;  %v14048_v47 = vpop.f32.mrf.mxu0  ;;  %14356 = vmatprep.subr.bf16.mxu0 %v20007_v37  ;;  %v20070_v11 = vld [vmem:[%s22566_s24 + $0x15b4] ss:$8 sps:$4 sm:$0xff]   ;;  %v20074_v53 = vld [vmem:[%s22566_s24 + $0x15a0] ss:$8 sps:$4 sm:$0xff]   ;;  %v20080_v26 = vld [vmem:[%s22566_s24 + $0x1590] ss:$8 sps:$4 sm:$0xff]  }
 0x31d   : > { %14399 = vmatprep.subr.bf16.mxu1 %v20010_v38  ;;  %v23527_v32 = vadd.f32 %v14089_v42, %v14047_v45  ;;  %v14049_v35 = vadd.f32 %v14048_v47, %v23434_v30  ;;  %v14091_v7 = vpop.f32.mrf.mxu1  ;;  %v20017_v30 = vld [vmem:[%s22566_s24 + $0x1430] ss:$8 sps:$4 sm:$0xff]   ;;  %v20079_v55 = vld [vmem:[%s22566_s24 + $0x1494] ss:$8 sps:$4 sm:$0xff]   ;;  %v20083_v28 = vld [vmem:[%s22566_s24 + $0x1480] ss:$8 sps:$4 sm:$0xff]  }
 0x31e   : > { %v20082_v37 = vld [vmem:[%s22566_s24 + $0x1594] ss:$8 sps:$4 sm:$0xff]   ;;  %v20077_v38 = vld [vmem:[%s22566_s24 + $0x1490] ss:$8 sps:$4 sm:$0xff]   ;;  %v20086_v42 = vld [vmem:[%s22566_s24 + $0x1580] ss:$8 sps:$4 sm:$0xff]  }
 0x31f   : > { %v23530_v16 = vadd.f32 %v14091_v7, %v14049_v35  ;;  %14357 = vmatpush1.bf16.msra.mxu0 %v20005_v27  ;;  %v20085_v27 = vld [vmem:[%s22566_s24 + $0x1484] ss:$8 sps:$4 sm:$0xff]   ;;  %v20091_v45 = vld [vmem:[%s22566_s24 + $0x1674] ss:$8 sps:$4 sm:$0xff]   ;;  %v16747_v35 = vcombine.low %v23489_v50, %v23497_v0  ;;  %v16749_v7 = vcombine.low %v23500_v61, %v23503_v62  ;;  %v20098_v50 = vld [vmem:[%s22566_s24 + $0x1760] ss:$8 sps:$4 sm:$0xff]  }
 0x320   : > { %14400 = vmatpush1.bf16.msra.mxu1 %v20008_v60  ;;  %14358 = vmatprep.subr.bf16.mxu0 %v20013_v17  ;;  %v20088_v60 = vld [vmem:[%s22566_s24 + $0x1584] ss:$8 sps:$4 sm:$0xff]   ;;  %v20094_v47 = vld [vmem:[%s22566_s24 + $0x1774] ss:$8 sps:$4 sm:$0xff]  }
 0x321   : > { %14401 = vmatprep.subr.bf16.mxu1 %v20016_v12  ;;  %v23585_v17 = vld [vmem:[%s22634_s29 + $0xb0] sm:$0xff] }
 0x322   : > { %v20089_v12 = vld [vmem:[%s22566_s24 + $0x1670] ss:$8 sps:$4 sm:$0xff]  }
 0x323   : > { %14359 = vmatpush1.bf16.msra.mxu0 %v20011_v48  ;;  %v23593_v48 = vld [vmem:[%s22634_s29 + $0x6b0] sm:$0xff] }
 0x324   : > { %14402 = vmatpush1.bf16.msra.mxu1 %v20014_v51  ;;  %14360 = vmatprep.subr.bf16.mxu0 %v20019_v20  ;;  %v23596_v51 = vld [vmem:[%s22634_s29 + $0xb8] sm:$0xff]  ;;  %v16752_v0 = vcombine.high %v23585_v17, %v23593_v48 }
 0x325   : > { %14403 = vmatprep.subr.bf16.mxu1 %v20022_v57  ;;  %v23599_v20 = vld [vmem:[%s22634_s29 + $0x6b8] sm:$0xff] }
 0x326   : > { %v20092_v57 = vld [vmem:[%s22566_s24 + $0x1770] ss:$8 sps:$4 sm:$0xff]   ;;  %v16754_v61 = vcombine.high %v23596_v51, %v23599_v20 }
 0x327   : > { %14361 = vmatpush1.bf16.msra.mxu0 %v20017_v30  ;;  %v20097_v30 = vld [vmem:[%s22566_s24 + $0x1664] ss:$8 sps:$4 sm:$0xff]  }
 0x328   : > { %14404 = vmatpush1.bf16.msra.mxu1 %v20020_v18  ;;  %14362 = vmatprep.subr.bf16.mxu0 %v20025_v22  ;;  %v20100_v18 = vld [vmem:[%s22566_s24 + $0x1764] ss:$8 sps:$4 sm:$0xff]   ;;  %v20095_v22 = vld [vmem:[%s22566_s24 + $0x1660] ss:$8 sps:$4 sm:$0xff]  }
 0x329   : > { %14405 = vmatprep.subr.bf16.mxu1 %v20028_v39 }
 0x32b   : > { %14363 = vmatpush1.bf16.msra.mxu0 %v20023_v40 }
 0x32c   : > { %14406 = vmatpush1.bf16.msra.mxu1 %v20026_v43  ;;  %14364 = vmatprep.subr.bf16.mxu0 %v20031_v44 }
 0x32d   : > { %14407 = vmatprep.subr.bf16.mxu1 %v20034_v54  ;;  %v20103_v54 = vld [vmem:[%s22566_s24 + $0x1654] ss:$8 sps:$4 sm:$0xff]  }
 0x32f   : > { %14365 = vmatpush1.bf16.msra.mxu0 %v20029_v24  ;;  %v20106_v24 = vld [vmem:[%s22566_s24 + $0x1754] ss:$8 sps:$4 sm:$0xff]  }
 0x330   : > { %14408 = vmatpush1.bf16.msra.mxu1 %v20032_v33  ;;  %14366 = vmatprep.subr.bf16.mxu0 %v20037_v56 }
 0x331   : > { %14409 = vmatprep.subr.bf16.mxu1 %v20040_v4  ;;  %v20101_v4 = vld [vmem:[%s22566_s24 + $0x1650] ss:$8 sps:$4 sm:$0xff]  }
 0x333   : > { %14367 = vmatpush1.bf16.msra.mxu0 %v20035_v5  ;;  %v20104_v5 = vld [vmem:[%s22566_s24 + $0x1750] ss:$8 sps:$4 sm:$0xff]  }
 0x334   : > { %14410 = vmatpush1.bf16.msra.mxu1 %v20038_v6  ;;  %14368 = vmatprep.subr.bf16.mxu0 %v20043_v8 }
 0x335   : > { %14411 = vmatprep.subr.bf16.mxu1 %v20046_v9 }
 0x337   : > { %14369 = vmatpush2.bf16.msra.mxu0 %v20041_v10 }
 0x338   : > { %14412 = vmatpush2.bf16.msra.mxu1 %v20044_v13  ;;  %14370 = vmatprep.subr.bf16.mxu0 %v20049_v14  ;;  %v20112_v13 = vld [vmem:[%s22566_s24 + $0x1744] ss:$8 sps:$4 sm:$0xff]  }
 0x339   : > { %14413 = vmatprep.subr.bf16.mxu1 %v20052_v31 }
 0x33b   : > { %14371 = vmatpush2.bf16.msra.mxu0 %v20047_v15 }
 0x33c   : > { %14414 = vmatpush2.bf16.msra.mxu1 %v20050_v46  ;;  %14372 = vmatprep.subr.bf16.mxu0 %v20055_v1  ;;  %v20110_v1 = vld [vmem:[%s22566_s24 + $0x1740] ss:$8 sps:$4 sm:$0xff]  }
 0x33d   : > { %14415 = vmatprep.subr.bf16.mxu1 %v20058_v2  ;;  %v20115_v2 = vld [vmem:[%s22566_s24 + $0x1634] ss:$8 sps:$4 sm:$0xff]  }
 0x33f   : > { %14373 = vmatpush2.bf16.msra.mxu0 %v20053_v29  ;;  %v20118_v29 = vld [vmem:[%s22566_s24 + $0x1734] ss:$8 sps:$4 sm:$0xff]  }
 0x340   : > { %14416 = vmatpush2.bf16.msra.mxu1 %v20056_v19  ;;  %14374 = vmatprep.subr.bf16.mxu0 %v20061_v21  ;;  %v20116_v19 = vld [vmem:[%s22566_s24 + $0x1730] ss:$8 sps:$4 sm:$0xff]   ;;  %v20121_v21 = vld [vmem:[%s22566_s24 + $0x1624] ss:$8 sps:$4 sm:$0xff]  }
 0x341   : > { %14417 = vmatprep.subr.bf16.mxu1 %v20064_v58  ;;  %v20124_v58 = vld [vmem:[%s22566_s24 + $0x1724] ss:$8 sps:$4 sm:$0xff]  }
 0x343   : > { %14375 = vmatpush2.bf16.msra.mxu0 %v20059_v59  ;;  %v20119_v59 = vld [vmem:[%s22566_s24 + $0x1620] ss:$8 sps:$4 sm:$0xff]  }
 0x344   : > { %14418 = vmatpush2.bf16.msra.mxu1 %v20062_v63  ;;  %14376 = vmatprep.subr.bf16.mxu0 %v20067_v34  ;;  %v20122_v63 = vld [vmem:[%s22566_s24 + $0x1720] ss:$8 sps:$4 sm:$0xff]   ;;  %v20127_v34 = vld [vmem:[%s22566_s24 + $0x1614] ss:$8 sps:$4 sm:$0xff]  }
 0x345   : > { %14419 = vmatprep.subr.bf16.mxu1 %v20070_v11  ;;  %v20130_v11 = vld [vmem:[%s22566_s24 + $0x1714] ss:$8 sps:$4 sm:$0xff]  }
 0x347   : > { %14377 = vmatpush2.bf16.msra.mxu0 %v20065_v49  ;;  %v20125_v49 = vld [vmem:[%s22566_s24 + $0x1610] ss:$8 sps:$4 sm:$0xff]  }
 0x348   : > { %14420 = vmatpush2.bf16.msra.mxu1 %v20068_v23  ;;  %14378 = vmatprep.subr.bf16.mxu0 %v20073_v3  ;;  %v20128_v23 = vld [vmem:[%s22566_s24 + $0x1710] ss:$8 sps:$4 sm:$0xff]   ;;  %v20133_v3 = vld [vmem:[%s22566_s24 + $0x1604] ss:$8 sps:$4 sm:$0xff]  }
 0x349   : > { %14421 = vmatprep.subr.bf16.mxu1 %v20076_v36  ;;  %v20136_v36 = vld [vmem:[%s22566_s24 + $0x1704] ss:$8 sps:$4 sm:$0xff]  }
 0x34b   : > { %14379 = vmatpush2.bf16.msra.mxu0 %v20071_v52  ;;  %v20131_v52 = vld [vmem:[%s22566_s24 + $0x1600] ss:$8 sps:$4 sm:$0xff]  }
 0x34c   : > { %14422 = vmatpush2.bf16.msra.mxu1 %v20074_v53  ;;  %14380 = vmatprep.subr.bf16.mxu0 %v20079_v55  ;;  %v20134_v53 = vld [vmem:[%s22566_s24 + $0x1700] ss:$8 sps:$4 sm:$0xff]   ;;  %v20139_v55 = vld [vmem:[%s22566_s24 + $0x16f4] ss:$8 sps:$4 sm:$0xff]  }
 0x34d   : > { %14423 = vmatprep.subr.bf16.mxu1 %v20082_v37  ;;  %v20142_v37 = vld [vmem:[%s22566_s24 + $0x17f4] ss:$8 sps:$4 sm:$0xff]  }
 0x34f   : > { %14381 = vmatpush2.bf16.msra.mxu0 %v20077_v38  ;;  %v20137_v38 = vld [vmem:[%s22566_s24 + $0x16f0] ss:$8 sps:$4 sm:$0xff]  }
 0x350   : > { %14424 = vmatpush2.bf16.msra.mxu1 %v20080_v26  ;;  %14382 = vmatprep.subr.bf16.mxu0 %v20085_v27  ;;  %v20140_v26 = vld [vmem:[%s22566_s24 + $0x17f0] ss:$8 sps:$4 sm:$0xff]   ;;  %v20145_v27 = vld [vmem:[%s22566_s24 + $0x16e4] ss:$8 sps:$4 sm:$0xff]  }
 0x351   : > { %14425 = vmatprep.subr.bf16.mxu1 %v20088_v60  ;;  %v20148_v60 = vld [vmem:[%s22566_s24 + $0x17e4] ss:$8 sps:$4 sm:$0xff]  }
 0x353   : > { %14383 = vmatpush2.bf16.msra.mxu0 %v20083_v28  ;;  %v20143_v28 = vld [vmem:[%s22566_s24 + $0x16e0] ss:$8 sps:$4 sm:$0xff]  }
 0x354   : > { %14426 = vmatpush2.bf16.msra.mxu1 %v20086_v42  ;;  %14438 = vmatprep.subr.bf16.mxu0 %v20091_v45  ;;  %v20146_v42 = vld [vmem:[%s22566_s24 + $0x17e0] ss:$8 sps:$4 sm:$0xff]   ;;  %v20151_v45 = vld [vmem:[%s22566_s24 + $0x16d4] ss:$8 sps:$4 sm:$0xff]  }
 0x355   : > { %14481 = vmatprep.subr.bf16.mxu1 %v20094_v47  ;;  %v20154_v47 = vld [vmem:[%s22566_s24 + $0x17d4] ss:$8 sps:$4 sm:$0xff]  }
 0x356   : > { %v14128_v62 = vpop.f32.mrf.mxu0  ;;  %14385 = vmatmul.mubr.bf16.vlgmr.msra.gmra.mxu0 %v16747_v35  ;;  %v20152_v35 = vld [vmem:[%s22566_s24 + $0x17d0] ss:$8 sps:$4 sm:$0xff]  }
 0x357   : > { %v14171_v39 = vpop.f32.mrf.mxu1  ;;  %14428 = vmatmul.mubr.bf16.vlgmr.msra.gmra.mxu1 %v16749_v7  ;;  %v14129_v40 = vadd.f32 %v14128_v62, %v23517_v25  ;;  %14439 = vmatpush1.bf16.msra.mxu0 %v20089_v12  ;;  %v20149_v12 = vld [vmem:[%s22566_s24 + $0x16d0] ss:$8 sps:$4 sm:$0xff]   ;;  %v20157_v7 = vld [vmem:[%s22566_s24 + $0x16c4] ss:$8 sps:$4 sm:$0xff]  }
 0x358   : > { %14482 = vmatpush1.bf16.msra.mxu1 %v20092_v57  ;;  %v14130_v43 = vpop.f32.mrf.mxu0  ;;  %14440 = vmatprep.subr.bf16.mxu0 %v20097_v30  ;;  %v20160_v57 = vld [vmem:[%s22566_s24 + $0x17c4] ss:$8 sps:$4 sm:$0xff]   ;;  %v20155_v30 = vld [vmem:[%s22566_s24 + $0x16c0] ss:$8 sps:$4 sm:$0xff]  }
 0x359   : > { %v14173_v44 = vpop.f32.mrf.mxu1  ;;  %14483 = vmatprep.subr.bf16.mxu1 %v20100_v18  ;;  %v23613_v33 = vadd.f32 %v14171_v39, %v14129_v40  ;;  %v14131_v56 = vadd.f32 %v14130_v43, %v23522_v41  ;;  %14470 = vmatprep.mubr.bf16.mxu0 %v16752_v0  ;;  %v20109_v41 = vld [vmem:[%s22566_s24 + $0x1644] ss:$8 sps:$4 sm:$0xff]   ;;  %v20158_v18 = vld [vmem:[%s22566_s24 + $0x17c0] ss:$8 sps:$4 sm:$0xff]   ;;  %v20161_v0 = vld [vmem:[%s22566_s24 + $0x16b0] ss:$8 sps:$4 sm:$0xff]  }
 0x35a   : > { %14513 = vmatprep.mubr.bf16.mxu1 %v16754_v61  ;;  %v14132_v6 = vpop.f32.mrf.mxu0  ;;  %v20164_v61 = vld [vmem:[%s22566_s24 + $0x17b0] ss:$8 sps:$4 sm:$0xff]   ;;  %v20169_v62 = vld [vmem:[%s22566_s24 + $0x16a4] ss:$8 sps:$4 sm:$0xff]   ;;  %v20167_v40 = vld [vmem:[%s22566_s24 + $0x16a0] ss:$8 sps:$4 sm:$0xff]  }
 0x35b   : > { %v14175_v25 = vpop.f32.mrf.mxu1  ;;  %v23618_v8 = vadd.f32 %v14173_v44, %v14131_v56  ;;  %v14133_v9 = vadd.f32 %v14132_v6, %v23527_v32  ;;  %14441 = vmatpush1.bf16.msra.mxu0 %v20095_v22  ;;  %v20107_v32 = vld [vmem:[%s22566_s24 + $0x1640] ss:$8 sps:$4 sm:$0xff]   ;;  %v20163_v22 = vld [vmem:[%s22566_s24 + $0x16b4] ss:$8 sps:$4 sm:$0xff]   ;;  %v20172_v39 = vld [vmem:[%s22566_s24 + $0x17a4] ss:$8 sps:$4 sm:$0xff]  }
 0x35c   : > { %14484 = vmatpush1.bf16.msra.mxu1 %v20098_v50  ;;  %v14134_v10 = vpop.f32.mrf.mxu0  ;;  %14442 = vmatprep.subr.bf16.mxu0 %v20103_v54  ;;  %v20166_v50 = vld [vmem:[%s22566_s24 + $0x17b4] ss:$8 sps:$4 sm:$0xff]   ;;  %v20170_v43 = vld [vmem:[%s22566_s24 + $0x17a0] ss:$8 sps:$4 sm:$0xff]   ;;  %v20176_v56 = vld [vmem:[%s22566_s24 + $0x1790] ss:$8 sps:$4 sm:$0xff]  }
 0x35d   : > { %14485 = vmatprep.subr.bf16.mxu1 %v20106_v24  ;;  %v23623_v14 = vadd.f32 %v14175_v25, %v14133_v9  ;;  %v14135_v31 = vadd.f32 %v14134_v10, %v23530_v16  ;;  %v14177_v15 = vpop.f32.mrf.mxu1  ;;  %v20113_v16 = vld [vmem:[%s22566_s24 + $0x1630] ss:$8 sps:$4 sm:$0xff]   ;;  %v20175_v44 = vld [vmem:[%s22566_s24 + $0x1694] ss:$8 sps:$4 sm:$0xff]   ;;  %v20179_v6 = vld [vmem:[%s22566_s24 + $0x1680] ss:$8 sps:$4 sm:$0xff]  }
 0x35e   : > { %v20178_v54 = vld [vmem:[%s22566_s24 + $0x1794] ss:$8 sps:$4 sm:$0xff]   ;;  %v20173_v24 = vld [vmem:[%s22566_s24 + $0x1690] ss:$8 sps:$4 sm:$0xff]   ;;  %v20182_v25 = vld [vmem:[%s22566_s24 + $0x1780] ss:$8 sps:$4 sm:$0xff]  }
 0x35f   : > { %v23626_v46 = vadd.f32 %v14177_v15, %v14135_v31  ;;  %14443 = vmatpush1.bf16.msra.mxu0 %v20101_v4  ;;  %v20181_v4 = vld [vmem:[%s22566_s24 + $0x1684] ss:$8 sps:$4 sm:$0xff]   ;;  %v20187_v9 = vld [vmem:[%s22566_s24 + $0x1874] ss:$8 sps:$4 sm:$0xff]   ;;  %v16751_v31 = vcombine.low %v23585_v17, %v23593_v48  ;;  %v16753_v15 = vcombine.low %v23596_v51, %v23599_v20  ;;  %v20194_v17 = vld [vmem:[%s22566_s24 + $0x1960] ss:$8 sps:$4 sm:$0xff]  }
 0x360   : > { %14486 = vmatpush1.bf16.msra.mxu1 %v20104_v5  ;;  %14444 = vmatprep.subr.bf16.mxu0 %v20109_v41  ;;  %v20184_v5 = vld [vmem:[%s22566_s24 + $0x1784] ss:$8 sps:$4 sm:$0xff]   ;;  %v20190_v10 = vld [vmem:[%s22566_s24 + $0x1974] ss:$8 sps:$4 sm:$0xff]  }
 0x361   : > { %14487 = vmatprep.subr.bf16.mxu1 %v20112_v13  ;;  %v23681_v41 = vld [vmem:[%s22634_s29 + $0xc0] sm:$0xff]  ;;  %v20185_v13 = vld [vmem:[%s22566_s24 + $0x1870] ss:$8 sps:$4 sm:$0xff]  }
 0x363   : > { %14445 = vmatpush1.bf16.msra.mxu0 %v20107_v32  ;;  %v23689_v32 = vld [vmem:[%s22634_s29 + $0x6c0] sm:$0xff] }
 0x364   : > { %14488 = vmatpush1.bf16.msra.mxu1 %v20110_v1  ;;  %14446 = vmatprep.subr.bf16.mxu0 %v20115_v2  ;;  %v23692_v1 = vld [vmem:[%s22634_s29 + $0xc8] sm:$0xff]  ;;  %v16756_v48 = vcombine.high %v23681_v41, %v23689_v32 }
 0x365   : > { %14489 = vmatprep.subr.bf16.mxu1 %v20118_v29  ;;  %v23695_v2 = vld [vmem:[%s22634_s29 + $0x6c8] sm:$0xff]  ;;  %v20188_v29 = vld [vmem:[%s22566_s24 + $0x1970] ss:$8 sps:$4 sm:$0xff]  }
 0x366   : > { %v16758_v51 = vcombine.high %v23692_v1, %v23695_v2 }
 0x367   : > { %14447 = vmatpush1.bf16.msra.mxu0 %v20113_v16  ;;  %v20193_v16 = vld [vmem:[%s22566_s24 + $0x1864] ss:$8 sps:$4 sm:$0xff]  }
 0x368   : > { %14490 = vmatpush1.bf16.msra.mxu1 %v20116_v19  ;;  %14448 = vmatprep.subr.bf16.mxu0 %v20121_v21  ;;  %v20196_v19 = vld [vmem:[%s22566_s24 + $0x1964] ss:$8 sps:$4 sm:$0xff]   ;;  %v20191_v21 = vld [vmem:[%s22566_s24 + $0x1860] ss:$8 sps:$4 sm:$0xff]  }
 0x369   : > { %14491 = vmatprep.subr.bf16.mxu1 %v20124_v58 }
 0x36b   : > { %14449 = vmatpush1.bf16.msra.mxu0 %v20119_v59 }
 0x36c   : > { %14492 = vmatpush1.bf16.msra.mxu1 %v20122_v63  ;;  %14450 = vmatprep.subr.bf16.mxu0 %v20127_v34 }
 0x36d   : > { %14493 = vmatprep.subr.bf16.mxu1 %v20130_v11  ;;  %v20199_v11 = vld [vmem:[%s22566_s24 + $0x1854] ss:$8 sps:$4 sm:$0xff]  }
 0x36f   : > { %14451 = vmatpush1.bf16.msra.mxu0 %v20125_v49  ;;  %v20202_v49 = vld [vmem:[%s22566_s24 + $0x1954] ss:$8 sps:$4 sm:$0xff]  }
 0x370   : > { %14494 = vmatpush1.bf16.msra.mxu1 %v20128_v23  ;;  %14452 = vmatprep.subr.bf16.mxu0 %v20133_v3 }
 0x371   : > { %14495 = vmatprep.subr.bf16.mxu1 %v20136_v36  ;;  %v20197_v36 = vld [vmem:[%s22566_s24 + $0x1850] ss:$8 sps:$4 sm:$0xff]  }
 0x373   : > { %14453 = vmatpush1.bf16.msra.mxu0 %v20131_v52  ;;  %v20200_v52 = vld [vmem:[%s22566_s24 + $0x1950] ss:$8 sps:$4 sm:$0xff]  }
 0x374   : > { %14496 = vmatpush1.bf16.msra.mxu1 %v20134_v53  ;;  %14454 = vmatprep.subr.bf16.mxu0 %v20139_v55 }
 0x375   : > { %14497 = vmatprep.subr.bf16.mxu1 %v20142_v37 }
 0x377   : > { %14455 = vmatpush2.bf16.msra.mxu0 %v20137_v38 }
 0x378   : > { %14498 = vmatpush2.bf16.msra.mxu1 %v20140_v26  ;;  %14456 = vmatprep.subr.bf16.mxu0 %v20145_v27  ;;  %v20208_v26 = vld [vmem:[%s22566_s24 + $0x1944] ss:$8 sps:$4 sm:$0xff]  }
 0x379   : > { %14499 = vmatprep.subr.bf16.mxu1 %v20148_v60 }
 0x37b   : > { %14457 = vmatpush2.bf16.msra.mxu0 %v20143_v28 }
 0x37c   : > { %14500 = vmatpush2.bf16.msra.mxu1 %v20146_v42  ;;  %14458 = vmatprep.subr.bf16.mxu0 %v20151_v45  ;;  %v20206_v45 = vld [vmem:[%s22566_s24 + $0x1940] ss:$8 sps:$4 sm:$0xff]  }
 0x37d   : > { %14501 = vmatprep.subr.bf16.mxu1 %v20154_v47  ;;  %v20211_v47 = vld [vmem:[%s22566_s24 + $0x1834] ss:$8 sps:$4 sm:$0xff]  }
 0x37f   : > { %14459 = vmatpush2.bf16.msra.mxu0 %v20149_v12  ;;  %v20214_v12 = vld [vmem:[%s22566_s24 + $0x1934] ss:$8 sps:$4 sm:$0xff]  }
 0x380   : > { %14502 = vmatpush2.bf16.msra.mxu1 %v20152_v35  ;;  %14460 = vmatprep.subr.bf16.mxu0 %v20157_v7  ;;  %v20212_v35 = vld [vmem:[%s22566_s24 + $0x1930] ss:$8 sps:$4 sm:$0xff]   ;;  %v20217_v7 = vld [vmem:[%s22566_s24 + $0x1824] ss:$8 sps:$4 sm:$0xff]  }
 0x381   : > { %14503 = vmatprep.subr.bf16.mxu1 %v20160_v57  ;;  %v20220_v57 = vld [vmem:[%s22566_s24 + $0x1924] ss:$8 sps:$4 sm:$0xff]  }
 0x383   : > { %14461 = vmatpush2.bf16.msra.mxu0 %v20155_v30  ;;  %v20215_v30 = vld [vmem:[%s22566_s24 + $0x1820] ss:$8 sps:$4 sm:$0xff]  }
 0x384   : > { %14504 = vmatpush2.bf16.msra.mxu1 %v20158_v18  ;;  %14462 = vmatprep.subr.bf16.mxu0 %v20163_v22  ;;  %v20218_v18 = vld [vmem:[%s22566_s24 + $0x1920] ss:$8 sps:$4 sm:$0xff]   ;;  %v20223_v22 = vld [vmem:[%s22566_s24 + $0x1814] ss:$8 sps:$4 sm:$0xff]  }
 0x385   : > { %14505 = vmatprep.subr.bf16.mxu1 %v20166_v50  ;;  %v20226_v50 = vld [vmem:[%s22566_s24 + $0x1914] ss:$8 sps:$4 sm:$0xff]  }
 0x387   : > { %14463 = vmatpush2.bf16.msra.mxu0 %v20161_v0  ;;  %v20221_v0 = vld [vmem:[%s22566_s24 + $0x1810] ss:$8 sps:$4 sm:$0xff]  }
 0x388   : > { %14506 = vmatpush2.bf16.msra.mxu1 %v20164_v61  ;;  %14464 = vmatprep.subr.bf16.mxu0 %v20169_v62  ;;  %v20224_v61 = vld [vmem:[%s22566_s24 + $0x1910] ss:$8 sps:$4 sm:$0xff]   ;;  %v20229_v62 = vld [vmem:[%s22566_s24 + $0x1804] ss:$8 sps:$4 sm:$0xff]  }
 0x389   : > { %14507 = vmatprep.subr.bf16.mxu1 %v20172_v39  ;;  %v20232_v39 = vld [vmem:[%s22566_s24 + $0x1904] ss:$8 sps:$4 sm:$0xff]  }
 0x38b   : > { %14465 = vmatpush2.bf16.msra.mxu0 %v20167_v40  ;;  %v20227_v40 = vld [vmem:[%s22566_s24 + $0x1800] ss:$8 sps:$4 sm:$0xff]  }
 0x38c   : > { %14508 = vmatpush2.bf16.msra.mxu1 %v20170_v43  ;;  %14466 = vmatprep.subr.bf16.mxu0 %v20175_v44  ;;  %v20230_v43 = vld [vmem:[%s22566_s24 + $0x1900] ss:$8 sps:$4 sm:$0xff]   ;;  %v20235_v44 = vld [vmem:[%s22566_s24 + $0x18f4] ss:$8 sps:$4 sm:$0xff]  }
 0x38d   : > { %14509 = vmatprep.subr.bf16.mxu1 %v20178_v54  ;;  %v20238_v54 = vld [vmem:[%s22566_s24 + $0x19f4] ss:$8 sps:$4 sm:$0xff]  }
 0x38f   : > { %14467 = vmatpush2.bf16.msra.mxu0 %v20173_v24  ;;  %v20233_v24 = vld [vmem:[%s22566_s24 + $0x18f0] ss:$8 sps:$4 sm:$0xff]  }
 0x390   : > { %14510 = vmatpush2.bf16.msra.mxu1 %v20176_v56  ;;  %14468 = vmatprep.subr.bf16.mxu0 %v20181_v4  ;;  %v20236_v56 = vld [vmem:[%s22566_s24 + $0x19f0] ss:$8 sps:$4 sm:$0xff]   ;;  %v20241_v4 = vld [vmem:[%s22566_s24 + $0x18e4] ss:$8 sps:$4 sm:$0xff]  }
 0x391   : > { %14511 = vmatprep.subr.bf16.mxu1 %v20184_v5  ;;  %v20244_v5 = vld [vmem:[%s22566_s24 + $0x19e4] ss:$8 sps:$4 sm:$0xff]  }
 0x393   : > { %14469 = vmatpush2.bf16.msra.mxu0 %v20179_v6  ;;  %v20239_v6 = vld [vmem:[%s22566_s24 + $0x18e0] ss:$8 sps:$4 sm:$0xff]  }
 0x394   : > { %14512 = vmatpush2.bf16.msra.mxu1 %v20182_v25  ;;  %14524 = vmatprep.subr.bf16.mxu0 %v20187_v9  ;;  %v20242_v25 = vld [vmem:[%s22566_s24 + $0x19e0] ss:$8 sps:$4 sm:$0xff]   ;;  %v20247_v9 = vld [vmem:[%s22566_s24 + $0x18d4] ss:$8 sps:$4 sm:$0xff]  }
 0x395   : > { %14567 = vmatprep.subr.bf16.mxu1 %v20190_v10  ;;  %v20250_v10 = vld [vmem:[%s22566_s24 + $0x19d4] ss:$8 sps:$4 sm:$0xff]  }
 0x396   : > { %v14214_v20 = vpop.f32.mrf.mxu0  ;;  %14471 = vmatmul.mubr.bf16.vlgmr.msra.gmra.mxu0 %v16751_v31  ;;  %v20248_v31 = vld [vmem:[%s22566_s24 + $0x19d0] ss:$8 sps:$4 sm:$0xff]  }
 0x397   : > { %v14257_v58 = vpop.f32.mrf.mxu1  ;;  %14514 = vmatmul.mubr.bf16.vlgmr.msra.gmra.mxu1 %v16753_v15  ;;  %v14215_v59 = vadd.f32 %v14214_v20, %v23613_v33  ;;  %14525 = vmatpush1.bf16.msra.mxu0 %v20185_v13  ;;  %v20245_v13 = vld [vmem:[%s22566_s24 + $0x18d0] ss:$8 sps:$4 sm:$0xff]   ;;  %v20253_v15 = vld [vmem:[%s22566_s24 + $0x18c4] ss:$8 sps:$4 sm:$0xff]  }
 0x398   : > { %14568 = vmatpush1.bf16.msra.mxu1 %v20188_v29  ;;  %v14216_v63 = vpop.f32.mrf.mxu0  ;;  %14526 = vmatprep.subr.bf16.mxu0 %v20193_v16  ;;  %v20256_v29 = vld [vmem:[%s22566_s24 + $0x19c4] ss:$8 sps:$4 sm:$0xff]   ;;  %v20251_v16 = vld [vmem:[%s22566_s24 + $0x18c0] ss:$8 sps:$4 sm:$0xff]  }
 0x399   : > { %v14259_v34 = vpop.f32.mrf.mxu1  ;;  %14569 = vmatprep.subr.bf16.mxu1 %v20196_v19  ;;  %v23709_v23 = vadd.f32 %v14257_v58, %v14215_v59  ;;  %v14217_v3 = vadd.f32 %v14216_v63, %v23618_v8  ;;  %14556 = vmatprep.mubr.bf16.mxu0 %v16756_v48  ;;  %v20205_v8 = vld [vmem:[%s22566_s24 + $0x1844] ss:$8 sps:$4 sm:$0xff]   ;;  %v20254_v19 = vld [vmem:[%s22566_s24 + $0x19c0] ss:$8 sps:$4 sm:$0xff]   ;;  %v20257_v48 = vld [vmem:[%s22566_s24 + $0x18b0] ss:$8 sps:$4 sm:$0xff]  }
 0x39a   : > { %14599 = vmatprep.mubr.bf16.mxu1 %v16758_v51  ;;  %v14218_v53 = vpop.f32.mrf.mxu0  ;;  %v20260_v51 = vld [vmem:[%s22566_s24 + $0x19b0] ss:$8 sps:$4 sm:$0xff]   ;;  %v20265_v20 = vld [vmem:[%s22566_s24 + $0x18a4] ss:$8 sps:$4 sm:$0xff]   ;;  %v20263_v59 = vld [vmem:[%s22566_s24 + $0x18a0] ss:$8 sps:$4 sm:$0xff]  }
 0x39b   : > { %v14261_v33 = vpop.f32.mrf.mxu1  ;;  %v23714_v55 = vadd.f32 %v14259_v34, %v14217_v3  ;;  %v14219_v37 = vadd.f32 %v14218_v53, %v23623_v14  ;;  %14527 = vmatpush1.bf16.msra.mxu0 %v20191_v21  ;;  %v20203_v14 = vld [vmem:[%s22566_s24 + $0x1840] ss:$8 sps:$4 sm:$0xff]   ;;  %v20259_v21 = vld [vmem:[%s22566_s24 + $0x18b4] ss:$8 sps:$4 sm:$0xff]   ;;  %v20268_v58 = vld [vmem:[%s22566_s24 + $0x19a4] ss:$8 sps:$4 sm:$0xff]  }
 0x39c   : > { %14570 = vmatpush1.bf16.msra.mxu1 %v20194_v17  ;;  %v14220_v38 = vpop.f32.mrf.mxu0  ;;  %14528 = vmatprep.subr.bf16.mxu0 %v20199_v11  ;;  %v20262_v17 = vld [vmem:[%s22566_s24 + $0x19b4] ss:$8 sps:$4 sm:$0xff]   ;;  %v20266_v63 = vld [vmem:[%s22566_s24 + $0x19a0] ss:$8 sps:$4 sm:$0xff]   ;;  %v20272_v3 = vld [vmem:[%s22566_s24 + $0x1990] ss:$8 sps:$4 sm:$0xff]  }
 0x39d   : > { %14571 = vmatprep.subr.bf16.mxu1 %v20202_v49  ;;  %v23719_v27 = vadd.f32 %v14261_v33, %v14219_v37  ;;  %v14221_v60 = vadd.f32 %v14220_v38, %v23626_v46  ;;  %v14263_v28 = vpop.f32.mrf.mxu1  ;;  %v20209_v46 = vld [vmem:[%s22566_s24 + $0x1830] ss:$8 sps:$4 sm:$0xff]   ;;  %v20271_v34 = vld [vmem:[%s22566_s24 + $0x1894] ss:$8 sps:$4 sm:$0xff]   ;;  %v20275_v53 = vld [vmem:[%s22566_s24 + $0x1880] ss:$8 sps:$4 sm:$0xff]  }
 0x39e   : > { %v20274_v11 = vld [vmem:[%s22566_s24 + $0x1994] ss:$8 sps:$4 sm:$0xff]   ;;  %v20269_v49 = vld [vmem:[%s22566_s24 + $0x1890] ss:$8 sps:$4 sm:$0xff]   ;;  %v20278_v33 = vld [vmem:[%s22566_s24 + $0x1980] ss:$8 sps:$4 sm:$0xff]  }
 0x39f   : > { %v23722_v42 = vadd.f32 %v14263_v28, %v14221_v60  ;;  %14529 = vmatpush1.bf16.msra.mxu0 %v20197_v36  ;;  %v20277_v36 = vld [vmem:[%s22566_s24 + $0x1884] ss:$8 sps:$4 sm:$0xff]   ;;  %v20283_v37 = vld [vmem:[%s22566_s24 + $0x1a74] ss:$8 sps:$4 sm:$0xff]   ;;  %v16755_v60 = vcombine.low %v23681_v41, %v23689_v32  ;;  %v16757_v28 = vcombine.low %v23692_v1, %v23695_v2  ;;  %v20290_v41 = vld [vmem:[%s22566_s24 + $0x1b60] ss:$8 sps:$4 sm:$0xff]  }
 0x3a0   : > { %14572 = vmatpush1.bf16.msra.mxu1 %v20200_v52  ;;  %14530 = vmatprep.subr.bf16.mxu0 %v20205_v8  ;;  %v20280_v52 = vld [vmem:[%s22566_s24 + $0x1984] ss:$8 sps:$4 sm:$0xff]   ;;  %v20286_v38 = vld [vmem:[%s22566_s24 + $0x1b74] ss:$8 sps:$4 sm:$0xff]  }
 0x3a1   : > { %14573 = vmatprep.subr.bf16.mxu1 %v20208_v26  ;;  %v23777_v8 = vld [vmem:[%s22634_s29 + $0xd0] sm:$0xff] }
 0x3a2   : > { %v20281_v26 = vld [vmem:[%s22566_s24 + $0x1a70] ss:$8 sps:$4 sm:$0xff]  }
 0x3a3   : > { %14531 = vmatpush1.bf16.msra.mxu0 %v20203_v14  ;;  %v23785_v14 = vld [vmem:[%s22634_s29 + $0x6d0] sm:$0xff] }
 0x3a4   : > { %14574 = vmatpush1.bf16.msra.mxu1 %v20206_v45  ;;  %14532 = vmatprep.subr.bf16.mxu0 %v20211_v47  ;;  %v23788_v45 = vld [vmem:[%s22634_s29 + $0xd8] sm:$0xff]  ;;  %v16760_v32 = vcombine.high %v23777_v8, %v23785_v14 }
 0x3a5   : > { %14575 = vmatprep.subr.bf16.mxu1 %v20214_v12  ;;  %v23791_v47 = vld [vmem:[%s22634_s29 + $0x6d8] sm:$0xff] }
 0x3a6   : > { %v20284_v12 = vld [vmem:[%s22566_s24 + $0x1b70] ss:$8 sps:$4 sm:$0xff]   ;;  %v16762_v1 = vcombine.high %v23788_v45, %v23791_v47 }
 0x3a7   : > { %14533 = vmatpush1.bf16.msra.mxu0 %v20209_v46  ;;  %v20289_v46 = vld [vmem:[%s22566_s24 + $0x1a64] ss:$8 sps:$4 sm:$0xff]  }
 0x3a8   : > { %14576 = vmatpush1.bf16.msra.mxu1 %v20212_v35  ;;  %14534 = vmatprep.subr.bf16.mxu0 %v20217_v7  ;;  %v20292_v35 = vld [vmem:[%s22566_s24 + $0x1b64] ss:$8 sps:$4 sm:$0xff]   ;;  %v20287_v7 = vld [vmem:[%s22566_s24 + $0x1a60] ss:$8 sps:$4 sm:$0xff]  }
 0x3a9   : > { %14577 = vmatprep.subr.bf16.mxu1 %v20220_v57 }
 0x3ab   : > { %14535 = vmatpush1.bf16.msra.mxu0 %v20215_v30 }
 0x3ac   : > { %14578 = vmatpush1.bf16.msra.mxu1 %v20218_v18  ;;  %14536 = vmatprep.subr.bf16.mxu0 %v20223_v22 }
 0x3ad   : > { %14579 = vmatprep.subr.bf16.mxu1 %v20226_v50  ;;  %v20295_v50 = vld [vmem:[%s22566_s24 + $0x1a54] ss:$8 sps:$4 sm:$0xff]  }
 0x3af   : > { %14537 = vmatpush1.bf16.msra.mxu0 %v20221_v0  ;;  %v20298_v0 = vld [vmem:[%s22566_s24 + $0x1b54] ss:$8 sps:$4 sm:$0xff]  }
 0x3b0   : > { %14580 = vmatpush1.bf16.msra.mxu1 %v20224_v61  ;;  %14538 = vmatprep.subr.bf16.mxu0 %v20229_v62 }
 0x3b1   : > { %14581 = vmatprep.subr.bf16.mxu1 %v20232_v39  ;;  %v20293_v39 = vld [vmem:[%s22566_s24 + $0x1a50] ss:$8 sps:$4 sm:$0xff]  }
 0x3b3   : > { %14539 = vmatpush1.bf16.msra.mxu0 %v20227_v40  ;;  %v20296_v40 = vld [vmem:[%s22566_s24 + $0x1b50] ss:$8 sps:$4 sm:$0xff]  }
 0x3b4   : > { %14582 = vmatpush1.bf16.msra.mxu1 %v20230_v43  ;;  %14540 = vmatprep.subr.bf16.mxu0 %v20235_v44 }
 0x3b5   : > { %14583 = vmatprep.subr.bf16.mxu1 %v20238_v54 }
 0x3b7   : > { %14541 = vmatpush2.bf16.msra.mxu0 %v20233_v24 }
 0x3b8   : > { %14584 = vmatpush2.bf16.msra.mxu1 %v20236_v56  ;;  %14542 = vmatprep.subr.bf16.mxu0 %v20241_v4  ;;  %v20304_v56 = vld [vmem:[%s22566_s24 + $0x1b44] ss:$8 sps:$4 sm:$0xff]  }
 0x3b9   : > { %14585 = vmatprep.subr.bf16.mxu1 %v20244_v5 }
 0x3bb   : > { %14543 = vmatpush2.bf16.msra.mxu0 %v20239_v6 }
 0x3bc   : > { %14586 = vmatpush2.bf16.msra.mxu1 %v20242_v25  ;;  %14544 = vmatprep.subr.bf16.mxu0 %v20247_v9  ;;  %v20302_v9 = vld [vmem:[%s22566_s24 + $0x1b40] ss:$8 sps:$4 sm:$0xff]  }
 0x3bd   : > { %14587 = vmatprep.subr.bf16.mxu1 %v20250_v10  ;;  %v20307_v10 = vld [vmem:[%s22566_s24 + $0x1a34] ss:$8 sps:$4 sm:$0xff]  }
 0x3bf   : > { %14545 = vmatpush2.bf16.msra.mxu0 %v20245_v13  ;;  %v20310_v13 = vld [vmem:[%s22566_s24 + $0x1b34] ss:$8 sps:$4 sm:$0xff]  }
 0x3c0   : > { %14588 = vmatpush2.bf16.msra.mxu1 %v20248_v31  ;;  %14546 = vmatprep.subr.bf16.mxu0 %v20253_v15  ;;  %v20308_v31 = vld [vmem:[%s22566_s24 + $0x1b30] ss:$8 sps:$4 sm:$0xff]   ;;  %v20313_v15 = vld [vmem:[%s22566_s24 + $0x1a24] ss:$8 sps:$4 sm:$0xff]  }
 0x3c1   : > { %14589 = vmatprep.subr.bf16.mxu1 %v20256_v29  ;;  %v20316_v29 = vld [vmem:[%s22566_s24 + $0x1b24] ss:$8 sps:$4 sm:$0xff]  }
 0x3c3   : > { %14547 = vmatpush2.bf16.msra.mxu0 %v20251_v16  ;;  %v20311_v16 = vld [vmem:[%s22566_s24 + $0x1a20] ss:$8 sps:$4 sm:$0xff]  }
 0x3c4   : > { %14590 = vmatpush2.bf16.msra.mxu1 %v20254_v19  ;;  %14548 = vmatprep.subr.bf16.mxu0 %v20259_v21  ;;  %v20314_v19 = vld [vmem:[%s22566_s24 + $0x1b20] ss:$8 sps:$4 sm:$0xff]   ;;  %v20319_v21 = vld [vmem:[%s22566_s24 + $0x1a14] ss:$8 sps:$4 sm:$0xff]  }
 0x3c5   : > { %14591 = vmatprep.subr.bf16.mxu1 %v20262_v17  ;;  %v20322_v17 = vld [vmem:[%s22566_s24 + $0x1b14] ss:$8 sps:$4 sm:$0xff]  }
 0x3c7   : > { %14549 = vmatpush2.bf16.msra.mxu0 %v20257_v48  ;;  %v20317_v48 = vld [vmem:[%s22566_s24 + $0x1a10] ss:$8 sps:$4 sm:$0xff]  }
 0x3c8   : > { %14592 = vmatpush2.bf16.msra.mxu1 %v20260_v51  ;;  %14550 = vmatprep.subr.bf16.mxu0 %v20265_v20  ;;  %v20320_v51 = vld [vmem:[%s22566_s24 + $0x1b10] ss:$8 sps:$4 sm:$0xff]   ;;  %v20325_v20 = vld [vmem:[%s22566_s24 + $0x1a04] ss:$8 sps:$4 sm:$0xff]  }
 0x3c9   : > { %14593 = vmatprep.subr.bf16.mxu1 %v20268_v58  ;;  %v20328_v58 = vld [vmem:[%s22566_s24 + $0x1b04] ss:$8 sps:$4 sm:$0xff]  }
 0x3cb   : > { %14551 = vmatpush2.bf16.msra.mxu0 %v20263_v59  ;;  %v20323_v59 = vld [vmem:[%s22566_s24 + $0x1a00] ss:$8 sps:$4 sm:$0xff]  }
 0x3cc   : > { %14594 = vmatpush2.bf16.msra.mxu1 %v20266_v63  ;;  %14552 = vmatprep.subr.bf16.mxu0 %v20271_v34  ;;  %v20326_v63 = vld [vmem:[%s22566_s24 + $0x1b00] ss:$8 sps:$4 sm:$0xff]   ;;  %v20331_v34 = vld [vmem:[%s22566_s24 + $0x1af4] ss:$8 sps:$4 sm:$0xff]  }
 0x3cd   : > { %14595 = vmatprep.subr.bf16.mxu1 %v20274_v11  ;;  %v20334_v11 = vld [vmem:[%s22566_s24 + $0x1bf4] ss:$8 sps:$4 sm:$0xff]  }
 0x3cf   : > { %14553 = vmatpush2.bf16.msra.mxu0 %v20269_v49  ;;  %v20329_v49 = vld [vmem:[%s22566_s24 + $0x1af0] ss:$8 sps:$4 sm:$0xff]  }
 0x3d0   : > { %14596 = vmatpush2.bf16.msra.mxu1 %v20272_v3  ;;  %14554 = vmatprep.subr.bf16.mxu0 %v20277_v36  ;;  %v20332_v3 = vld [vmem:[%s22566_s24 + $0x1bf0] ss:$8 sps:$4 sm:$0xff]   ;;  %v20337_v36 = vld [vmem:[%s22566_s24 + $0x1ae4] ss:$8 sps:$4 sm:$0xff]  }
 0x3d1   : > { %14597 = vmatprep.subr.bf16.mxu1 %v20280_v52  ;;  %v20340_v52 = vld [vmem:[%s22566_s24 + $0x1be4] ss:$8 sps:$4 sm:$0xff]  }
 0x3d3   : > { %14555 = vmatpush2.bf16.msra.mxu0 %v20275_v53  ;;  %v20335_v53 = vld [vmem:[%s22566_s24 + $0x1ae0] ss:$8 sps:$4 sm:$0xff]  }
 0x3d4   : > { %14598 = vmatpush2.bf16.msra.mxu1 %v20278_v33  ;;  %14610 = vmatprep.subr.bf16.mxu0 %v20283_v37  ;;  %v20338_v33 = vld [vmem:[%s22566_s24 + $0x1be0] ss:$8 sps:$4 sm:$0xff]   ;;  %v20343_v37 = vld [vmem:[%s22566_s24 + $0x1ad4] ss:$8 sps:$4 sm:$0xff]  }
 0x3d5   : > { %14653 = vmatprep.subr.bf16.mxu1 %v20286_v38  ;;  %v20346_v38 = vld [vmem:[%s22566_s24 + $0x1bd4] ss:$8 sps:$4 sm:$0xff]  }
 0x3d6   : > { %v14300_v2 = vpop.f32.mrf.mxu0  ;;  %14557 = vmatmul.mubr.bf16.vlgmr.msra.gmra.mxu0 %v16755_v60  ;;  %v20344_v60 = vld [vmem:[%s22566_s24 + $0x1bd0] ss:$8 sps:$4 sm:$0xff]  }
 0x3d7   : > { %v14343_v57 = vpop.f32.mrf.mxu1  ;;  %14600 = vmatmul.mubr.bf16.vlgmr.msra.gmra.mxu1 %v16757_v28  ;;  %v14301_v30 = vadd.f32 %v14300_v2, %v23709_v23  ;;  %14611 = vmatpush1.bf16.msra.mxu0 %v20281_v26  ;;  %v20341_v26 = vld [vmem:[%s22566_s24 + $0x1ad0] ss:$8 sps:$4 sm:$0xff]   ;;  %v20349_v28 = vld [vmem:[%s22566_s24 + $0x1ac4] ss:$8 sps:$4 sm:$0xff]  }
 0x3d8   : > { %14654 = vmatpush1.bf16.msra.mxu1 %v20284_v12  ;;  %v14302_v18 = vpop.f32.mrf.mxu0  ;;  %14612 = vmatprep.subr.bf16.mxu0 %v20289_v46  ;;  %v20352_v12 = vld [vmem:[%s22566_s24 + $0x1bc4] ss:$8 sps:$4 sm:$0xff]   ;;  %v20347_v46 = vld [vmem:[%s22566_s24 + $0x1ac0] ss:$8 sps:$4 sm:$0xff]  }
 0x3d9   : > { %v14345_v22 = vpop.f32.mrf.mxu1  ;;  %14655 = vmatprep.subr.bf16.mxu1 %v20292_v35  ;;  %v23805_v61 = vadd.f32 %v14343_v57, %v14301_v30  ;;  %v14303_v62 = vadd.f32 %v14302_v18, %v23714_v55  ;;  %14642 = vmatprep.mubr.bf16.mxu0 %v16760_v32  ;;  %v20301_v55 = vld [vmem:[%s22566_s24 + $0x1a44] ss:$8 sps:$4 sm:$0xff]   ;;  %v20350_v35 = vld [vmem:[%s22566_s24 + $0x1bc0] ss:$8 sps:$4 sm:$0xff]   ;;  %v20353_v32 = vld [vmem:[%s22566_s24 + $0x1ab0] ss:$8 sps:$4 sm:$0xff]  }
 0x3da   : > { %14685 = vmatprep.mubr.bf16.mxu1 %v16762_v1  ;;  %v14304_v43 = vpop.f32.mrf.mxu0  ;;  %v20356_v1 = vld [vmem:[%s22566_s24 + $0x1bb0] ss:$8 sps:$4 sm:$0xff]   ;;  %v20361_v2 = vld [vmem:[%s22566_s24 + $0x1aa4] ss:$8 sps:$4 sm:$0xff]   ;;  %v20359_v30 = vld [vmem:[%s22566_s24 + $0x1aa0] ss:$8 sps:$4 sm:$0xff]  }
 0x3db   : > { %v14347_v23 = vpop.f32.mrf.mxu1  ;;  %v23810_v44 = vadd.f32 %v14345_v22, %v14303_v62  ;;  %v14305_v54 = vadd.f32 %v14304_v43, %v23719_v27  ;;  %14613 = vmatpush1.bf16.msra.mxu0 %v20287_v7  ;;  %v20299_v27 = vld [vmem:[%s22566_s24 + $0x1a40] ss:$8 sps:$4 sm:$0xff]   ;;  %v20355_v7 = vld [vmem:[%s22566_s24 + $0x1ab4] ss:$8 sps:$4 sm:$0xff]   ;;  %v20364_v57 = vld [vmem:[%s22566_s24 + $0x1ba4] ss:$8 sps:$4 sm:$0xff]  }
 0x3dc   : > { %14656 = vmatpush1.bf16.msra.mxu1 %v20290_v41  ;;  %v14306_v24 = vpop.f32.mrf.mxu0  ;;  %14614 = vmatprep.subr.bf16.mxu0 %v20295_v50  ;;  %v20358_v41 = vld [vmem:[%s22566_s24 + $0x1bb4] ss:$8 sps:$4 sm:$0xff]   ;;  %v20362_v18 = vld [vmem:[%s22566_s24 + $0x1ba0] ss:$8 sps:$4 sm:$0xff]   ;;  %v20368_v62 = vld [vmem:[%s22566_s24 + $0x1b90] ss:$8 sps:$4 sm:$0xff]  }
 0x3dd   : > { %14657 = vmatprep.subr.bf16.mxu1 %v20298_v0  ;;  %v23815_v4 = vadd.f32 %v14347_v23, %v14305_v54  ;;  %v14307_v5 = vadd.f32 %v14306_v24, %v23722_v42  ;;  %v14349_v6 = vpop.f32.mrf.mxu1  ;;  %v20305_v42 = vld [vmem:[%s22566_s24 + $0x1a30] ss:$8 sps:$4 sm:$0xff]   ;;  %v20367_v22 = vld [vmem:[%s22566_s24 + $0x1a94] ss:$8 sps:$4 sm:$0xff]   ;;  %v20371_v43 = vld [vmem:[%s22566_s24 + $0x1a80] ss:$8 sps:$4 sm:$0xff]  }
 0x3de   : > { %v20370_v50 = vld [vmem:[%s22566_s24 + $0x1b94] ss:$8 sps:$4 sm:$0xff]   ;;  %v20365_v0 = vld [vmem:[%s22566_s24 + $0x1a90] ss:$8 sps:$4 sm:$0xff]   ;;  %v20374_v23 = vld [vmem:[%s22566_s24 + $0x1b80] ss:$8 sps:$4 sm:$0xff]  }
 0x3df   : > { %v23818_v25 = vadd.f32 %v14349_v6, %v14307_v5  ;;  %14615 = vmatpush1.bf16.msra.mxu0 %v20293_v39  ;;  %v20373_v39 = vld [vmem:[%s22566_s24 + $0x1a84] ss:$8 sps:$4 sm:$0xff]   ;;  %v20379_v54 = vld [vmem:[%s22566_s24 + $0x1c74] ss:$8 sps:$4 sm:$0xff]   ;;  %v16759_v5 = vcombine.low %v23777_v8, %v23785_v14  ;;  %v16761_v6 = vcombine.low %v23788_v45, %v23791_v47  ;;  %v20386_v8 = vld [vmem:[%s22566_s24 + $0x1d60] ss:$8 sps:$4 sm:$0xff]  }
 0x3e0   : > { %14658 = vmatpush1.bf16.msra.mxu1 %v20296_v40  ;;  %14616 = vmatprep.subr.bf16.mxu0 %v20301_v55  ;;  %v20376_v40 = vld [vmem:[%s22566_s24 + $0x1b84] ss:$8 sps:$4 sm:$0xff]   ;;  %v20382_v24 = vld [vmem:[%s22566_s24 + $0x1d74] ss:$8 sps:$4 sm:$0xff]  }
 0x3e1   : > { %14659 = vmatprep.subr.bf16.mxu1 %v20304_v56  ;;  %v23873_v55 = vld [vmem:[%s22634_s29 + $0xe0] sm:$0xff]  ;;  %v20377_v56 = vld [vmem:[%s22566_s24 + $0x1c70] ss:$8 sps:$4 sm:$0xff]  }
 0x3e3   : > { %14617 = vmatpush1.bf16.msra.mxu0 %v20299_v27  ;;  %v23881_v27 = vld [vmem:[%s22634_s29 + $0x6e0] sm:$0xff] }
 0x3e4   : > { %14660 = vmatpush1.bf16.msra.mxu1 %v20302_v9  ;;  %14618 = vmatprep.subr.bf16.mxu0 %v20307_v10  ;;  %v23884_v9 = vld [vmem:[%s22634_s29 + $0xe8] sm:$0xff]  ;;  %v16764_v14 = vcombine.high %v23873_v55, %v23881_v27 }
 0x3e5   : > { %14661 = vmatprep.subr.bf16.mxu1 %v20310_v13  ;;  %v23887_v10 = vld [vmem:[%s22634_s29 + $0x6e8] sm:$0xff]  ;;  %v20380_v13 = vld [vmem:[%s22566_s24 + $0x1d70] ss:$8 sps:$4 sm:$0xff]  }
 0x3e6   : > { %v16766_v45 = vcombine.high %v23884_v9, %v23887_v10 }
 0x3e7   : > { %14619 = vmatpush1.bf16.msra.mxu0 %v20305_v42  ;;  %v20385_v42 = vld [vmem:[%s22566_s24 + $0x1c64] ss:$8 sps:$4 sm:$0xff]  }
 0x3e8   : > { %14662 = vmatpush1.bf16.msra.mxu1 %v20308_v31  ;;  %14620 = vmatprep.subr.bf16.mxu0 %v20313_v15  ;;  %v20388_v31 = vld [vmem:[%s22566_s24 + $0x1d64] ss:$8 sps:$4 sm:$0xff]   ;;  %v20383_v15 = vld [vmem:[%s22566_s24 + $0x1c60] ss:$8 sps:$4 sm:$0xff]  }
 0x3e9   : > { %14663 = vmatprep.subr.bf16.mxu1 %v20316_v29 }
 0x3eb   : > { %14621 = vmatpush1.bf16.msra.mxu0 %v20311_v16 }
 0x3ec   : > { %14664 = vmatpush1.bf16.msra.mxu1 %v20314_v19  ;;  %14622 = vmatprep.subr.bf16.mxu0 %v20319_v21 }
 0x3ed   : > { %14665 = vmatprep.subr.bf16.mxu1 %v20322_v17  ;;  %v20391_v17 = vld [vmem:[%s22566_s24 + $0x1c54] ss:$8 sps:$4 sm:$0xff]  }
 0x3ef   : > { %14623 = vmatpush1.bf16.msra.mxu0 %v20317_v48  ;;  %v20394_v48 = vld [vmem:[%s22566_s24 + $0x1d54] ss:$8 sps:$4 sm:$0xff]  }
 0x3f0   : > { %14666 = vmatpush1.bf16.msra.mxu1 %v20320_v51  ;;  %14624 = vmatprep.subr.bf16.mxu0 %v20325_v20 }
 0x3f1   : > { %14667 = vmatprep.subr.bf16.mxu1 %v20328_v58  ;;  %v20389_v58 = vld [vmem:[%s22566_s24 + $0x1c50] ss:$8 sps:$4 sm:$0xff]  }
 0x3f3   : > { %14625 = vmatpush1.bf16.msra.mxu0 %v20323_v59  ;;  %v20392_v59 = vld [vmem:[%s22566_s24 + $0x1d50] ss:$8 sps:$4 sm:$0xff]  }
 0x3f4   : > { %14668 = vmatpush1.bf16.msra.mxu1 %v20326_v63  ;;  %14626 = vmatprep.subr.bf16.mxu0 %v20331_v34 }
 0x3f5   : > { %14669 = vmatprep.subr.bf16.mxu1 %v20334_v11 }
 0x3f7   : > { %14627 = vmatpush2.bf16.msra.mxu0 %v20329_v49 }
 0x3f8   : > { %14670 = vmatpush2.bf16.msra.mxu1 %v20332_v3  ;;  %14628 = vmatprep.subr.bf16.mxu0 %v20337_v36  ;;  %v20400_v3 = vld [vmem:[%s22566_s24 + $0x1d44] ss:$8 sps:$4 sm:$0xff]  }
 0x3f9   : > { %14671 = vmatprep.subr.bf16.mxu1 %v20340_v52 }
 0x3fb   : > { %14629 = vmatpush2.bf16.msra.mxu0 %v20335_v53 }
 0x3fc   : > { %14672 = vmatpush2.bf16.msra.mxu1 %v20338_v33  ;;  %14630 = vmatprep.subr.bf16.mxu0 %v20343_v37  ;;  %v20398_v37 = vld [vmem:[%s22566_s24 + $0x1d40] ss:$8 sps:$4 sm:$0xff]  }
 0x3fd   : > { %14673 = vmatprep.subr.bf16.mxu1 %v20346_v38  ;;  %v20403_v38 = vld [vmem:[%s22566_s24 + $0x1c34] ss:$8 sps:$4 sm:$0xff]  }
 0x3ff   : > { %14631 = vmatpush2.bf16.msra.mxu0 %v20341_v26  ;;  %v20406_v26 = vld [vmem:[%s22566_s24 + $0x1d34] ss:$8 sps:$4 sm:$0xff]  }
 0x400   : > { %14674 = vmatpush2.bf16.msra.mxu1 %v20344_v60  ;;  %14632 = vmatprep.subr.bf16.mxu0 %v20349_v28  ;;  %v20404_v60 = vld [vmem:[%s22566_s24 + $0x1d30] ss:$8 sps:$4 sm:$0xff]   ;;  %v20409_v28 = vld [vmem:[%s22566_s24 + $0x1c24] ss:$8 sps:$4 sm:$0xff]  }
 0x401   : > { %14675 = vmatprep.subr.bf16.mxu1 %v20352_v12  ;;  %v20412_v12 = vld [vmem:[%s22566_s24 + $0x1d24] ss:$8 sps:$4 sm:$0xff]  }
 0x403   : > { %14633 = vmatpush2.bf16.msra.mxu0 %v20347_v46  ;;  %v20407_v46 = vld [vmem:[%s22566_s24 + $0x1c20] ss:$8 sps:$4 sm:$0xff]  }
 0x404   : > { %14676 = vmatpush2.bf16.msra.mxu1 %v20350_v35  ;;  %14634 = vmatprep.subr.bf16.mxu0 %v20355_v7  ;;  %v20410_v35 = vld [vmem:[%s22566_s24 + $0x1d20] ss:$8 sps:$4 sm:$0xff]   ;;  %v20415_v7 = vld [vmem:[%s22566_s24 + $0x1c14] ss:$8 sps:$4 sm:$0xff]  }
 0x405   : > { %14677 = vmatprep.subr.bf16.mxu1 %v20358_v41  ;;  %v20418_v41 = vld [vmem:[%s22566_s24 + $0x1d14] ss:$8 sps:$4 sm:$0xff]  }
 0x407   : > { %14635 = vmatpush2.bf16.msra.mxu0 %v20353_v32  ;;  %v20413_v32 = vld [vmem:[%s22566_s24 + $0x1c10] ss:$8 sps:$4 sm:$0xff]  }
 0x408   : > { %14678 = vmatpush2.bf16.msra.mxu1 %v20356_v1  ;;  %14636 = vmatprep.subr.bf16.mxu0 %v20361_v2  ;;  %v20416_v1 = vld [vmem:[%s22566_s24 + $0x1d10] ss:$8 sps:$4 sm:$0xff]   ;;  %v20421_v2 = vld [vmem:[%s22566_s24 + $0x1c04] ss:$8 sps:$4 sm:$0xff]  }
 0x409   : > { %14679 = vmatprep.subr.bf16.mxu1 %v20364_v57  ;;  %v20424_v57 = vld [vmem:[%s22566_s24 + $0x1d04] ss:$8 sps:$4 sm:$0xff]  }
 0x40b   : > { %14637 = vmatpush2.bf16.msra.mxu0 %v20359_v30  ;;  %v20419_v30 = vld [vmem:[%s22566_s24 + $0x1c00] ss:$8 sps:$4 sm:$0xff]  }
 0x40c   : > { %14680 = vmatpush2.bf16.msra.mxu1 %v20362_v18  ;;  %14638 = vmatprep.subr.bf16.mxu0 %v20367_v22  ;;  %v20422_v18 = vld [vmem:[%s22566_s24 + $0x1d00] ss:$8 sps:$4 sm:$0xff]   ;;  %v20427_v22 = vld [vmem:[%s22566_s24 + $0x1cf4] ss:$8 sps:$4 sm:$0xff]  }
 0x40d   : > { %14681 = vmatprep.subr.bf16.mxu1 %v20370_v50  ;;  %v20430_v50 = vld [vmem:[%s22566_s24 + $0x1df4] ss:$8 sps:$4 sm:$0xff]  }
 0x40f   : > { %14639 = vmatpush2.bf16.msra.mxu0 %v20365_v0  ;;  %v20425_v0 = vld [vmem:[%s22566_s24 + $0x1cf0] ss:$8 sps:$4 sm:$0xff]  }
 0x410   : > { %14682 = vmatpush2.bf16.msra.mxu1 %v20368_v62  ;;  %14640 = vmatprep.subr.bf16.mxu0 %v20373_v39  ;;  %v20428_v62 = vld [vmem:[%s22566_s24 + $0x1df0] ss:$8 sps:$4 sm:$0xff]   ;;  %v20433_v39 = vld [vmem:[%s22566_s24 + $0x1ce4] ss:$8 sps:$4 sm:$0xff]  }
 0x411   : > { %14683 = vmatprep.subr.bf16.mxu1 %v20376_v40  ;;  %v20436_v40 = vld [vmem:[%s22566_s24 + $0x1de4] ss:$8 sps:$4 sm:$0xff]  }
 0x413   : > { %14641 = vmatpush2.bf16.msra.mxu0 %v20371_v43  ;;  %v20431_v43 = vld [vmem:[%s22566_s24 + $0x1ce0] ss:$8 sps:$4 sm:$0xff]  }
 0x414   : > { %14684 = vmatpush2.bf16.msra.mxu1 %v20374_v23  ;;  %14696 = vmatprep.subr.bf16.mxu0 %v20379_v54  ;;  %v20434_v23 = vld [vmem:[%s22566_s24 + $0x1de0] ss:$8 sps:$4 sm:$0xff]   ;;  %v20439_v54 = vld [vmem:[%s22566_s24 + $0x1cd4] ss:$8 sps:$4 sm:$0xff]  }
 0x415   : > { %14739 = vmatprep.subr.bf16.mxu1 %v20382_v24  ;;  %v20442_v24 = vld [vmem:[%s22566_s24 + $0x1dd4] ss:$8 sps:$4 sm:$0xff]  }
 0x416   : > { %v14386_v47 = vpop.f32.mrf.mxu0  ;;  %14643 = vmatmul.mubr.bf16.vlgmr.msra.gmra.mxu0 %v16759_v5  ;;  %v20440_v5 = vld [vmem:[%s22566_s24 + $0x1dd0] ss:$8 sps:$4 sm:$0xff]  }
 0x417   : > { %v14429_v29 = vpop.f32.mrf.mxu1  ;;  %14686 = vmatmul.mubr.bf16.vlgmr.msra.gmra.mxu1 %v16761_v6  ;;  %v14387_v16 = vadd.f32 %v14386_v47, %v23805_v61  ;;  %14697 = vmatpush1.bf16.msra.mxu0 %v20377_v56  ;;  %v20437_v56 = vld [vmem:[%s22566_s24 + $0x1cd0] ss:$8 sps:$4 sm:$0xff]   ;;  %v20445_v6 = vld [vmem:[%s22566_s24 + $0x1cc4] ss:$8 sps:$4 sm:$0xff]  }
 0x418   : > { %14740 = vmatpush1.bf16.msra.mxu1 %v20380_v13  ;;  %v14388_v19 = vpop.f32.mrf.mxu0  ;;  %14698 = vmatprep.subr.bf16.mxu0 %v20385_v42  ;;  %v20448_v13 = vld [vmem:[%s22566_s24 + $0x1dc4] ss:$8 sps:$4 sm:$0xff]   ;;  %v20443_v42 = vld [vmem:[%s22566_s24 + $0x1cc0] ss:$8 sps:$4 sm:$0xff]  }
 0x419   : > { %v14431_v21 = vpop.f32.mrf.mxu1  ;;  %14741 = vmatprep.subr.bf16.mxu1 %v20388_v31  ;;  %v23901_v51 = vadd.f32 %v14429_v29, %v14387_v16  ;;  %v14389_v20 = vadd.f32 %v14388_v19, %v23810_v44  ;;  %14728 = vmatprep.mubr.bf16.mxu0 %v16764_v14  ;;  %v20397_v44 = vld [vmem:[%s22566_s24 + $0x1c44] ss:$8 sps:$4 sm:$0xff]   ;;  %v20446_v31 = vld [vmem:[%s22566_s24 + $0x1dc0] ss:$8 sps:$4 sm:$0xff]   ;;  %v20449_v14 = vld [vmem:[%s22566_s24 + $0x1cb0] ss:$8 sps:$4 sm:$0xff]  }
 0x41a   : > { %14771 = vmatprep.mubr.bf16.mxu1 %v16766_v45  ;;  %v14390_v63 = vpop.f32.mrf.mxu0  ;;  %v20452_v45 = vld [vmem:[%s22566_s24 + $0x1db0] ss:$8 sps:$4 sm:$0xff]   ;;  %v20457_v47 = vld [vmem:[%s22566_s24 + $0x1ca4] ss:$8 sps:$4 sm:$0xff]   ;;  %v20455_v16 = vld [vmem:[%s22566_s24 + $0x1ca0] ss:$8 sps:$4 sm:$0xff]  }
 0x41b   : > { %v14433_v61 = vpop.f32.mrf.mxu1  ;;  %v23906_v34 = vadd.f32 %v14431_v21, %v14389_v20  ;;  %v14391_v11 = vadd.f32 %v14390_v63, %v23815_v4  ;;  %14699 = vmatpush1.bf16.msra.mxu0 %v20383_v15  ;;  %v20395_v4 = vld [vmem:[%s22566_s24 + $0x1c40] ss:$8 sps:$4 sm:$0xff]   ;;  %v20451_v15 = vld [vmem:[%s22566_s24 + $0x1cb4] ss:$8 sps:$4 sm:$0xff]   ;;  %v20460_v29 = vld [vmem:[%s22566_s24 + $0x1da4] ss:$8 sps:$4 sm:$0xff]  }
 0x41c   : > { %14742 = vmatpush1.bf16.msra.mxu1 %v20386_v8  ;;  %v14392_v49 = vpop.f32.mrf.mxu0  ;;  %14700 = vmatprep.subr.bf16.mxu0 %v20391_v17  ;;  %v20454_v8 = vld [vmem:[%s22566_s24 + $0x1db4] ss:$8 sps:$4 sm:$0xff]   ;;  %v20458_v19 = vld [vmem:[%s22566_s24 + $0x1da0] ss:$8 sps:$4 sm:$0xff]   ;;  %v20464_v20 = vld [vmem:[%s22566_s24 + $0x1d90] ss:$8 sps:$4 sm:$0xff]  }
 0x41d   : > { %14743 = vmatprep.subr.bf16.mxu1 %v20394_v48  ;;  %v23911_v36 = vadd.f32 %v14433_v61, %v14391_v11  ;;  %v14393_v52 = vadd.f32 %v14392_v49, %v23818_v25  ;;  %v14435_v53 = vpop.f32.mrf.mxu1  ;;  %v20401_v25 = vld [vmem:[%s22566_s24 + $0x1c30] ss:$8 sps:$4 sm:$0xff]   ;;  %v20463_v21 = vld [vmem:[%s22566_s24 + $0x1c94] ss:$8 sps:$4 sm:$0xff]   ;;  %v20467_v63 = vld [vmem:[%s22566_s24 + $0x1c80] ss:$8 sps:$4 sm:$0xff]  }
 0x41e   : > { %v20466_v17 = vld [vmem:[%s22566_s24 + $0x1d94] ss:$8 sps:$4 sm:$0xff]   ;;  %v20461_v48 = vld [vmem:[%s22566_s24 + $0x1c90] ss:$8 sps:$4 sm:$0xff]   ;;  %v20470_v61 = vld [vmem:[%s22566_s24 + $0x1d80] ss:$8 sps:$4 sm:$0xff]  }
 0x41f   : > { %v23914_v33 = vadd.f32 %v14435_v53, %v14393_v52  ;;  %14701 = vmatpush1.bf16.msra.mxu0 %v20389_v58  ;;  %v20469_v58 = vld [vmem:[%s22566_s24 + $0x1c84] ss:$8 sps:$4 sm:$0xff]   ;;  %v20475_v11 = vld [vmem:[%s22566_s24 + $0x1e74] ss:$8 sps:$4 sm:$0xff]   ;;  %v16763_v52 = vcombine.low %v23873_v55, %v23881_v27  ;;  %v16765_v53 = vcombine.low %v23884_v9, %v23887_v10  ;;  %v20482_v55 = vld [vmem:[%s22566_s24 + $0x1f60] ss:$8 sps:$4 sm:$0xff]  }
 0x420   : > { %14744 = vmatpush1.bf16.msra.mxu1 %v20392_v59  ;;  %14702 = vmatprep.subr.bf16.mxu0 %v20397_v44  ;;  %v20472_v59 = vld [vmem:[%s22566_s24 + $0x1d84] ss:$8 sps:$4 sm:$0xff]   ;;  %v20478_v49 = vld [vmem:[%s22566_s24 + $0x1f74] ss:$8 sps:$4 sm:$0xff]  }
 0x421   : > { %14745 = vmatprep.subr.bf16.mxu1 %v20400_v3  ;;  %v23969_v44 = vld [vmem:[%s22634_s29 + $0xf0] sm:$0xff] }
 0x422   : > { %v20473_v3 = vld [vmem:[%s22566_s24 + $0x1e70] ss:$8 sps:$4 sm:$0xff]  }
 0x423   : > { %14703 = vmatpush1.bf16.msra.mxu0 %v20395_v4  ;;  %v23977_v4 = vld [vmem:[%s22634_s29 + $0x6f0] sm:$0xff] }
 0x424   : > { %14746 = vmatpush1.bf16.msra.mxu1 %v20398_v37  ;;  %14704 = vmatprep.subr.bf16.mxu0 %v20403_v38  ;;  %v23980_v37 = vld [vmem:[%s22634_s29 + $0xf8] sm:$0xff]  ;;  %v16768_v27 = vcombine.high %v23969_v44, %v23977_v4 }
 0x425   : > { %14747 = vmatprep.subr.bf16.mxu1 %v20406_v26  ;;  %v23983_v38 = vld [vmem:[%s22634_s29 + $0x6f8] sm:$0xff] }
 0x426   : > { %v20476_v26 = vld [vmem:[%s22566_s24 + $0x1f70] ss:$8 sps:$4 sm:$0xff]   ;;  %v16770_v9 = vcombine.high %v23980_v37, %v23983_v38 }
 0x427   : > { %14705 = vmatpush1.bf16.msra.mxu0 %v20401_v25  ;;  %v20481_v25 = vld [vmem:[%s22566_s24 + $0x1e64] ss:$8 sps:$4 sm:$0xff]  }
 0x428   : > { %14748 = vmatpush1.bf16.msra.mxu1 %v20404_v60  ;;  %14706 = vmatprep.subr.bf16.mxu0 %v20409_v28  ;;  %v20484_v60 = vld [vmem:[%s22566_s24 + $0x1f64] ss:$8 sps:$4 sm:$0xff]   ;;  %v20479_v28 = vld [vmem:[%s22566_s24 + $0x1e60] ss:$8 sps:$4 sm:$0xff]  }
 0x429   : > { %14749 = vmatprep.subr.bf16.mxu1 %v20412_v12 }
 0x42b   : > { %14707 = vmatpush1.bf16.msra.mxu0 %v20407_v46 }
 0x42c   : > { %14750 = vmatpush1.bf16.msra.mxu1 %v20410_v35  ;;  %14708 = vmatprep.subr.bf16.mxu0 %v20415_v7 }
 0x42d   : > { %14751 = vmatprep.subr.bf16.mxu1 %v20418_v41  ;;  %v20487_v41 = vld [vmem:[%s22566_s24 + $0x1e54] ss:$8 sps:$4 sm:$0xff]  }
 0x42f   : > { %14709 = vmatpush1.bf16.msra.mxu0 %v20413_v32  ;;  %v20490_v32 = vld [vmem:[%s22566_s24 + $0x1f54] ss:$8 sps:$4 sm:$0xff]  }
 0x430   : > { %14752 = vmatpush1.bf16.msra.mxu1 %v20416_v1  ;;  %14710 = vmatprep.subr.bf16.mxu0 %v20421_v2 }
 0x431   : > { %14753 = vmatprep.subr.bf16.mxu1 %v20424_v57  ;;  %v20485_v57 = vld [vmem:[%s22566_s24 + $0x1e50] ss:$8 sps:$4 sm:$0xff]  }
 0x433   : > { %14711 = vmatpush1.bf16.msra.mxu0 %v20419_v30  ;;  %v20488_v30 = vld [vmem:[%s22566_s24 + $0x1f50] ss:$8 sps:$4 sm:$0xff]  }
 0x434   : > { %14754 = vmatpush1.bf16.msra.mxu1 %v20422_v18  ;;  %14712 = vmatprep.subr.bf16.mxu0 %v20427_v22 }
 0x435   : > { %14755 = vmatprep.subr.bf16.mxu1 %v20430_v50 }
 0x437   : > { %14713 = vmatpush2.bf16.msra.mxu0 %v20425_v0 }
 0x438   : > { %14756 = vmatpush2.bf16.msra.mxu1 %v20428_v62  ;;  %14714 = vmatprep.subr.bf16.mxu0 %v20433_v39  ;;  %v20496_v62 = vld [vmem:[%s22566_s24 + $0x1f44] ss:$8 sps:$4 sm:$0xff]  }
 0x439   : > { %14757 = vmatprep.subr.bf16.mxu1 %v20436_v40 }
 0x43b   : > { %14715 = vmatpush2.bf16.msra.mxu0 %v20431_v43 }
 0x43c   : > { %14758 = vmatpush2.bf16.msra.mxu1 %v20434_v23  ;;  %14716 = vmatprep.subr.bf16.mxu0 %v20439_v54  ;;  %v20494_v54 = vld [vmem:[%s22566_s24 + $0x1f40] ss:$8 sps:$4 sm:$0xff]  }
 0x43d   : > { %14759 = vmatprep.subr.bf16.mxu1 %v20442_v24  ;;  %v20499_v24 = vld [vmem:[%s22566_s24 + $0x1e34] ss:$8 sps:$4 sm:$0xff]  }
 0x43f   : > { %14717 = vmatpush2.bf16.msra.mxu0 %v20437_v56  ;;  %v20502_v56 = vld [vmem:[%s22566_s24 + $0x1f34] ss:$8 sps:$4 sm:$0xff]  }
 0x440   : > { %14760 = vmatpush2.bf16.msra.mxu1 %v20440_v5  ;;  %14718 = vmatprep.subr.bf16.mxu0 %v20445_v6  ;;  %v20500_v5 = vld [vmem:[%s22566_s24 + $0x1f30] ss:$8 sps:$4 sm:$0xff]   ;;  %v20505_v6 = vld [vmem:[%s22566_s24 + $0x1e24] ss:$8 sps:$4 sm:$0xff]  }
 0x441   : > { %14761 = vmatprep.subr.bf16.mxu1 %v20448_v13  ;;  %v20508_v13 = vld [vmem:[%s22566_s24 + $0x1f24] ss:$8 sps:$4 sm:$0xff]  }
 0x443   : > { %14719 = vmatpush2.bf16.msra.mxu0 %v20443_v42  ;;  %v20503_v42 = vld [vmem:[%s22566_s24 + $0x1e20] ss:$8 sps:$4 sm:$0xff]  }
 0x444   : > { %14762 = vmatpush2.bf16.msra.mxu1 %v20446_v31  ;;  %14720 = vmatprep.subr.bf16.mxu0 %v20451_v15  ;;  %v20506_v31 = vld [vmem:[%s22566_s24 + $0x1f20] ss:$8 sps:$4 sm:$0xff]   ;;  %v20511_v15 = vld [vmem:[%s22566_s24 + $0x1e14] ss:$8 sps:$4 sm:$0xff]  }
 0x445   : > { %14763 = vmatprep.subr.bf16.mxu1 %v20454_v8  ;;  %v20514_v8 = vld [vmem:[%s22566_s24 + $0x1f14] ss:$8 sps:$4 sm:$0xff]  }
 0x447   : > { %14721 = vmatpush2.bf16.msra.mxu0 %v20449_v14  ;;  %v20509_v14 = vld [vmem:[%s22566_s24 + $0x1e10] ss:$8 sps:$4 sm:$0xff]  }
 0x448   : > { %14764 = vmatpush2.bf16.msra.mxu1 %v20452_v45  ;;  %14722 = vmatprep.subr.bf16.mxu0 %v20457_v47  ;;  %v20512_v45 = vld [vmem:[%s22566_s24 + $0x1f10] ss:$8 sps:$4 sm:$0xff]   ;;  %v20517_v47 = vld [vmem:[%s22566_s24 + $0x1e04] ss:$8 sps:$4 sm:$0xff]  }
 0x449   : > { %14765 = vmatprep.subr.bf16.mxu1 %v20460_v29  ;;  %v20520_v29 = vld [vmem:[%s22566_s24 + $0x1f04] ss:$8 sps:$4 sm:$0xff]  }
 0x44b   : > { %14723 = vmatpush2.bf16.msra.mxu0 %v20455_v16  ;;  %v20515_v16 = vld [vmem:[%s22566_s24 + $0x1e00] ss:$8 sps:$4 sm:$0xff]  }
 0x44c   : > { %14766 = vmatpush2.bf16.msra.mxu1 %v20458_v19  ;;  %14724 = vmatprep.subr.bf16.mxu0 %v20463_v21  ;;  %v20518_v19 = vld [vmem:[%s22566_s24 + $0x1f00] ss:$8 sps:$4 sm:$0xff]   ;;  %v20523_v21 = vld [vmem:[%s22566_s24 + $0x1ef4] ss:$8 sps:$4 sm:$0xff]  }
 0x44d   : > { %14767 = vmatprep.subr.bf16.mxu1 %v20466_v17  ;;  %v20526_v17 = vld [vmem:[%s22566_s24 + $0x1ff4] ss:$8 sps:$4 sm:$0xff]  }
 0x44f   : > { %14725 = vmatpush2.bf16.msra.mxu0 %v20461_v48  ;;  %v20521_v48 = vld [vmem:[%s22566_s24 + $0x1ef0] ss:$8 sps:$4 sm:$0xff]  }
 0x450   : > { %14768 = vmatpush2.bf16.msra.mxu1 %v20464_v20  ;;  %14726 = vmatprep.subr.bf16.mxu0 %v20469_v58  ;;  %v20524_v20 = vld [vmem:[%s22566_s24 + $0x1ff0] ss:$8 sps:$4 sm:$0xff]   ;;  %v20529_v58 = vld [vmem:[%s22566_s24 + $0x1ee4] ss:$8 sps:$4 sm:$0xff]  }
 0x451   : > { %14769 = vmatprep.subr.bf16.mxu1 %v20472_v59  ;;  %v20532_v59 = vld [vmem:[%s22566_s24 + $0x1fe4] ss:$8 sps:$4 sm:$0xff]  }
 0x453   : > { %14727 = vmatpush2.bf16.msra.mxu0 %v20467_v63  ;;  %v20527_v63 = vld [vmem:[%s22566_s24 + $0x1ee0] ss:$8 sps:$4 sm:$0xff]  }
 0x454   : > { %14770 = vmatpush2.bf16.msra.mxu1 %v20470_v61  ;;  %14782 = vmatprep.subr.bf16.mxu0 %v20475_v11  ;;  %v20530_v61 = vld [vmem:[%s22566_s24 + $0x1fe0] ss:$8 sps:$4 sm:$0xff]   ;;  %v20535_v11 = vld [vmem:[%s22566_s24 + $0x1ed4] ss:$8 sps:$4 sm:$0xff]  }
 0x455   : > { %14825 = vmatprep.subr.bf16.mxu1 %v20478_v49  ;;  %v20538_v49 = vld [vmem:[%s22566_s24 + $0x1fd4] ss:$8 sps:$4 sm:$0xff]  }
 0x456   : > { %v14472_v10 = vpop.f32.mrf.mxu0  ;;  %14729 = vmatmul.mubr.bf16.vlgmr.msra.gmra.mxu0 %v16763_v52  ;;  %v20536_v52 = vld [vmem:[%s22566_s24 + $0x1fd0] ss:$8 sps:$4 sm:$0xff]  }
 0x457   : > { %v14515_v12 = vpop.f32.mrf.mxu1  ;;  %14772 = vmatmul.mubr.bf16.vlgmr.msra.gmra.mxu1 %v16765_v53  ;;  %v14473_v46 = vadd.f32 %v14472_v10, %v23901_v51  ;;  %14783 = vmatpush1.bf16.msra.mxu0 %v20473_v3  ;;  %v20533_v3 = vld [vmem:[%s22566_s24 + $0x1ed0] ss:$8 sps:$4 sm:$0xff]   ;;  %v20541_v53 = vld [vmem:[%s22566_s24 + $0x1ec4] ss:$8 sps:$4 sm:$0xff]  }
 0x458   : > { %14826 = vmatpush1.bf16.msra.mxu1 %v20476_v26  ;;  %v14474_v35 = vpop.f32.mrf.mxu0  ;;  %14784 = vmatprep.subr.bf16.mxu0 %v20481_v25  ;;  %v20544_v26 = vld [vmem:[%s22566_s24 + $0x1fc4] ss:$8 sps:$4 sm:$0xff]   ;;  %v20539_v25 = vld [vmem:[%s22566_s24 + $0x1ec0] ss:$8 sps:$4 sm:$0xff]  }
 0x459   : > { %v14517_v7 = vpop.f32.mrf.mxu1  ;;  %14827 = vmatprep.subr.bf16.mxu1 %v20484_v60  ;;  %v23997_v1 = vadd.f32 %v14515_v12, %v14473_v46  ;;  %v14475_v2 = vadd.f32 %v14474_v35, %v23906_v34  ;;  %14814 = vmatprep.mubr.bf16.mxu0 %v16768_v27  ;;  %v20493_v34 = vld [vmem:[%s22566_s24 + $0x1e44] ss:$8 sps:$4 sm:$0xff]   ;;  %v20542_v60 = vld [vmem:[%s22566_s24 + $0x1fc0] ss:$8 sps:$4 sm:$0xff]   ;;  %v20545_v27 = vld [vmem:[%s22566_s24 + $0x1eb0] ss:$8 sps:$4 sm:$0xff]  }
 0x45a   : > { %14857 = vmatprep.mubr.bf16.mxu1 %v16770_v9  ;;  %v14476_v18 = vpop.f32.mrf.mxu0  ;;  %v20548_v9 = vld [vmem:[%s22566_s24 + $0x1fb0] ss:$8 sps:$4 sm:$0xff]   ;;  %v20553_v10 = vld [vmem:[%s22566_s24 + $0x1ea4] ss:$8 sps:$4 sm:$0xff]   ;;  %v20551_v46 = vld [vmem:[%s22566_s24 + $0x1ea0] ss:$8 sps:$4 sm:$0xff]  }
 0x45b   : > { %v14519_v51 = vpop.f32.mrf.mxu1  ;;  %v24002_v22 = vadd.f32 %v14517_v7, %v14475_v2  ;;  %v14477_v50 = vadd.f32 %v14476_v18, %v23911_v36  ;;  %14785 = vmatpush1.bf16.msra.mxu0 %v20479_v28  ;;  %v20491_v36 = vld [vmem:[%s22566_s24 + $0x1e40] ss:$8 sps:$4 sm:$0xff]   ;;  %v20547_v28 = vld [vmem:[%s22566_s24 + $0x1eb4] ss:$8 sps:$4 sm:$0xff]   ;;  %v20556_v12 = vld [vmem:[%s22566_s24 + $0x1fa4] ss:$8 sps:$4 sm:$0xff]  }
 0x45c   : > { %14828 = vmatpush1.bf16.msra.mxu1 %v20482_v55  ;;  %v14478_v0 = vpop.f32.mrf.mxu0  ;;  %14786 = vmatprep.subr.bf16.mxu0 %v20487_v41  ;;  %v20550_v55 = vld [vmem:[%s22566_s24 + $0x1fb4] ss:$8 sps:$4 sm:$0xff]   ;;  %v20554_v35 = vld [vmem:[%s22566_s24 + $0x1fa0] ss:$8 sps:$4 sm:$0xff]   ;;  %v20560_v2 = vld [vmem:[%s22566_s24 + $0x1f90] ss:$8 sps:$4 sm:$0xff]  }
 0x45d   : > { %14829 = vmatprep.subr.bf16.mxu1 %v20490_v32  ;;  %v24007_v39 = vadd.f32 %v14519_v51, %v14477_v50  ;;  %v14479_v40 = vadd.f32 %v14478_v0, %v23914_v33  ;;  %v14521_v43 = vpop.f32.mrf.mxu1  ;;  %v20497_v33 = vld [vmem:[%s22566_s24 + $0x1e30] ss:$8 sps:$4 sm:$0xff]   ;;  %v20559_v7 = vld [vmem:[%s22566_s24 + $0x1e94] ss:$8 sps:$4 sm:$0xff]   ;;  %v20563_v18 = vld [vmem:[%s22566_s24 + $0x1e80] ss:$8 sps:$4 sm:$0xff]  }
 0x45e   : > { %v20562_v41 = vld [vmem:[%s22566_s24 + $0x1f94] ss:$8 sps:$4 sm:$0xff]   ;;  %v20557_v32 = vld [vmem:[%s22566_s24 + $0x1e90] ss:$8 sps:$4 sm:$0xff]   ;;  %v20566_v51 = vld [vmem:[%s22566_s24 + $0x1f80] ss:$8 sps:$4 sm:$0xff]  }
 0x45f   : > { %v24010_v23 = vadd.f32 %v14521_v43, %v14479_v40  ;;  %14787 = vmatpush1.bf16.msra.mxu0 %v20485_v57  ;;  %v20565_v57 = vld [vmem:[%s22566_s24 + $0x1e84] ss:$8 sps:$4 sm:$0xff]   ;;  %v20571_v50 = vld [vmem:[%s22566_s24 + $0x2074] ss:$8 sps:$4 sm:$0xff]   ;;  %v16767_v40 = vcombine.low %v23969_v44, %v23977_v4  ;;  %v16769_v43 = vcombine.low %v23980_v37, %v23983_v38  ;;  %v20578_v44 = vld [vmem:[%s22566_s24 + $0x2160] ss:$8 sps:$4 sm:$0xff]  }
 0x460   : > { %14830 = vmatpush1.bf16.msra.mxu1 %v20488_v30  ;;  %14788 = vmatprep.subr.bf16.mxu0 %v20493_v34  ;;  %v20568_v30 = vld [vmem:[%s22566_s24 + $0x1f84] ss:$8 sps:$4 sm:$0xff]   ;;  %v20574_v0 = vld [vmem:[%s22566_s24 + $0x2174] ss:$8 sps:$4 sm:$0xff]  }
 0x461   : > { %14831 = vmatprep.subr.bf16.mxu1 %v20496_v62  ;;  %v24065_v34 = vld [vmem:[%s22634_s29 + $0x100] sm:$0xff]  ;;  %v20569_v62 = vld [vmem:[%s22566_s24 + $0x2070] ss:$8 sps:$4 sm:$0xff]  }
 0x463   : > { %14789 = vmatpush1.bf16.msra.mxu0 %v20491_v36  ;;  %v24073_v36 = vld [vmem:[%s22634_s29 + $0x700] sm:$0xff] }
 0x464   : > { %14832 = vmatpush1.bf16.msra.mxu1 %v20494_v54  ;;  %14790 = vmatprep.subr.bf16.mxu0 %v20499_v24  ;;  %v24076_v54 = vld [vmem:[%s22634_s29 + $0x108] sm:$0xff]  ;;  %v16772_v4 = vcombine.high %v24065_v34, %v24073_v36 }
 0x465   : > { %14833 = vmatprep.subr.bf16.mxu1 %v20502_v56  ;;  %v24079_v24 = vld [vmem:[%s22634_s29 + $0x708] sm:$0xff]  ;;  %v20572_v56 = vld [vmem:[%s22566_s24 + $0x2170] ss:$8 sps:$4 sm:$0xff]  }
 0x466   : > { %v16774_v37 = vcombine.high %v24076_v54, %v24079_v24 }
 0x467   : > { %14791 = vmatpush1.bf16.msra.mxu0 %v20497_v33  ;;  %v20577_v33 = vld [vmem:[%s22566_s24 + $0x2064] ss:$8 sps:$4 sm:$0xff]  }
 0x468   : > { %14834 = vmatpush1.bf16.msra.mxu1 %v20500_v5  ;;  %14792 = vmatprep.subr.bf16.mxu0 %v20505_v6  ;;  %v20580_v5 = vld [vmem:[%s22566_s24 + $0x2164] ss:$8 sps:$4 sm:$0xff]   ;;  %v20575_v6 = vld [vmem:[%s22566_s24 + $0x2060] ss:$8 sps:$4 sm:$0xff]  }
 0x469   : > { %14835 = vmatprep.subr.bf16.mxu1 %v20508_v13 }
 0x46b   : > { %14793 = vmatpush1.bf16.msra.mxu0 %v20503_v42 }
 0x46c   : > { %14836 = vmatpush1.bf16.msra.mxu1 %v20506_v31  ;;  %14794 = vmatprep.subr.bf16.mxu0 %v20511_v15 }
 0x46d   : > { %14837 = vmatprep.subr.bf16.mxu1 %v20514_v8  ;;  %v20583_v8 = vld [vmem:[%s22566_s24 + $0x2054] ss:$8 sps:$4 sm:$0xff]  }
 0x46f   : > { %14795 = vmatpush1.bf16.msra.mxu0 %v20509_v14  ;;  %v20586_v14 = vld [vmem:[%s22566_s24 + $0x2154] ss:$8 sps:$4 sm:$0xff]  }
 0x470   : > { %14838 = vmatpush1.bf16.msra.mxu1 %v20512_v45  ;;  %14796 = vmatprep.subr.bf16.mxu0 %v20517_v47 }
 0x471   : > { %14839 = vmatprep.subr.bf16.mxu1 %v20520_v29  ;;  %v20581_v29 = vld [vmem:[%s22566_s24 + $0x2050] ss:$8 sps:$4 sm:$0xff]  }
 0x473   : > { %14797 = vmatpush1.bf16.msra.mxu0 %v20515_v16  ;;  %v20584_v16 = vld [vmem:[%s22566_s24 + $0x2150] ss:$8 sps:$4 sm:$0xff]  }
 0x474   : > { %14840 = vmatpush1.bf16.msra.mxu1 %v20518_v19  ;;  %14798 = vmatprep.subr.bf16.mxu0 %v20523_v21 }
 0x475   : > { %14841 = vmatprep.subr.bf16.mxu1 %v20526_v17 }
 0x477   : > { %14799 = vmatpush2.bf16.msra.mxu0 %v20521_v48 }
 0x478   : > { %14842 = vmatpush2.bf16.msra.mxu1 %v20524_v20  ;;  %14800 = vmatprep.subr.bf16.mxu0 %v20529_v58  ;;  %v20592_v20 = vld [vmem:[%s22566_s24 + $0x2144] ss:$8 sps:$4 sm:$0xff]  }
 0x479   : > { %14843 = vmatprep.subr.bf16.mxu1 %v20532_v59 }
 0x47b   : > { %14801 = vmatpush2.bf16.msra.mxu0 %v20527_v63 }
 0x47c   : > { %14844 = vmatpush2.bf16.msra.mxu1 %v20530_v61  ;;  %14802 = vmatprep.subr.bf16.mxu0 %v20535_v11  ;;  %v20590_v11 = vld [vmem:[%s22566_s24 + $0x2140] ss:$8 sps:$4 sm:$0xff]  }
 0x47d   : > { %14845 = vmatprep.subr.bf16.mxu1 %v20538_v49  ;;  %v20595_v49 = vld [vmem:[%s22566_s24 + $0x2034] ss:$8 sps:$4 sm:$0xff]  }
 0x47f   : > { %14803 = vmatpush2.bf16.msra.mxu0 %v20533_v3  ;;  %v20598_v3 = vld [vmem:[%s22566_s24 + $0x2134] ss:$8 sps:$4 sm:$0xff]  }
 0x480   : > { %14846 = vmatpush2.bf16.msra.mxu1 %v20536_v52  ;;  %14804 = vmatprep.subr.bf16.mxu0 %v20541_v53  ;;  %v20596_v52 = vld [vmem:[%s22566_s24 + $0x2130] ss:$8 sps:$4 sm:$0xff]   ;;  %v20601_v53 = vld [vmem:[%s22566_s24 + $0x2024] ss:$8 sps:$4 sm:$0xff]  }
 0x481   : > { %14847 = vmatprep.subr.bf16.mxu1 %v20544_v26  ;;  %v20604_v26 = vld [vmem:[%s22566_s24 + $0x2124] ss:$8 sps:$4 sm:$0xff]  }
 0x483   : > { %14805 = vmatpush2.bf16.msra.mxu0 %v20539_v25  ;;  %v20599_v25 = vld [vmem:[%s22566_s24 + $0x2020] ss:$8 sps:$4 sm:$0xff]  }
 0x484   : > { %14848 = vmatpush2.bf16.msra.mxu1 %v20542_v60  ;;  %14806 = vmatprep.subr.bf16.mxu0 %v20547_v28  ;;  %v20602_v60 = vld [vmem:[%s22566_s24 + $0x2120] ss:$8 sps:$4 sm:$0xff]   ;;  %v20607_v28 = vld [vmem:[%s22566_s24 + $0x2014] ss:$8 sps:$4 sm:$0xff]  }
 0x485   : > { %14849 = vmatprep.subr.bf16.mxu1 %v20550_v55  ;;  %v20610_v55 = vld [vmem:[%s22566_s24 + $0x2114] ss:$8 sps:$4 sm:$0xff]  }
 0x487   : > { %14807 = vmatpush2.bf16.msra.mxu0 %v20545_v27  ;;  %v20605_v27 = vld [vmem:[%s22566_s24 + $0x2010] ss:$8 sps:$4 sm:$0xff]  }
 0x488   : > { %14850 = vmatpush2.bf16.msra.mxu1 %v20548_v9  ;;  %14808 = vmatprep.subr.bf16.mxu0 %v20553_v10  ;;  %v20608_v9 = vld [vmem:[%s22566_s24 + $0x2110] ss:$8 sps:$4 sm:$0xff]   ;;  %v20613_v10 = vld [vmem:[%s22566_s24 + $0x2004] ss:$8 sps:$4 sm:$0xff]  }
 0x489   : > { %14851 = vmatprep.subr.bf16.mxu1 %v20556_v12  ;;  %v20616_v12 = vld [vmem:[%s22566_s24 + $0x2104] ss:$8 sps:$4 sm:$0xff]  }
 0x48b   : > { %14809 = vmatpush2.bf16.msra.mxu0 %v20551_v46  ;;  %v20611_v46 = vld [vmem:[%s22566_s24 + $0x2000] ss:$8 sps:$4 sm:$0xff]  }
 0x48c   : > { %14852 = vmatpush2.bf16.msra.mxu1 %v20554_v35  ;;  %14810 = vmatprep.subr.bf16.mxu0 %v20559_v7  ;;  %v20614_v35 = vld [vmem:[%s22566_s24 + $0x2100] ss:$8 sps:$4 sm:$0xff]   ;;  %v20619_v7 = vld [vmem:[%s22566_s24 + $0x20f4] ss:$8 sps:$4 sm:$0xff]  }
 0x48d   : > { %14853 = vmatprep.subr.bf16.mxu1 %v20562_v41  ;;  %v20622_v41 = vld [vmem:[%s22566_s24 + $0x21f4] ss:$8 sps:$4 sm:$0xff]  }
 0x48f   : > { %14811 = vmatpush2.bf16.msra.mxu0 %v20557_v32  ;;  %v20617_v32 = vld [vmem:[%s22566_s24 + $0x20f0] ss:$8 sps:$4 sm:$0xff]  }
 0x490   : > { %14854 = vmatpush2.bf16.msra.mxu1 %v20560_v2  ;;  %14812 = vmatprep.subr.bf16.mxu0 %v20565_v57  ;;  %v20620_v2 = vld [vmem:[%s22566_s24 + $0x21f0] ss:$8 sps:$4 sm:$0xff]   ;;  %v20625_v57 = vld [vmem:[%s22566_s24 + $0x20e4] ss:$8 sps:$4 sm:$0xff]  }
 0x491   : > { %14855 = vmatprep.subr.bf16.mxu1 %v20568_v30  ;;  %v20628_v30 = vld [vmem:[%s22566_s24 + $0x21e4] ss:$8 sps:$4 sm:$0xff]  }
 0x493   : > { %14813 = vmatpush2.bf16.msra.mxu0 %v20563_v18  ;;  %v20623_v18 = vld [vmem:[%s22566_s24 + $0x20e0] ss:$8 sps:$4 sm:$0xff]  }
 0x494   : > { %14856 = vmatpush2.bf16.msra.mxu1 %v20566_v51  ;;  %14868 = vmatprep.subr.bf16.mxu0 %v20571_v50  ;;  %v20626_v51 = vld [vmem:[%s22566_s24 + $0x21e0] ss:$8 sps:$4 sm:$0xff]   ;;  %v20631_v50 = vld [vmem:[%s22566_s24 + $0x20d4] ss:$8 sps:$4 sm:$0xff]  }
 0x495   : > { %14911 = vmatprep.subr.bf16.mxu1 %v20574_v0  ;;  %v20634_v0 = vld [vmem:[%s22566_s24 + $0x21d4] ss:$8 sps:$4 sm:$0xff]  }
 0x496   : > { %v14558_v38 = vpop.f32.mrf.mxu0  ;;  %14815 = vmatmul.mubr.bf16.vlgmr.msra.gmra.mxu0 %v16767_v40  ;;  %v20632_v40 = vld [vmem:[%s22566_s24 + $0x21d0] ss:$8 sps:$4 sm:$0xff]  }
 0x497   : > { %v14601_v13 = vpop.f32.mrf.mxu1  ;;  %14858 = vmatmul.mubr.bf16.vlgmr.msra.gmra.mxu1 %v16769_v43  ;;  %v14559_v42 = vadd.f32 %v14558_v38, %v23997_v1  ;;  %14869 = vmatpush1.bf16.msra.mxu0 %v20569_v62  ;;  %v20629_v62 = vld [vmem:[%s22566_s24 + $0x20d0] ss:$8 sps:$4 sm:$0xff]   ;;  %v20637_v43 = vld [vmem:[%s22566_s24 + $0x20c4] ss:$8 sps:$4 sm:$0xff]  }
 0x498   : > { %14912 = vmatpush1.bf16.msra.mxu1 %v20572_v56  ;;  %v14560_v31 = vpop.f32.mrf.mxu0  ;;  %14870 = vmatprep.subr.bf16.mxu0 %v20577_v33  ;;  %v20640_v56 = vld [vmem:[%s22566_s24 + $0x21c4] ss:$8 sps:$4 sm:$0xff]   ;;  %v20635_v33 = vld [vmem:[%s22566_s24 + $0x20c0] ss:$8 sps:$4 sm:$0xff]  }
 0x499   : > { %v14603_v15 = vpop.f32.mrf.mxu1  ;;  %14913 = vmatprep.subr.bf16.mxu1 %v20580_v5  ;;  %v24093_v45 = vadd.f32 %v14601_v13, %v14559_v42  ;;  %v14561_v47 = vadd.f32 %v14560_v31, %v24002_v22  ;;  %14900 = vmatprep.mubr.bf16.mxu0 %v16772_v4  ;;  %v20589_v22 = vld [vmem:[%s22566_s24 + $0x2044] ss:$8 sps:$4 sm:$0xff]   ;;  %v20638_v5 = vld [vmem:[%s22566_s24 + $0x21c0] ss:$8 sps:$4 sm:$0xff]   ;;  %v20641_v4 = vld [vmem:[%s22566_s24 + $0x20b0] ss:$8 sps:$4 sm:$0xff]  }
 0x49a   : > { %14943 = vmatprep.mubr.bf16.mxu1 %v16774_v37  ;;  %v14562_v19 = vpop.f32.mrf.mxu0  ;;  %v20644_v37 = vld [vmem:[%s22566_s24 + $0x21b0] ss:$8 sps:$4 sm:$0xff]   ;;  %v20649_v38 = vld [vmem:[%s22566_s24 + $0x20a4] ss:$8 sps:$4 sm:$0xff]   ;;  %v20647_v42 = vld [vmem:[%s22566_s24 + $0x20a0] ss:$8 sps:$4 sm:$0xff]  }
 0x49b   : > { %v14605_v1 = vpop.f32.mrf.mxu1  ;;  %v24098_v21 = vadd.f32 %v14603_v15, %v14561_v47  ;;  %v14563_v17 = vadd.f32 %v14562_v19, %v24007_v39  ;;  %14871 = vmatpush1.bf16.msra.mxu0 %v20575_v6  ;;  %v20587_v39 = vld [vmem:[%s22566_s24 + $0x2040] ss:$8 sps:$4 sm:$0xff]   ;;  %v20643_v6 = vld [vmem:[%s22566_s24 + $0x20b4] ss:$8 sps:$4 sm:$0xff]   ;;  %v20652_v13 = vld [vmem:[%s22566_s24 + $0x21a4] ss:$8 sps:$4 sm:$0xff]  }
 0x49c   : > { %14914 = vmatpush1.bf16.msra.mxu1 %v20578_v44  ;;  %v14564_v48 = vpop.f32.mrf.mxu0  ;;  %14872 = vmatprep.subr.bf16.mxu0 %v20583_v8  ;;  %v20646_v44 = vld [vmem:[%s22566_s24 + $0x21b4] ss:$8 sps:$4 sm:$0xff]   ;;  %v20650_v31 = vld [vmem:[%s22566_s24 + $0x21a0] ss:$8 sps:$4 sm:$0xff]   ;;  %v20656_v47 = vld [vmem:[%s22566_s24 + $0x2190] ss:$8 sps:$4 sm:$0xff]  }
 0x49d   : > { %14915 = vmatprep.subr.bf16.mxu1 %v20586_v14  ;;  %v24103_v58 = vadd.f32 %v14605_v1, %v14563_v17  ;;  %v14565_v59 = vadd.f32 %v14564_v48, %v24010_v23  ;;  %v14607_v63 = vpop.f32.mrf.mxu1  ;;  %v20593_v23 = vld [vmem:[%s22566_s24 + $0x2030] ss:$8 sps:$4 sm:$0xff]   ;;  %v20655_v15 = vld [vmem:[%s22566_s24 + $0x2094] ss:$8 sps:$4 sm:$0xff]   ;;  %v20659_v19 = vld [vmem:[%s22566_s24 + $0x2080] ss:$8 sps:$4 sm:$0xff]  }
 0x49e   : > { %v20658_v8 = vld [vmem:[%s22566_s24 + $0x2194] ss:$8 sps:$4 sm:$0xff]   ;;  %v20653_v14 = vld [vmem:[%s22566_s24 + $0x2090] ss:$8 sps:$4 sm:$0xff]   ;;  %v20662_v1 = vld [vmem:[%s22566_s24 + $0x2180] ss:$8 sps:$4 sm:$0xff]  }
 0x49f   : > { %v24106_v61 = vadd.f32 %v14607_v63, %v14565_v59  ;;  %14873 = vmatpush1.bf16.msra.mxu0 %v20581_v29  ;;  %v20661_v29 = vld [vmem:[%s22566_s24 + $0x2084] ss:$8 sps:$4 sm:$0xff]   ;;  %v20667_v17 = vld [vmem:[%s22566_s24 + $0x2274] ss:$8 sps:$4 sm:$0xff]   ;;  %v16771_v59 = vcombine.low %v24065_v34, %v24073_v36  ;;  %v16773_v63 = vcombine.low %v24076_v54, %v24079_v24  ;;  %v20674_v34 = vld [vmem:[%s22566_s24 + $0x2360] ss:$8 sps:$4 sm:$0xff]  }
 0x4a0   : > { %14916 = vmatpush1.bf16.msra.mxu1 %v20584_v16  ;;  %14874 = vmatprep.subr.bf16.mxu0 %v20589_v22  ;;  %v20664_v16 = vld [vmem:[%s22566_s24 + $0x2184] ss:$8 sps:$4 sm:$0xff]   ;;  %v20670_v48 = vld [vmem:[%s22566_s24 + $0x2374] ss:$8 sps:$4 sm:$0xff]  }
 0x4a1   : > { %14917 = vmatprep.subr.bf16.mxu1 %v20592_v20  ;;  %v24161_v22 = vld [vmem:[%s22634_s29 + $0x110] sm:$0xff] }
 0x4a2   : > { %v20665_v20 = vld [vmem:[%s22566_s24 + $0x2270] ss:$8 sps:$4 sm:$0xff]  }
 0x4a3   : > { %14875 = vmatpush1.bf16.msra.mxu0 %v20587_v39  ;;  %v24169_v39 = vld [vmem:[%s22634_s29 + $0x710] sm:$0xff] }
 0x4a4   : > { %14918 = vmatpush1.bf16.msra.mxu1 %v20590_v11  ;;  %14876 = vmatprep.subr.bf16.mxu0 %v20595_v49  ;;  %v24172_v11 = vld [vmem:[%s22634_s29 + $0x118] sm:$0xff]  ;;  %v16776_v36 = vcombine.high %v24161_v22, %v24169_v39 }
 0x4a5   : > { %14919 = vmatprep.subr.bf16.mxu1 %v20598_v3  ;;  %v24175_v49 = vld [vmem:[%s22634_s29 + $0x718] sm:$0xff] }
 0x4a6   : > { %v20668_v3 = vld [vmem:[%s22566_s24 + $0x2370] ss:$8 sps:$4 sm:$0xff]   ;;  %v16778_v54 = vcombine.high %v24172_v11, %v24175_v49 }
 0x4a7   : > { %14877 = vmatpush1.bf16.msra.mxu0 %v20593_v23  ;;  %v20673_v23 = vld [vmem:[%s22566_s24 + $0x2264] ss:$8 sps:$4 sm:$0xff]  }
 0x4a8   : > { %14920 = vmatpush1.bf16.msra.mxu1 %v20596_v52  ;;  %14878 = vmatprep.subr.bf16.mxu0 %v20601_v53  ;;  %v20676_v52 = vld [vmem:[%s22566_s24 + $0x2364] ss:$8 sps:$4 sm:$0xff]   ;;  %v20671_v53 = vld [vmem:[%s22566_s24 + $0x2260] ss:$8 sps:$4 sm:$0xff]  }
 0x4a9   : > { %14921 = vmatprep.subr.bf16.mxu1 %v20604_v26 }
 0x4ab   : > { %14879 = vmatpush1.bf16.msra.mxu0 %v20599_v25 }
 0x4ac   : > { %14922 = vmatpush1.bf16.msra.mxu1 %v20602_v60  ;;  %14880 = vmatprep.subr.bf16.mxu0 %v20607_v28 }
 0x4ad   : > { %14923 = vmatprep.subr.bf16.mxu1 %v20610_v55  ;;  %v20679_v55 = vld [vmem:[%s22566_s24 + $0x2254] ss:$8 sps:$4 sm:$0xff]  }
 0x4af   : > { %14881 = vmatpush1.bf16.msra.mxu0 %v20605_v27  ;;  %v20682_v27 = vld [vmem:[%s22566_s24 + $0x2354] ss:$8 sps:$4 sm:$0xff]  }
 0x4b0   : > { %14924 = vmatpush1.bf16.msra.mxu1 %v20608_v9  ;;  %14882 = vmatprep.subr.bf16.mxu0 %v20613_v10 }
 0x4b1   : > { %14925 = vmatprep.subr.bf16.mxu1 %v20616_v12  ;;  %v20677_v12 = vld [vmem:[%s22566_s24 + $0x2250] ss:$8 sps:$4 sm:$0xff]  }
 0x4b3   : > { %14883 = vmatpush1.bf16.msra.mxu0 %v20611_v46  ;;  %v20680_v46 = vld [vmem:[%s22566_s24 + $0x2350] ss:$8 sps:$4 sm:$0xff]  }
 0x4b4   : > { %14926 = vmatpush1.bf16.msra.mxu1 %v20614_v35  ;;  %14884 = vmatprep.subr.bf16.mxu0 %v20619_v7 }
 0x4b5   : > { %14927 = vmatprep.subr.bf16.mxu1 %v20622_v41 }
 0x4b7   : > { %14885 = vmatpush2.bf16.msra.mxu0 %v20617_v32 }
 0x4b8   : > { %14928 = vmatpush2.bf16.msra.mxu1 %v20620_v2  ;;  %14886 = vmatprep.subr.bf16.mxu0 %v20625_v57  ;;  %v20688_v2 = vld [vmem:[%s22566_s24 + $0x2344] ss:$8 sps:$4 sm:$0xff]  }
 0x4b9   : > { %14929 = vmatprep.subr.bf16.mxu1 %v20628_v30 }
 0x4bb   : > { %14887 = vmatpush2.bf16.msra.mxu0 %v20623_v18 }
 0x4bc   : > { %14930 = vmatpush2.bf16.msra.mxu1 %v20626_v51  ;;  %14888 = vmatprep.subr.bf16.mxu0 %v20631_v50  ;;  %v20686_v50 = vld [vmem:[%s22566_s24 + $0x2340] ss:$8 sps:$4 sm:$0xff]  }
 0x4bd   : > { %14931 = vmatprep.subr.bf16.mxu1 %v20634_v0  ;;  %v20691_v0 = vld [vmem:[%s22566_s24 + $0x2234] ss:$8 sps:$4 sm:$0xff]  }
 0x4bf   : > { %14889 = vmatpush2.bf16.msra.mxu0 %v20629_v62  ;;  %v20694_v62 = vld [vmem:[%s22566_s24 + $0x2334] ss:$8 sps:$4 sm:$0xff]  }
 0x4c0   : > { %14932 = vmatpush2.bf16.msra.mxu1 %v20632_v40  ;;  %14890 = vmatprep.subr.bf16.mxu0 %v20637_v43  ;;  %v20692_v40 = vld [vmem:[%s22566_s24 + $0x2330] ss:$8 sps:$4 sm:$0xff]   ;;  %v20697_v43 = vld [vmem:[%s22566_s24 + $0x2224] ss:$8 sps:$4 sm:$0xff]  }
 0x4c1   : > { %14933 = vmatprep.subr.bf16.mxu1 %v20640_v56  ;;  %v20700_v56 = vld [vmem:[%s22566_s24 + $0x2324] ss:$8 sps:$4 sm:$0xff]  }
 0x4c3   : > { %14891 = vmatpush2.bf16.msra.mxu0 %v20635_v33  ;;  %v20695_v33 = vld [vmem:[%s22566_s24 + $0x2220] ss:$8 sps:$4 sm:$0xff]  }
 0x4c4   : > { %14934 = vmatpush2.bf16.msra.mxu1 %v20638_v5  ;;  %14892 = vmatprep.subr.bf16.mxu0 %v20643_v6  ;;  %v20698_v5 = vld [vmem:[%s22566_s24 + $0x2320] ss:$8 sps:$4 sm:$0xff]   ;;  %v20703_v6 = vld [vmem:[%s22566_s24 + $0x2214] ss:$8 sps:$4 sm:$0xff]  }
 0x4c5   : > { %14935 = vmatprep.subr.bf16.mxu1 %v20646_v44  ;;  %v20706_v44 = vld [vmem:[%s22566_s24 + $0x2314] ss:$8 sps:$4 sm:$0xff]  }
 0x4c7   : > { %14893 = vmatpush2.bf16.msra.mxu0 %v20641_v4  ;;  %v20701_v4 = vld [vmem:[%s22566_s24 + $0x2210] ss:$8 sps:$4 sm:$0xff]  }
 0x4c8   : > { %14936 = vmatpush2.bf16.msra.mxu1 %v20644_v37  ;;  %14894 = vmatprep.subr.bf16.mxu0 %v20649_v38  ;;  %v20704_v37 = vld [vmem:[%s22566_s24 + $0x2310] ss:$8 sps:$4 sm:$0xff]   ;;  %v20709_v38 = vld [vmem:[%s22566_s24 + $0x2204] ss:$8 sps:$4 sm:$0xff]  }
 0x4c9   : > { %14937 = vmatprep.subr.bf16.mxu1 %v20652_v13  ;;  %v20712_v13 = vld [vmem:[%s22566_s24 + $0x2304] ss:$8 sps:$4 sm:$0xff]  }
 0x4cb   : > { %14895 = vmatpush2.bf16.msra.mxu0 %v20647_v42  ;;  %v20707_v42 = vld [vmem:[%s22566_s24 + $0x2200] ss:$8 sps:$4 sm:$0xff]  }
 0x4cc   : > { %14938 = vmatpush2.bf16.msra.mxu1 %v20650_v31  ;;  %14896 = vmatprep.subr.bf16.mxu0 %v20655_v15  ;;  %v20710_v31 = vld [vmem:[%s22566_s24 + $0x2300] ss:$8 sps:$4 sm:$0xff]   ;;  %v20715_v15 = vld [vmem:[%s22566_s24 + $0x22f4] ss:$8 sps:$4 sm:$0xff]  }
 0x4cd   : > { %14939 = vmatprep.subr.bf16.mxu1 %v20658_v8  ;;  %v20718_v8 = vld [vmem:[%s22566_s24 + $0x23f4] ss:$8 sps:$4 sm:$0xff]  }
 0x4cf   : > { %14897 = vmatpush2.bf16.msra.mxu0 %v20653_v14  ;;  %v20713_v14 = vld [vmem:[%s22566_s24 + $0x22f0] ss:$8 sps:$4 sm:$0xff]  }
 0x4d0   : > { %14940 = vmatpush2.bf16.msra.mxu1 %v20656_v47  ;;  %14898 = vmatprep.subr.bf16.mxu0 %v20661_v29  ;;  %v20716_v47 = vld [vmem:[%s22566_s24 + $0x23f0] ss:$8 sps:$4 sm:$0xff]   ;;  %v20721_v29 = vld [vmem:[%s22566_s24 + $0x22e4] ss:$8 sps:$4 sm:$0xff]  }
 0x4d1   : > { %14941 = vmatprep.subr.bf16.mxu1 %v20664_v16  ;;  %v20724_v16 = vld [vmem:[%s22566_s24 + $0x23e4] ss:$8 sps:$4 sm:$0xff]  }
 0x4d3   : > { %14899 = vmatpush2.bf16.msra.mxu0 %v20659_v19  ;;  %v20719_v19 = vld [vmem:[%s22566_s24 + $0x22e0] ss:$8 sps:$4 sm:$0xff]  }
 0x4d4   : > { %14942 = vmatpush2.bf16.msra.mxu1 %v20662_v1  ;;  %14954 = vmatprep.subr.bf16.mxu0 %v20667_v17  ;;  %v20722_v1 = vld [vmem:[%s22566_s24 + $0x23e0] ss:$8 sps:$4 sm:$0xff]   ;;  %v20727_v17 = vld [vmem:[%s22566_s24 + $0x22d4] ss:$8 sps:$4 sm:$0xff]  }
 0x4d5   : > { %14997 = vmatprep.subr.bf16.mxu1 %v20670_v48  ;;  %v20730_v48 = vld [vmem:[%s22566_s24 + $0x23d4] ss:$8 sps:$4 sm:$0xff]  }
 0x4d6   : > { %v14644_v24 = vpop.f32.mrf.mxu0  ;;  %14901 = vmatmul.mubr.bf16.vlgmr.msra.gmra.mxu0 %v16771_v59  ;;  %v20728_v59 = vld [vmem:[%s22566_s24 + $0x23d0] ss:$8 sps:$4 sm:$0xff]  }
 0x4d7   : > { %v14687_v26 = vpop.f32.mrf.mxu1  ;;  %14944 = vmatmul.mubr.bf16.vlgmr.msra.gmra.mxu1 %v16773_v63  ;;  %v14645_v25 = vadd.f32 %v14644_v24, %v24093_v45  ;;  %14955 = vmatpush1.bf16.msra.mxu0 %v20665_v20  ;;  %v20725_v20 = vld [vmem:[%s22566_s24 + $0x22d0] ss:$8 sps:$4 sm:$0xff]   ;;  %v20733_v63 = vld [vmem:[%s22566_s24 + $0x22c4] ss:$8 sps:$4 sm:$0xff]  }
 0x4d8   : > { %14998 = vmatpush1.bf16.msra.mxu1 %v20668_v3  ;;  %v14646_v60 = vpop.f32.mrf.mxu0  ;;  %14956 = vmatprep.subr.bf16.mxu0 %v20673_v23  ;;  %v20736_v3 = vld [vmem:[%s22566_s24 + $0x23c4] ss:$8 sps:$4 sm:$0xff]   ;;  %v20731_v23 = vld [vmem:[%s22566_s24 + $0x22c0] ss:$8 sps:$4 sm:$0xff]  }
 0x4d9   : > { %v14689_v28 = vpop.f32.mrf.mxu1  ;;  %14999 = vmatprep.subr.bf16.mxu1 %v20676_v52  ;;  %v24189_v9 = vadd.f32 %v14687_v26, %v14645_v25  ;;  %v14647_v10 = vadd.f32 %v14646_v60, %v24098_v21  ;;  %14986 = vmatprep.mubr.bf16.mxu0 %v16776_v36  ;;  %v20685_v21 = vld [vmem:[%s22566_s24 + $0x2244] ss:$8 sps:$4 sm:$0xff]   ;;  %v20734_v52 = vld [vmem:[%s22566_s24 + $0x23c0] ss:$8 sps:$4 sm:$0xff]   ;;  %v20737_v36 = vld [vmem:[%s22566_s24 + $0x22b0] ss:$8 sps:$4 sm:$0xff]  }
 0x4da   : > { %15029 = vmatprep.mubr.bf16.mxu1 %v16778_v54  ;;  %v14648_v35 = vpop.f32.mrf.mxu0  ;;  %v20740_v54 = vld [vmem:[%s22566_s24 + $0x23b0] ss:$8 sps:$4 sm:$0xff]   ;;  %v20745_v24 = vld [vmem:[%s22566_s24 + $0x22a4] ss:$8 sps:$4 sm:$0xff]   ;;  %v20743_v25 = vld [vmem:[%s22566_s24 + $0x22a0] ss:$8 sps:$4 sm:$0xff]  }
 0x4db   : > { %v14691_v45 = vpop.f32.mrf.mxu1  ;;  %v24194_v7 = vadd.f32 %v14689_v28, %v14647_v10  ;;  %v14649_v41 = vadd.f32 %v14648_v35, %v24103_v58  ;;  %14957 = vmatpush1.bf16.msra.mxu0 %v20671_v53  ;;  %v20683_v58 = vld [vmem:[%s22566_s24 + $0x2240] ss:$8 sps:$4 sm:$0xff]   ;;  %v20739_v53 = vld [vmem:[%s22566_s24 + $0x22b4] ss:$8 sps:$4 sm:$0xff]   ;;  %v20748_v26 = vld [vmem:[%s22566_s24 + $0x23a4] ss:$8 sps:$4 sm:$0xff]  }
 0x4dc   : > { %15000 = vmatpush1.bf16.msra.mxu1 %v20674_v34  ;;  %v14650_v32 = vpop.f32.mrf.mxu0  ;;  %14958 = vmatprep.subr.bf16.mxu0 %v20679_v55  ;;  %v20742_v34 = vld [vmem:[%s22566_s24 + $0x23b4] ss:$8 sps:$4 sm:$0xff]   ;;  %v20746_v60 = vld [vmem:[%s22566_s24 + $0x23a0] ss:$8 sps:$4 sm:$0xff]   ;;  %v20752_v10 = vld [vmem:[%s22566_s24 + $0x2390] ss:$8 sps:$4 sm:$0xff]  }
 0x4dd   : > { %15001 = vmatprep.subr.bf16.mxu1 %v20682_v27  ;;  %v24199_v57 = vadd.f32 %v14691_v45, %v14649_v41  ;;  %v14651_v30 = vadd.f32 %v14650_v32, %v24106_v61  ;;  %v14693_v18 = vpop.f32.mrf.mxu1  ;;  %v20689_v61 = vld [vmem:[%s22566_s24 + $0x2230] ss:$8 sps:$4 sm:$0xff]   ;;  %v20751_v28 = vld [vmem:[%s22566_s24 + $0x2294] ss:$8 sps:$4 sm:$0xff]   ;;  %v20755_v35 = vld [vmem:[%s22566_s24 + $0x2280] ss:$8 sps:$4 sm:$0xff]  }
 0x4de   : > { %v20754_v55 = vld [vmem:[%s22566_s24 + $0x2394] ss:$8 sps:$4 sm:$0xff]   ;;  %v20749_v27 = vld [vmem:[%s22566_s24 + $0x2290] ss:$8 sps:$4 sm:$0xff]   ;;  %v20758_v45 = vld [vmem:[%s22566_s24 + $0x2380] ss:$8 sps:$4 sm:$0xff]  }
 0x4df   : > { %v24202_v51 = vadd.f32 %v14693_v18, %v14651_v30  ;;  %14959 = vmatpush1.bf16.msra.mxu0 %v20677_v12  ;;  %v20757_v12 = vld [vmem:[%s22566_s24 + $0x2284] ss:$8 sps:$4 sm:$0xff]   ;;  %v20763_v41 = vld [vmem:[%s22566_s24 + $0x2474] ss:$8 sps:$4 sm:$0xff]   ;;  %v16777_v30 = vcombine.low %v24172_v11, %v24175_v49 }
 0x4e0   : > { %15002 = vmatpush1.bf16.msra.mxu1 %v20680_v46  ;;  %14960 = vmatprep.subr.bf16.mxu0 %v20685_v21  ;;  %v20760_v46 = vld [vmem:[%s22566_s24 + $0x2384] ss:$8 sps:$4 sm:$0xff]   ;;  %v20766_v32 = vld [vmem:[%s22566_s24 + $0x2574] ss:$8 sps:$4 sm:$0xff]  }
 0x4e1   : > { %15003 = vmatprep.subr.bf16.mxu1 %v20688_v2  ;;  %v24257_v21 = vld [vmem:[%s22634_s29 + $0x120] sm:$0xff]  ;;  %v16775_v2 = vcombine.low %v24161_v22, %v24169_v39 }
 0x4e2   : > { %v24264_v18 = vld [vmem:[%s22634_s29 + $0x720] sm:$0xff] }
 0x4e3   : > { %14961 = vmatpush1.bf16.msra.mxu0 %v20683_v58  ;;  %v24267_v58 = vld [vmem:[%s22634_s29 + $0x128] sm:$0xff]  ;;  %v16780_v22 = vcombine.high %v24257_v21, %v24264_v18 }
 0x4e4   : > { %15004 = vmatpush1.bf16.msra.mxu1 %v20686_v50  ;;  %14962 = vmatprep.subr.bf16.mxu0 %v20691_v0  ;;  %v24270_v50 = vld [vmem:[%s22634_s29 + $0x728] sm:$0xff]  ;;  %v20761_v0 = vld [vmem:[%s22566_s24 + $0x2470] ss:$8 sps:$4 sm:$0xff]  }
 0x4e5   : > { %15005 = vmatprep.subr.bf16.mxu1 %v20694_v62  ;;  %v20764_v62 = vld [vmem:[%s22566_s24 + $0x2570] ss:$8 sps:$4 sm:$0xff]   ;;  %v16782_v39 = vcombine.high %v24267_v58, %v24270_v50 }
 0x4e7   : > { %14963 = vmatpush1.bf16.msra.mxu0 %v20689_v61  ;;  %v20769_v61 = vld [vmem:[%s22566_s24 + $0x2464] ss:$8 sps:$4 sm:$0xff]  }
 0x4e8   : > { %15006 = vmatpush1.bf16.msra.mxu1 %v20692_v40  ;;  %14964 = vmatprep.subr.bf16.mxu0 %v20697_v43  ;;  %v20772_v40 = vld [vmem:[%s22566_s24 + $0x2564] ss:$8 sps:$4 sm:$0xff]  }
 0x4e9   : > { %15007 = vmatprep.subr.bf16.mxu1 %v20700_v56  ;;  %v20767_v56 = vld [vmem:[%s22566_s24 + $0x2460] ss:$8 sps:$4 sm:$0xff]  }
 0x4eb   : > { %14965 = vmatpush1.bf16.msra.mxu0 %v20695_v33  ;;  %v20770_v33 = vld [vmem:[%s22566_s24 + $0x2560] ss:$8 sps:$4 sm:$0xff]  }
 0x4ec   : > { %15008 = vmatpush1.bf16.msra.mxu1 %v20698_v5  ;;  %14966 = vmatprep.subr.bf16.mxu0 %v20703_v6 }
 0x4ed   : > { %15009 = vmatprep.subr.bf16.mxu1 %v20706_v44  ;;  %v20775_v44 = vld [vmem:[%s22566_s24 + $0x2454] ss:$8 sps:$4 sm:$0xff]  }
 0x4ef   : > { %14967 = vmatpush1.bf16.msra.mxu0 %v20701_v4  ;;  %v20778_v4 = vld [vmem:[%s22566_s24 + $0x2554] ss:$8 sps:$4 sm:$0xff]  }
 0x4f0   : > { %15010 = vmatpush1.bf16.msra.mxu1 %v20704_v37  ;;  %14968 = vmatprep.subr.bf16.mxu0 %v20709_v38 }
 0x4f1   : > { %15011 = vmatprep.subr.bf16.mxu1 %v20712_v13 }
 0x4f3   : > { %14969 = vmatpush1.bf16.msra.mxu0 %v20707_v42 }
 0x4f4   : > { %15012 = vmatpush1.bf16.msra.mxu1 %v20710_v31  ;;  %14970 = vmatprep.subr.bf16.mxu0 %v20715_v15  ;;  %v20773_v15 = vld [vmem:[%s22566_s24 + $0x2450] ss:$8 sps:$4 sm:$0xff]  }
 0x4f5   : > { %15013 = vmatprep.subr.bf16.mxu1 %v20718_v8  ;;  %v20776_v8 = vld [vmem:[%s22566_s24 + $0x2550] ss:$8 sps:$4 sm:$0xff]  }
 0x4f7   : > { %14971 = vmatpush2.bf16.msra.mxu0 %v20713_v14 }
 0x4f8   : > { %15014 = vmatpush2.bf16.msra.mxu1 %v20716_v47  ;;  %14972 = vmatprep.subr.bf16.mxu0 %v20721_v29  ;;  %v20784_v47 = vld [vmem:[%s22566_s24 + $0x2544] ss:$8 sps:$4 sm:$0xff]  }
 0x4f9   : > { %15015 = vmatprep.subr.bf16.mxu1 %v20724_v16 }
 0x4fb   : > { %14973 = vmatpush2.bf16.msra.mxu0 %v20719_v19 }
 0x4fc   : > { %15016 = vmatpush2.bf16.msra.mxu1 %v20722_v1  ;;  %14974 = vmatprep.subr.bf16.mxu0 %v20727_v17  ;;  %v20779_v1 = vld [vmem:[%s22566_s24 + $0x2440] ss:$8 sps:$4 sm:$0xff]  }
 0x4fd   : > { %15017 = vmatprep.subr.bf16.mxu1 %v20730_v48  ;;  %v20782_v17 = vld [vmem:[%s22566_s24 + $0x2540] ss:$8 sps:$4 sm:$0xff]   ;;  %v20787_v48 = vld [vmem:[%s22566_s24 + $0x2434] ss:$8 sps:$4 sm:$0xff]  }
 0x4ff   : > { %14975 = vmatpush2.bf16.msra.mxu0 %v20725_v20  ;;  %v20790_v20 = vld [vmem:[%s22566_s24 + $0x2534] ss:$8 sps:$4 sm:$0xff]  }
 0x500   : > { %15018 = vmatpush2.bf16.msra.mxu1 %v20728_v59  ;;  %14976 = vmatprep.subr.bf16.mxu0 %v20733_v63  ;;  %v20788_v59 = vld [vmem:[%s22566_s24 + $0x2530] ss:$8 sps:$4 sm:$0xff]   ;;  %v20793_v63 = vld [vmem:[%s22566_s24 + $0x2424] ss:$8 sps:$4 sm:$0xff]  }
 0x501   : > { %15019 = vmatprep.subr.bf16.mxu1 %v20736_v3  ;;  %v20796_v3 = vld [vmem:[%s22566_s24 + $0x2524] ss:$8 sps:$4 sm:$0xff]  }
 0x503   : > { %14977 = vmatpush2.bf16.msra.mxu0 %v20731_v23  ;;  %v20791_v23 = vld [vmem:[%s22566_s24 + $0x2420] ss:$8 sps:$4 sm:$0xff]  }
 0x504   : > { %15020 = vmatpush2.bf16.msra.mxu1 %v20734_v52  ;;  %14978 = vmatprep.subr.bf16.mxu0 %v20739_v53  ;;  %v20794_v52 = vld [vmem:[%s22566_s24 + $0x2520] ss:$8 sps:$4 sm:$0xff]   ;;  %v20799_v53 = vld [vmem:[%s22566_s24 + $0x2414] ss:$8 sps:$4 sm:$0xff]  }
 0x505   : > { %15021 = vmatprep.subr.bf16.mxu1 %v20742_v34  ;;  %v20802_v34 = vld [vmem:[%s22566_s24 + $0x2514] ss:$8 sps:$4 sm:$0xff]  }
 0x507   : > { %14979 = vmatpush2.bf16.msra.mxu0 %v20737_v36  ;;  %v20797_v36 = vld [vmem:[%s22566_s24 + $0x2410] ss:$8 sps:$4 sm:$0xff]  }
 0x508   : > { %15022 = vmatpush2.bf16.msra.mxu1 %v20740_v54  ;;  %14980 = vmatprep.subr.bf16.mxu0 %v20745_v24  ;;  %v20800_v54 = vld [vmem:[%s22566_s24 + $0x2510] ss:$8 sps:$4 sm:$0xff]   ;;  %v20805_v24 = vld [vmem:[%s22566_s24 + $0x2404] ss:$8 sps:$4 sm:$0xff]  }
 0x509   : > { %15023 = vmatprep.subr.bf16.mxu1 %v20748_v26  ;;  %v20808_v26 = vld [vmem:[%s22566_s24 + $0x2504] ss:$8 sps:$4 sm:$0xff]  }
 0x50b   : > { %14981 = vmatpush2.bf16.msra.mxu0 %v20743_v25  ;;  %v20803_v25 = vld [vmem:[%s22566_s24 + $0x2400] ss:$8 sps:$4 sm:$0xff]  }
 0x50c   : > { %15024 = vmatpush2.bf16.msra.mxu1 %v20746_v60  ;;  %14982 = vmatprep.subr.bf16.mxu0 %v20751_v28  ;;  %v20806_v60 = vld [vmem:[%s22566_s24 + $0x2500] ss:$8 sps:$4 sm:$0xff]   ;;  %v20811_v28 = vld [vmem:[%s22566_s24 + $0x24f4] ss:$8 sps:$4 sm:$0xff]  }
 0x50d   : > { %15025 = vmatprep.subr.bf16.mxu1 %v20754_v55  ;;  %v20814_v55 = vld [vmem:[%s22566_s24 + $0x25f4] ss:$8 sps:$4 sm:$0xff]  }
 0x50f   : > { %14983 = vmatpush2.bf16.msra.mxu0 %v20749_v27  ;;  %v20809_v27 = vld [vmem:[%s22566_s24 + $0x24f0] ss:$8 sps:$4 sm:$0xff]  }
 0x510   : > { %15026 = vmatpush2.bf16.msra.mxu1 %v20752_v10  ;;  %14984 = vmatprep.subr.bf16.mxu0 %v20757_v12  ;;  %v20812_v10 = vld [vmem:[%s22566_s24 + $0x25f0] ss:$8 sps:$4 sm:$0xff]   ;;  %v20817_v12 = vld [vmem:[%s22566_s24 + $0x24e4] ss:$8 sps:$4 sm:$0xff]  }
 0x511   : > { %15027 = vmatprep.subr.bf16.mxu1 %v20760_v46  ;;  %v20820_v46 = vld [vmem:[%s22566_s24 + $0x25e4] ss:$8 sps:$4 sm:$0xff]  }
 0x513   : > { %14985 = vmatpush2.bf16.msra.mxu0 %v20755_v35  ;;  %v20815_v35 = vld [vmem:[%s22566_s24 + $0x24e0] ss:$8 sps:$4 sm:$0xff]  }
 0x514   : > { %15028 = vmatpush2.bf16.msra.mxu1 %v20758_v45  ;;  %15040 = vmatprep.subr.bf16.mxu0 %v20763_v41  ;;  %v20818_v45 = vld [vmem:[%s22566_s24 + $0x25e0] ss:$8 sps:$4 sm:$0xff]   ;;  %v20823_v41 = vld [vmem:[%s22566_s24 + $0x24d4] ss:$8 sps:$4 sm:$0xff]  }
 0x515   : > { %15083 = vmatprep.subr.bf16.mxu1 %v20766_v32  ;;  %v20826_v32 = vld [vmem:[%s22566_s24 + $0x25d4] ss:$8 sps:$4 sm:$0xff]  }
 0x516   : > { %v14730_v11 = vpop.f32.mrf.mxu0  ;;  %14987 = vmatmul.mubr.bf16.vlgmr.msra.gmra.mxu0 %v16775_v2  ;;  %v20821_v2 = vld [vmem:[%s22566_s24 + $0x24d0] ss:$8 sps:$4 sm:$0xff]  }
 0x517   : > { %v14773_v49 = vpop.f32.mrf.mxu1  ;;  %15030 = vmatmul.mubr.bf16.vlgmr.msra.gmra.mxu1 %v16777_v30  ;;  %v14731_v43 = vadd.f32 %v14730_v11, %v24189_v9  ;;  %15041 = vmatpush1.bf16.msra.mxu0 %v20761_v0  ;;  %v20824_v30 = vld [vmem:[%s22566_s24 + $0x25d0] ss:$8 sps:$4 sm:$0xff]   ;;  %v20829_v0 = vld [vmem:[%s22566_s24 + $0x24c4] ss:$8 sps:$4 sm:$0xff]  }
 0x518   : > { %15084 = vmatpush1.bf16.msra.mxu1 %v20764_v62  ;;  %v14732_v5 = vpop.f32.mrf.mxu0  ;;  %15042 = vmatprep.subr.bf16.mxu0 %v20769_v61  ;;  %v20832_v62 = vld [vmem:[%s22566_s24 + $0x25c4] ss:$8 sps:$4 sm:$0xff]   ;;  %v20827_v61 = vld [vmem:[%s22566_s24 + $0x24c0] ss:$8 sps:$4 sm:$0xff]   ;;  %v20833_v11 = vld [vmem:[%s22566_s24 + $0x24b0] ss:$8 sps:$4 sm:$0xff]  }
 0x519   : > { %v14775_v6 = vpop.f32.mrf.mxu1  ;;  %15085 = vmatprep.subr.bf16.mxu1 %v20772_v40  ;;  %v24285_v37 = vadd.f32 %v14773_v49, %v14731_v43  ;;  %v14733_v38 = vadd.f32 %v14732_v5, %v24194_v7  ;;  %15072 = vmatprep.mubr.bf16.mxu0 %v16780_v22  ;;  %v20781_v7 = vld [vmem:[%s22566_s24 + $0x2444] ss:$8 sps:$4 sm:$0xff]   ;;  %v20830_v40 = vld [vmem:[%s22566_s24 + $0x25c0] ss:$8 sps:$4 sm:$0xff]   ;;  %v20835_v22 = vld [vmem:[%s22566_s24 + $0x24b4] ss:$8 sps:$4 sm:$0xff]  }
 0x51a   : > { %15115 = vmatprep.mubr.bf16.mxu1 %v16782_v39  ;;  %v14734_v9 = vpop.f32.mrf.mxu0  ;;  %v20838_v39 = vld [vmem:[%s22566_s24 + $0x25b4] ss:$8 sps:$4 sm:$0xff]   ;;  %v20836_v49 = vld [vmem:[%s22566_s24 + $0x25b0] ss:$8 sps:$4 sm:$0xff]   ;;  %v20841_v43 = vld [vmem:[%s22566_s24 + $0x24a4] ss:$8 sps:$4 sm:$0xff]  }
 0x51b   : > { %v14777_v13 = vpop.f32.mrf.mxu1  ;;  %v24288_v42 = vadd.f32 %v14775_v6, %v14733_v38  ;;  %v14735_v31 = vadd.f32 %v14734_v9, %v24199_v57  ;;  %15043 = vmatpush1.bf16.msra.mxu0 %v20767_v56  ;;  %v20844_v56 = vld [vmem:[%s22566_s24 + $0x25a4] ss:$8 sps:$4 sm:$0xff]   ;;  %v20842_v5 = vld [vmem:[%s22566_s24 + $0x25a0] ss:$8 sps:$4 sm:$0xff]   ;;  %v20847_v6 = vld [vmem:[%s22566_s24 + $0x2494] ss:$8 sps:$4 sm:$0xff]  }
 0x51c   : > { %15086 = vmatpush1.bf16.msra.mxu1 %v20770_v33  ;;  %v14736_v14 = vpop.f32.mrf.mxu0  ;;  %15044 = vmatprep.subr.bf16.mxu0 %v20775_v44  ;;  %v20839_v33 = vld [vmem:[%s22566_s24 + $0x24a0] ss:$8 sps:$4 sm:$0xff]   ;;  %v20850_v44 = vld [vmem:[%s22566_s24 + $0x2594] ss:$8 sps:$4 sm:$0xff]   ;;  %v20848_v38 = vld [vmem:[%s22566_s24 + $0x2590] ss:$8 sps:$4 sm:$0xff]  }
 0x51d   : > { %15087 = vmatprep.subr.bf16.mxu1 %v20778_v4  ;;  %v24295_v29 = vadd.f32 %v14777_v13, %v14735_v31  ;;  %v14737_v16 = vadd.f32 %v14736_v14, %v24202_v51  ;;  %v14779_v57 = vpop.f32.mrf.mxu1  ;;  %v20785_v51 = vld [vmem:[%s22566_s24 + $0x2430] ss:$8 sps:$4 sm:$0xff]   ;;  %v20853_v9 = vld [vmem:[%s22566_s24 + $0x2484] ss:$8 sps:$4 sm:$0xff]   ;;  %v20851_v31 = vld [vmem:[%s22566_s24 + $0x2480] ss:$8 sps:$4 sm:$0xff]  }
 0x51e   : > { %v20845_v4 = vld [vmem:[%s22566_s24 + $0x2490] ss:$8 sps:$4 sm:$0xff]   ;;  %v20856_v13 = vld [vmem:[%s22566_s24 + $0x2584] ss:$8 sps:$4 sm:$0xff]   ;;  %v20862_v14 = vld [vmem:[%s22566_s24 + $0x2774] ss:$8 sps:$4 sm:$0xff]  }
 0x51f   : > { %v24298_v19 = vadd.f32 %v14779_v57, %v14737_v16  ;;  %15045 = vmatpush1.bf16.msra.mxu0 %v20773_v15  ;;  %v20854_v15 = vld [vmem:[%s22566_s24 + $0x2580] ss:$8 sps:$4 sm:$0xff]   ;;  %v16781_v16 = vcombine.low %v24267_v58, %v24270_v50  ;;  %v24360_v57 = vld [vmem:[%s22634_s29 + $0x730] sm:$0xff] }
 0x520   : > { %15088 = vmatpush1.bf16.msra.mxu1 %v20776_v8  ;;  %15046 = vmatprep.subr.bf16.mxu0 %v20781_v7  ;;  %v20859_v8 = vld [vmem:[%s22566_s24 + $0x2674] ss:$8 sps:$4 sm:$0xff]  }
 0x521   : > { %15089 = vmatprep.subr.bf16.mxu1 %v20784_v47  ;;  %v24353_v7 = vld [vmem:[%s22634_s29 + $0x130] sm:$0xff]  ;;  %v16779_v47 = vcombine.low %v24257_v21, %v24264_v18 }
 0x522   : > { %v16784_v21 = vcombine.high %v24353_v7, %v24360_v57 }
 0x523   : > { %15047 = vmatpush1.bf16.msra.mxu0 %v20779_v1  ;;  %v24363_v1 = vld [vmem:[%s22634_s29 + $0x138] sm:$0xff] }
 0x524   : > { %15090 = vmatpush1.bf16.msra.mxu1 %v20782_v17  ;;  %15048 = vmatprep.subr.bf16.mxu0 %v20787_v48  ;;  %v24366_v17 = vld [vmem:[%s22634_s29 + $0x738] sm:$0xff] }
 0x525   : > { %15091 = vmatprep.subr.bf16.mxu1 %v20790_v20  ;;  %v20857_v48 = vld [vmem:[%s22566_s24 + $0x2670] ss:$8 sps:$4 sm:$0xff]   ;;  %v16786_v18 = vcombine.high %v24363_v1, %v24366_v17 }
 0x526   : > { %v20860_v20 = vld [vmem:[%s22566_s24 + $0x2770] ss:$8 sps:$4 sm:$0xff]  }
 0x527   : > { %15049 = vmatpush1.bf16.msra.mxu0 %v20785_v51  ;;  %v20865_v51 = vld [vmem:[%s22566_s24 + $0x2664] ss:$8 sps:$4 sm:$0xff]  }
 0x528   : > { %15092 = vmatpush1.bf16.msra.mxu1 %v20788_v59  ;;  %15050 = vmatprep.subr.bf16.mxu0 %v20793_v63  ;;  %v20868_v59 = vld [vmem:[%s22566_s24 + $0x2764] ss:$8 sps:$4 sm:$0xff]  }
 0x529   : > { %15093 = vmatprep.subr.bf16.mxu1 %v20796_v3  ;;  %v20863_v3 = vld [vmem:[%s22566_s24 + $0x2660] ss:$8 sps:$4 sm:$0xff]  }
 0x52b   : > { %15051 = vmatpush1.bf16.msra.mxu0 %v20791_v23  ;;  %v20866_v23 = vld [vmem:[%s22566_s24 + $0x2760] ss:$8 sps:$4 sm:$0xff]  }
 0x52c   : > { %15094 = vmatpush1.bf16.msra.mxu1 %v20794_v52  ;;  %15052 = vmatprep.subr.bf16.mxu0 %v20799_v53 }
 0x52d   : > { %15095 = vmatprep.subr.bf16.mxu1 %v20802_v34  ;;  %v20871_v34 = vld [vmem:[%s22566_s24 + $0x2654] ss:$8 sps:$4 sm:$0xff]  }
 0x52f   : > { %15053 = vmatpush1.bf16.msra.mxu0 %v20797_v36  ;;  %v20874_v36 = vld [vmem:[%s22566_s24 + $0x2754] ss:$8 sps:$4 sm:$0xff]  }
 0x530   : > { %15096 = vmatpush1.bf16.msra.mxu1 %v20800_v54  ;;  %15054 = vmatprep.subr.bf16.mxu0 %v20805_v24 }
 0x531   : > { %15097 = vmatprep.subr.bf16.mxu1 %v20808_v26 }
 0x533   : > { %15055 = vmatpush1.bf16.msra.mxu0 %v20803_v25 }
 0x534   : > { %15098 = vmatpush1.bf16.msra.mxu1 %v20806_v60  ;;  %15056 = vmatprep.subr.bf16.mxu0 %v20811_v28  ;;  %v20869_v28 = vld [vmem:[%s22566_s24 + $0x2650] ss:$8 sps:$4 sm:$0xff]  }
 0x535   : > { %15099 = vmatprep.subr.bf16.mxu1 %v20814_v55  ;;  %v20872_v55 = vld [vmem:[%s22566_s24 + $0x2750] ss:$8 sps:$4 sm:$0xff]  }
 0x537   : > { %15057 = vmatpush2.bf16.msra.mxu0 %v20809_v27 }
 0x538   : > { %15100 = vmatpush2.bf16.msra.mxu1 %v20812_v10  ;;  %15058 = vmatprep.subr.bf16.mxu0 %v20817_v12  ;;  %v20880_v10 = vld [vmem:[%s22566_s24 + $0x2744] ss:$8 sps:$4 sm:$0xff]  }
 0x539   : > { %15101 = vmatprep.subr.bf16.mxu1 %v20820_v46 }
 0x53b   : > { %15059 = vmatpush2.bf16.msra.mxu0 %v20815_v35 }
 0x53c   : > { %15102 = vmatpush2.bf16.msra.mxu1 %v20818_v45  ;;  %15060 = vmatprep.subr.bf16.mxu0 %v20823_v41  ;;  %v20875_v45 = vld [vmem:[%s22566_s24 + $0x2640] ss:$8 sps:$4 sm:$0xff]  }
 0x53d   : > { %15103 = vmatprep.subr.bf16.mxu1 %v20826_v32  ;;  %v20878_v41 = vld [vmem:[%s22566_s24 + $0x2740] ss:$8 sps:$4 sm:$0xff]   ;;  %v20883_v32 = vld [vmem:[%s22566_s24 + $0x2634] ss:$8 sps:$4 sm:$0xff]  }
 0x53f   : > { %15061 = vmatpush2.bf16.msra.mxu0 %v20821_v2  ;;  %v20886_v2 = vld [vmem:[%s22566_s24 + $0x2734] ss:$8 sps:$4 sm:$0xff]  }
 0x540   : > { %15104 = vmatpush2.bf16.msra.mxu1 %v20824_v30  ;;  %15062 = vmatprep.subr.bf16.mxu0 %v20829_v0  ;;  %v20884_v30 = vld [vmem:[%s22566_s24 + $0x2730] ss:$8 sps:$4 sm:$0xff]   ;;  %v20889_v0 = vld [vmem:[%s22566_s24 + $0x2624] ss:$8 sps:$4 sm:$0xff]  }
 0x541   : > { %15105 = vmatprep.subr.bf16.mxu1 %v20832_v62  ;;  %v20892_v62 = vld [vmem:[%s22566_s24 + $0x2724] ss:$8 sps:$4 sm:$0xff]  }
 0x543   : > { %15063 = vmatpush2.bf16.msra.mxu0 %v20827_v61  ;;  %v20887_v61 = vld [vmem:[%s22566_s24 + $0x2620] ss:$8 sps:$4 sm:$0xff]  }
 0x544   : > { %15106 = vmatpush2.bf16.msra.mxu1 %v20830_v40  ;;  %15064 = vmatprep.subr.bf16.mxu0 %v20835_v22  ;;  %v20890_v40 = vld [vmem:[%s22566_s24 + $0x2720] ss:$8 sps:$4 sm:$0xff]   ;;  %v20895_v22 = vld [vmem:[%s22566_s24 + $0x2614] ss:$8 sps:$4 sm:$0xff]  }
 0x545   : > { %15107 = vmatprep.subr.bf16.mxu1 %v20838_v39  ;;  %v20898_v39 = vld [vmem:[%s22566_s24 + $0x2714] ss:$8 sps:$4 sm:$0xff]  }
 0x547   : > { %15065 = vmatpush2.bf16.msra.mxu0 %v20833_v11  ;;  %v20893_v11 = vld [vmem:[%s22566_s24 + $0x2610] ss:$8 sps:$4 sm:$0xff]  }
 0x548   : > { %15108 = vmatpush2.bf16.msra.mxu1 %v20836_v49  ;;  %15066 = vmatprep.subr.bf16.mxu0 %v20841_v43  ;;  %v20896_v49 = vld [vmem:[%s22566_s24 + $0x2710] ss:$8 sps:$4 sm:$0xff]   ;;  %v20901_v43 = vld [vmem:[%s22566_s24 + $0x2604] ss:$8 sps:$4 sm:$0xff]  }
 0x549   : > { %15109 = vmatprep.subr.bf16.mxu1 %v20844_v56  ;;  %v20904_v56 = vld [vmem:[%s22566_s24 + $0x2704] ss:$8 sps:$4 sm:$0xff]  }
 0x54b   : > { %15067 = vmatpush2.bf16.msra.mxu0 %v20839_v33  ;;  %v20899_v33 = vld [vmem:[%s22566_s24 + $0x2600] ss:$8 sps:$4 sm:$0xff]  }
 0x54c   : > { %15110 = vmatpush2.bf16.msra.mxu1 %v20842_v5  ;;  %15068 = vmatprep.subr.bf16.mxu0 %v20847_v6  ;;  %v20902_v5 = vld [vmem:[%s22566_s24 + $0x2700] ss:$8 sps:$4 sm:$0xff]   ;;  %v20907_v6 = vld [vmem:[%s22566_s24 + $0x26f4] ss:$8 sps:$4 sm:$0xff]  }
 0x54d   : > { %15111 = vmatprep.subr.bf16.mxu1 %v20850_v44  ;;  %v20910_v44 = vld [vmem:[%s22566_s24 + $0x27f4] ss:$8 sps:$4 sm:$0xff]  }
 0x54f   : > { %15069 = vmatpush2.bf16.msra.mxu0 %v20845_v4  ;;  %v20905_v4 = vld [vmem:[%s22566_s24 + $0x26f0] ss:$8 sps:$4 sm:$0xff]  }
 0x550   : > { %15112 = vmatpush2.bf16.msra.mxu1 %v20848_v38  ;;  %15070 = vmatprep.subr.bf16.mxu0 %v20853_v9  ;;  %v20908_v38 = vld [vmem:[%s22566_s24 + $0x27f0] ss:$8 sps:$4 sm:$0xff]   ;;  %v20913_v9 = vld [vmem:[%s22566_s24 + $0x26e4] ss:$8 sps:$4 sm:$0xff]  }
 0x551   : > { %15113 = vmatprep.subr.bf16.mxu1 %v20856_v13  ;;  %v20916_v13 = vld [vmem:[%s22566_s24 + $0x27e4] ss:$8 sps:$4 sm:$0xff]  }
 0x553   : > { %15071 = vmatpush2.bf16.msra.mxu0 %v20851_v31  ;;  %v20911_v31 = vld [vmem:[%s22566_s24 + $0x26e0] ss:$8 sps:$4 sm:$0xff]  }
 0x554   : > { %15114 = vmatpush2.bf16.msra.mxu1 %v20854_v15  ;;  %15126 = vmatprep.subr.bf16.mxu0 %v20859_v8  ;;  %v20914_v15 = vld [vmem:[%s22566_s24 + $0x27e0] ss:$8 sps:$4 sm:$0xff]   ;;  %v20919_v8 = vld [vmem:[%s22566_s24 + $0x26d4] ss:$8 sps:$4 sm:$0xff]  }
 0x555   : > { %15169 = vmatprep.subr.bf16.mxu1 %v20862_v14  ;;  %v20922_v14 = vld [vmem:[%s22566_s24 + $0x27d4] ss:$8 sps:$4 sm:$0xff]  }
 0x556   : > { %v14816_v58 = vpop.f32.mrf.mxu0  ;;  %15073 = vmatmul.mubr.bf16.vlgmr.msra.gmra.mxu0 %v16779_v47  ;;  %v20917_v47 = vld [vmem:[%s22566_s24 + $0x26d0] ss:$8 sps:$4 sm:$0xff]  }
 0x557   : > { %v14859_v50 = vpop.f32.mrf.mxu1  ;;  %15116 = vmatmul.mubr.bf16.vlgmr.msra.gmra.mxu1 %v16781_v16  ;;  %v14817_v63 = vadd.f32 %v14816_v58, %v24285_v37  ;;  %15127 = vmatpush1.bf16.msra.mxu0 %v20857_v48  ;;  %v20920_v16 = vld [vmem:[%s22566_s24 + $0x27d0] ss:$8 sps:$4 sm:$0xff]   ;;  %v20925_v48 = vld [vmem:[%s22566_s24 + $0x26c4] ss:$8 sps:$4 sm:$0xff]  }
 0x558   : > { %15170 = vmatpush1.bf16.msra.mxu1 %v20860_v20  ;;  %v14818_v52 = vpop.f32.mrf.mxu0  ;;  %15128 = vmatprep.subr.bf16.mxu0 %v20865_v51  ;;  %v20928_v20 = vld [vmem:[%s22566_s24 + $0x27c4] ss:$8 sps:$4 sm:$0xff]   ;;  %v20923_v51 = vld [vmem:[%s22566_s24 + $0x26c0] ss:$8 sps:$4 sm:$0xff]   ;;  %v20929_v58 = vld [vmem:[%s22566_s24 + $0x26b0] ss:$8 sps:$4 sm:$0xff]  }
 0x559   : > { %v14861_v53 = vpop.f32.mrf.mxu1  ;;  %15171 = vmatprep.subr.bf16.mxu1 %v20868_v59  ;;  %v24381_v54 = vadd.f32 %v14859_v50, %v14817_v63  ;;  %v14819_v24 = vadd.f32 %v14818_v52, %v24288_v42  ;;  %15158 = vmatprep.mubr.bf16.mxu0 %v16784_v21  ;;  %v20877_v42 = vld [vmem:[%s22566_s24 + $0x2644] ss:$8 sps:$4 sm:$0xff]   ;;  %v20926_v59 = vld [vmem:[%s22566_s24 + $0x27c0] ss:$8 sps:$4 sm:$0xff]   ;;  %v20931_v21 = vld [vmem:[%s22566_s24 + $0x26b4] ss:$8 sps:$4 sm:$0xff]  }
 0x55a   : > { %15201 = vmatprep.mubr.bf16.mxu1 %v16786_v18  ;;  %v14820_v37 = vpop.f32.mrf.mxu0  ;;  %v20934_v18 = vld [vmem:[%s22566_s24 + $0x27b4] ss:$8 sps:$4 sm:$0xff]   ;;  %v20932_v50 = vld [vmem:[%s22566_s24 + $0x27b0] ss:$8 sps:$4 sm:$0xff]   ;;  %v20937_v63 = vld [vmem:[%s22566_s24 + $0x26a4] ss:$8 sps:$4 sm:$0xff]  }
 0x55b   : > { %v14863_v26 = vpop.f32.mrf.mxu1  ;;  %v24384_v25 = vadd.f32 %v14861_v53, %v14819_v24  ;;  %v14821_v60 = vadd.f32 %v14820_v37, %v24295_v29  ;;  %15129 = vmatpush1.bf16.msra.mxu0 %v20863_v3  ;;  %v20940_v3 = vld [vmem:[%s22566_s24 + $0x27a4] ss:$8 sps:$4 sm:$0xff]   ;;  %v20938_v52 = vld [vmem:[%s22566_s24 + $0x27a0] ss:$8 sps:$4 sm:$0xff]   ;;  %v20943_v53 = vld [vmem:[%s22566_s24 + $0x2694] ss:$8 sps:$4 sm:$0xff]  }
 0x55c   : > { %15172 = vmatpush1.bf16.msra.mxu1 %v20866_v23  ;;  %v14822_v27 = vpop.f32.mrf.mxu0  ;;  %15130 = vmatprep.subr.bf16.mxu0 %v20871_v34  ;;  %v20935_v23 = vld [vmem:[%s22566_s24 + $0x26a0] ss:$8 sps:$4 sm:$0xff]   ;;  %v20946_v34 = vld [vmem:[%s22566_s24 + $0x2794] ss:$8 sps:$4 sm:$0xff]   ;;  %v20944_v24 = vld [vmem:[%s22566_s24 + $0x2790] ss:$8 sps:$4 sm:$0xff]  }
 0x55d   : > { %15173 = vmatprep.subr.bf16.mxu1 %v20874_v36  ;;  %v24391_v12 = vadd.f32 %v14863_v26, %v14821_v60  ;;  %v14823_v46 = vadd.f32 %v14822_v27, %v24298_v19  ;;  %v14865_v29 = vpop.f32.mrf.mxu1  ;;  %v20881_v19 = vld [vmem:[%s22566_s24 + $0x2630] ss:$8 sps:$4 sm:$0xff]   ;;  %v20949_v37 = vld [vmem:[%s22566_s24 + $0x2684] ss:$8 sps:$4 sm:$0xff]   ;;  %v20947_v60 = vld [vmem:[%s22566_s24 + $0x2680] ss:$8 sps:$4 sm:$0xff]  }
 0x55e   : > { %v20941_v36 = vld [vmem:[%s22566_s24 + $0x2690] ss:$8 sps:$4 sm:$0xff]   ;;  %v20952_v26 = vld [vmem:[%s22566_s24 + $0x2784] ss:$8 sps:$4 sm:$0xff]   ;;  %v20958_v27 = vld [vmem:[%s22566_s24 + $0x2974] ss:$8 sps:$4 sm:$0xff]  }
 0x55f   : > { %v24394_v35 = vadd.f32 %v14865_v29, %v14823_v46  ;;  %15131 = vmatpush1.bf16.msra.mxu0 %v20869_v28  ;;  %v20950_v28 = vld [vmem:[%s22566_s24 + $0x2780] ss:$8 sps:$4 sm:$0xff]   ;;  %v16785_v46 = vcombine.low %v24363_v1, %v24366_v17 }
 0x560   : > { %15174 = vmatpush1.bf16.msra.mxu1 %v20872_v55  ;;  %15132 = vmatprep.subr.bf16.mxu0 %v20877_v42  ;;  %v20955_v55 = vld [vmem:[%s22566_s24 + $0x2874] ss:$8 sps:$4 sm:$0xff]   ;;  %v24449_v42 = vld [vmem:[%s22634_s29 + $0x140] sm:$0xff] }
 0x561   : > { %15175 = vmatprep.subr.bf16.mxu1 %v20880_v10  ;;  %v16783_v10 = vcombine.low %v24353_v7, %v24360_v57  ;;  %v24456_v29 = vld [vmem:[%s22634_s29 + $0x740] sm:$0xff] }
 0x562   : > { %v20961_v7 = vld [vmem:[%s22566_s24 + $0x2864] ss:$8 sps:$4 sm:$0xff]   ;;  %v16788_v1 = vcombine.high %v24449_v42, %v24456_v29 }
 0x563   : > { %15133 = vmatpush1.bf16.msra.mxu0 %v20875_v45  ;;  %v24459_v45 = vld [vmem:[%s22634_s29 + $0x148] sm:$0xff] }
 0x564   : > { %15176 = vmatpush1.bf16.msra.mxu1 %v20878_v41  ;;  %15134 = vmatprep.subr.bf16.mxu0 %v20883_v32  ;;  %v24462_v41 = vld [vmem:[%s22634_s29 + $0x748] sm:$0xff]  ;;  %v20953_v32 = vld [vmem:[%s22566_s24 + $0x2870] ss:$8 sps:$4 sm:$0xff]  }
 0x565   : > { %15177 = vmatprep.subr.bf16.mxu1 %v20886_v2  ;;  %v20956_v2 = vld [vmem:[%s22566_s24 + $0x2970] ss:$8 sps:$4 sm:$0xff]   ;;  %v20964_v57 = vld [vmem:[%s22566_s24 + $0x2964] ss:$8 sps:$4 sm:$0xff]   ;;  %v16790_v17 = vcombine.high %v24459_v45, %v24462_v41 }
 0x567   : > { %15135 = vmatpush1.bf16.msra.mxu0 %v20881_v19  ;;  %v20959_v19 = vld [vmem:[%s22566_s24 + $0x2860] ss:$8 sps:$4 sm:$0xff]  }
 0x568   : > { %15178 = vmatpush1.bf16.msra.mxu1 %v20884_v30  ;;  %15136 = vmatprep.subr.bf16.mxu0 %v20889_v0  ;;  %v20962_v30 = vld [vmem:[%s22566_s24 + $0x2960] ss:$8 sps:$4 sm:$0xff]   ;;  %v20967_v0 = vld [vmem:[%s22566_s24 + $0x2854] ss:$8 sps:$4 sm:$0xff]  }
 0x569   : > { %15179 = vmatprep.subr.bf16.mxu1 %v20892_v62  ;;  %v20970_v62 = vld [vmem:[%s22566_s24 + $0x2954] ss:$8 sps:$4 sm:$0xff]  }
 0x56b   : > { %15137 = vmatpush1.bf16.msra.mxu0 %v20887_v61  ;;  %v20965_v61 = vld [vmem:[%s22566_s24 + $0x2850] ss:$8 sps:$4 sm:$0xff]  }
 0x56c   : > { %15180 = vmatpush1.bf16.msra.mxu1 %v20890_v40  ;;  %15138 = vmatprep.subr.bf16.mxu0 %v20895_v22  ;;  %v20968_v40 = vld [vmem:[%s22566_s24 + $0x2950] ss:$8 sps:$4 sm:$0xff]   ;;  %v20973_v22 = vld [vmem:[%s22566_s24 + $0x2844] ss:$8 sps:$4 sm:$0xff]  }
 0x56d   : > { %15181 = vmatprep.subr.bf16.mxu1 %v20898_v39  ;;  %v20976_v39 = vld [vmem:[%s22566_s24 + $0x2944] ss:$8 sps:$4 sm:$0xff]  }
 0x56f   : > { %15139 = vmatpush1.bf16.msra.mxu0 %v20893_v11  ;;  %v20971_v11 = vld [vmem:[%s22566_s24 + $0x2840] ss:$8 sps:$4 sm:$0xff]  }
 0x570   : > { %15182 = vmatpush1.bf16.msra.mxu1 %v20896_v49  ;;  %15140 = vmatprep.subr.bf16.mxu0 %v20901_v43  ;;  %v20974_v49 = vld [vmem:[%s22566_s24 + $0x2940] ss:$8 sps:$4 sm:$0xff]   ;;  %v20979_v43 = vld [vmem:[%s22566_s24 + $0x2834] ss:$8 sps:$4 sm:$0xff]  }
 0x571   : > { %15183 = vmatprep.subr.bf16.mxu1 %v20904_v56  ;;  %v20982_v56 = vld [vmem:[%s22566_s24 + $0x2934] ss:$8 sps:$4 sm:$0xff]  }
 0x573   : > { %15141 = vmatpush1.bf16.msra.mxu0 %v20899_v33  ;;  %v20977_v33 = vld [vmem:[%s22566_s24 + $0x2830] ss:$8 sps:$4 sm:$0xff]  }
 0x574   : > { %15184 = vmatpush1.bf16.msra.mxu1 %v20902_v5  ;;  %15142 = vmatprep.subr.bf16.mxu0 %v20907_v6  ;;  %v20980_v5 = vld [vmem:[%s22566_s24 + $0x2930] ss:$8 sps:$4 sm:$0xff]   ;;  %v20985_v6 = vld [vmem:[%s22566_s24 + $0x2824] ss:$8 sps:$4 sm:$0xff]  }
 0x575   : > { %15185 = vmatprep.subr.bf16.mxu1 %v20910_v44  ;;  %v20988_v44 = vld [vmem:[%s22566_s24 + $0x2924] ss:$8 sps:$4 sm:$0xff]  }
 0x577   : > { %15143 = vmatpush2.bf16.msra.mxu0 %v20905_v4  ;;  %v20983_v4 = vld [vmem:[%s22566_s24 + $0x2820] ss:$8 sps:$4 sm:$0xff]  }
 0x578   : > { %15186 = vmatpush2.bf16.msra.mxu1 %v20908_v38  ;;  %15144 = vmatprep.subr.bf16.mxu0 %v20913_v9  ;;  %v20986_v38 = vld [vmem:[%s22566_s24 + $0x2920] ss:$8 sps:$4 sm:$0xff]   ;;  %v20991_v9 = vld [vmem:[%s22566_s24 + $0x2814] ss:$8 sps:$4 sm:$0xff]  }
 0x579   : > { %15187 = vmatprep.subr.bf16.mxu1 %v20916_v13  ;;  %v20994_v13 = vld [vmem:[%s22566_s24 + $0x2914] ss:$8 sps:$4 sm:$0xff]  }
 0x57b   : > { %15145 = vmatpush2.bf16.msra.mxu0 %v20911_v31  ;;  %v20989_v31 = vld [vmem:[%s22566_s24 + $0x2810] ss:$8 sps:$4 sm:$0xff]  }
 0x57c   : > { %15188 = vmatpush2.bf16.msra.mxu1 %v20914_v15  ;;  %15146 = vmatprep.subr.bf16.mxu0 %v20919_v8  ;;  %v20992_v15 = vld [vmem:[%s22566_s24 + $0x2910] ss:$8 sps:$4 sm:$0xff]   ;;  %v20997_v8 = vld [vmem:[%s22566_s24 + $0x2804] ss:$8 sps:$4 sm:$0xff]  }
 0x57d   : > { %15189 = vmatprep.subr.bf16.mxu1 %v20922_v14  ;;  %v21000_v14 = vld [vmem:[%s22566_s24 + $0x2904] ss:$8 sps:$4 sm:$0xff]  }
 0x57f   : > { %15147 = vmatpush2.bf16.msra.mxu0 %v20917_v47  ;;  %v20995_v47 = vld [vmem:[%s22566_s24 + $0x2800] ss:$8 sps:$4 sm:$0xff]  }
 0x580   : > { %15190 = vmatpush2.bf16.msra.mxu1 %v20920_v16  ;;  %15148 = vmatprep.subr.bf16.mxu0 %v20925_v48  ;;  %v20998_v16 = vld [vmem:[%s22566_s24 + $0x2900] ss:$8 sps:$4 sm:$0xff]   ;;  %v21003_v48 = vld [vmem:[%s22566_s24 + $0x28f4] ss:$8 sps:$4 sm:$0xff]  }
 0x581   : > { %15191 = vmatprep.subr.bf16.mxu1 %v20928_v20  ;;  %v21006_v20 = vld [vmem:[%s22566_s24 + $0x29f4] ss:$8 sps:$4 sm:$0xff]  }
 0x583   : > { %15149 = vmatpush2.bf16.msra.mxu0 %v20923_v51  ;;  %v21001_v51 = vld [vmem:[%s22566_s24 + $0x28f0] ss:$8 sps:$4 sm:$0xff]  }
 0x584   : > { %15192 = vmatpush2.bf16.msra.mxu1 %v20926_v59  ;;  %15150 = vmatprep.subr.bf16.mxu0 %v20931_v21  ;;  %v21004_v59 = vld [vmem:[%s22566_s24 + $0x29f0] ss:$8 sps:$4 sm:$0xff]   ;;  %v21009_v21 = vld [vmem:[%s22566_s24 + $0x28e4] ss:$8 sps:$4 sm:$0xff]  }
 0x585   : > { %15193 = vmatprep.subr.bf16.mxu1 %v20934_v18  ;;  %v21012_v18 = vld [vmem:[%s22566_s24 + $0x29e4] ss:$8 sps:$4 sm:$0xff]  }
 0x587   : > { %15151 = vmatpush2.bf16.msra.mxu0 %v20929_v58  ;;  %v21007_v58 = vld [vmem:[%s22566_s24 + $0x28e0] ss:$8 sps:$4 sm:$0xff]  }
 0x588   : > { %15194 = vmatpush2.bf16.msra.mxu1 %v20932_v50  ;;  %15152 = vmatprep.subr.bf16.mxu0 %v20937_v63  ;;  %v21010_v50 = vld [vmem:[%s22566_s24 + $0x29e0] ss:$8 sps:$4 sm:$0xff]   ;;  %v21015_v63 = vld [vmem:[%s22566_s24 + $0x28d4] ss:$8 sps:$4 sm:$0xff]  }
 0x589   : > { %15195 = vmatprep.subr.bf16.mxu1 %v20940_v3  ;;  %v21018_v3 = vld [vmem:[%s22566_s24 + $0x29d4] ss:$8 sps:$4 sm:$0xff]  }
 0x58b   : > { %15153 = vmatpush2.bf16.msra.mxu0 %v20935_v23  ;;  %v21013_v23 = vld [vmem:[%s22566_s24 + $0x28d0] ss:$8 sps:$4 sm:$0xff]  }
 0x58c   : > { %15196 = vmatpush2.bf16.msra.mxu1 %v20938_v52  ;;  %15154 = vmatprep.subr.bf16.mxu0 %v20943_v53  ;;  %v21016_v52 = vld [vmem:[%s22566_s24 + $0x29d0] ss:$8 sps:$4 sm:$0xff]   ;;  %v21021_v53 = vld [vmem:[%s22566_s24 + $0x28c4] ss:$8 sps:$4 sm:$0xff]  }
 0x58d   : > { %15197 = vmatprep.subr.bf16.mxu1 %v20946_v34  ;;  %v21024_v34 = vld [vmem:[%s22566_s24 + $0x29c4] ss:$8 sps:$4 sm:$0xff]  }
 0x58f   : > { %15155 = vmatpush2.bf16.msra.mxu0 %v20941_v36  ;;  %v21019_v36 = vld [vmem:[%s22566_s24 + $0x28c0] ss:$8 sps:$4 sm:$0xff]  }
 0x590   : > { %15198 = vmatpush2.bf16.msra.mxu1 %v20944_v24  ;;  %15156 = vmatprep.subr.bf16.mxu0 %v20949_v37  ;;  %v21022_v24 = vld [vmem:[%s22566_s24 + $0x29c0] ss:$8 sps:$4 sm:$0xff]   ;;  %v21027_v37 = vld [vmem:[%s22566_s24 + $0x28b4] ss:$8 sps:$4 sm:$0xff]  }
 0x591   : > { %15199 = vmatprep.subr.bf16.mxu1 %v20952_v26  ;;  %v21030_v26 = vld [vmem:[%s22566_s24 + $0x29b4] ss:$8 sps:$4 sm:$0xff]  }
 0x593   : > { %15157 = vmatpush2.bf16.msra.mxu0 %v20947_v60  ;;  %v21025_v60 = vld [vmem:[%s22566_s24 + $0x28b0] ss:$8 sps:$4 sm:$0xff]  }
 0x594   : > { %15200 = vmatpush2.bf16.msra.mxu1 %v20950_v28  ;;  %15212 = vmatprep.subr.bf16.mxu0 %v20955_v55  ;;  %v21028_v28 = vld [vmem:[%s22566_s24 + $0x29b0] ss:$8 sps:$4 sm:$0xff]   ;;  %v21033_v55 = vld [vmem:[%s22566_s24 + $0x28a4] ss:$8 sps:$4 sm:$0xff]  }
 0x595   : > { %15255 = vmatprep.subr.bf16.mxu1 %v20958_v27  ;;  %v21036_v27 = vld [vmem:[%s22566_s24 + $0x29a4] ss:$8 sps:$4 sm:$0xff]  }
 0x596   : > { %15159 = vmatmul.mubr.bf16.vlgmr.msra.gmra.mxu0 %v16783_v10  ;;  %v21031_v10 = vld [vmem:[%s22566_s24 + $0x28a0] ss:$8 sps:$4 sm:$0xff]  }
 0x597   : > { %15202 = vmatmul.mubr.bf16.vlgmr.msra.gmra.mxu1 %v16785_v46  ;;  %15213 = vmatpush1.bf16.msra.mxu0 %v20953_v32  ;;  %v21034_v46 = vld [vmem:[%s22566_s24 + $0x29a0] ss:$8 sps:$4 sm:$0xff]   ;;  %v21039_v32 = vld [vmem:[%s22566_s24 + $0x2894] ss:$8 sps:$4 sm:$0xff]  }
 0x598   : > { %15256 = vmatpush1.bf16.msra.mxu1 %v20956_v2  ;;  %15214 = vmatprep.subr.bf16.mxu0 %v20961_v7  ;;  %v21042_v2 = vld [vmem:[%s22566_s24 + $0x2994] ss:$8 sps:$4 sm:$0xff]   ;;  %v21037_v7 = vld [vmem:[%s22566_s24 + $0x2890] ss:$8 sps:$4 sm:$0xff]  }
 0x599   : > { %15257 = vmatprep.subr.bf16.mxu1 %v20964_v57  ;;  %15244 = vmatprep.mubr.bf16.mxu0 %v16788_v1  ;;  %v21040_v57 = vld [vmem:[%s22566_s24 + $0x2990] ss:$8 sps:$4 sm:$0xff]   ;;  %v21045_v1 = vld [vmem:[%s22566_s24 + $0x2884] ss:$8 sps:$4 sm:$0xff]  }
 0x59a   : > { %15287 = vmatprep.mubr.bf16.mxu1 %v16790_v17  ;;  %v21048_v17 = vld [vmem:[%s22566_s24 + $0x2984] ss:$8 sps:$4 sm:$0xff]  }
 0x59b   : > { %15215 = vmatpush1.bf16.msra.mxu0 %v20959_v19  ;;  %v21043_v19 = vld [vmem:[%s22566_s24 + $0x2880] ss:$8 sps:$4 sm:$0xff]  }
 0x59c   : > { %15258 = vmatpush1.bf16.msra.mxu1 %v20962_v30  ;;  %15216 = vmatprep.subr.bf16.mxu0 %v20967_v0  ;;  %v21046_v30 = vld [vmem:[%s22566_s24 + $0x2980] ss:$8 sps:$4 sm:$0xff]   ;;  %v21051_v0 = vld [vmem:[%s22566_s24 + $0x2a74] ss:$8 sps:$4 sm:$0xff]  }
 0x59d   : > { %15259 = vmatprep.subr.bf16.mxu1 %v20970_v62  ;;  %v21054_v62 = vld [vmem:[%s22566_s24 + $0x2b74] ss:$8 sps:$4 sm:$0xff]  }
 0x59f   : > { %15217 = vmatpush1.bf16.msra.mxu0 %v20965_v61  ;;  %v24533_v61 = vld [vmem:[%s22634_s29 + $0x150] sm:$0xff] }
 0x5a0   : > { %15260 = vmatpush1.bf16.msra.mxu1 %v20968_v40  ;;  %15218 = vmatprep.subr.bf16.mxu0 %v20973_v22  ;;  %v16787_v40 = vcombine.low %v24449_v42, %v24456_v29  ;;  %v16789_v22 = vcombine.low %v24459_v45, %v24462_v41  ;;  %v21057_v42 = vld [vmem:[%s22566_s24 + $0x2a64] ss:$8 sps:$4 sm:$0xff]  }
 0x5a1   : > { %15261 = vmatprep.subr.bf16.mxu1 %v20976_v39  ;;  %v24540_v39 = vld [vmem:[%s22634_s29 + $0x750] sm:$0xff]  ;;  %v21060_v29 = vld [vmem:[%s22566_s24 + $0x2b64] ss:$8 sps:$4 sm:$0xff]  }
 0x5a2   : > { %v16792_v45 = vcombine.high %v24533_v61, %v24540_v39 }
 0x5a3   : > { %15219 = vmatpush1.bf16.msra.mxu0 %v20971_v11  ;;  %v24543_v11 = vld [vmem:[%s22634_s29 + $0x158] sm:$0xff] }
 0x5a4   : > { %15262 = vmatpush1.bf16.msra.mxu1 %v20974_v49  ;;  %15220 = vmatprep.subr.bf16.mxu0 %v20979_v43  ;;  %v24546_v49 = vld [vmem:[%s22634_s29 + $0x758] sm:$0xff] }
 0x5a5   : > { %15263 = vmatprep.subr.bf16.mxu1 %v20982_v56  ;;  %v21049_v43 = vld [vmem:[%s22566_s24 + $0x2a70] ss:$8 sps:$4 sm:$0xff]   ;;  %v16794_v41 = vcombine.high %v24543_v11, %v24546_v49 }
 0x5a6   : > { %v21052_v56 = vld [vmem:[%s22566_s24 + $0x2b70] ss:$8 sps:$4 sm:$0xff]  }
 0x5a7   : > { %15221 = vmatpush1.bf16.msra.mxu0 %v20977_v33  ;;  %v21055_v33 = vld [vmem:[%s22566_s24 + $0x2a60] ss:$8 sps:$4 sm:$0xff]  }
 0x5a8   : > { %15264 = vmatpush1.bf16.msra.mxu1 %v20980_v5  ;;  %15222 = vmatprep.subr.bf16.mxu0 %v20985_v6  ;;  %v21058_v5 = vld [vmem:[%s22566_s24 + $0x2b60] ss:$8 sps:$4 sm:$0xff]   ;;  %v21063_v6 = vld [vmem:[%s22566_s24 + $0x2a54] ss:$8 sps:$4 sm:$0xff]  }
 0x5a9   : > { %15265 = vmatprep.subr.bf16.mxu1 %v20988_v44  ;;  %v21066_v44 = vld [vmem:[%s22566_s24 + $0x2b54] ss:$8 sps:$4 sm:$0xff]  }
 0x5ab   : > { %15223 = vmatpush1.bf16.msra.mxu0 %v20983_v4  ;;  %v21061_v4 = vld [vmem:[%s22566_s24 + $0x2a50] ss:$8 sps:$4 sm:$0xff]  }
 0x5ac   : > { %15266 = vmatpush1.bf16.msra.mxu1 %v20986_v38  ;;  %15224 = vmatprep.subr.bf16.mxu0 %v20991_v9  ;;  %v21064_v38 = vld [vmem:[%s22566_s24 + $0x2b50] ss:$8 sps:$4 sm:$0xff]   ;;  %v21069_v9 = vld [vmem:[%s22566_s24 + $0x2a44] ss:$8 sps:$4 sm:$0xff]  }
 0x5ad   : > { %15267 = vmatprep.subr.bf16.mxu1 %v20994_v13  ;;  %v21072_v13 = vld [vmem:[%s22566_s24 + $0x2b44] ss:$8 sps:$4 sm:$0xff]  }
 0x5af   : > { %15225 = vmatpush1.bf16.msra.mxu0 %v20989_v31  ;;  %v21067_v31 = vld [vmem:[%s22566_s24 + $0x2a40] ss:$8 sps:$4 sm:$0xff]  }
 0x5b0   : > { %15268 = vmatpush1.bf16.msra.mxu1 %v20992_v15  ;;  %15226 = vmatprep.subr.bf16.mxu0 %v20997_v8  ;;  %v21070_v15 = vld [vmem:[%s22566_s24 + $0x2b40] ss:$8 sps:$4 sm:$0xff]   ;;  %v21075_v8 = vld [vmem:[%s22566_s24 + $0x2a34] ss:$8 sps:$4 sm:$0xff]  }
 0x5b1   : > { %15269 = vmatprep.subr.bf16.mxu1 %v21000_v14  ;;  %v21078_v14 = vld [vmem:[%s22566_s24 + $0x2b34] ss:$8 sps:$4 sm:$0xff]  }
 0x5b3   : > { %15227 = vmatpush1.bf16.msra.mxu0 %v20995_v47  ;;  %v21073_v47 = vld [vmem:[%s22566_s24 + $0x2a30] ss:$8 sps:$4 sm:$0xff]  }
 0x5b4   : > { %15270 = vmatpush1.bf16.msra.mxu1 %v20998_v16  ;;  %15228 = vmatprep.subr.bf16.mxu0 %v21003_v48  ;;  %v21076_v16 = vld [vmem:[%s22566_s24 + $0x2b30] ss:$8 sps:$4 sm:$0xff]   ;;  %v21081_v48 = vld [vmem:[%s22566_s24 + $0x2a24] ss:$8 sps:$4 sm:$0xff]  }
 0x5b5   : > { %15271 = vmatprep.subr.bf16.mxu1 %v21006_v20  ;;  %v21084_v20 = vld [vmem:[%s22566_s24 + $0x2b24] ss:$8 sps:$4 sm:$0xff]  }
 0x5b7   : > { %15229 = vmatpush2.bf16.msra.mxu0 %v21001_v51  ;;  %v21079_v51 = vld [vmem:[%s22566_s24 + $0x2a20] ss:$8 sps:$4 sm:$0xff]  }
 0x5b8   : > { %15272 = vmatpush2.bf16.msra.mxu1 %v21004_v59  ;;  %15230 = vmatprep.subr.bf16.mxu0 %v21009_v21  ;;  %v21082_v59 = vld [vmem:[%s22566_s24 + $0x2b20] ss:$8 sps:$4 sm:$0xff]   ;;  %v21087_v21 = vld [vmem:[%s22566_s24 + $0x2a14] ss:$8 sps:$4 sm:$0xff]  }
 0x5b9   : > { %15273 = vmatprep.subr.bf16.mxu1 %v21012_v18  ;;  %v21090_v18 = vld [vmem:[%s22566_s24 + $0x2b14] ss:$8 sps:$4 sm:$0xff]  }
 0x5bb   : > { %15231 = vmatpush2.bf16.msra.mxu0 %v21007_v58  ;;  %v21085_v58 = vld [vmem:[%s22566_s24 + $0x2a10] ss:$8 sps:$4 sm:$0xff]  }
 0x5bc   : > { %15274 = vmatpush2.bf16.msra.mxu1 %v21010_v50  ;;  %15232 = vmatprep.subr.bf16.mxu0 %v21015_v63  ;;  %v21088_v50 = vld [vmem:[%s22566_s24 + $0x2b10] ss:$8 sps:$4 sm:$0xff]   ;;  %v21093_v63 = vld [vmem:[%s22566_s24 + $0x2a04] ss:$8 sps:$4 sm:$0xff]  }
 0x5bd   : > { %15275 = vmatprep.subr.bf16.mxu1 %v21018_v3  ;;  %v21096_v3 = vld [vmem:[%s22566_s24 + $0x2b04] ss:$8 sps:$4 sm:$0xff]  }
 0x5bf   : > { %15233 = vmatpush2.bf16.msra.mxu0 %v21013_v23  ;;  %v21091_v23 = vld [vmem:[%s22566_s24 + $0x2a00] ss:$8 sps:$4 sm:$0xff]  }
 0x5c0   : > { %15276 = vmatpush2.bf16.msra.mxu1 %v21016_v52  ;;  %15234 = vmatprep.subr.bf16.mxu0 %v21021_v53  ;;  %v21094_v52 = vld [vmem:[%s22566_s24 + $0x2b00] ss:$8 sps:$4 sm:$0xff]   ;;  %v21099_v53 = vld [vmem:[%s22566_s24 + $0x2af4] ss:$8 sps:$4 sm:$0xff]  }
 0x5c1   : > { %15277 = vmatprep.subr.bf16.mxu1 %v21024_v34  ;;  %v21102_v34 = vld [vmem:[%s22566_s24 + $0x2bf4] ss:$8 sps:$4 sm:$0xff]  }
 0x5c3   : > { %15235 = vmatpush2.bf16.msra.mxu0 %v21019_v36  ;;  %v21097_v36 = vld [vmem:[%s22566_s24 + $0x2af0] ss:$8 sps:$4 sm:$0xff]  }
 0x5c4   : > { %15278 = vmatpush2.bf16.msra.mxu1 %v21022_v24  ;;  %15236 = vmatprep.subr.bf16.mxu0 %v21027_v37  ;;  %v21100_v24 = vld [vmem:[%s22566_s24 + $0x2bf0] ss:$8 sps:$4 sm:$0xff]   ;;  %v21105_v37 = vld [vmem:[%s22566_s24 + $0x2ae4] ss:$8 sps:$4 sm:$0xff]  }
 0x5c5   : > { %15279 = vmatprep.subr.bf16.mxu1 %v21030_v26  ;;  %v21108_v26 = vld [vmem:[%s22566_s24 + $0x2be4] ss:$8 sps:$4 sm:$0xff]  }
 0x5c7   : > { %15237 = vmatpush2.bf16.msra.mxu0 %v21025_v60  ;;  %v21103_v60 = vld [vmem:[%s22566_s24 + $0x2ae0] ss:$8 sps:$4 sm:$0xff]  }
 0x5c8   : > { %15280 = vmatpush2.bf16.msra.mxu1 %v21028_v28  ;;  %15238 = vmatprep.subr.bf16.mxu0 %v21033_v55  ;;  %v21106_v28 = vld [vmem:[%s22566_s24 + $0x2be0] ss:$8 sps:$4 sm:$0xff]   ;;  %v21111_v55 = vld [vmem:[%s22566_s24 + $0x2ad4] ss:$8 sps:$4 sm:$0xff]  }
 0x5c9   : > { %15281 = vmatprep.subr.bf16.mxu1 %v21036_v27  ;;  %v21114_v27 = vld [vmem:[%s22566_s24 + $0x2bd4] ss:$8 sps:$4 sm:$0xff]  }
 0x5cb   : > { %15239 = vmatpush2.bf16.msra.mxu0 %v21031_v10  ;;  %v21109_v10 = vld [vmem:[%s22566_s24 + $0x2ad0] ss:$8 sps:$4 sm:$0xff]  }
 0x5cc   : > { %15282 = vmatpush2.bf16.msra.mxu1 %v21034_v46  ;;  %15240 = vmatprep.subr.bf16.mxu0 %v21039_v32  ;;  %v21112_v46 = vld [vmem:[%s22566_s24 + $0x2bd0] ss:$8 sps:$4 sm:$0xff]   ;;  %v21117_v32 = vld [vmem:[%s22566_s24 + $0x2ac4] ss:$8 sps:$4 sm:$0xff]  }
 0x5cd   : > { %15283 = vmatprep.subr.bf16.mxu1 %v21042_v2  ;;  %v21120_v2 = vld [vmem:[%s22566_s24 + $0x2bc4] ss:$8 sps:$4 sm:$0xff]  }
 0x5cf   : > { %15241 = vmatpush2.bf16.msra.mxu0 %v21037_v7  ;;  %v21115_v7 = vld [vmem:[%s22566_s24 + $0x2ac0] ss:$8 sps:$4 sm:$0xff]  }
 0x5d0   : > { %15284 = vmatpush2.bf16.msra.mxu1 %v21040_v57  ;;  %15242 = vmatprep.subr.bf16.mxu0 %v21045_v1  ;;  %v21118_v57 = vld [vmem:[%s22566_s24 + $0x2bc0] ss:$8 sps:$4 sm:$0xff]   ;;  %v21123_v1 = vld [vmem:[%s22566_s24 + $0x2ab4] ss:$8 sps:$4 sm:$0xff]  }
 0x5d1   : > { %15285 = vmatprep.subr.bf16.mxu1 %v21048_v17  ;;  %v21126_v17 = vld [vmem:[%s22566_s24 + $0x2bb4] ss:$8 sps:$4 sm:$0xff]  }
 0x5d3   : > { %15243 = vmatpush2.bf16.msra.mxu0 %v21043_v19  ;;  %v21121_v19 = vld [vmem:[%s22566_s24 + $0x2ab0] ss:$8 sps:$4 sm:$0xff]  }
 0x5d4   : > { %15286 = vmatpush2.bf16.msra.mxu1 %v21046_v30  ;;  %15298 = vmatprep.subr.bf16.mxu0 %v21051_v0  ;;  %v21124_v30 = vld [vmem:[%s22566_s24 + $0x2bb0] ss:$8 sps:$4 sm:$0xff]   ;;  %v21129_v0 = vld [vmem:[%s22566_s24 + $0x2aa4] ss:$8 sps:$4 sm:$0xff]  }
 0x5d5   : > { %15341 = vmatprep.subr.bf16.mxu1 %v21054_v62  ;;  %v21132_v62 = vld [vmem:[%s22566_s24 + $0x2ba4] ss:$8 sps:$4 sm:$0xff]  }
 0x5d6   : > { %15245 = vmatmul.mubr.bf16.vlgmr.msra.gmra.mxu0 %v16787_v40  ;;  %v21127_v40 = vld [vmem:[%s22566_s24 + $0x2aa0] ss:$8 sps:$4 sm:$0xff]  }
 0x5d7   : > { %15288 = vmatmul.mubr.bf16.vlgmr.msra.gmra.mxu1 %v16789_v22  ;;  %15299 = vmatpush1.bf16.msra.mxu0 %v21049_v43  ;;  %v21130_v22 = vld [vmem:[%s22566_s24 + $0x2ba0] ss:$8 sps:$4 sm:$0xff]   ;;  %v21135_v43 = vld [vmem:[%s22566_s24 + $0x2a94] ss:$8 sps:$4 sm:$0xff]  }
 0x5d8   : > { %15342 = vmatpush1.bf16.msra.mxu1 %v21052_v56  ;;  %15300 = vmatprep.subr.bf16.mxu0 %v21057_v42  ;;  %v21138_v56 = vld [vmem:[%s22566_s24 + $0x2b94] ss:$8 sps:$4 sm:$0xff]   ;;  %v21133_v42 = vld [vmem:[%s22566_s24 + $0x2a90] ss:$8 sps:$4 sm:$0xff]  }
 0x5d9   : > { %15343 = vmatprep.subr.bf16.mxu1 %v21060_v29  ;;  %15330 = vmatprep.mubr.bf16.mxu0 %v16792_v45  ;;  %v21136_v29 = vld [vmem:[%s22566_s24 + $0x2b90] ss:$8 sps:$4 sm:$0xff]   ;;  %v21141_v45 = vld [vmem:[%s22566_s24 + $0x2a84] ss:$8 sps:$4 sm:$0xff]  }
 0x5da   : > { %15373 = vmatprep.mubr.bf16.mxu1 %v16794_v41  ;;  %v21144_v41 = vld [vmem:[%s22566_s24 + $0x2b84] ss:$8 sps:$4 sm:$0xff]  }
 0x5db   : > { %15301 = vmatpush1.bf16.msra.mxu0 %v21055_v33  ;;  %v21139_v33 = vld [vmem:[%s22566_s24 + $0x2a80] ss:$8 sps:$4 sm:$0xff]  }
 0x5dc   : > { %15344 = vmatpush1.bf16.msra.mxu1 %v21058_v5  ;;  %15302 = vmatprep.subr.bf16.mxu0 %v21063_v6  ;;  %v21142_v5 = vld [vmem:[%s22566_s24 + $0x2b80] ss:$8 sps:$4 sm:$0xff]   ;;  %v21147_v6 = vld [vmem:[%s22566_s24 + $0x2c74] ss:$8 sps:$4 sm:$0xff]  }
 0x5dd   : > { %15345 = vmatprep.subr.bf16.mxu1 %v21066_v44  ;;  %v21150_v44 = vld [vmem:[%s22566_s24 + $0x2d74] ss:$8 sps:$4 sm:$0xff]  }
 0x5df   : > { %15303 = vmatpush1.bf16.msra.mxu0 %v21061_v4  ;;  %v24617_v4 = vld [vmem:[%s22634_s29 + $0x160] sm:$0xff] }
 0x5e0   : > { %15346 = vmatpush1.bf16.msra.mxu1 %v21064_v38  ;;  %15304 = vmatprep.subr.bf16.mxu0 %v21069_v9  ;;  %v16791_v38 = vcombine.low %v24533_v61, %v24540_v39  ;;  %v16793_v9 = vcombine.low %v24543_v11, %v24546_v49  ;;  %v21153_v61 = vld [vmem:[%s22566_s24 + $0x2c64] ss:$8 sps:$4 sm:$0xff]  }
 0x5e1   : > { %15347 = vmatprep.subr.bf16.mxu1 %v21072_v13  ;;  %v24624_v13 = vld [vmem:[%s22634_s29 + $0x760] sm:$0xff] }
 0x5e2   : > { %v21156_v39 = vld [vmem:[%s22566_s24 + $0x2d64] ss:$8 sps:$4 sm:$0xff]   ;;  %v16796_v11 = vcombine.high %v24617_v4, %v24624_v13 }
 0x5e3   : > { %15305 = vmatpush1.bf16.msra.mxu0 %v21067_v31  ;;  %v24627_v31 = vld [vmem:[%s22634_s29 + $0x168] sm:$0xff] }
 0x5e4   : > { %15348 = vmatpush1.bf16.msra.mxu1 %v21070_v15  ;;  %15306 = vmatprep.subr.bf16.mxu0 %v21075_v8  ;;  %v24630_v15 = vld [vmem:[%s22634_s29 + $0x768] sm:$0xff]  ;;  %v21145_v8 = vld [vmem:[%s22566_s24 + $0x2c70] ss:$8 sps:$4 sm:$0xff]  }
 0x5e5   : > { %15349 = vmatprep.subr.bf16.mxu1 %v21078_v14  ;;  %v21148_v14 = vld [vmem:[%s22566_s24 + $0x2d70] ss:$8 sps:$4 sm:$0xff]   ;;  %v16798_v49 = vcombine.high %v24627_v31, %v24630_v15 }
 0x5e7   : > { %15307 = vmatpush1.bf16.msra.mxu0 %v21073_v47  ;;  %v21151_v47 = vld [vmem:[%s22566_s24 + $0x2c60] ss:$8 sps:$4 sm:$0xff]  }
 0x5e8   : > { %15350 = vmatpush1.bf16.msra.mxu1 %v21076_v16  ;;  %15308 = vmatprep.subr.bf16.mxu0 %v21081_v48  ;;  %v21154_v16 = vld [vmem:[%s22566_s24 + $0x2d60] ss:$8 sps:$4 sm:$0xff]   ;;  %v21159_v48 = vld [vmem:[%s22566_s24 + $0x2c54] ss:$8 sps:$4 sm:$0xff]  }
 0x5e9   : > { %15351 = vmatprep.subr.bf16.mxu1 %v21084_v20  ;;  %v21162_v20 = vld [vmem:[%s22566_s24 + $0x2d54] ss:$8 sps:$4 sm:$0xff]  }
 0x5eb   : > { %15309 = vmatpush1.bf16.msra.mxu0 %v21079_v51  ;;  %v21157_v51 = vld [vmem:[%s22566_s24 + $0x2c50] ss:$8 sps:$4 sm:$0xff]  }
 0x5ec   : > { %15352 = vmatpush1.bf16.msra.mxu1 %v21082_v59  ;;  %15310 = vmatprep.subr.bf16.mxu0 %v21087_v21  ;;  %v21160_v59 = vld [vmem:[%s22566_s24 + $0x2d50] ss:$8 sps:$4 sm:$0xff]   ;;  %v21165_v21 = vld [vmem:[%s22566_s24 + $0x2c44] ss:$8 sps:$4 sm:$0xff]  }
 0x5ed   : > { %15353 = vmatprep.subr.bf16.mxu1 %v21090_v18  ;;  %v21168_v18 = vld [vmem:[%s22566_s24 + $0x2d44] ss:$8 sps:$4 sm:$0xff]  }
 0x5ef   : > { %15311 = vmatpush1.bf16.msra.mxu0 %v21085_v58  ;;  %v21163_v58 = vld [vmem:[%s22566_s24 + $0x2c40] ss:$8 sps:$4 sm:$0xff]  }
 0x5f0   : > { %15354 = vmatpush1.bf16.msra.mxu1 %v21088_v50  ;;  %15312 = vmatprep.subr.bf16.mxu0 %v21093_v63  ;;  %v21166_v50 = vld [vmem:[%s22566_s24 + $0x2d40] ss:$8 sps:$4 sm:$0xff]   ;;  %v21171_v63 = vld [vmem:[%s22566_s24 + $0x2c34] ss:$8 sps:$4 sm:$0xff]  }
 0x5f1   : > { %15355 = vmatprep.subr.bf16.mxu1 %v21096_v3  ;;  %v21174_v3 = vld [vmem:[%s22566_s24 + $0x2d34] ss:$8 sps:$4 sm:$0xff]  }
 0x5f3   : > { %15313 = vmatpush1.bf16.msra.mxu0 %v21091_v23  ;;  %v21169_v23 = vld [vmem:[%s22566_s24 + $0x2c30] ss:$8 sps:$4 sm:$0xff]  }
 0x5f4   : > { %15356 = vmatpush1.bf16.msra.mxu1 %v21094_v52  ;;  %15314 = vmatprep.subr.bf16.mxu0 %v21099_v53  ;;  %v21172_v52 = vld [vmem:[%s22566_s24 + $0x2d30] ss:$8 sps:$4 sm:$0xff]   ;;  %v21177_v53 = vld [vmem:[%s22566_s24 + $0x2c24] ss:$8 sps:$4 sm:$0xff]  }
 0x5f5   : > { %15357 = vmatprep.subr.bf16.mxu1 %v21102_v34  ;;  %v21180_v34 = vld [vmem:[%s22566_s24 + $0x2d24] ss:$8 sps:$4 sm:$0xff]  }
 0x5f7   : > { %15315 = vmatpush2.bf16.msra.mxu0 %v21097_v36  ;;  %v21175_v36 = vld [vmem:[%s22566_s24 + $0x2c20] ss:$8 sps:$4 sm:$0xff]  }
 0x5f8   : > { %15358 = vmatpush2.bf16.msra.mxu1 %v21100_v24  ;;  %15316 = vmatprep.subr.bf16.mxu0 %v21105_v37  ;;  %v21178_v24 = vld [vmem:[%s22566_s24 + $0x2d20] ss:$8 sps:$4 sm:$0xff]   ;;  %v21183_v37 = vld [vmem:[%s22566_s24 + $0x2c14] ss:$8 sps:$4 sm:$0xff]  }
 0x5f9   : > { %15359 = vmatprep.subr.bf16.mxu1 %v21108_v26  ;;  %v21186_v26 = vld [vmem:[%s22566_s24 + $0x2d14] ss:$8 sps:$4 sm:$0xff]  }
 0x5fb   : > { %15317 = vmatpush2.bf16.msra.mxu0 %v21103_v60  ;;  %v21181_v60 = vld [vmem:[%s22566_s24 + $0x2c10] ss:$8 sps:$4 sm:$0xff]  }
 0x5fc   : > { %15360 = vmatpush2.bf16.msra.mxu1 %v21106_v28  ;;  %15318 = vmatprep.subr.bf16.mxu0 %v21111_v55  ;;  %v21184_v28 = vld [vmem:[%s22566_s24 + $0x2d10] ss:$8 sps:$4 sm:$0xff]   ;;  %v21189_v55 = vld [vmem:[%s22566_s24 + $0x2c04] ss:$8 sps:$4 sm:$0xff]  }
 0x5fd   : > { %15361 = vmatprep.subr.bf16.mxu1 %v21114_v27  ;;  %v21192_v27 = vld [vmem:[%s22566_s24 + $0x2d04] ss:$8 sps:$4 sm:$0xff]  }
 0x5ff   : > { %15319 = vmatpush2.bf16.msra.mxu0 %v21109_v10  ;;  %v21187_v10 = vld [vmem:[%s22566_s24 + $0x2c00] ss:$8 sps:$4 sm:$0xff]  }
 0x600   : > { %15362 = vmatpush2.bf16.msra.mxu1 %v21112_v46  ;;  %15320 = vmatprep.subr.bf16.mxu0 %v21117_v32  ;;  %v21190_v46 = vld [vmem:[%s22566_s24 + $0x2d00] ss:$8 sps:$4 sm:$0xff]   ;;  %v21195_v32 = vld [vmem:[%s22566_s24 + $0x2cf4] ss:$8 sps:$4 sm:$0xff]  }
 0x601   : > { %15363 = vmatprep.subr.bf16.mxu1 %v21120_v2  ;;  %v21198_v2 = vld [vmem:[%s22566_s24 + $0x2df4] ss:$8 sps:$4 sm:$0xff]  }
 0x603   : > { %15321 = vmatpush2.bf16.msra.mxu0 %v21115_v7  ;;  %v21193_v7 = vld [vmem:[%s22566_s24 + $0x2cf0] ss:$8 sps:$4 sm:$0xff]  }
 0x604   : > { %15364 = vmatpush2.bf16.msra.mxu1 %v21118_v57  ;;  %15322 = vmatprep.subr.bf16.mxu0 %v21123_v1  ;;  %v21196_v57 = vld [vmem:[%s22566_s24 + $0x2df0] ss:$8 sps:$4 sm:$0xff]   ;;  %v21201_v1 = vld [vmem:[%s22566_s24 + $0x2ce4] ss:$8 sps:$4 sm:$0xff]  }
 0x605   : > { %15365 = vmatprep.subr.bf16.mxu1 %v21126_v17  ;;  %v21204_v17 = vld [vmem:[%s22566_s24 + $0x2de4] ss:$8 sps:$4 sm:$0xff]  }
 0x607   : > { %15323 = vmatpush2.bf16.msra.mxu0 %v21121_v19  ;;  %v21199_v19 = vld [vmem:[%s22566_s24 + $0x2ce0] ss:$8 sps:$4 sm:$0xff]  }
 0x608   : > { %15366 = vmatpush2.bf16.msra.mxu1 %v21124_v30  ;;  %15324 = vmatprep.subr.bf16.mxu0 %v21129_v0  ;;  %v21202_v30 = vld [vmem:[%s22566_s24 + $0x2de0] ss:$8 sps:$4 sm:$0xff]   ;;  %v21207_v0 = vld [vmem:[%s22566_s24 + $0x2cd4] ss:$8 sps:$4 sm:$0xff]  }
 0x609   : > { %15367 = vmatprep.subr.bf16.mxu1 %v21132_v62  ;;  %v21210_v62 = vld [vmem:[%s22566_s24 + $0x2dd4] ss:$8 sps:$4 sm:$0xff]  }
 0x60b   : > { %15325 = vmatpush2.bf16.msra.mxu0 %v21127_v40  ;;  %v21205_v40 = vld [vmem:[%s22566_s24 + $0x2cd0] ss:$8 sps:$4 sm:$0xff]  }
 0x60c   : > { %15368 = vmatpush2.bf16.msra.mxu1 %v21130_v22  ;;  %15326 = vmatprep.subr.bf16.mxu0 %v21135_v43  ;;  %v21208_v22 = vld [vmem:[%s22566_s24 + $0x2dd0] ss:$8 sps:$4 sm:$0xff]   ;;  %v21213_v43 = vld [vmem:[%s22566_s24 + $0x2cc4] ss:$8 sps:$4 sm:$0xff]  }
 0x60d   : > { %15369 = vmatprep.subr.bf16.mxu1 %v21138_v56  ;;  %v21216_v56 = vld [vmem:[%s22566_s24 + $0x2dc4] ss:$8 sps:$4 sm:$0xff]  }
 0x60f   : > { %15327 = vmatpush2.bf16.msra.mxu0 %v21133_v42  ;;  %v21211_v42 = vld [vmem:[%s22566_s24 + $0x2cc0] ss:$8 sps:$4 sm:$0xff]  }
 0x610   : > { %15370 = vmatpush2.bf16.msra.mxu1 %v21136_v29  ;;  %15328 = vmatprep.subr.bf16.mxu0 %v21141_v45  ;;  %v21214_v29 = vld [vmem:[%s22566_s24 + $0x2dc0] ss:$8 sps:$4 sm:$0xff]   ;;  %v21219_v45 = vld [vmem:[%s22566_s24 + $0x2cb4] ss:$8 sps:$4 sm:$0xff]  }
 0x611   : > { %15371 = vmatprep.subr.bf16.mxu1 %v21144_v41  ;;  %v21222_v41 = vld [vmem:[%s22566_s24 + $0x2db4] ss:$8 sps:$4 sm:$0xff]  }
 0x613   : > { %15329 = vmatpush2.bf16.msra.mxu0 %v21139_v33  ;;  %v21217_v33 = vld [vmem:[%s22566_s24 + $0x2cb0] ss:$8 sps:$4 sm:$0xff]  }
 0x614   : > { %15372 = vmatpush2.bf16.msra.mxu1 %v21142_v5  ;;  %15384 = vmatprep.subr.bf16.mxu0 %v21147_v6  ;;  %v21220_v5 = vld [vmem:[%s22566_s24 + $0x2db0] ss:$8 sps:$4 sm:$0xff]   ;;  %v21225_v6 = vld [vmem:[%s22566_s24 + $0x2ca4] ss:$8 sps:$4 sm:$0xff]  }
 0x615   : > { %15427 = vmatprep.subr.bf16.mxu1 %v21150_v44  ;;  %v21228_v44 = vld [vmem:[%s22566_s24 + $0x2da4] ss:$8 sps:$4 sm:$0xff]  }
 0x616   : > { %15331 = vmatmul.mubr.bf16.vlgmr.msra.gmra.mxu0 %v16791_v38  ;;  %v21223_v38 = vld [vmem:[%s22566_s24 + $0x2ca0] ss:$8 sps:$4 sm:$0xff]  }
 0x617   : > { %15374 = vmatmul.mubr.bf16.vlgmr.msra.gmra.mxu1 %v16793_v9  ;;  %15385 = vmatpush1.bf16.msra.mxu0 %v21145_v8  ;;  %v21226_v9 = vld [vmem:[%s22566_s24 + $0x2da0] ss:$8 sps:$4 sm:$0xff]   ;;  %v21231_v8 = vld [vmem:[%s22566_s24 + $0x2c94] ss:$8 sps:$4 sm:$0xff]  }
 0x618   : > { %15428 = vmatpush1.bf16.msra.mxu1 %v21148_v14  ;;  %15386 = vmatprep.subr.bf16.mxu0 %v21153_v61  ;;  %v21234_v14 = vld [vmem:[%s22566_s24 + $0x2d94] ss:$8 sps:$4 sm:$0xff]   ;;  %v21229_v61 = vld [vmem:[%s22566_s24 + $0x2c90] ss:$8 sps:$4 sm:$0xff]  }
 0x619   : > { %15429 = vmatprep.subr.bf16.mxu1 %v21156_v39  ;;  %15416 = vmatprep.mubr.bf16.mxu0 %v16796_v11  ;;  %v21232_v39 = vld [vmem:[%s22566_s24 + $0x2d90] ss:$8 sps:$4 sm:$0xff]   ;;  %v21237_v11 = vld [vmem:[%s22566_s24 + $0x2c84] ss:$8 sps:$4 sm:$0xff]  }
 0x61a   : > { %15459 = vmatprep.mubr.bf16.mxu1 %v16798_v49  ;;  %v21240_v49 = vld [vmem:[%s22566_s24 + $0x2d84] ss:$8 sps:$4 sm:$0xff]  }
 0x61b   : > { %15387 = vmatpush1.bf16.msra.mxu0 %v21151_v47  ;;  %v21235_v47 = vld [vmem:[%s22566_s24 + $0x2c80] ss:$8 sps:$4 sm:$0xff]  }
 0x61c   : > { %15430 = vmatpush1.bf16.msra.mxu1 %v21154_v16  ;;  %15388 = vmatprep.subr.bf16.mxu0 %v21159_v48  ;;  %v21238_v16 = vld [vmem:[%s22566_s24 + $0x2d80] ss:$8 sps:$4 sm:$0xff]   ;;  %v21243_v48 = vld [vmem:[%s22566_s24 + $0x2e74] ss:$8 sps:$4 sm:$0xff]  }
 0x61d   : > { %15431 = vmatprep.subr.bf16.mxu1 %v21162_v20  ;;  %v21246_v20 = vld [vmem:[%s22566_s24 + $0x2f74] ss:$8 sps:$4 sm:$0xff]  }
 0x61f   : > { %15389 = vmatpush1.bf16.msra.mxu0 %v21157_v51  ;;  %v24701_v51 = vld [vmem:[%s22634_s29 + $0x170] sm:$0xff] }
 0x620   : > { %15432 = vmatpush1.bf16.msra.mxu1 %v21160_v59  ;;  %15390 = vmatprep.subr.bf16.mxu0 %v21165_v21  ;;  %v16795_v59 = vcombine.low %v24617_v4, %v24624_v13  ;;  %v16797_v21 = vcombine.low %v24627_v31, %v24630_v15  ;;  %v21249_v4 = vld [vmem:[%s22566_s24 + $0x2e64] ss:$8 sps:$4 sm:$0xff]  }
 0x621   : > { %15433 = vmatprep.subr.bf16.mxu1 %v21168_v18  ;;  %v24708_v18 = vld [vmem:[%s22634_s29 + $0x770] sm:$0xff]  ;;  %v21252_v13 = vld [vmem:[%s22566_s24 + $0x2f64] ss:$8 sps:$4 sm:$0xff]  }
 0x622   : > { %v16800_v31 = vcombine.high %v24701_v51, %v24708_v18 }
 0x623   : > { %15391 = vmatpush1.bf16.msra.mxu0 %v21163_v58  ;;  %v24711_v58 = vld [vmem:[%s22634_s29 + $0x178] sm:$0xff] }
 0x624   : > { %15434 = vmatpush1.bf16.msra.mxu1 %v21166_v50  ;;  %15392 = vmatprep.subr.bf16.mxu0 %v21171_v63  ;;  %v24714_v50 = vld [vmem:[%s22634_s29 + $0x778] sm:$0xff] }
 0x625   : > { %15435 = vmatprep.subr.bf16.mxu1 %v21174_v3  ;;  %v21241_v63 = vld [vmem:[%s22566_s24 + $0x2e70] ss:$8 sps:$4 sm:$0xff]   ;;  %v16802_v15 = vcombine.high %v24711_v58, %v24714_v50 }
 0x626   : > { %v21244_v3 = vld [vmem:[%s22566_s24 + $0x2f70] ss:$8 sps:$4 sm:$0xff]  }
 0x627   : > { %15393 = vmatpush1.bf16.msra.mxu0 %v21169_v23  ;;  %v21247_v23 = vld [vmem:[%s22566_s24 + $0x2e60] ss:$8 sps:$4 sm:$0xff]  }
 0x628   : > { %15436 = vmatpush1.bf16.msra.mxu1 %v21172_v52  ;;  %15394 = vmatprep.subr.bf16.mxu0 %v21177_v53  ;;  %v21250_v52 = vld [vmem:[%s22566_s24 + $0x2f60] ss:$8 sps:$4 sm:$0xff]   ;;  %v21255_v53 = vld [vmem:[%s22566_s24 + $0x2e54] ss:$8 sps:$4 sm:$0xff]  }
 0x629   : > { %15437 = vmatprep.subr.bf16.mxu1 %v21180_v34  ;;  %v21258_v34 = vld [vmem:[%s22566_s24 + $0x2f54] ss:$8 sps:$4 sm:$0xff]  }
 0x62b   : > { %15395 = vmatpush1.bf16.msra.mxu0 %v21175_v36  ;;  %v21253_v36 = vld [vmem:[%s22566_s24 + $0x2e50] ss:$8 sps:$4 sm:$0xff]  }
 0x62c   : > { %15438 = vmatpush1.bf16.msra.mxu1 %v21178_v24  ;;  %15396 = vmatprep.subr.bf16.mxu0 %v21183_v37  ;;  %v21256_v24 = vld [vmem:[%s22566_s24 + $0x2f50] ss:$8 sps:$4 sm:$0xff]   ;;  %v21261_v37 = vld [vmem:[%s22566_s24 + $0x2e44] ss:$8 sps:$4 sm:$0xff]  }
 0x62d   : > { %15439 = vmatprep.subr.bf16.mxu1 %v21186_v26  ;;  %v21264_v26 = vld [vmem:[%s22566_s24 + $0x2f44] ss:$8 sps:$4 sm:$0xff]  }
 0x62f   : > { %15397 = vmatpush1.bf16.msra.mxu0 %v21181_v60  ;;  %v21259_v60 = vld [vmem:[%s22566_s24 + $0x2e40] ss:$8 sps:$4 sm:$0xff]  }
 0x630   : > { %15440 = vmatpush1.bf16.msra.mxu1 %v21184_v28  ;;  %15398 = vmatprep.subr.bf16.mxu0 %v21189_v55  ;;  %v21262_v28 = vld [vmem:[%s22566_s24 + $0x2f40] ss:$8 sps:$4 sm:$0xff]   ;;  %v21267_v55 = vld [vmem:[%s22566_s24 + $0x2e34] ss:$8 sps:$4 sm:$0xff]  }
 0x631   : > { %15441 = vmatprep.subr.bf16.mxu1 %v21192_v27  ;;  %v21270_v27 = vld [vmem:[%s22566_s24 + $0x2f34] ss:$8 sps:$4 sm:$0xff]  }
 0x633   : > { %15399 = vmatpush1.bf16.msra.mxu0 %v21187_v10  ;;  %v21265_v10 = vld [vmem:[%s22566_s24 + $0x2e30] ss:$8 sps:$4 sm:$0xff]  }
 0x634   : > { %15442 = vmatpush1.bf16.msra.mxu1 %v21190_v46  ;;  %15400 = vmatprep.subr.bf16.mxu0 %v21195_v32  ;;  %v21268_v46 = vld [vmem:[%s22566_s24 + $0x2f30] ss:$8 sps:$4 sm:$0xff]   ;;  %v21273_v32 = vld [vmem:[%s22566_s24 + $0x2e24] ss:$8 sps:$4 sm:$0xff]  }
 0x635   : > { %15443 = vmatprep.subr.bf16.mxu1 %v21198_v2  ;;  %v21276_v2 = vld [vmem:[%s22566_s24 + $0x2f24] ss:$8 sps:$4 sm:$0xff]  }
 0x637   : > { %15401 = vmatpush2.bf16.msra.mxu0 %v21193_v7  ;;  %v21271_v7 = vld [vmem:[%s22566_s24 + $0x2e20] ss:$8 sps:$4 sm:$0xff]  }
 0x638   : > { %15444 = vmatpush2.bf16.msra.mxu1 %v21196_v57  ;;  %15402 = vmatprep.subr.bf16.mxu0 %v21201_v1  ;;  %v21274_v57 = vld [vmem:[%s22566_s24 + $0x2f20] ss:$8 sps:$4 sm:$0xff]   ;;  %v21279_v1 = vld [vmem:[%s22566_s24 + $0x2e14] ss:$8 sps:$4 sm:$0xff]  }
 0x639   : > { %15445 = vmatprep.subr.bf16.mxu1 %v21204_v17  ;;  %v21282_v17 = vld [vmem:[%s22566_s24 + $0x2f14] ss:$8 sps:$4 sm:$0xff]  }
 0x63b   : > { %15403 = vmatpush2.bf16.msra.mxu0 %v21199_v19  ;;  %v21277_v19 = vld [vmem:[%s22566_s24 + $0x2e10] ss:$8 sps:$4 sm:$0xff]  }
 0x63c   : > { %15446 = vmatpush2.bf16.msra.mxu1 %v21202_v30  ;;  %15404 = vmatprep.subr.bf16.mxu0 %v21207_v0  ;;  %v21280_v30 = vld [vmem:[%s22566_s24 + $0x2f10] ss:$8 sps:$4 sm:$0xff]   ;;  %v21285_v0 = vld [vmem:[%s22566_s24 + $0x2e04] ss:$8 sps:$4 sm:$0xff]  }
 0x63d   : > { %15447 = vmatprep.subr.bf16.mxu1 %v21210_v62  ;;  %v21288_v62 = vld [vmem:[%s22566_s24 + $0x2f04] ss:$8 sps:$4 sm:$0xff]  }
 0x63f   : > { %15405 = vmatpush2.bf16.msra.mxu0 %v21205_v40  ;;  %v21283_v40 = vld [vmem:[%s22566_s24 + $0x2e00] ss:$8 sps:$4 sm:$0xff]  }
 0x640   : > { %15448 = vmatpush2.bf16.msra.mxu1 %v21208_v22  ;;  %15406 = vmatprep.subr.bf16.mxu0 %v21213_v43  ;;  %v21286_v22 = vld [vmem:[%s22566_s24 + $0x2f00] ss:$8 sps:$4 sm:$0xff]   ;;  %v21291_v43 = vld [vmem:[%s22566_s24 + $0x2ef4] ss:$8 sps:$4 sm:$0xff]  }
 0x641   : > { %15449 = vmatprep.subr.bf16.mxu1 %v21216_v56  ;;  %v21294_v56 = vld [vmem:[%s22566_s24 + $0x2ff4] ss:$8 sps:$4 sm:$0xff]  }
 0x643   : > { %15407 = vmatpush2.bf16.msra.mxu0 %v21211_v42  ;;  %v21289_v42 = vld [vmem:[%s22566_s24 + $0x2ef0] ss:$8 sps:$4 sm:$0xff]  }
 0x644   : > { %15450 = vmatpush2.bf16.msra.mxu1 %v21214_v29  ;;  %15408 = vmatprep.subr.bf16.mxu0 %v21219_v45  ;;  %v21292_v29 = vld [vmem:[%s22566_s24 + $0x2ff0] ss:$8 sps:$4 sm:$0xff]   ;;  %v21297_v45 = vld [vmem:[%s22566_s24 + $0x2ee4] ss:$8 sps:$4 sm:$0xff]  }
 0x645   : > { %15451 = vmatprep.subr.bf16.mxu1 %v21222_v41  ;;  %v21300_v41 = vld [vmem:[%s22566_s24 + $0x2fe4] ss:$8 sps:$4 sm:$0xff]  }
 0x647   : > { %15409 = vmatpush2.bf16.msra.mxu0 %v21217_v33  ;;  %v21295_v33 = vld [vmem:[%s22566_s24 + $0x2ee0] ss:$8 sps:$4 sm:$0xff]  }
 0x648   : > { %15452 = vmatpush2.bf16.msra.mxu1 %v21220_v5  ;;  %15410 = vmatprep.subr.bf16.mxu0 %v21225_v6  ;;  %v21298_v5 = vld [vmem:[%s22566_s24 + $0x2fe0] ss:$8 sps:$4 sm:$0xff]   ;;  %v21303_v6 = vld [vmem:[%s22566_s24 + $0x2ed4] ss:$8 sps:$4 sm:$0xff]  }
 0x649   : > { %15453 = vmatprep.subr.bf16.mxu1 %v21228_v44  ;;  %v21306_v44 = vld [vmem:[%s22566_s24 + $0x2fd4] ss:$8 sps:$4 sm:$0xff]  }
 0x64b   : > { %15411 = vmatpush2.bf16.msra.mxu0 %v21223_v38  ;;  %v21301_v38 = vld [vmem:[%s22566_s24 + $0x2ed0] ss:$8 sps:$4 sm:$0xff]  }
 0x64c   : > { %15454 = vmatpush2.bf16.msra.mxu1 %v21226_v9  ;;  %15412 = vmatprep.subr.bf16.mxu0 %v21231_v8  ;;  %v21304_v9 = vld [vmem:[%s22566_s24 + $0x2fd0] ss:$8 sps:$4 sm:$0xff]   ;;  %v21309_v8 = vld [vmem:[%s22566_s24 + $0x2ec4] ss:$8 sps:$4 sm:$0xff]  }
 0x64d   : > { %15455 = vmatprep.subr.bf16.mxu1 %v21234_v14  ;;  %v21312_v14 = vld [vmem:[%s22566_s24 + $0x2fc4] ss:$8 sps:$4 sm:$0xff]  }
 0x64f   : > { %15413 = vmatpush2.bf16.msra.mxu0 %v21229_v61  ;;  %v21307_v61 = vld [vmem:[%s22566_s24 + $0x2ec0] ss:$8 sps:$4 sm:$0xff]  }
 0x650   : > { %15456 = vmatpush2.bf16.msra.mxu1 %v21232_v39  ;;  %15414 = vmatprep.subr.bf16.mxu0 %v21237_v11  ;;  %v21310_v39 = vld [vmem:[%s22566_s24 + $0x2fc0] ss:$8 sps:$4 sm:$0xff]   ;;  %v21315_v11 = vld [vmem:[%s22566_s24 + $0x2eb4] ss:$8 sps:$4 sm:$0xff]  }
 0x651   : > { %15457 = vmatprep.subr.bf16.mxu1 %v21240_v49  ;;  %v21318_v49 = vld [vmem:[%s22566_s24 + $0x2fb4] ss:$8 sps:$4 sm:$0xff]  }
 0x653   : > { %15415 = vmatpush2.bf16.msra.mxu0 %v21235_v47  ;;  %v21313_v47 = vld [vmem:[%s22566_s24 + $0x2eb0] ss:$8 sps:$4 sm:$0xff]  }
 0x654   : > { %15458 = vmatpush2.bf16.msra.mxu1 %v21238_v16  ;;  %15470 = vmatprep.subr.bf16.mxu0 %v21243_v48  ;;  %v21316_v16 = vld [vmem:[%s22566_s24 + $0x2fb0] ss:$8 sps:$4 sm:$0xff]   ;;  %v21321_v48 = vld [vmem:[%s22566_s24 + $0x2ea4] ss:$8 sps:$4 sm:$0xff]  }
 0x655   : > { %15513 = vmatprep.subr.bf16.mxu1 %v21246_v20  ;;  %v21324_v20 = vld [vmem:[%s22566_s24 + $0x2fa4] ss:$8 sps:$4 sm:$0xff]  }
 0x656   : > { %15417 = vmatmul.mubr.bf16.vlgmr.msra.gmra.mxu0 %v16795_v59  ;;  %v21319_v59 = vld [vmem:[%s22566_s24 + $0x2ea0] ss:$8 sps:$4 sm:$0xff]  }
 0x657   : > { %15460 = vmatmul.mubr.bf16.vlgmr.msra.gmra.mxu1 %v16797_v21  ;;  %15471 = vmatpush1.bf16.msra.mxu0 %v21241_v63  ;;  %v21322_v21 = vld [vmem:[%s22566_s24 + $0x2fa0] ss:$8 sps:$4 sm:$0xff]   ;;  %v21327_v63 = vld [vmem:[%s22566_s24 + $0x2e94] ss:$8 sps:$4 sm:$0xff]  }
 0x658   : > { %15514 = vmatpush1.bf16.msra.mxu1 %v21244_v3  ;;  %15472 = vmatprep.subr.bf16.mxu0 %v21249_v4  ;;  %v21330_v3 = vld [vmem:[%s22566_s24 + $0x2f94] ss:$8 sps:$4 sm:$0xff]   ;;  %v21325_v4 = vld [vmem:[%s22566_s24 + $0x2e90] ss:$8 sps:$4 sm:$0xff]  }
 0x659   : > { %15515 = vmatprep.subr.bf16.mxu1 %v21252_v13  ;;  %15502 = vmatprep.mubr.bf16.mxu0 %v16800_v31  ;;  %v21328_v13 = vld [vmem:[%s22566_s24 + $0x2f90] ss:$8 sps:$4 sm:$0xff]   ;;  %v21333_v31 = vld [vmem:[%s22566_s24 + $0x2e84] ss:$8 sps:$4 sm:$0xff]  }
 0x65a   : > { %15545 = vmatprep.mubr.bf16.mxu1 %v16802_v15  ;;  %v21336_v15 = vld [vmem:[%s22566_s24 + $0x2f84] ss:$8 sps:$4 sm:$0xff]  }
 0x65b   : > { %15473 = vmatpush1.bf16.msra.mxu0 %v21247_v23  ;;  %v21331_v23 = vld [vmem:[%s22566_s24 + $0x2e80] ss:$8 sps:$4 sm:$0xff]  }
 0x65c   : > { %15516 = vmatpush1.bf16.msra.mxu1 %v21250_v52  ;;  %15474 = vmatprep.subr.bf16.mxu0 %v21255_v53  ;;  %v21334_v52 = vld [vmem:[%s22566_s24 + $0x2f80] ss:$8 sps:$4 sm:$0xff]   ;;  %v21339_v53 = vld [vmem:[%s22566_s24 + $0x3074] ss:$8 sps:$4 sm:$0xff]  }
 0x65d   : > { %15517 = vmatprep.subr.bf16.mxu1 %v21258_v34  ;;  %v21342_v34 = vld [vmem:[%s22566_s24 + $0x3174] ss:$8 sps:$4 sm:$0xff]  }
 0x65f   : > { %15475 = vmatpush1.bf16.msra.mxu0 %v21253_v36  ;;  %v24785_v36 = vld [vmem:[%s22634_s29 + $0x180] sm:$0xff] }
 0x660   : > { %15518 = vmatpush1.bf16.msra.mxu1 %v21256_v24  ;;  %15476 = vmatprep.subr.bf16.mxu0 %v21261_v37  ;;  %v16799_v24 = vcombine.low %v24701_v51, %v24708_v18  ;;  %v16801_v37 = vcombine.low %v24711_v58, %v24714_v50  ;;  %v21345_v51 = vld [vmem:[%s22566_s24 + $0x3064] ss:$8 sps:$4 sm:$0xff]  }
 0x661   : > { %15519 = vmatprep.subr.bf16.mxu1 %v21264_v26  ;;  %v24792_v26 = vld [vmem:[%s22634_s29 + $0x780] sm:$0xff] }
 0x662   : > { %v21348_v18 = vld [vmem:[%s22566_s24 + $0x3164] ss:$8 sps:$4 sm:$0xff]   ;;  %v16804_v58 = vcombine.high %v24785_v36, %v24792_v26 }
 0x663   : > { %15477 = vmatpush1.bf16.msra.mxu0 %v21259_v60  ;;  %v24795_v60 = vld [vmem:[%s22634_s29 + $0x188] sm:$0xff] }
 0x664   : > { %15520 = vmatpush1.bf16.msra.mxu1 %v21262_v28  ;;  %15478 = vmatprep.subr.bf16.mxu0 %v21267_v55  ;;  %v24798_v28 = vld [vmem:[%s22634_s29 + $0x788] sm:$0xff]  ;;  %v21337_v55 = vld [vmem:[%s22566_s24 + $0x3070] ss:$8 sps:$4 sm:$0xff]  }
 0x665   : > { %15521 = vmatprep.subr.bf16.mxu1 %v21270_v27  ;;  %v21340_v27 = vld [vmem:[%s22566_s24 + $0x3170] ss:$8 sps:$4 sm:$0xff]   ;;  %v16806_v50 = vcombine.high %v24795_v60, %v24798_v28 }
 0x667   : > { %15479 = vmatpush1.bf16.msra.mxu0 %v21265_v10  ;;  %v21343_v10 = vld [vmem:[%s22566_s24 + $0x3060] ss:$8 sps:$4 sm:$0xff]  }
 0x668   : > { %15522 = vmatpush1.bf16.msra.mxu1 %v21268_v46  ;;  %15480 = vmatprep.subr.bf16.mxu0 %v21273_v32  ;;  %v21346_v46 = vld [vmem:[%s22566_s24 + $0x3160] ss:$8 sps:$4 sm:$0xff]   ;;  %v21351_v32 = vld [vmem:[%s22566_s24 + $0x3054] ss:$8 sps:$4 sm:$0xff]  }
 0x669   : > { %15523 = vmatprep.subr.bf16.mxu1 %v21276_v2  ;;  %v21354_v2 = vld [vmem:[%s22566_s24 + $0x3154] ss:$8 sps:$4 sm:$0xff]  }
 0x66b   : > { %15481 = vmatpush1.bf16.msra.mxu0 %v21271_v7  ;;  %v21349_v7 = vld [vmem:[%s22566_s24 + $0x3050] ss:$8 sps:$4 sm:$0xff]  }
 0x66c   : > { %15524 = vmatpush1.bf16.msra.mxu1 %v21274_v57  ;;  %15482 = vmatprep.subr.bf16.mxu0 %v21279_v1  ;;  %v21352_v57 = vld [vmem:[%s22566_s24 + $0x3150] ss:$8 sps:$4 sm:$0xff]   ;;  %v21357_v1 = vld [vmem:[%s22566_s24 + $0x3044] ss:$8 sps:$4 sm:$0xff]  }
 0x66d   : > { %15525 = vmatprep.subr.bf16.mxu1 %v21282_v17  ;;  %v21360_v17 = vld [vmem:[%s22566_s24 + $0x3144] ss:$8 sps:$4 sm:$0xff]  }
 0x66f   : > { %15483 = vmatpush1.bf16.msra.mxu0 %v21277_v19  ;;  %v21355_v19 = vld [vmem:[%s22566_s24 + $0x3040] ss:$8 sps:$4 sm:$0xff]  }
 0x670   : > { %15526 = vmatpush1.bf16.msra.mxu1 %v21280_v30  ;;  %15484 = vmatprep.subr.bf16.mxu0 %v21285_v0  ;;  %v21358_v30 = vld [vmem:[%s22566_s24 + $0x3140] ss:$8 sps:$4 sm:$0xff]   ;;  %v21363_v0 = vld [vmem:[%s22566_s24 + $0x3034] ss:$8 sps:$4 sm:$0xff]  }
 0x671   : > { %15527 = vmatprep.subr.bf16.mxu1 %v21288_v62  ;;  %v21366_v62 = vld [vmem:[%s22566_s24 + $0x3134] ss:$8 sps:$4 sm:$0xff]  }
 0x673   : > { %15485 = vmatpush1.bf16.msra.mxu0 %v21283_v40  ;;  %v21361_v40 = vld [vmem:[%s22566_s24 + $0x3030] ss:$8 sps:$4 sm:$0xff]  }
 0x674   : > { %15528 = vmatpush1.bf16.msra.mxu1 %v21286_v22  ;;  %15486 = vmatprep.subr.bf16.mxu0 %v21291_v43  ;;  %v21364_v22 = vld [vmem:[%s22566_s24 + $0x3130] ss:$8 sps:$4 sm:$0xff]   ;;  %v21369_v43 = vld [vmem:[%s22566_s24 + $0x3024] ss:$8 sps:$4 sm:$0xff]  }
 0x675   : > { %15529 = vmatprep.subr.bf16.mxu1 %v21294_v56  ;;  %v21372_v56 = vld [vmem:[%s22566_s24 + $0x3124] ss:$8 sps:$4 sm:$0xff]  }
 0x677   : > { %15487 = vmatpush2.bf16.msra.mxu0 %v21289_v42  ;;  %v21367_v42 = vld [vmem:[%s22566_s24 + $0x3020] ss:$8 sps:$4 sm:$0xff]  }
 0x678   : > { %15530 = vmatpush2.bf16.msra.mxu1 %v21292_v29  ;;  %15488 = vmatprep.subr.bf16.mxu0 %v21297_v45  ;;  %v21370_v29 = vld [vmem:[%s22566_s24 + $0x3120] ss:$8 sps:$4 sm:$0xff]   ;;  %v21375_v45 = vld [vmem:[%s22566_s24 + $0x3014] ss:$8 sps:$4 sm:$0xff]  }
 0x679   : > { %15531 = vmatprep.subr.bf16.mxu1 %v21300_v41  ;;  %v21378_v41 = vld [vmem:[%s22566_s24 + $0x3114] ss:$8 sps:$4 sm:$0xff]  }
 0x67b   : > { %15489 = vmatpush2.bf16.msra.mxu0 %v21295_v33  ;;  %v21373_v33 = vld [vmem:[%s22566_s24 + $0x3010] ss:$8 sps:$4 sm:$0xff]  }
 0x67c   : > { %15532 = vmatpush2.bf16.msra.mxu1 %v21298_v5  ;;  %15490 = vmatprep.subr.bf16.mxu0 %v21303_v6  ;;  %v21376_v5 = vld [vmem:[%s22566_s24 + $0x3110] ss:$8 sps:$4 sm:$0xff]   ;;  %v21381_v6 = vld [vmem:[%s22566_s24 + $0x3004] ss:$8 sps:$4 sm:$0xff]  }
 0x67d   : > { %15533 = vmatprep.subr.bf16.mxu1 %v21306_v44  ;;  %v21384_v44 = vld [vmem:[%s22566_s24 + $0x3104] ss:$8 sps:$4 sm:$0xff]  }
 0x67f   : > { %15491 = vmatpush2.bf16.msra.mxu0 %v21301_v38  ;;  %v21379_v38 = vld [vmem:[%s22566_s24 + $0x3000] ss:$8 sps:$4 sm:$0xff]  }
 0x680   : > { %15534 = vmatpush2.bf16.msra.mxu1 %v21304_v9  ;;  %15492 = vmatprep.subr.bf16.mxu0 %v21309_v8  ;;  %v21382_v9 = vld [vmem:[%s22566_s24 + $0x3100] ss:$8 sps:$4 sm:$0xff]   ;;  %v21387_v8 = vld [vmem:[%s22566_s24 + $0x30f4] ss:$8 sps:$4 sm:$0xff]  }
 0x681   : > { %15535 = vmatprep.subr.bf16.mxu1 %v21312_v14  ;;  %v21390_v14 = vld [vmem:[%s22566_s24 + $0x31f4] ss:$8 sps:$4 sm:$0xff]  }
 0x683   : > { %15493 = vmatpush2.bf16.msra.mxu0 %v21307_v61  ;;  %v21385_v61 = vld [vmem:[%s22566_s24 + $0x30f0] ss:$8 sps:$4 sm:$0xff]  }
 0x684   : > { %15536 = vmatpush2.bf16.msra.mxu1 %v21310_v39  ;;  %15494 = vmatprep.subr.bf16.mxu0 %v21315_v11  ;;  %v21388_v39 = vld [vmem:[%s22566_s24 + $0x31f0] ss:$8 sps:$4 sm:$0xff]   ;;  %v21393_v11 = vld [vmem:[%s22566_s24 + $0x30e4] ss:$8 sps:$4 sm:$0xff]  }
 0x685   : > { %15537 = vmatprep.subr.bf16.mxu1 %v21318_v49  ;;  %v21396_v49 = vld [vmem:[%s22566_s24 + $0x31e4] ss:$8 sps:$4 sm:$0xff]  }
 0x687   : > { %15495 = vmatpush2.bf16.msra.mxu0 %v21313_v47  ;;  %v21391_v47 = vld [vmem:[%s22566_s24 + $0x30e0] ss:$8 sps:$4 sm:$0xff]  }
 0x688   : > { %15538 = vmatpush2.bf16.msra.mxu1 %v21316_v16  ;;  %15496 = vmatprep.subr.bf16.mxu0 %v21321_v48  ;;  %v21394_v16 = vld [vmem:[%s22566_s24 + $0x31e0] ss:$8 sps:$4 sm:$0xff]   ;;  %v21399_v48 = vld [vmem:[%s22566_s24 + $0x30d4] ss:$8 sps:$4 sm:$0xff]  }
 0x689   : > { %15539 = vmatprep.subr.bf16.mxu1 %v21324_v20  ;;  %v21402_v20 = vld [vmem:[%s22566_s24 + $0x31d4] ss:$8 sps:$4 sm:$0xff]  }
 0x68b   : > { %15497 = vmatpush2.bf16.msra.mxu0 %v21319_v59  ;;  %v21397_v59 = vld [vmem:[%s22566_s24 + $0x30d0] ss:$8 sps:$4 sm:$0xff]  }
 0x68c   : > { %15540 = vmatpush2.bf16.msra.mxu1 %v21322_v21  ;;  %15498 = vmatprep.subr.bf16.mxu0 %v21327_v63  ;;  %v21400_v21 = vld [vmem:[%s22566_s24 + $0x31d0] ss:$8 sps:$4 sm:$0xff]   ;;  %v21405_v63 = vld [vmem:[%s22566_s24 + $0x30c4] ss:$8 sps:$4 sm:$0xff]  }
 0x68d   : > { %15541 = vmatprep.subr.bf16.mxu1 %v21330_v3  ;;  %v21408_v3 = vld [vmem:[%s22566_s24 + $0x31c4] ss:$8 sps:$4 sm:$0xff]  }
 0x68f   : > { %15499 = vmatpush2.bf16.msra.mxu0 %v21325_v4  ;;  %v21403_v4 = vld [vmem:[%s22566_s24 + $0x30c0] ss:$8 sps:$4 sm:$0xff]  }
 0x690   : > { %15542 = vmatpush2.bf16.msra.mxu1 %v21328_v13  ;;  %15500 = vmatprep.subr.bf16.mxu0 %v21333_v31  ;;  %v21406_v13 = vld [vmem:[%s22566_s24 + $0x31c0] ss:$8 sps:$4 sm:$0xff]   ;;  %v21411_v31 = vld [vmem:[%s22566_s24 + $0x30b4] ss:$8 sps:$4 sm:$0xff]  }
 0x691   : > { %15543 = vmatprep.subr.bf16.mxu1 %v21336_v15  ;;  %v21414_v15 = vld [vmem:[%s22566_s24 + $0x31b4] ss:$8 sps:$4 sm:$0xff]  }
 0x693   : > { %15501 = vmatpush2.bf16.msra.mxu0 %v21331_v23  ;;  %v21409_v23 = vld [vmem:[%s22566_s24 + $0x30b0] ss:$8 sps:$4 sm:$0xff]  }
 0x694   : > { %15544 = vmatpush2.bf16.msra.mxu1 %v21334_v52  ;;  %15556 = vmatprep.subr.bf16.mxu0 %v21339_v53  ;;  %v21412_v52 = vld [vmem:[%s22566_s24 + $0x31b0] ss:$8 sps:$4 sm:$0xff]   ;;  %v21417_v53 = vld [vmem:[%s22566_s24 + $0x30a4] ss:$8 sps:$4 sm:$0xff]  }
 0x695   : > { %15599 = vmatprep.subr.bf16.mxu1 %v21342_v34  ;;  %v21420_v34 = vld [vmem:[%s22566_s24 + $0x31a4] ss:$8 sps:$4 sm:$0xff]  }
 0x696   : > { %15503 = vmatmul.mubr.bf16.vlgmr.msra.gmra.mxu0 %v16799_v24  ;;  %v21415_v24 = vld [vmem:[%s22566_s24 + $0x30a0] ss:$8 sps:$4 sm:$0xff]  }
 0x697   : > { %15546 = vmatmul.mubr.bf16.vlgmr.msra.gmra.mxu1 %v16801_v37  ;;  %15557 = vmatpush1.bf16.msra.mxu0 %v21337_v55  ;;  %v21418_v37 = vld [vmem:[%s22566_s24 + $0x31a0] ss:$8 sps:$4 sm:$0xff]   ;;  %v21423_v55 = vld [vmem:[%s22566_s24 + $0x3094] ss:$8 sps:$4 sm:$0xff]  }
 0x698   : > { %15600 = vmatpush1.bf16.msra.mxu1 %v21340_v27  ;;  %15558 = vmatprep.subr.bf16.mxu0 %v21345_v51  ;;  %v21426_v27 = vld [vmem:[%s22566_s24 + $0x3194] ss:$8 sps:$4 sm:$0xff]   ;;  %v21421_v51 = vld [vmem:[%s22566_s24 + $0x3090] ss:$8 sps:$4 sm:$0xff]  }
 0x699   : > { %15601 = vmatprep.subr.bf16.mxu1 %v21348_v18  ;;  %15588 = vmatprep.mubr.bf16.mxu0 %v16804_v58  ;;  %v21424_v18 = vld [vmem:[%s22566_s24 + $0x3190] ss:$8 sps:$4 sm:$0xff]   ;;  %v21429_v58 = vld [vmem:[%s22566_s24 + $0x3084] ss:$8 sps:$4 sm:$0xff]  }
 0x69a   : > { %15631 = vmatprep.mubr.bf16.mxu1 %v16806_v50  ;;  %v21432_v50 = vld [vmem:[%s22566_s24 + $0x3184] ss:$8 sps:$4 sm:$0xff]  }
 0x69b   : > { %15559 = vmatpush1.bf16.msra.mxu0 %v21343_v10  ;;  %v21427_v10 = vld [vmem:[%s22566_s24 + $0x3080] ss:$8 sps:$4 sm:$0xff]  }
 0x69c   : > { %15602 = vmatpush1.bf16.msra.mxu1 %v21346_v46  ;;  %15560 = vmatprep.subr.bf16.mxu0 %v21351_v32  ;;  %v21430_v46 = vld [vmem:[%s22566_s24 + $0x3180] ss:$8 sps:$4 sm:$0xff]   ;;  %v21435_v32 = vld [vmem:[%s22566_s24 + $0x3274] ss:$8 sps:$4 sm:$0xff]  }
 0x69d   : > { %15603 = vmatprep.subr.bf16.mxu1 %v21354_v2  ;;  %v21438_v2 = vld [vmem:[%s22566_s24 + $0x3374] ss:$8 sps:$4 sm:$0xff]  }
 0x69f   : > { %15561 = vmatpush1.bf16.msra.mxu0 %v21349_v7  ;;  %v24869_v7 = vld [vmem:[%s22634_s29 + $0x190] sm:$0xff] }
 0x6a0   : > { %15604 = vmatpush1.bf16.msra.mxu1 %v21352_v57  ;;  %15562 = vmatprep.subr.bf16.mxu0 %v21357_v1  ;;  %v16803_v57 = vcombine.low %v24785_v36, %v24792_v26  ;;  %v16805_v1 = vcombine.low %v24795_v60, %v24798_v28  ;;  %v21441_v36 = vld [vmem:[%s22566_s24 + $0x3264] ss:$8 sps:$4 sm:$0xff]  }
 0x6a1   : > { %15605 = vmatprep.subr.bf16.mxu1 %v21360_v17  ;;  %v24876_v17 = vld [vmem:[%s22634_s29 + $0x790] sm:$0xff]  ;;  %v21444_v26 = vld [vmem:[%s22566_s24 + $0x3364] ss:$8 sps:$4 sm:$0xff]  }
 0x6a2   : > { %v16808_v60 = vcombine.high %v24869_v7, %v24876_v17 }
 0x6a3   : > { %15563 = vmatpush1.bf16.msra.mxu0 %v21355_v19  ;;  %v24879_v19 = vld [vmem:[%s22634_s29 + $0x198] sm:$0xff] }
 0x6a4   : > { %15606 = vmatpush1.bf16.msra.mxu1 %v21358_v30  ;;  %15564 = vmatprep.subr.bf16.mxu0 %v21363_v0  ;;  %v24882_v30 = vld [vmem:[%s22634_s29 + $0x798] sm:$0xff] }
 0x6a5   : > { %15607 = vmatprep.subr.bf16.mxu1 %v21366_v62  ;;  %v21433_v0 = vld [vmem:[%s22566_s24 + $0x3270] ss:$8 sps:$4 sm:$0xff]   ;;  %v16810_v28 = vcombine.high %v24879_v19, %v24882_v30 }
 0x6a6   : > { %v21436_v62 = vld [vmem:[%s22566_s24 + $0x3370] ss:$8 sps:$4 sm:$0xff]  }
 0x6a7   : > { %15565 = vmatpush1.bf16.msra.mxu0 %v21361_v40  ;;  %v21439_v40 = vld [vmem:[%s22566_s24 + $0x3260] ss:$8 sps:$4 sm:$0xff]  }
 0x6a8   : > { %15608 = vmatpush1.bf16.msra.mxu1 %v21364_v22  ;;  %15566 = vmatprep.subr.bf16.mxu0 %v21369_v43  ;;  %v21442_v22 = vld [vmem:[%s22566_s24 + $0x3360] ss:$8 sps:$4 sm:$0xff]   ;;  %v21447_v43 = vld [vmem:[%s22566_s24 + $0x3254] ss:$8 sps:$4 sm:$0xff]  }
 0x6a9   : > { %15609 = vmatprep.subr.bf16.mxu1 %v21372_v56  ;;  %v21450_v56 = vld [vmem:[%s22566_s24 + $0x3354] ss:$8 sps:$4 sm:$0xff]  }
 0x6ab   : > { %15567 = vmatpush1.bf16.msra.mxu0 %v21367_v42  ;;  %v21445_v42 = vld [vmem:[%s22566_s24 + $0x3250] ss:$8 sps:$4 sm:$0xff]  }
 0x6ac   : > { %15610 = vmatpush1.bf16.msra.mxu1 %v21370_v29  ;;  %15568 = vmatprep.subr.bf16.mxu0 %v21375_v45  ;;  %v21448_v29 = vld [vmem:[%s22566_s24 + $0x3350] ss:$8 sps:$4 sm:$0xff]   ;;  %v21453_v45 = vld [vmem:[%s22566_s24 + $0x3244] ss:$8 sps:$4 sm:$0xff]  }
 0x6ad   : > { %15611 = vmatprep.subr.bf16.mxu1 %v21378_v41  ;;  %v21456_v41 = vld [vmem:[%s22566_s24 + $0x3344] ss:$8 sps:$4 sm:$0xff]  }
 0x6af   : > { %15569 = vmatpush1.bf16.msra.mxu0 %v21373_v33  ;;  %v21451_v33 = vld [vmem:[%s22566_s24 + $0x3240] ss:$8 sps:$4 sm:$0xff]  }
 0x6b0   : > { %15612 = vmatpush1.bf16.msra.mxu1 %v21376_v5  ;;  %15570 = vmatprep.subr.bf16.mxu0 %v21381_v6  ;;  %v21454_v5 = vld [vmem:[%s22566_s24 + $0x3340] ss:$8 sps:$4 sm:$0xff]   ;;  %v21459_v6 = vld [vmem:[%s22566_s24 + $0x3234] ss:$8 sps:$4 sm:$0xff]  }
 0x6b1   : > { %15613 = vmatprep.subr.bf16.mxu1 %v21384_v44  ;;  %v21462_v44 = vld [vmem:[%s22566_s24 + $0x3334] ss:$8 sps:$4 sm:$0xff]  }
 0x6b3   : > { %15571 = vmatpush1.bf16.msra.mxu0 %v21379_v38  ;;  %v21457_v38 = vld [vmem:[%s22566_s24 + $0x3230] ss:$8 sps:$4 sm:$0xff]  }
 0x6b4   : > { %15614 = vmatpush1.bf16.msra.mxu1 %v21382_v9  ;;  %15572 = vmatprep.subr.bf16.mxu0 %v21387_v8  ;;  %v21460_v9 = vld [vmem:[%s22566_s24 + $0x3330] ss:$8 sps:$4 sm:$0xff]   ;;  %v21465_v8 = vld [vmem:[%s22566_s24 + $0x3224] ss:$8 sps:$4 sm:$0xff]  }
 0x6b5   : > { %15615 = vmatprep.subr.bf16.mxu1 %v21390_v14  ;;  %v21468_v14 = vld [vmem:[%s22566_s24 + $0x3324] ss:$8 sps:$4 sm:$0xff]  }
 0x6b7   : > { %15573 = vmatpush2.bf16.msra.mxu0 %v21385_v61  ;;  %v21463_v61 = vld [vmem:[%s22566_s24 + $0x3220] ss:$8 sps:$4 sm:$0xff]  }
 0x6b8   : > { %15616 = vmatpush2.bf16.msra.mxu1 %v21388_v39  ;;  %15574 = vmatprep.subr.bf16.mxu0 %v21393_v11  ;;  %v21466_v39 = vld [vmem:[%s22566_s24 + $0x3320] ss:$8 sps:$4 sm:$0xff]   ;;  %v21471_v11 = vld [vmem:[%s22566_s24 + $0x3214] ss:$8 sps:$4 sm:$0xff]  }
 0x6b9   : > { %15617 = vmatprep.subr.bf16.mxu1 %v21396_v49  ;;  %v21474_v49 = vld [vmem:[%s22566_s24 + $0x3314] ss:$8 sps:$4 sm:$0xff]  }
 0x6bb   : > { %15575 = vmatpush2.bf16.msra.mxu0 %v21391_v47  ;;  %v21469_v47 = vld [vmem:[%s22566_s24 + $0x3210] ss:$8 sps:$4 sm:$0xff]  }
 0x6bc   : > { %15618 = vmatpush2.bf16.msra.mxu1 %v21394_v16  ;;  %15576 = vmatprep.subr.bf16.mxu0 %v21399_v48  ;;  %v21472_v16 = vld [vmem:[%s22566_s24 + $0x3310] ss:$8 sps:$4 sm:$0xff]   ;;  %v21477_v48 = vld [vmem:[%s22566_s24 + $0x3204] ss:$8 sps:$4 sm:$0xff]  }
 0x6bd   : > { %15619 = vmatprep.subr.bf16.mxu1 %v21402_v20  ;;  %v21480_v20 = vld [vmem:[%s22566_s24 + $0x3304] ss:$8 sps:$4 sm:$0xff]  }
 0x6bf   : > { %15577 = vmatpush2.bf16.msra.mxu0 %v21397_v59  ;;  %v21475_v59 = vld [vmem:[%s22566_s24 + $0x3200] ss:$8 sps:$4 sm:$0xff]  }
 0x6c0   : > { %15620 = vmatpush2.bf16.msra.mxu1 %v21400_v21  ;;  %15578 = vmatprep.subr.bf16.mxu0 %v21405_v63  ;;  %v21478_v21 = vld [vmem:[%s22566_s24 + $0x3300] ss:$8 sps:$4 sm:$0xff]   ;;  %v21483_v63 = vld [vmem:[%s22566_s24 + $0x32f4] ss:$8 sps:$4 sm:$0xff]  }
 0x6c1   : > { %15621 = vmatprep.subr.bf16.mxu1 %v21408_v3  ;;  %v21486_v3 = vld [vmem:[%s22566_s24 + $0x33f4] ss:$8 sps:$4 sm:$0xff]  }
 0x6c3   : > { %15579 = vmatpush2.bf16.msra.mxu0 %v21403_v4  ;;  %v21481_v4 = vld [vmem:[%s22566_s24 + $0x32f0] ss:$8 sps:$4 sm:$0xff]  }
 0x6c4   : > { %15622 = vmatpush2.bf16.msra.mxu1 %v21406_v13  ;;  %15580 = vmatprep.subr.bf16.mxu0 %v21411_v31  ;;  %v21484_v13 = vld [vmem:[%s22566_s24 + $0x33f0] ss:$8 sps:$4 sm:$0xff]   ;;  %v21489_v31 = vld [vmem:[%s22566_s24 + $0x32e4] ss:$8 sps:$4 sm:$0xff]  }
 0x6c5   : > { %15623 = vmatprep.subr.bf16.mxu1 %v21414_v15  ;;  %v21492_v15 = vld [vmem:[%s22566_s24 + $0x33e4] ss:$8 sps:$4 sm:$0xff]  }
 0x6c7   : > { %15581 = vmatpush2.bf16.msra.mxu0 %v21409_v23  ;;  %v21487_v23 = vld [vmem:[%s22566_s24 + $0x32e0] ss:$8 sps:$4 sm:$0xff]  }
 0x6c8   : > { %15624 = vmatpush2.bf16.msra.mxu1 %v21412_v52  ;;  %15582 = vmatprep.subr.bf16.mxu0 %v21417_v53  ;;  %v21490_v52 = vld [vmem:[%s22566_s24 + $0x33e0] ss:$8 sps:$4 sm:$0xff]   ;;  %v21495_v53 = vld [vmem:[%s22566_s24 + $0x32d4] ss:$8 sps:$4 sm:$0xff]  }
 0x6c9   : > { %15625 = vmatprep.subr.bf16.mxu1 %v21420_v34  ;;  %v21498_v34 = vld [vmem:[%s22566_s24 + $0x33d4] ss:$8 sps:$4 sm:$0xff]  }
 0x6cb   : > { %15583 = vmatpush2.bf16.msra.mxu0 %v21415_v24  ;;  %v21493_v24 = vld [vmem:[%s22566_s24 + $0x32d0] ss:$8 sps:$4 sm:$0xff]  }
 0x6cc   : > { %15626 = vmatpush2.bf16.msra.mxu1 %v21418_v37  ;;  %15584 = vmatprep.subr.bf16.mxu0 %v21423_v55  ;;  %v21496_v37 = vld [vmem:[%s22566_s24 + $0x33d0] ss:$8 sps:$4 sm:$0xff]   ;;  %v21501_v55 = vld [vmem:[%s22566_s24 + $0x32c4] ss:$8 sps:$4 sm:$0xff]  }
 0x6cd   : > { %15627 = vmatprep.subr.bf16.mxu1 %v21426_v27  ;;  %v21504_v27 = vld [vmem:[%s22566_s24 + $0x33c4] ss:$8 sps:$4 sm:$0xff]  }
 0x6cf   : > { %15585 = vmatpush2.bf16.msra.mxu0 %v21421_v51  ;;  %v21499_v51 = vld [vmem:[%s22566_s24 + $0x32c0] ss:$8 sps:$4 sm:$0xff]  }
 0x6d0   : > { %15628 = vmatpush2.bf16.msra.mxu1 %v21424_v18  ;;  %15586 = vmatprep.subr.bf16.mxu0 %v21429_v58  ;;  %v21502_v18 = vld [vmem:[%s22566_s24 + $0x33c0] ss:$8 sps:$4 sm:$0xff]   ;;  %v21507_v58 = vld [vmem:[%s22566_s24 + $0x32b4] ss:$8 sps:$4 sm:$0xff]  }
 0x6d1   : > { %15629 = vmatprep.subr.bf16.mxu1 %v21432_v50  ;;  %v21510_v50 = vld [vmem:[%s22566_s24 + $0x33b4] ss:$8 sps:$4 sm:$0xff]  }
 0x6d3   : > { %15587 = vmatpush2.bf16.msra.mxu0 %v21427_v10  ;;  %v21505_v10 = vld [vmem:[%s22566_s24 + $0x32b0] ss:$8 sps:$4 sm:$0xff]  }
 0x6d4   : > { %15630 = vmatpush2.bf16.msra.mxu1 %v21430_v46  ;;  %15642 = vmatprep.subr.bf16.mxu0 %v21435_v32  ;;  %v21508_v46 = vld [vmem:[%s22566_s24 + $0x33b0] ss:$8 sps:$4 sm:$0xff]   ;;  %v21513_v32 = vld [vmem:[%s22566_s24 + $0x32a4] ss:$8 sps:$4 sm:$0xff]  }
 0x6d5   : > { %15685 = vmatprep.subr.bf16.mxu1 %v21438_v2  ;;  %v21516_v2 = vld [vmem:[%s22566_s24 + $0x33a4] ss:$8 sps:$4 sm:$0xff]  }
 0x6d6   : > { %15589 = vmatmul.mubr.bf16.vlgmr.msra.gmra.mxu0 %v16803_v57  ;;  %v21511_v57 = vld [vmem:[%s22566_s24 + $0x32a0] ss:$8 sps:$4 sm:$0xff]  }
 0x6d7   : > { %15632 = vmatmul.mubr.bf16.vlgmr.msra.gmra.mxu1 %v16805_v1  ;;  %15643 = vmatpush1.bf16.msra.mxu0 %v21433_v0  ;;  %v21514_v1 = vld [vmem:[%s22566_s24 + $0x33a0] ss:$8 sps:$4 sm:$0xff]   ;;  %v21519_v0 = vld [vmem:[%s22566_s24 + $0x3294] ss:$8 sps:$4 sm:$0xff]  }
 0x6d8   : > { %15686 = vmatpush1.bf16.msra.mxu1 %v21436_v62  ;;  %15644 = vmatprep.subr.bf16.mxu0 %v21441_v36  ;;  %v21522_v62 = vld [vmem:[%s22566_s24 + $0x3394] ss:$8 sps:$4 sm:$0xff]   ;;  %v21517_v36 = vld [vmem:[%s22566_s24 + $0x3290] ss:$8 sps:$4 sm:$0xff]  }
 0x6d9   : > { %15687 = vmatprep.subr.bf16.mxu1 %v21444_v26  ;;  %15674 = vmatprep.mubr.bf16.mxu0 %v16808_v60  ;;  %v21520_v26 = vld [vmem:[%s22566_s24 + $0x3390] ss:$8 sps:$4 sm:$0xff]   ;;  %v21525_v60 = vld [vmem:[%s22566_s24 + $0x3284] ss:$8 sps:$4 sm:$0xff]  }
 0x6da   : > { %15717 = vmatprep.mubr.bf16.mxu1 %v16810_v28  ;;  %v21528_v28 = vld [vmem:[%s22566_s24 + $0x3384] ss:$8 sps:$4 sm:$0xff]  }
 0x6db   : > { %15645 = vmatpush1.bf16.msra.mxu0 %v21439_v40  ;;  %v21523_v40 = vld [vmem:[%s22566_s24 + $0x3280] ss:$8 sps:$4 sm:$0xff]  }
 0x6dc   : > { %15688 = vmatpush1.bf16.msra.mxu1 %v21442_v22  ;;  %15646 = vmatprep.subr.bf16.mxu0 %v21447_v43  ;;  %v21526_v22 = vld [vmem:[%s22566_s24 + $0x3380] ss:$8 sps:$4 sm:$0xff]   ;;  %v21531_v43 = vld [vmem:[%s22566_s24 + $0x3474] ss:$8 sps:$4 sm:$0xff]  }
 0x6dd   : > { %15689 = vmatprep.subr.bf16.mxu1 %v21450_v56  ;;  %v21534_v56 = vld [vmem:[%s22566_s24 + $0x3574] ss:$8 sps:$4 sm:$0xff]  }
 0x6df   : > { %15647 = vmatpush1.bf16.msra.mxu0 %v21445_v42  ;;  %v24953_v42 = vld [vmem:[%s22634_s29 + $0x1a0] sm:$0xff] }
 0x6e0   : > { %15690 = vmatpush1.bf16.msra.mxu1 %v21448_v29  ;;  %15648 = vmatprep.subr.bf16.mxu0 %v21453_v45  ;;  %v16807_v29 = vcombine.low %v24869_v7, %v24876_v17  ;;  %v16809_v45 = vcombine.low %v24879_v19, %v24882_v30  ;;  %v21537_v7 = vld [vmem:[%s22566_s24 + $0x3464] ss:$8 sps:$4 sm:$0xff]  }
 0x6e1   : > { %15691 = vmatprep.subr.bf16.mxu1 %v21456_v41  ;;  %v24960_v41 = vld [vmem:[%s22634_s29 + $0x7a0] sm:$0xff] }
 0x6e2   : > { %v21540_v17 = vld [vmem:[%s22566_s24 + $0x3564] ss:$8 sps:$4 sm:$0xff]   ;;  %v16812_v19 = vcombine.high %v24953_v42, %v24960_v41 }
 0x6e3   : > { %15649 = vmatpush1.bf16.msra.mxu0 %v21451_v33  ;;  %v24963_v33 = vld [vmem:[%s22634_s29 + $0x1a8] sm:$0xff] }
 0x6e4   : > { %15692 = vmatpush1.bf16.msra.mxu1 %v21454_v5  ;;  %15650 = vmatprep.subr.bf16.mxu0 %v21459_v6  ;;  %v24966_v5 = vld [vmem:[%s22634_s29 + $0x7a8] sm:$0xff]  ;;  %v21529_v6 = vld [vmem:[%s22566_s24 + $0x3470] ss:$8 sps:$4 sm:$0xff]  }
 0x6e5   : > { %15693 = vmatprep.subr.bf16.mxu1 %v21462_v44  ;;  %v21532_v44 = vld [vmem:[%s22566_s24 + $0x3570] ss:$8 sps:$4 sm:$0xff]   ;;  %v16814_v30 = vcombine.high %v24963_v33, %v24966_v5 }
 0x6e7   : > { %15651 = vmatpush1.bf16.msra.mxu0 %v21457_v38  ;;  %v21535_v38 = vld [vmem:[%s22566_s24 + $0x3460] ss:$8 sps:$4 sm:$0xff]  }
 0x6e8   : > { %15694 = vmatpush1.bf16.msra.mxu1 %v21460_v9  ;;  %15652 = vmatprep.subr.bf16.mxu0 %v21465_v8  ;;  %v21538_v9 = vld [vmem:[%s22566_s24 + $0x3560] ss:$8 sps:$4 sm:$0xff]   ;;  %v21543_v8 = vld [vmem:[%s22566_s24 + $0x3454] ss:$8 sps:$4 sm:$0xff]  }
 0x6e9   : > { %15695 = vmatprep.subr.bf16.mxu1 %v21468_v14  ;;  %v21546_v14 = vld [vmem:[%s22566_s24 + $0x3554] ss:$8 sps:$4 sm:$0xff]  }
 0x6eb   : > { %15653 = vmatpush1.bf16.msra.mxu0 %v21463_v61  ;;  %v21541_v61 = vld [vmem:[%s22566_s24 + $0x3450] ss:$8 sps:$4 sm:$0xff]  }
 0x6ec   : > { %15696 = vmatpush1.bf16.msra.mxu1 %v21466_v39  ;;  %15654 = vmatprep.subr.bf16.mxu0 %v21471_v11  ;;  %v21544_v39 = vld [vmem:[%s22566_s24 + $0x3550] ss:$8 sps:$4 sm:$0xff]   ;;  %v21549_v11 = vld [vmem:[%s22566_s24 + $0x3444] ss:$8 sps:$4 sm:$0xff]  }
 0x6ed   : > { %15697 = vmatprep.subr.bf16.mxu1 %v21474_v49  ;;  %v21552_v49 = vld [vmem:[%s22566_s24 + $0x3544] ss:$8 sps:$4 sm:$0xff]  }
 0x6ef   : > { %15655 = vmatpush1.bf16.msra.mxu0 %v21469_v47  ;;  %v21547_v47 = vld [vmem:[%s22566_s24 + $0x3440] ss:$8 sps:$4 sm:$0xff]  }
 0x6f0   : > { %15698 = vmatpush1.bf16.msra.mxu1 %v21472_v16  ;;  %15656 = vmatprep.subr.bf16.mxu0 %v21477_v48  ;;  %v21550_v16 = vld [vmem:[%s22566_s24 + $0x3540] ss:$8 sps:$4 sm:$0xff]   ;;  %v21555_v48 = vld [vmem:[%s22566_s24 + $0x3434] ss:$8 sps:$4 sm:$0xff]  }
 0x6f1   : > { %15699 = vmatprep.subr.bf16.mxu1 %v21480_v20  ;;  %v21558_v20 = vld [vmem:[%s22566_s24 + $0x3534] ss:$8 sps:$4 sm:$0xff]  }
 0x6f3   : > { %15657 = vmatpush1.bf16.msra.mxu0 %v21475_v59  ;;  %v21553_v59 = vld [vmem:[%s22566_s24 + $0x3430] ss:$8 sps:$4 sm:$0xff]  }
 0x6f4   : > { %15700 = vmatpush1.bf16.msra.mxu1 %v21478_v21  ;;  %15658 = vmatprep.subr.bf16.mxu0 %v21483_v63  ;;  %v21556_v21 = vld [vmem:[%s22566_s24 + $0x3530] ss:$8 sps:$4 sm:$0xff]   ;;  %v21561_v63 = vld [vmem:[%s22566_s24 + $0x3424] ss:$8 sps:$4 sm:$0xff]  }
 0x6f5   : > { %15701 = vmatprep.subr.bf16.mxu1 %v21486_v3  ;;  %v21564_v3 = vld [vmem:[%s22566_s24 + $0x3524] ss:$8 sps:$4 sm:$0xff]  }
 0x6f7   : > { %15659 = vmatpush2.bf16.msra.mxu0 %v21481_v4  ;;  %v21559_v4 = vld [vmem:[%s22566_s24 + $0x3420] ss:$8 sps:$4 sm:$0xff]  }
 0x6f8   : > { %15702 = vmatpush2.bf16.msra.mxu1 %v21484_v13  ;;  %15660 = vmatprep.subr.bf16.mxu0 %v21489_v31  ;;  %v21562_v13 = vld [vmem:[%s22566_s24 + $0x3520] ss:$8 sps:$4 sm:$0xff]   ;;  %v21567_v31 = vld [vmem:[%s22566_s24 + $0x3414] ss:$8 sps:$4 sm:$0xff]  }
 0x6f9   : > { %15703 = vmatprep.subr.bf16.mxu1 %v21492_v15  ;;  %v21570_v15 = vld [vmem:[%s22566_s24 + $0x3514] ss:$8 sps:$4 sm:$0xff]  }
 0x6fb   : > { %15661 = vmatpush2.bf16.msra.mxu0 %v21487_v23  ;;  %v21565_v23 = vld [vmem:[%s22566_s24 + $0x3410] ss:$8 sps:$4 sm:$0xff]  }
 0x6fc   : > { %15704 = vmatpush2.bf16.msra.mxu1 %v21490_v52  ;;  %15662 = vmatprep.subr.bf16.mxu0 %v21495_v53  ;;  %v21568_v52 = vld [vmem:[%s22566_s24 + $0x3510] ss:$8 sps:$4 sm:$0xff]   ;;  %v21573_v53 = vld [vmem:[%s22566_s24 + $0x3404] ss:$8 sps:$4 sm:$0xff]  }
 0x6fd   : > { %15705 = vmatprep.subr.bf16.mxu1 %v21498_v34  ;;  %v21576_v34 = vld [vmem:[%s22566_s24 + $0x3504] ss:$8 sps:$4 sm:$0xff]  }
 0x6ff   : > { %15663 = vmatpush2.bf16.msra.mxu0 %v21493_v24  ;;  %v21571_v24 = vld [vmem:[%s22566_s24 + $0x3400] ss:$8 sps:$4 sm:$0xff]  }
 0x700   : > { %15706 = vmatpush2.bf16.msra.mxu1 %v21496_v37  ;;  %15664 = vmatprep.subr.bf16.mxu0 %v21501_v55  ;;  %v21574_v37 = vld [vmem:[%s22566_s24 + $0x3500] ss:$8 sps:$4 sm:$0xff]   ;;  %v21579_v55 = vld [vmem:[%s22566_s24 + $0x34f4] ss:$8 sps:$4 sm:$0xff]  }
 0x701   : > { %15707 = vmatprep.subr.bf16.mxu1 %v21504_v27  ;;  %v21582_v27 = vld [vmem:[%s22566_s24 + $0x35f4] ss:$8 sps:$4 sm:$0xff]  }
 0x703   : > { %15665 = vmatpush2.bf16.msra.mxu0 %v21499_v51  ;;  %v21577_v51 = vld [vmem:[%s22566_s24 + $0x34f0] ss:$8 sps:$4 sm:$0xff]  }
 0x704   : > { %15708 = vmatpush2.bf16.msra.mxu1 %v21502_v18  ;;  %15666 = vmatprep.subr.bf16.mxu0 %v21507_v58  ;;  %v21580_v18 = vld [vmem:[%s22566_s24 + $0x35f0] ss:$8 sps:$4 sm:$0xff]   ;;  %v21585_v58 = vld [vmem:[%s22566_s24 + $0x34e4] ss:$8 sps:$4 sm:$0xff]  }
 0x705   : > { %15709 = vmatprep.subr.bf16.mxu1 %v21510_v50  ;;  %v21588_v50 = vld [vmem:[%s22566_s24 + $0x35e4] ss:$8 sps:$4 sm:$0xff]  }
 0x707   : > { %15667 = vmatpush2.bf16.msra.mxu0 %v21505_v10  ;;  %v21583_v10 = vld [vmem:[%s22566_s24 + $0x34e0] ss:$8 sps:$4 sm:$0xff]  }
 0x708   : > { %15710 = vmatpush2.bf16.msra.mxu1 %v21508_v46  ;;  %15668 = vmatprep.subr.bf16.mxu0 %v21513_v32  ;;  %v21586_v46 = vld [vmem:[%s22566_s24 + $0x35e0] ss:$8 sps:$4 sm:$0xff]   ;;  %v21591_v32 = vld [vmem:[%s22566_s24 + $0x34d4] ss:$8 sps:$4 sm:$0xff]  }
 0x709   : > { %15711 = vmatprep.subr.bf16.mxu1 %v21516_v2  ;;  %v21594_v2 = vld [vmem:[%s22566_s24 + $0x35d4] ss:$8 sps:$4 sm:$0xff]  }
 0x70b   : > { %15669 = vmatpush2.bf16.msra.mxu0 %v21511_v57  ;;  %v21589_v57 = vld [vmem:[%s22566_s24 + $0x34d0] ss:$8 sps:$4 sm:$0xff]  }
 0x70c   : > { %15712 = vmatpush2.bf16.msra.mxu1 %v21514_v1  ;;  %15670 = vmatprep.subr.bf16.mxu0 %v21519_v0  ;;  %v21592_v1 = vld [vmem:[%s22566_s24 + $0x35d0] ss:$8 sps:$4 sm:$0xff]   ;;  %v21597_v0 = vld [vmem:[%s22566_s24 + $0x34c4] ss:$8 sps:$4 sm:$0xff]  }
 0x70d   : > { %15713 = vmatprep.subr.bf16.mxu1 %v21522_v62  ;;  %v21600_v62 = vld [vmem:[%s22566_s24 + $0x35c4] ss:$8 sps:$4 sm:$0xff]  }
 0x70f   : > { %15671 = vmatpush2.bf16.msra.mxu0 %v21517_v36  ;;  %v21595_v36 = vld [vmem:[%s22566_s24 + $0x34c0] ss:$8 sps:$4 sm:$0xff]  }
 0x710   : > { %15714 = vmatpush2.bf16.msra.mxu1 %v21520_v26  ;;  %15672 = vmatprep.subr.bf16.mxu0 %v21525_v60  ;;  %v21598_v26 = vld [vmem:[%s22566_s24 + $0x35c0] ss:$8 sps:$4 sm:$0xff]   ;;  %v21603_v60 = vld [vmem:[%s22566_s24 + $0x34b4] ss:$8 sps:$4 sm:$0xff]  }
 0x711   : > { %15715 = vmatprep.subr.bf16.mxu1 %v21528_v28  ;;  %v21606_v28 = vld [vmem:[%s22566_s24 + $0x35b4] ss:$8 sps:$4 sm:$0xff]  }
 0x713   : > { %15673 = vmatpush2.bf16.msra.mxu0 %v21523_v40  ;;  %v21601_v40 = vld [vmem:[%s22566_s24 + $0x34b0] ss:$8 sps:$4 sm:$0xff]  }
 0x714   : > { %15716 = vmatpush2.bf16.msra.mxu1 %v21526_v22  ;;  %15728 = vmatprep.subr.bf16.mxu0 %v21531_v43  ;;  %v21604_v22 = vld [vmem:[%s22566_s24 + $0x35b0] ss:$8 sps:$4 sm:$0xff]   ;;  %v21609_v43 = vld [vmem:[%s22566_s24 + $0x34a4] ss:$8 sps:$4 sm:$0xff]  }
 0x715   : > { %15771 = vmatprep.subr.bf16.mxu1 %v21534_v56  ;;  %v21612_v56 = vld [vmem:[%s22566_s24 + $0x35a4] ss:$8 sps:$4 sm:$0xff]  }
 0x716   : > { %15675 = vmatmul.mubr.bf16.vlgmr.msra.gmra.mxu0 %v16807_v29  ;;  %v21607_v29 = vld [vmem:[%s22566_s24 + $0x34a0] ss:$8 sps:$4 sm:$0xff]  }
 0x717   : > { %15718 = vmatmul.mubr.bf16.vlgmr.msra.gmra.mxu1 %v16809_v45  ;;  %15729 = vmatpush1.bf16.msra.mxu0 %v21529_v6  ;;  %v21610_v45 = vld [vmem:[%s22566_s24 + $0x35a0] ss:$8 sps:$4 sm:$0xff]   ;;  %v21615_v6 = vld [vmem:[%s22566_s24 + $0x3494] ss:$8 sps:$4 sm:$0xff]  }
 0x718   : > { %15772 = vmatpush1.bf16.msra.mxu1 %v21532_v44  ;;  %15730 = vmatprep.subr.bf16.mxu0 %v21537_v7  ;;  %v21618_v44 = vld [vmem:[%s22566_s24 + $0x3594] ss:$8 sps:$4 sm:$0xff]   ;;  %v21613_v7 = vld [vmem:[%s22566_s24 + $0x3490] ss:$8 sps:$4 sm:$0xff]  }
 0x719   : > { %15773 = vmatprep.subr.bf16.mxu1 %v21540_v17  ;;  %15760 = vmatprep.mubr.bf16.mxu0 %v16812_v19  ;;  %v21616_v17 = vld [vmem:[%s22566_s24 + $0x3590] ss:$8 sps:$4 sm:$0xff]   ;;  %v21621_v19 = vld [vmem:[%s22566_s24 + $0x3484] ss:$8 sps:$4 sm:$0xff]  }
 0x71a   : > { %15803 = vmatprep.mubr.bf16.mxu1 %v16814_v30  ;;  %v21624_v30 = vld [vmem:[%s22566_s24 + $0x3584] ss:$8 sps:$4 sm:$0xff]  }
 0x71b   : > { %15731 = vmatpush1.bf16.msra.mxu0 %v21535_v38  ;;  %v21619_v38 = vld [vmem:[%s22566_s24 + $0x3480] ss:$8 sps:$4 sm:$0xff]  }
 0x71c   : > { %15774 = vmatpush1.bf16.msra.mxu1 %v21538_v9  ;;  %15732 = vmatprep.subr.bf16.mxu0 %v21543_v8  ;;  %v21622_v9 = vld [vmem:[%s22566_s24 + $0x3580] ss:$8 sps:$4 sm:$0xff]   ;;  %v21627_v8 = vld [vmem:[%s22566_s24 + $0x3674] ss:$8 sps:$4 sm:$0xff]  }
 0x71d   : > { %15775 = vmatprep.subr.bf16.mxu1 %v21546_v14  ;;  %v21630_v14 = vld [vmem:[%s22566_s24 + $0x3774] ss:$8 sps:$4 sm:$0xff]  }
 0x71f   : > { %15733 = vmatpush1.bf16.msra.mxu0 %v21541_v61  ;;  %v25037_v61 = vld [vmem:[%s22634_s29 + $0x1b0] sm:$0xff] }
 0x720   : > { %15776 = vmatpush1.bf16.msra.mxu1 %v21544_v39  ;;  %15734 = vmatprep.subr.bf16.mxu0 %v21549_v11  ;;  %v16811_v39 = vcombine.low %v24953_v42, %v24960_v41  ;;  %v16813_v11 = vcombine.low %v24963_v33, %v24966_v5  ;;  %v21633_v42 = vld [vmem:[%s22566_s24 + $0x3664] ss:$8 sps:$4 sm:$0xff]  }
 0x721   : > { %15777 = vmatprep.subr.bf16.mxu1 %v21552_v49  ;;  %v25044_v49 = vld [vmem:[%s22634_s29 + $0x7b0] sm:$0xff]  ;;  %v21636_v41 = vld [vmem:[%s22566_s24 + $0x3764] ss:$8 sps:$4 sm:$0xff]  }
 0x722   : > { %v16816_v33 = vcombine.high %v25037_v61, %v25044_v49 }
 0x723   : > { %15735 = vmatpush1.bf16.msra.mxu0 %v21547_v47  ;;  %v25047_v47 = vld [vmem:[%s22634_s29 + $0x1b8] sm:$0xff] }
 0x724   : > { %15778 = vmatpush1.bf16.msra.mxu1 %v21550_v16  ;;  %15736 = vmatprep.subr.bf16.mxu0 %v21555_v48  ;;  %v25050_v16 = vld [vmem:[%s22634_s29 + $0x7b8] sm:$0xff] }
 0x725   : > { %15779 = vmatprep.subr.bf16.mxu1 %v21558_v20  ;;  %v21625_v48 = vld [vmem:[%s22566_s24 + $0x3670] ss:$8 sps:$4 sm:$0xff]   ;;  %v16818_v5 = vcombine.high %v25047_v47, %v25050_v16 }
 0x726   : > { %v21628_v20 = vld [vmem:[%s22566_s24 + $0x3770] ss:$8 sps:$4 sm:$0xff]  }
 0x727   : > { %15737 = vmatpush1.bf16.msra.mxu0 %v21553_v59  ;;  %v21631_v59 = vld [vmem:[%s22566_s24 + $0x3660] ss:$8 sps:$4 sm:$0xff]  }
 0x728   : > { %15780 = vmatpush1.bf16.msra.mxu1 %v21556_v21  ;;  %15738 = vmatprep.subr.bf16.mxu0 %v21561_v63  ;;  %v21634_v21 = vld [vmem:[%s22566_s24 + $0x3760] ss:$8 sps:$4 sm:$0xff]   ;;  %v21639_v63 = vld [vmem:[%s22566_s24 + $0x3654] ss:$8 sps:$4 sm:$0xff]  }
 0x729   : > { %15781 = vmatprep.subr.bf16.mxu1 %v21564_v3  ;;  %v21642_v3 = vld [vmem:[%s22566_s24 + $0x3754] ss:$8 sps:$4 sm:$0xff]  }
 0x72b   : > { %15739 = vmatpush1.bf16.msra.mxu0 %v21559_v4  ;;  %v21637_v4 = vld [vmem:[%s22566_s24 + $0x3650] ss:$8 sps:$4 sm:$0xff]  }
 0x72c   : > { %15782 = vmatpush1.bf16.msra.mxu1 %v21562_v13  ;;  %15740 = vmatprep.subr.bf16.mxu0 %v21567_v31  ;;  %v21640_v13 = vld [vmem:[%s22566_s24 + $0x3750] ss:$8 sps:$4 sm:$0xff]   ;;  %v21645_v31 = vld [vmem:[%s22566_s24 + $0x3644] ss:$8 sps:$4 sm:$0xff]  }
 0x72d   : > { %15783 = vmatprep.subr.bf16.mxu1 %v21570_v15  ;;  %v21648_v15 = vld [vmem:[%s22566_s24 + $0x3744] ss:$8 sps:$4 sm:$0xff]  }
 0x72f   : > { %15741 = vmatpush1.bf16.msra.mxu0 %v21565_v23  ;;  %v21643_v23 = vld [vmem:[%s22566_s24 + $0x3640] ss:$8 sps:$4 sm:$0xff]  }
 0x730   : > { %15784 = vmatpush1.bf16.msra.mxu1 %v21568_v52  ;;  %15742 = vmatprep.subr.bf16.mxu0 %v21573_v53  ;;  %v21646_v52 = vld [vmem:[%s22566_s24 + $0x3740] ss:$8 sps:$4 sm:$0xff]   ;;  %v21651_v53 = vld [vmem:[%s22566_s24 + $0x3634] ss:$8 sps:$4 sm:$0xff]  }
 0x731   : > { %15785 = vmatprep.subr.bf16.mxu1 %v21576_v34  ;;  %v21654_v34 = vld [vmem:[%s22566_s24 + $0x3734] ss:$8 sps:$4 sm:$0xff]  }
 0x733   : > { %15743 = vmatpush1.bf16.msra.mxu0 %v21571_v24  ;;  %v21649_v24 = vld [vmem:[%s22566_s24 + $0x3630] ss:$8 sps:$4 sm:$0xff]  }
 0x734   : > { %15786 = vmatpush1.bf16.msra.mxu1 %v21574_v37  ;;  %15744 = vmatprep.subr.bf16.mxu0 %v21579_v55  ;;  %v21652_v37 = vld [vmem:[%s22566_s24 + $0x3730] ss:$8 sps:$4 sm:$0xff]   ;;  %v21657_v55 = vld [vmem:[%s22566_s24 + $0x3624] ss:$8 sps:$4 sm:$0xff]  }
 0x735   : > { %15787 = vmatprep.subr.bf16.mxu1 %v21582_v27  ;;  %v21660_v27 = vld [vmem:[%s22566_s24 + $0x3724] ss:$8 sps:$4 sm:$0xff]  }
 0x737   : > { %15745 = vmatpush2.bf16.msra.mxu0 %v21577_v51  ;;  %v21655_v51 = vld [vmem:[%s22566_s24 + $0x3620] ss:$8 sps:$4 sm:$0xff]  }
 0x738   : > { %15788 = vmatpush2.bf16.msra.mxu1 %v21580_v18  ;;  %15746 = vmatprep.subr.bf16.mxu0 %v21585_v58  ;;  %v21658_v18 = vld [vmem:[%s22566_s24 + $0x3720] ss:$8 sps:$4 sm:$0xff]   ;;  %v21663_v58 = vld [vmem:[%s22566_s24 + $0x3614] ss:$8 sps:$4 sm:$0xff]  }
 0x739   : > { %15789 = vmatprep.subr.bf16.mxu1 %v21588_v50  ;;  %v21666_v50 = vld [vmem:[%s22566_s24 + $0x3714] ss:$8 sps:$4 sm:$0xff]  }
 0x73b   : > { %15747 = vmatpush2.bf16.msra.mxu0 %v21583_v10  ;;  %v21661_v10 = vld [vmem:[%s22566_s24 + $0x3610] ss:$8 sps:$4 sm:$0xff]  }
 0x73c   : > { %15790 = vmatpush2.bf16.msra.mxu1 %v21586_v46  ;;  %15748 = vmatprep.subr.bf16.mxu0 %v21591_v32  ;;  %v21664_v46 = vld [vmem:[%s22566_s24 + $0x3710] ss:$8 sps:$4 sm:$0xff]   ;;  %v21669_v32 = vld [vmem:[%s22566_s24 + $0x3604] ss:$8 sps:$4 sm:$0xff]  }
 0x73d   : > { %15791 = vmatprep.subr.bf16.mxu1 %v21594_v2  ;;  %v21672_v2 = vld [vmem:[%s22566_s24 + $0x3704] ss:$8 sps:$4 sm:$0xff]  }
 0x73f   : > { %15749 = vmatpush2.bf16.msra.mxu0 %v21589_v57  ;;  %v21667_v57 = vld [vmem:[%s22566_s24 + $0x3600] ss:$8 sps:$4 sm:$0xff]  }
 0x740   : > { %15792 = vmatpush2.bf16.msra.mxu1 %v21592_v1  ;;  %15750 = vmatprep.subr.bf16.mxu0 %v21597_v0  ;;  %v21670_v1 = vld [vmem:[%s22566_s24 + $0x3700] ss:$8 sps:$4 sm:$0xff]   ;;  %v21675_v0 = vld [vmem:[%s22566_s24 + $0x36f4] ss:$8 sps:$4 sm:$0xff]  }
 0x741   : > { %15793 = vmatprep.subr.bf16.mxu1 %v21600_v62  ;;  %v21678_v62 = vld [vmem:[%s22566_s24 + $0x37f4] ss:$8 sps:$4 sm:$0xff]  }
 0x743   : > { %15751 = vmatpush2.bf16.msra.mxu0 %v21595_v36  ;;  %v21673_v36 = vld [vmem:[%s22566_s24 + $0x36f0] ss:$8 sps:$4 sm:$0xff]  }
 0x744   : > { %15794 = vmatpush2.bf16.msra.mxu1 %v21598_v26  ;;  %15752 = vmatprep.subr.bf16.mxu0 %v21603_v60  ;;  %v21676_v26 = vld [vmem:[%s22566_s24 + $0x37f0] ss:$8 sps:$4 sm:$0xff]   ;;  %v21681_v60 = vld [vmem:[%s22566_s24 + $0x36e4] ss:$8 sps:$4 sm:$0xff]  }
 0x745   : > { %15795 = vmatprep.subr.bf16.mxu1 %v21606_v28  ;;  %v21684_v28 = vld [vmem:[%s22566_s24 + $0x37e4] ss:$8 sps:$4 sm:$0xff]  }
 0x747   : > { %15753 = vmatpush2.bf16.msra.mxu0 %v21601_v40  ;;  %v21679_v40 = vld [vmem:[%s22566_s24 + $0x36e0] ss:$8 sps:$4 sm:$0xff]  }
 0x748   : > { %15796 = vmatpush2.bf16.msra.mxu1 %v21604_v22  ;;  %15754 = vmatprep.subr.bf16.mxu0 %v21609_v43  ;;  %v21682_v22 = vld [vmem:[%s22566_s24 + $0x37e0] ss:$8 sps:$4 sm:$0xff]   ;;  %v21687_v43 = vld [vmem:[%s22566_s24 + $0x36d4] ss:$8 sps:$4 sm:$0xff]  }
 0x749   : > { %15797 = vmatprep.subr.bf16.mxu1 %v21612_v56  ;;  %v21690_v56 = vld [vmem:[%s22566_s24 + $0x37d4] ss:$8 sps:$4 sm:$0xff]  }
 0x74b   : > { %15755 = vmatpush2.bf16.msra.mxu0 %v21607_v29  ;;  %v21685_v29 = vld [vmem:[%s22566_s24 + $0x36d0] ss:$8 sps:$4 sm:$0xff]  }
 0x74c   : > { %15798 = vmatpush2.bf16.msra.mxu1 %v21610_v45  ;;  %15756 = vmatprep.subr.bf16.mxu0 %v21615_v6  ;;  %v21688_v45 = vld [vmem:[%s22566_s24 + $0x37d0] ss:$8 sps:$4 sm:$0xff]   ;;  %v21693_v6 = vld [vmem:[%s22566_s24 + $0x36c4] ss:$8 sps:$4 sm:$0xff]  }
 0x74d   : > { %15799 = vmatprep.subr.bf16.mxu1 %v21618_v44  ;;  %v21696_v44 = vld [vmem:[%s22566_s24 + $0x37c4] ss:$8 sps:$4 sm:$0xff]  }
 0x74f   : > { %15757 = vmatpush2.bf16.msra.mxu0 %v21613_v7  ;;  %v21691_v7 = vld [vmem:[%s22566_s24 + $0x36c0] ss:$8 sps:$4 sm:$0xff]  }
 0x750   : > { %15800 = vmatpush2.bf16.msra.mxu1 %v21616_v17  ;;  %15758 = vmatprep.subr.bf16.mxu0 %v21621_v19  ;;  %v21694_v17 = vld [vmem:[%s22566_s24 + $0x37c0] ss:$8 sps:$4 sm:$0xff]   ;;  %v21699_v19 = vld [vmem:[%s22566_s24 + $0x36b4] ss:$8 sps:$4 sm:$0xff]  }
 0x751   : > { %15801 = vmatprep.subr.bf16.mxu1 %v21624_v30  ;;  %v21702_v30 = vld [vmem:[%s22566_s24 + $0x37b4] ss:$8 sps:$4 sm:$0xff]  }
 0x753   : > { %15759 = vmatpush2.bf16.msra.mxu0 %v21619_v38  ;;  %v21697_v38 = vld [vmem:[%s22566_s24 + $0x36b0] ss:$8 sps:$4 sm:$0xff]  }
 0x754   : > { %15802 = vmatpush2.bf16.msra.mxu1 %v21622_v9  ;;  %15814 = vmatprep.subr.bf16.mxu0 %v21627_v8  ;;  %v21700_v9 = vld [vmem:[%s22566_s24 + $0x37b0] ss:$8 sps:$4 sm:$0xff]   ;;  %v21705_v8 = vld [vmem:[%s22566_s24 + $0x36a4] ss:$8 sps:$4 sm:$0xff]  }
 0x755   : > { %15857 = vmatprep.subr.bf16.mxu1 %v21630_v14  ;;  %v21708_v14 = vld [vmem:[%s22566_s24 + $0x37a4] ss:$8 sps:$4 sm:$0xff]  }
 0x756   : > { %15761 = vmatmul.mubr.bf16.vlgmr.msra.gmra.mxu0 %v16811_v39  ;;  %v21703_v39 = vld [vmem:[%s22566_s24 + $0x36a0] ss:$8 sps:$4 sm:$0xff]  }
 0x757   : > { %15804 = vmatmul.mubr.bf16.vlgmr.msra.gmra.mxu1 %v16813_v11  ;;  %15815 = vmatpush1.bf16.msra.mxu0 %v21625_v48  ;;  %v21706_v11 = vld [vmem:[%s22566_s24 + $0x37a0] ss:$8 sps:$4 sm:$0xff]   ;;  %v21711_v48 = vld [vmem:[%s22566_s24 + $0x3694] ss:$8 sps:$4 sm:$0xff]  }
 0x758   : > { %15858 = vmatpush1.bf16.msra.mxu1 %v21628_v20  ;;  %15816 = vmatprep.subr.bf16.mxu0 %v21633_v42  ;;  %v21714_v20 = vld [vmem:[%s22566_s24 + $0x3794] ss:$8 sps:$4 sm:$0xff]   ;;  %v21709_v42 = vld [vmem:[%s22566_s24 + $0x3690] ss:$8 sps:$4 sm:$0xff]  }
 0x759   : > { %15859 = vmatprep.subr.bf16.mxu1 %v21636_v41  ;;  %15846 = vmatprep.mubr.bf16.mxu0 %v16816_v33  ;;  %v21712_v41 = vld [vmem:[%s22566_s24 + $0x3790] ss:$8 sps:$4 sm:$0xff]   ;;  %v21717_v33 = vld [vmem:[%s22566_s24 + $0x3684] ss:$8 sps:$4 sm:$0xff]  }
 0x75a   : > { %15889 = vmatprep.mubr.bf16.mxu1 %v16818_v5  ;;  %v21720_v5 = vld [vmem:[%s22566_s24 + $0x3784] ss:$8 sps:$4 sm:$0xff]  }
 0x75b   : > { %15817 = vmatpush1.bf16.msra.mxu0 %v21631_v59  ;;  %v21715_v59 = vld [vmem:[%s22566_s24 + $0x3680] ss:$8 sps:$4 sm:$0xff]  }
 0x75c   : > { %15860 = vmatpush1.bf16.msra.mxu1 %v21634_v21  ;;  %15818 = vmatprep.subr.bf16.mxu0 %v21639_v63  ;;  %v21718_v21 = vld [vmem:[%s22566_s24 + $0x3780] ss:$8 sps:$4 sm:$0xff]   ;;  %v21723_v63 = vld [vmem:[%s22566_s24 + $0x3874] ss:$8 sps:$4 sm:$0xff]  }
 0x75d   : > { %15861 = vmatprep.subr.bf16.mxu1 %v21642_v3  ;;  %v21726_v3 = vld [vmem:[%s22566_s24 + $0x3974] ss:$8 sps:$4 sm:$0xff]  }
 0x75f   : > { %15819 = vmatpush1.bf16.msra.mxu0 %v21637_v4  ;;  %v25121_v4 = vld [vmem:[%s22634_s29 + $0x1c0] sm:$0xff] }
 0x760   : > { %15862 = vmatpush1.bf16.msra.mxu1 %v21640_v13  ;;  %15820 = vmatprep.subr.bf16.mxu0 %v21645_v31  ;;  %v16815_v13 = vcombine.low %v25037_v61, %v25044_v49  ;;  %v16817_v31 = vcombine.low %v25047_v47, %v25050_v16  ;;  %v21729_v61 = vld [vmem:[%s22566_s24 + $0x3864] ss:$8 sps:$4 sm:$0xff]  }
 0x761   : > { %15863 = vmatprep.subr.bf16.mxu1 %v21648_v15  ;;  %v25128_v15 = vld [vmem:[%s22634_s29 + $0x7c0] sm:$0xff] }
 0x762   : > { %v21732_v49 = vld [vmem:[%s22566_s24 + $0x3964] ss:$8 sps:$4 sm:$0xff]   ;;  %v16820_v47 = vcombine.high %v25121_v4, %v25128_v15 }
 0x763   : > { %15821 = vmatpush1.bf16.msra.mxu0 %v21643_v23  ;;  %v25131_v23 = vld [vmem:[%s22634_s29 + $0x1c8] sm:$0xff] }
 0x764   : > { %15864 = vmatpush1.bf16.msra.mxu1 %v21646_v52  ;;  %15822 = vmatprep.subr.bf16.mxu0 %v21651_v53  ;;  %v25134_v52 = vld [vmem:[%s22634_s29 + $0x7c8] sm:$0xff]  ;;  %v21721_v53 = vld [vmem:[%s22566_s24 + $0x3870] ss:$8 sps:$4 sm:$0xff]  }
 0x765   : > { %15865 = vmatprep.subr.bf16.mxu1 %v21654_v34  ;;  %v21724_v34 = vld [vmem:[%s22566_s24 + $0x3970] ss:$8 sps:$4 sm:$0xff]   ;;  %v16822_v16 = vcombine.high %v25131_v23, %v25134_v52 }
 0x767   : > { %15823 = vmatpush1.bf16.msra.mxu0 %v21649_v24  ;;  %v21727_v24 = vld [vmem:[%s22566_s24 + $0x3860] ss:$8 sps:$4 sm:$0xff]  }
 0x768   : > { %15866 = vmatpush1.bf16.msra.mxu1 %v21652_v37  ;;  %15824 = vmatprep.subr.bf16.mxu0 %v21657_v55  ;;  %v21730_v37 = vld [vmem:[%s22566_s24 + $0x3960] ss:$8 sps:$4 sm:$0xff]   ;;  %v21735_v55 = vld [vmem:[%s22566_s24 + $0x3854] ss:$8 sps:$4 sm:$0xff]  }
 0x769   : > { %15867 = vmatprep.subr.bf16.mxu1 %v21660_v27  ;;  %v21738_v27 = vld [vmem:[%s22566_s24 + $0x3954] ss:$8 sps:$4 sm:$0xff]  }
 0x76b   : > { %15825 = vmatpush1.bf16.msra.mxu0 %v21655_v51  ;;  %v21733_v51 = vld [vmem:[%s22566_s24 + $0x3850] ss:$8 sps:$4 sm:$0xff]  }
 0x76c   : > { %15868 = vmatpush1.bf16.msra.mxu1 %v21658_v18  ;;  %15826 = vmatprep.subr.bf16.mxu0 %v21663_v58  ;;  %v21736_v18 = vld [vmem:[%s22566_s24 + $0x3950] ss:$8 sps:$4 sm:$0xff]   ;;  %v21741_v58 = vld [vmem:[%s22566_s24 + $0x3844] ss:$8 sps:$4 sm:$0xff]  }
 0x76d   : > { %15869 = vmatprep.subr.bf16.mxu1 %v21666_v50  ;;  %v21744_v50 = vld [vmem:[%s22566_s24 + $0x3944] ss:$8 sps:$4 sm:$0xff]  }
 0x76f   : > { %15827 = vmatpush1.bf16.msra.mxu0 %v21661_v10  ;;  %v21739_v10 = vld [vmem:[%s22566_s24 + $0x3840] ss:$8 sps:$4 sm:$0xff]  }
 0x770   : > { %15870 = vmatpush1.bf16.msra.mxu1 %v21664_v46  ;;  %15828 = vmatprep.subr.bf16.mxu0 %v21669_v32  ;;  %v21742_v46 = vld [vmem:[%s22566_s24 + $0x3940] ss:$8 sps:$4 sm:$0xff]   ;;  %v21747_v32 = vld [vmem:[%s22566_s24 + $0x3834] ss:$8 sps:$4 sm:$0xff]  }
 0x771   : > { %15871 = vmatprep.subr.bf16.mxu1 %v21672_v2  ;;  %v21750_v2 = vld [vmem:[%s22566_s24 + $0x3934] ss:$8 sps:$4 sm:$0xff]  }
 0x773   : > { %15829 = vmatpush1.bf16.msra.mxu0 %v21667_v57  ;;  %v21745_v57 = vld [vmem:[%s22566_s24 + $0x3830] ss:$8 sps:$4 sm:$0xff]  }
 0x774   : > { %15872 = vmatpush1.bf16.msra.mxu1 %v21670_v1  ;;  %15830 = vmatprep.subr.bf16.mxu0 %v21675_v0  ;;  %v21748_v1 = vld [vmem:[%s22566_s24 + $0x3930] ss:$8 sps:$4 sm:$0xff]   ;;  %v21753_v0 = vld [vmem:[%s22566_s24 + $0x3824] ss:$8 sps:$4 sm:$0xff]  }
 0x775   : > { %15873 = vmatprep.subr.bf16.mxu1 %v21678_v62  ;;  %v21756_v62 = vld [vmem:[%s22566_s24 + $0x3924] ss:$8 sps:$4 sm:$0xff]  }
 0x777   : > { %15831 = vmatpush2.bf16.msra.mxu0 %v21673_v36  ;;  %v21751_v36 = vld [vmem:[%s22566_s24 + $0x3820] ss:$8 sps:$4 sm:$0xff]  }
 0x778   : > { %15874 = vmatpush2.bf16.msra.mxu1 %v21676_v26  ;;  %15832 = vmatprep.subr.bf16.mxu0 %v21681_v60  ;;  %v21754_v26 = vld [vmem:[%s22566_s24 + $0x3920] ss:$8 sps:$4 sm:$0xff]   ;;  %v21759_v60 = vld [vmem:[%s22566_s24 + $0x3814] ss:$8 sps:$4 sm:$0xff]  }
 0x779   : > { %15875 = vmatprep.subr.bf16.mxu1 %v21684_v28  ;;  %v21762_v28 = vld [vmem:[%s22566_s24 + $0x3914] ss:$8 sps:$4 sm:$0xff]  }
 0x77b   : > { %15833 = vmatpush2.bf16.msra.mxu0 %v21679_v40  ;;  %v21757_v40 = vld [vmem:[%s22566_s24 + $0x3810] ss:$8 sps:$4 sm:$0xff]  }
 0x77c   : > { %15876 = vmatpush2.bf16.msra.mxu1 %v21682_v22  ;;  %15834 = vmatprep.subr.bf16.mxu0 %v21687_v43  ;;  %v21760_v22 = vld [vmem:[%s22566_s24 + $0x3910] ss:$8 sps:$4 sm:$0xff]   ;;  %v21765_v43 = vld [vmem:[%s22566_s24 + $0x3804] ss:$8 sps:$4 sm:$0xff]  }
 0x77d   : > { %15877 = vmatprep.subr.bf16.mxu1 %v21690_v56  ;;  %v21768_v56 = vld [vmem:[%s22566_s24 + $0x3904] ss:$8 sps:$4 sm:$0xff]  }
 0x77f   : > { %15835 = vmatpush2.bf16.msra.mxu0 %v21685_v29  ;;  %v21763_v29 = vld [vmem:[%s22566_s24 + $0x3800] ss:$8 sps:$4 sm:$0xff]  }
 0x780   : > { %15878 = vmatpush2.bf16.msra.mxu1 %v21688_v45  ;;  %15836 = vmatprep.subr.bf16.mxu0 %v21693_v6  ;;  %v21766_v45 = vld [vmem:[%s22566_s24 + $0x3900] ss:$8 sps:$4 sm:$0xff]   ;;  %v21771_v6 = vld [vmem:[%s22566_s24 + $0x38f4] ss:$8 sps:$4 sm:$0xff]  }
 0x781   : > { %15879 = vmatprep.subr.bf16.mxu1 %v21696_v44  ;;  %v21774_v44 = vld [vmem:[%s22566_s24 + $0x39f4] ss:$8 sps:$4 sm:$0xff]  }
 0x783   : > { %15837 = vmatpush2.bf16.msra.mxu0 %v21691_v7  ;;  %v21769_v7 = vld [vmem:[%s22566_s24 + $0x38f0] ss:$8 sps:$4 sm:$0xff]  }
 0x784   : > { %15880 = vmatpush2.bf16.msra.mxu1 %v21694_v17  ;;  %15838 = vmatprep.subr.bf16.mxu0 %v21699_v19  ;;  %v21772_v17 = vld [vmem:[%s22566_s24 + $0x39f0] ss:$8 sps:$4 sm:$0xff]   ;;  %v21777_v19 = vld [vmem:[%s22566_s24 + $0x38e4] ss:$8 sps:$4 sm:$0xff]  }
 0x785   : > { %15881 = vmatprep.subr.bf16.mxu1 %v21702_v30  ;;  %v21780_v30 = vld [vmem:[%s22566_s24 + $0x39e4] ss:$8 sps:$4 sm:$0xff]  }
 0x787   : > { %15839 = vmatpush2.bf16.msra.mxu0 %v21697_v38  ;;  %v21775_v38 = vld [vmem:[%s22566_s24 + $0x38e0] ss:$8 sps:$4 sm:$0xff]  }
 0x788   : > { %15882 = vmatpush2.bf16.msra.mxu1 %v21700_v9  ;;  %15840 = vmatprep.subr.bf16.mxu0 %v21705_v8  ;;  %v21778_v9 = vld [vmem:[%s22566_s24 + $0x39e0] ss:$8 sps:$4 sm:$0xff]   ;;  %v21783_v8 = vld [vmem:[%s22566_s24 + $0x38d4] ss:$8 sps:$4 sm:$0xff]  }
 0x789   : > { %15883 = vmatprep.subr.bf16.mxu1 %v21708_v14  ;;  %v21786_v14 = vld [vmem:[%s22566_s24 + $0x39d4] ss:$8 sps:$4 sm:$0xff]  }
 0x78b   : > { %15841 = vmatpush2.bf16.msra.mxu0 %v21703_v39  ;;  %v21781_v39 = vld [vmem:[%s22566_s24 + $0x38d0] ss:$8 sps:$4 sm:$0xff]  }
 0x78c   : > { %15884 = vmatpush2.bf16.msra.mxu1 %v21706_v11  ;;  %15842 = vmatprep.subr.bf16.mxu0 %v21711_v48  ;;  %v21784_v11 = vld [vmem:[%s22566_s24 + $0x39d0] ss:$8 sps:$4 sm:$0xff]   ;;  %v21789_v48 = vld [vmem:[%s22566_s24 + $0x38c4] ss:$8 sps:$4 sm:$0xff]  }
 0x78d   : > { %15885 = vmatprep.subr.bf16.mxu1 %v21714_v20  ;;  %v21792_v20 = vld [vmem:[%s22566_s24 + $0x39c4] ss:$8 sps:$4 sm:$0xff]  }
 0x78f   : > { %15843 = vmatpush2.bf16.msra.mxu0 %v21709_v42  ;;  %v21787_v42 = vld [vmem:[%s22566_s24 + $0x38c0] ss:$8 sps:$4 sm:$0xff]  }
 0x790   : > { %15886 = vmatpush2.bf16.msra.mxu1 %v21712_v41  ;;  %15844 = vmatprep.subr.bf16.mxu0 %v21717_v33  ;;  %v21790_v41 = vld [vmem:[%s22566_s24 + $0x39c0] ss:$8 sps:$4 sm:$0xff]   ;;  %v21795_v33 = vld [vmem:[%s22566_s24 + $0x38b4] ss:$8 sps:$4 sm:$0xff]  }
 0x791   : > { %15887 = vmatprep.subr.bf16.mxu1 %v21720_v5  ;;  %v21798_v5 = vld [vmem:[%s22566_s24 + $0x39b4] ss:$8 sps:$4 sm:$0xff]  }
 0x793   : > { %15845 = vmatpush2.bf16.msra.mxu0 %v21715_v59  ;;  %v21793_v59 = vld [vmem:[%s22566_s24 + $0x38b0] ss:$8 sps:$4 sm:$0xff]  }
 0x794   : > { %15888 = vmatpush2.bf16.msra.mxu1 %v21718_v21  ;;  %15900 = vmatprep.subr.bf16.mxu0 %v21723_v63  ;;  %v21796_v21 = vld [vmem:[%s22566_s24 + $0x39b0] ss:$8 sps:$4 sm:$0xff]   ;;  %v21801_v63 = vld [vmem:[%s22566_s24 + $0x38a4] ss:$8 sps:$4 sm:$0xff]  }
 0x795   : > { %15943 = vmatprep.subr.bf16.mxu1 %v21726_v3  ;;  %v21804_v3 = vld [vmem:[%s22566_s24 + $0x39a4] ss:$8 sps:$4 sm:$0xff]  }
 0x796   : > { %15847 = vmatmul.mubr.bf16.vlgmr.msra.gmra.mxu0 %v16815_v13  ;;  %v21799_v13 = vld [vmem:[%s22566_s24 + $0x38a0] ss:$8 sps:$4 sm:$0xff]  }
 0x797   : > { %15890 = vmatmul.mubr.bf16.vlgmr.msra.gmra.mxu1 %v16817_v31  ;;  %15901 = vmatpush1.bf16.msra.mxu0 %v21721_v53  ;;  %v21802_v31 = vld [vmem:[%s22566_s24 + $0x39a0] ss:$8 sps:$4 sm:$0xff]   ;;  %v21807_v53 = vld [vmem:[%s22566_s24 + $0x3894] ss:$8 sps:$4 sm:$0xff]  }
 0x798   : > { %15944 = vmatpush1.bf16.msra.mxu1 %v21724_v34  ;;  %15902 = vmatprep.subr.bf16.mxu0 %v21729_v61  ;;  %v21810_v34 = vld [vmem:[%s22566_s24 + $0x3994] ss:$8 sps:$4 sm:$0xff]   ;;  %v21805_v61 = vld [vmem:[%s22566_s24 + $0x3890] ss:$8 sps:$4 sm:$0xff]  }
 0x799   : > { %15945 = vmatprep.subr.bf16.mxu1 %v21732_v49  ;;  %15932 = vmatprep.mubr.bf16.mxu0 %v16820_v47  ;;  %v21808_v49 = vld [vmem:[%s22566_s24 + $0x3990] ss:$8 sps:$4 sm:$0xff]   ;;  %v21813_v47 = vld [vmem:[%s22566_s24 + $0x3884] ss:$8 sps:$4 sm:$0xff]  }
 0x79a   : > { %15975 = vmatprep.mubr.bf16.mxu1 %v16822_v16  ;;  %v21816_v16 = vld [vmem:[%s22566_s24 + $0x3984] ss:$8 sps:$4 sm:$0xff]  }
 0x79b   : > { %15903 = vmatpush1.bf16.msra.mxu0 %v21727_v24  ;;  %v21811_v24 = vld [vmem:[%s22566_s24 + $0x3880] ss:$8 sps:$4 sm:$0xff]  }
 0x79c   : > { %15946 = vmatpush1.bf16.msra.mxu1 %v21730_v37  ;;  %15904 = vmatprep.subr.bf16.mxu0 %v21735_v55  ;;  %v21814_v37 = vld [vmem:[%s22566_s24 + $0x3980] ss:$8 sps:$4 sm:$0xff]   ;;  %v21819_v55 = vld [vmem:[%s22566_s24 + $0x3a74] ss:$8 sps:$4 sm:$0xff]  }
 0x79d   : > { %15947 = vmatprep.subr.bf16.mxu1 %v21738_v27  ;;  %v21822_v27 = vld [vmem:[%s22566_s24 + $0x3b74] ss:$8 sps:$4 sm:$0xff]  }
 0x79f   : > { %15905 = vmatpush1.bf16.msra.mxu0 %v21733_v51  ;;  %v25205_v51 = vld [vmem:[%s22634_s29 + $0x1d0] sm:$0xff] }
 0x7a0   : > { %15948 = vmatpush1.bf16.msra.mxu1 %v21736_v18  ;;  %15906 = vmatprep.subr.bf16.mxu0 %v21741_v58  ;;  %v16819_v18 = vcombine.low %v25121_v4, %v25128_v15  ;;  %v16821_v58 = vcombine.low %v25131_v23, %v25134_v52  ;;  %v21825_v4 = vld [vmem:[%s22566_s24 + $0x3a64] ss:$8 sps:$4 sm:$0xff]  }
 0x7a1   : > { %15949 = vmatprep.subr.bf16.mxu1 %v21744_v50  ;;  %v25212_v50 = vld [vmem:[%s22634_s29 + $0x7d0] sm:$0xff]  ;;  %v21828_v15 = vld [vmem:[%s22566_s24 + $0x3b64] ss:$8 sps:$4 sm:$0xff]  }
 0x7a2   : > { %v16824_v23 = vcombine.high %v25205_v51, %v25212_v50 }
 0x7a3   : > { %15907 = vmatpush1.bf16.msra.mxu0 %v21739_v10  ;;  %v25215_v10 = vld [vmem:[%s22634_s29 + $0x1d8] sm:$0xff] }
 0x7a4   : > { %15950 = vmatpush1.bf16.msra.mxu1 %v21742_v46  ;;  %15908 = vmatprep.subr.bf16.mxu0 %v21747_v32  ;;  %v25218_v46 = vld [vmem:[%s22634_s29 + $0x7d8] sm:$0xff] }
 0x7a5   : > { %15951 = vmatprep.subr.bf16.mxu1 %v21750_v2  ;;  %v21817_v32 = vld [vmem:[%s22566_s24 + $0x3a70] ss:$8 sps:$4 sm:$0xff]   ;;  %v16826_v52 = vcombine.high %v25215_v10, %v25218_v46 }
 0x7a6   : > { %v21820_v2 = vld [vmem:[%s22566_s24 + $0x3b70] ss:$8 sps:$4 sm:$0xff]  }
 0x7a7   : > { %15909 = vmatpush1.bf16.msra.mxu0 %v21745_v57  ;;  %v21823_v57 = vld [vmem:[%s22566_s24 + $0x3a60] ss:$8 sps:$4 sm:$0xff]  }
 0x7a8   : > { %15952 = vmatpush1.bf16.msra.mxu1 %v21748_v1  ;;  %15910 = vmatprep.subr.bf16.mxu0 %v21753_v0  ;;  %v21826_v1 = vld [vmem:[%s22566_s24 + $0x3b60] ss:$8 sps:$4 sm:$0xff]   ;;  %v21831_v0 = vld [vmem:[%s22566_s24 + $0x3a54] ss:$8 sps:$4 sm:$0xff]  }
 0x7a9   : > { %15953 = vmatprep.subr.bf16.mxu1 %v21756_v62  ;;  %v21834_v62 = vld [vmem:[%s22566_s24 + $0x3b54] ss:$8 sps:$4 sm:$0xff]  }
 0x7ab   : > { %15911 = vmatpush1.bf16.msra.mxu0 %v21751_v36  ;;  %v21829_v36 = vld [vmem:[%s22566_s24 + $0x3a50] ss:$8 sps:$4 sm:$0xff]  }
 0x7ac   : > { %15954 = vmatpush1.bf16.msra.mxu1 %v21754_v26  ;;  %15912 = vmatprep.subr.bf16.mxu0 %v21759_v60  ;;  %v21832_v26 = vld [vmem:[%s22566_s24 + $0x3b50] ss:$8 sps:$4 sm:$0xff]   ;;  %v21837_v60 = vld [vmem:[%s22566_s24 + $0x3a44] ss:$8 sps:$4 sm:$0xff]  }
 0x7ad   : > { %15955 = vmatprep.subr.bf16.mxu1 %v21762_v28  ;;  %v21840_v28 = vld [vmem:[%s22566_s24 + $0x3b44] ss:$8 sps:$4 sm:$0xff]  }
 0x7af   : > { %15913 = vmatpush1.bf16.msra.mxu0 %v21757_v40  ;;  %v21835_v40 = vld [vmem:[%s22566_s24 + $0x3a40] ss:$8 sps:$4 sm:$0xff]  }
 0x7b0   : > { %15956 = vmatpush1.bf16.msra.mxu1 %v21760_v22  ;;  %15914 = vmatprep.subr.bf16.mxu0 %v21765_v43  ;;  %v21838_v22 = vld [vmem:[%s22566_s24 + $0x3b40] ss:$8 sps:$4 sm:$0xff]   ;;  %v21843_v43 = vld [vmem:[%s22566_s24 + $0x3a34] ss:$8 sps:$4 sm:$0xff]  }
 0x7b1   : > { %15957 = vmatprep.subr.bf16.mxu1 %v21768_v56  ;;  %v21846_v56 = vld [vmem:[%s22566_s24 + $0x3b34] ss:$8 sps:$4 sm:$0xff]  }
 0x7b3   : > { %15915 = vmatpush1.bf16.msra.mxu0 %v21763_v29  ;;  %v21841_v29 = vld [vmem:[%s22566_s24 + $0x3a30] ss:$8 sps:$4 sm:$0xff]  }
 0x7b4   : > { %15958 = vmatpush1.bf16.msra.mxu1 %v21766_v45  ;;  %15916 = vmatprep.subr.bf16.mxu0 %v21771_v6  ;;  %v21844_v45 = vld [vmem:[%s22566_s24 + $0x3b30] ss:$8 sps:$4 sm:$0xff]   ;;  %v21849_v6 = vld [vmem:[%s22566_s24 + $0x3a24] ss:$8 sps:$4 sm:$0xff]  }
 0x7b5   : > { %15959 = vmatprep.subr.bf16.mxu1 %v21774_v44  ;;  %v21852_v44 = vld [vmem:[%s22566_s24 + $0x3b24] ss:$8 sps:$4 sm:$0xff]  }
 0x7b7   : > { %15917 = vmatpush2.bf16.msra.mxu0 %v21769_v7  ;;  %v21847_v7 = vld [vmem:[%s22566_s24 + $0x3a20] ss:$8 sps:$4 sm:$0xff]  }
 0x7b8   : > { %15960 = vmatpush2.bf16.msra.mxu1 %v21772_v17  ;;  %15918 = vmatprep.subr.bf16.mxu0 %v21777_v19  ;;  %v21850_v17 = vld [vmem:[%s22566_s24 + $0x3b20] ss:$8 sps:$4 sm:$0xff]   ;;  %v21855_v19 = vld [vmem:[%s22566_s24 + $0x3a14] ss:$8 sps:$4 sm:$0xff]  }
 0x7b9   : > { %15961 = vmatprep.subr.bf16.mxu1 %v21780_v30  ;;  %v21858_v30 = vld [vmem:[%s22566_s24 + $0x3b14] ss:$8 sps:$4 sm:$0xff]  }
 0x7bb   : > { %15919 = vmatpush2.bf16.msra.mxu0 %v21775_v38  ;;  %v21853_v38 = vld [vmem:[%s22566_s24 + $0x3a10] ss:$8 sps:$4 sm:$0xff]  }
 0x7bc   : > { %15962 = vmatpush2.bf16.msra.mxu1 %v21778_v9  ;;  %15920 = vmatprep.subr.bf16.mxu0 %v21783_v8  ;;  %v21856_v9 = vld [vmem:[%s22566_s24 + $0x3b10] ss:$8 sps:$4 sm:$0xff]   ;;  %v21861_v8 = vld [vmem:[%s22566_s24 + $0x3a04] ss:$8 sps:$4 sm:$0xff]  }
 0x7bd   : > { %15963 = vmatprep.subr.bf16.mxu1 %v21786_v14  ;;  %v21864_v14 = vld [vmem:[%s22566_s24 + $0x3b04] ss:$8 sps:$4 sm:$0xff]  }
 0x7bf   : > { %15921 = vmatpush2.bf16.msra.mxu0 %v21781_v39  ;;  %v21859_v39 = vld [vmem:[%s22566_s24 + $0x3a00] ss:$8 sps:$4 sm:$0xff]  }
 0x7c0   : > { %15964 = vmatpush2.bf16.msra.mxu1 %v21784_v11  ;;  %15922 = vmatprep.subr.bf16.mxu0 %v21789_v48  ;;  %v21862_v11 = vld [vmem:[%s22566_s24 + $0x3b00] ss:$8 sps:$4 sm:$0xff]   ;;  %v21867_v48 = vld [vmem:[%s22566_s24 + $0x3af4] ss:$8 sps:$4 sm:$0xff]  }
 0x7c1   : > { %15965 = vmatprep.subr.bf16.mxu1 %v21792_v20  ;;  %v21870_v20 = vld [vmem:[%s22566_s24 + $0x3bf4] ss:$8 sps:$4 sm:$0xff]  }
 0x7c3   : > { %15923 = vmatpush2.bf16.msra.mxu0 %v21787_v42  ;;  %v21865_v42 = vld [vmem:[%s22566_s24 + $0x3af0] ss:$8 sps:$4 sm:$0xff]  }
 0x7c4   : > { %15966 = vmatpush2.bf16.msra.mxu1 %v21790_v41  ;;  %15924 = vmatprep.subr.bf16.mxu0 %v21795_v33  ;;  %v21868_v41 = vld [vmem:[%s22566_s24 + $0x3bf0] ss:$8 sps:$4 sm:$0xff]   ;;  %v21873_v33 = vld [vmem:[%s22566_s24 + $0x3ae4] ss:$8 sps:$4 sm:$0xff]  }
 0x7c5   : > { %15967 = vmatprep.subr.bf16.mxu1 %v21798_v5  ;;  %v21876_v5 = vld [vmem:[%s22566_s24 + $0x3be4] ss:$8 sps:$4 sm:$0xff]  }
 0x7c7   : > { %15925 = vmatpush2.bf16.msra.mxu0 %v21793_v59  ;;  %v21871_v59 = vld [vmem:[%s22566_s24 + $0x3ae0] ss:$8 sps:$4 sm:$0xff]  }
 0x7c8   : > { %15968 = vmatpush2.bf16.msra.mxu1 %v21796_v21  ;;  %15926 = vmatprep.subr.bf16.mxu0 %v21801_v63  ;;  %v21874_v21 = vld [vmem:[%s22566_s24 + $0x3be0] ss:$8 sps:$4 sm:$0xff]   ;;  %v21879_v63 = vld [vmem:[%s22566_s24 + $0x3ad4] ss:$8 sps:$4 sm:$0xff]  }
 0x7c9   : > { %15969 = vmatprep.subr.bf16.mxu1 %v21804_v3  ;;  %v21882_v3 = vld [vmem:[%s22566_s24 + $0x3bd4] ss:$8 sps:$4 sm:$0xff]  }
 0x7cb   : > { %15927 = vmatpush2.bf16.msra.mxu0 %v21799_v13  ;;  %v21877_v13 = vld [vmem:[%s22566_s24 + $0x3ad0] ss:$8 sps:$4 sm:$0xff]  }
 0x7cc   : > { %15970 = vmatpush2.bf16.msra.mxu1 %v21802_v31  ;;  %15928 = vmatprep.subr.bf16.mxu0 %v21807_v53  ;;  %v21880_v31 = vld [vmem:[%s22566_s24 + $0x3bd0] ss:$8 sps:$4 sm:$0xff]   ;;  %v21885_v53 = vld [vmem:[%s22566_s24 + $0x3ac4] ss:$8 sps:$4 sm:$0xff]  }
 0x7cd   : > { %15971 = vmatprep.subr.bf16.mxu1 %v21810_v34  ;;  %v21888_v34 = vld [vmem:[%s22566_s24 + $0x3bc4] ss:$8 sps:$4 sm:$0xff]  }
 0x7cf   : > { %15929 = vmatpush2.bf16.msra.mxu0 %v21805_v61  ;;  %v21883_v61 = vld [vmem:[%s22566_s24 + $0x3ac0] ss:$8 sps:$4 sm:$0xff]  }
 0x7d0   : > { %15972 = vmatpush2.bf16.msra.mxu1 %v21808_v49  ;;  %15930 = vmatprep.subr.bf16.mxu0 %v21813_v47  ;;  %v21886_v49 = vld [vmem:[%s22566_s24 + $0x3bc0] ss:$8 sps:$4 sm:$0xff]   ;;  %v21891_v47 = vld [vmem:[%s22566_s24 + $0x3ab4] ss:$8 sps:$4 sm:$0xff]  }
 0x7d1   : > { %15973 = vmatprep.subr.bf16.mxu1 %v21816_v16  ;;  %v21894_v16 = vld [vmem:[%s22566_s24 + $0x3bb4] ss:$8 sps:$4 sm:$0xff]  }
 0x7d3   : > { %15931 = vmatpush2.bf16.msra.mxu0 %v21811_v24  ;;  %v21889_v24 = vld [vmem:[%s22566_s24 + $0x3ab0] ss:$8 sps:$4 sm:$0xff]  }
 0x7d4   : > { %15974 = vmatpush2.bf16.msra.mxu1 %v21814_v37  ;;  %15986 = vmatprep.subr.bf16.mxu0 %v21819_v55  ;;  %v21892_v37 = vld [vmem:[%s22566_s24 + $0x3bb0] ss:$8 sps:$4 sm:$0xff]   ;;  %v21897_v55 = vld [vmem:[%s22566_s24 + $0x3aa4] ss:$8 sps:$4 sm:$0xff]  }
 0x7d5   : > { %16029 = vmatprep.subr.bf16.mxu1 %v21822_v27  ;;  %v21900_v27 = vld [vmem:[%s22566_s24 + $0x3ba4] ss:$8 sps:$4 sm:$0xff]  }
 0x7d6   : > { %15933 = vmatmul.mubr.bf16.vlgmr.msra.gmra.mxu0 %v16819_v18  ;;  %v21895_v18 = vld [vmem:[%s22566_s24 + $0x3aa0] ss:$8 sps:$4 sm:$0xff]  }
 0x7d7   : > { %15976 = vmatmul.mubr.bf16.vlgmr.msra.gmra.mxu1 %v16821_v58  ;;  %15987 = vmatpush1.bf16.msra.mxu0 %v21817_v32  ;;  %v21898_v58 = vld [vmem:[%s22566_s24 + $0x3ba0] ss:$8 sps:$4 sm:$0xff]   ;;  %v21903_v32 = vld [vmem:[%s22566_s24 + $0x3a94] ss:$8 sps:$4 sm:$0xff]  }
 0x7d8   : > { %16030 = vmatpush1.bf16.msra.mxu1 %v21820_v2  ;;  %15988 = vmatprep.subr.bf16.mxu0 %v21825_v4  ;;  %v21906_v2 = vld [vmem:[%s22566_s24 + $0x3b94] ss:$8 sps:$4 sm:$0xff]   ;;  %v21901_v4 = vld [vmem:[%s22566_s24 + $0x3a90] ss:$8 sps:$4 sm:$0xff]  }
 0x7d9   : > { %16031 = vmatprep.subr.bf16.mxu1 %v21828_v15  ;;  %16018 = vmatprep.mubr.bf16.mxu0 %v16824_v23  ;;  %v21904_v15 = vld [vmem:[%s22566_s24 + $0x3b90] ss:$8 sps:$4 sm:$0xff]   ;;  %v21909_v23 = vld [vmem:[%s22566_s24 + $0x3a84] ss:$8 sps:$4 sm:$0xff]  }
 0x7da   : > { %16061 = vmatprep.mubr.bf16.mxu1 %v16826_v52  ;;  %v21912_v52 = vld [vmem:[%s22566_s24 + $0x3b84] ss:$8 sps:$4 sm:$0xff]  }
 0x7db   : > { %15989 = vmatpush1.bf16.msra.mxu0 %v21823_v57  ;;  %v21907_v57 = vld [vmem:[%s22566_s24 + $0x3a80] ss:$8 sps:$4 sm:$0xff]  }
 0x7dc   : > { %16032 = vmatpush1.bf16.msra.mxu1 %v21826_v1  ;;  %15990 = vmatprep.subr.bf16.mxu0 %v21831_v0  ;;  %v21910_v1 = vld [vmem:[%s22566_s24 + $0x3b80] ss:$8 sps:$4 sm:$0xff]   ;;  %v21915_v0 = vld [vmem:[%s22566_s24 + $0x3c74] ss:$8 sps:$4 sm:$0xff]  }
 0x7dd   : > { %16033 = vmatprep.subr.bf16.mxu1 %v21834_v62  ;;  %v21918_v62 = vld [vmem:[%s22566_s24 + $0x3d74] ss:$8 sps:$4 sm:$0xff]  }
 0x7df   : > { %15991 = vmatpush1.bf16.msra.mxu0 %v21829_v36  ;;  %v25289_v36 = vld [vmem:[%s22634_s29 + $0x1e0] sm:$0xff] }
 0x7e0   : > { %16034 = vmatpush1.bf16.msra.mxu1 %v21832_v26  ;;  %15992 = vmatprep.subr.bf16.mxu0 %v21837_v60  ;;  %v16823_v26 = vcombine.low %v25205_v51, %v25212_v50  ;;  %v16825_v60 = vcombine.low %v25215_v10, %v25218_v46  ;;  %v21921_v51 = vld [vmem:[%s22566_s24 + $0x3c64] ss:$8 sps:$4 sm:$0xff]  }
 0x7e1   : > { %16035 = vmatprep.subr.bf16.mxu1 %v21840_v28  ;;  %v25296_v28 = vld [vmem:[%s22634_s29 + $0x7e0] sm:$0xff] }
 0x7e2   : > { %v21924_v50 = vld [vmem:[%s22566_s24 + $0x3d64] ss:$8 sps:$4 sm:$0xff]   ;;  %v16828_v10 = vcombine.high %v25289_v36, %v25296_v28 }
 0x7e3   : > { %15993 = vmatpush1.bf16.msra.mxu0 %v21835_v40  ;;  %v25299_v40 = vld [vmem:[%s22634_s29 + $0x1e8] sm:$0xff] }
 0x7e4   : > { %16036 = vmatpush1.bf16.msra.mxu1 %v21838_v22  ;;  %15994 = vmatprep.subr.bf16.mxu0 %v21843_v43  ;;  %v25302_v22 = vld [vmem:[%s22634_s29 + $0x7e8] sm:$0xff]  ;;  %v21913_v43 = vld [vmem:[%s22566_s24 + $0x3c70] ss:$8 sps:$4 sm:$0xff]  }
 0x7e5   : > { %16037 = vmatprep.subr.bf16.mxu1 %v21846_v56  ;;  %v21916_v56 = vld [vmem:[%s22566_s24 + $0x3d70] ss:$8 sps:$4 sm:$0xff]   ;;  %v16830_v46 = vcombine.high %v25299_v40, %v25302_v22 }
 0x7e7   : > { %15995 = vmatpush1.bf16.msra.mxu0 %v21841_v29  ;;  %v21919_v29 = vld [vmem:[%s22566_s24 + $0x3c60] ss:$8 sps:$4 sm:$0xff]  }
 0x7e8   : > { %16038 = vmatpush1.bf16.msra.mxu1 %v21844_v45  ;;  %15996 = vmatprep.subr.bf16.mxu0 %v21849_v6  ;;  %v21922_v45 = vld [vmem:[%s22566_s24 + $0x3d60] ss:$8 sps:$4 sm:$0xff]   ;;  %v21927_v6 = vld [vmem:[%s22566_s24 + $0x3c54] ss:$8 sps:$4 sm:$0xff]  }
 0x7e9   : > { %16039 = vmatprep.subr.bf16.mxu1 %v21852_v44  ;;  %v21930_v44 = vld [vmem:[%s22566_s24 + $0x3d54] ss:$8 sps:$4 sm:$0xff]  }
 0x7eb   : > { %15997 = vmatpush1.bf16.msra.mxu0 %v21847_v7  ;;  %v21925_v7 = vld [vmem:[%s22566_s24 + $0x3c50] ss:$8 sps:$4 sm:$0xff]  }
 0x7ec   : > { %16040 = vmatpush1.bf16.msra.mxu1 %v21850_v17  ;;  %15998 = vmatprep.subr.bf16.mxu0 %v21855_v19  ;;  %v21928_v17 = vld [vmem:[%s22566_s24 + $0x3d50] ss:$8 sps:$4 sm:$0xff]   ;;  %v21933_v19 = vld [vmem:[%s22566_s24 + $0x3c44] ss:$8 sps:$4 sm:$0xff]  }
 0x7ed   : > { %16041 = vmatprep.subr.bf16.mxu1 %v21858_v30  ;;  %v21936_v30 = vld [vmem:[%s22566_s24 + $0x3d44] ss:$8 sps:$4 sm:$0xff]  }
 0x7ef   : > { %15999 = vmatpush1.bf16.msra.mxu0 %v21853_v38  ;;  %v21931_v38 = vld [vmem:[%s22566_s24 + $0x3c40] ss:$8 sps:$4 sm:$0xff]  }
 0x7f0   : > { %16042 = vmatpush1.bf16.msra.mxu1 %v21856_v9  ;;  %16000 = vmatprep.subr.bf16.mxu0 %v21861_v8  ;;  %v21934_v9 = vld [vmem:[%s22566_s24 + $0x3d40] ss:$8 sps:$4 sm:$0xff]   ;;  %v21939_v8 = vld [vmem:[%s22566_s24 + $0x3c34] ss:$8 sps:$4 sm:$0xff]  }
 0x7f1   : > { %16043 = vmatprep.subr.bf16.mxu1 %v21864_v14  ;;  %v21942_v14 = vld [vmem:[%s22566_s24 + $0x3d34] ss:$8 sps:$4 sm:$0xff]  }
 0x7f3   : > { %16001 = vmatpush1.bf16.msra.mxu0 %v21859_v39  ;;  %v21937_v39 = vld [vmem:[%s22566_s24 + $0x3c30] ss:$8 sps:$4 sm:$0xff]  }
 0x7f4   : > { %16044 = vmatpush1.bf16.msra.mxu1 %v21862_v11  ;;  %16002 = vmatprep.subr.bf16.mxu0 %v21867_v48  ;;  %v21940_v11 = vld [vmem:[%s22566_s24 + $0x3d30] ss:$8 sps:$4 sm:$0xff]   ;;  %v21945_v48 = vld [vmem:[%s22566_s24 + $0x3c24] ss:$8 sps:$4 sm:$0xff]  }
 0x7f5   : > { %16045 = vmatprep.subr.bf16.mxu1 %v21870_v20  ;;  %v21948_v20 = vld [vmem:[%s22566_s24 + $0x3d24] ss:$8 sps:$4 sm:$0xff]  }
 0x7f7   : > { %16003 = vmatpush2.bf16.msra.mxu0 %v21865_v42  ;;  %v21943_v42 = vld [vmem:[%s22566_s24 + $0x3c20] ss:$8 sps:$4 sm:$0xff]  }
 0x7f8   : > { %16046 = vmatpush2.bf16.msra.mxu1 %v21868_v41  ;;  %16004 = vmatprep.subr.bf16.mxu0 %v21873_v33  ;;  %v21946_v41 = vld [vmem:[%s22566_s24 + $0x3d20] ss:$8 sps:$4 sm:$0xff]   ;;  %v21951_v33 = vld [vmem:[%s22566_s24 + $0x3c14] ss:$8 sps:$4 sm:$0xff]  }
 0x7f9   : > { %16047 = vmatprep.subr.bf16.mxu1 %v21876_v5  ;;  %v21954_v5 = vld [vmem:[%s22566_s24 + $0x3d14] ss:$8 sps:$4 sm:$0xff]  }
 0x7fb   : > { %16005 = vmatpush2.bf16.msra.mxu0 %v21871_v59  ;;  %v21949_v59 = vld [vmem:[%s22566_s24 + $0x3c10] ss:$8 sps:$4 sm:$0xff]  }
 0x7fc   : > { %16048 = vmatpush2.bf16.msra.mxu1 %v21874_v21  ;;  %16006 = vmatprep.subr.bf16.mxu0 %v21879_v63  ;;  %v21952_v21 = vld [vmem:[%s22566_s24 + $0x3d10] ss:$8 sps:$4 sm:$0xff]   ;;  %v21957_v63 = vld [vmem:[%s22566_s24 + $0x3c04] ss:$8 sps:$4 sm:$0xff]  }
 0x7fd   : > { %16049 = vmatprep.subr.bf16.mxu1 %v21882_v3  ;;  %v21960_v3 = vld [vmem:[%s22566_s24 + $0x3d04] ss:$8 sps:$4 sm:$0xff]  }
 0x7ff   : > { %16007 = vmatpush2.bf16.msra.mxu0 %v21877_v13  ;;  %v21955_v13 = vld [vmem:[%s22566_s24 + $0x3c00] ss:$8 sps:$4 sm:$0xff]  }
 0x800   : > { %16050 = vmatpush2.bf16.msra.mxu1 %v21880_v31  ;;  %16008 = vmatprep.subr.bf16.mxu0 %v21885_v53  ;;  %v21958_v31 = vld [vmem:[%s22566_s24 + $0x3d00] ss:$8 sps:$4 sm:$0xff]   ;;  %v21963_v53 = vld [vmem:[%s22566_s24 + $0x3cf4] ss:$8 sps:$4 sm:$0xff]  }
 0x801   : > { %16051 = vmatprep.subr.bf16.mxu1 %v21888_v34  ;;  %v21966_v34 = vld [vmem:[%s22566_s24 + $0x3df4] ss:$8 sps:$4 sm:$0xff]  }
 0x803   : > { %16009 = vmatpush2.bf16.msra.mxu0 %v21883_v61  ;;  %v21961_v61 = vld [vmem:[%s22566_s24 + $0x3cf0] ss:$8 sps:$4 sm:$0xff]  }
 0x804   : > { %16052 = vmatpush2.bf16.msra.mxu1 %v21886_v49  ;;  %16010 = vmatprep.subr.bf16.mxu0 %v21891_v47  ;;  %v21964_v49 = vld [vmem:[%s22566_s24 + $0x3df0] ss:$8 sps:$4 sm:$0xff]   ;;  %v21969_v47 = vld [vmem:[%s22566_s24 + $0x3ce4] ss:$8 sps:$4 sm:$0xff]  }
 0x805   : > { %16053 = vmatprep.subr.bf16.mxu1 %v21894_v16  ;;  %v21972_v16 = vld [vmem:[%s22566_s24 + $0x3de4] ss:$8 sps:$4 sm:$0xff]  }
 0x807   : > { %16011 = vmatpush2.bf16.msra.mxu0 %v21889_v24  ;;  %v21967_v24 = vld [vmem:[%s22566_s24 + $0x3ce0] ss:$8 sps:$4 sm:$0xff]  }
 0x808   : > { %16054 = vmatpush2.bf16.msra.mxu1 %v21892_v37  ;;  %16012 = vmatprep.subr.bf16.mxu0 %v21897_v55  ;;  %v21970_v37 = vld [vmem:[%s22566_s24 + $0x3de0] ss:$8 sps:$4 sm:$0xff]   ;;  %v21975_v55 = vld [vmem:[%s22566_s24 + $0x3cd4] ss:$8 sps:$4 sm:$0xff]  }
 0x809   : > { %16055 = vmatprep.subr.bf16.mxu1 %v21900_v27  ;;  %v21978_v27 = vld [vmem:[%s22566_s24 + $0x3dd4] ss:$8 sps:$4 sm:$0xff]  }
 0x80b   : > { %16013 = vmatpush2.bf16.msra.mxu0 %v21895_v18  ;;  %v21973_v18 = vld [vmem:[%s22566_s24 + $0x3cd0] ss:$8 sps:$4 sm:$0xff]  }
 0x80c   : > { %16056 = vmatpush2.bf16.msra.mxu1 %v21898_v58  ;;  %16014 = vmatprep.subr.bf16.mxu0 %v21903_v32  ;;  %v21976_v58 = vld [vmem:[%s22566_s24 + $0x3dd0] ss:$8 sps:$4 sm:$0xff]   ;;  %v21981_v32 = vld [vmem:[%s22566_s24 + $0x3cc4] ss:$8 sps:$4 sm:$0xff]  }
 0x80d   : > { %16057 = vmatprep.subr.bf16.mxu1 %v21906_v2  ;;  %v21984_v2 = vld [vmem:[%s22566_s24 + $0x3dc4] ss:$8 sps:$4 sm:$0xff]  }
 0x80f   : > { %16015 = vmatpush2.bf16.msra.mxu0 %v21901_v4  ;;  %v21979_v4 = vld [vmem:[%s22566_s24 + $0x3cc0] ss:$8 sps:$4 sm:$0xff]  }
 0x810   : > { %16058 = vmatpush2.bf16.msra.mxu1 %v21904_v15  ;;  %16016 = vmatprep.subr.bf16.mxu0 %v21909_v23  ;;  %v21982_v15 = vld [vmem:[%s22566_s24 + $0x3dc0] ss:$8 sps:$4 sm:$0xff]   ;;  %v21987_v23 = vld [vmem:[%s22566_s24 + $0x3cb4] ss:$8 sps:$4 sm:$0xff]  }
 0x811   : > { %16059 = vmatprep.subr.bf16.mxu1 %v21912_v52  ;;  %v21990_v52 = vld [vmem:[%s22566_s24 + $0x3db4] ss:$8 sps:$4 sm:$0xff]  }
 0x813   : > { %16017 = vmatpush2.bf16.msra.mxu0 %v21907_v57  ;;  %v21985_v57 = vld [vmem:[%s22566_s24 + $0x3cb0] ss:$8 sps:$4 sm:$0xff]  }
 0x814   : > { %16060 = vmatpush2.bf16.msra.mxu1 %v21910_v1  ;;  %16072 = vmatprep.subr.bf16.mxu0 %v21915_v0  ;;  %v21988_v1 = vld [vmem:[%s22566_s24 + $0x3db0] ss:$8 sps:$4 sm:$0xff]   ;;  %v21993_v0 = vld [vmem:[%s22566_s24 + $0x3ca4] ss:$8 sps:$4 sm:$0xff]  }
 0x815   : > { %16115 = vmatprep.subr.bf16.mxu1 %v21918_v62  ;;  %v21996_v62 = vld [vmem:[%s22566_s24 + $0x3da4] ss:$8 sps:$4 sm:$0xff]  }
 0x816   : > { %16019 = vmatmul.mubr.bf16.vlgmr.msra.gmra.mxu0 %v16823_v26  ;;  %v21991_v26 = vld [vmem:[%s22566_s24 + $0x3ca0] ss:$8 sps:$4 sm:$0xff]  }
 0x817   : > { %16062 = vmatmul.mubr.bf16.vlgmr.msra.gmra.mxu1 %v16825_v60  ;;  %16073 = vmatpush1.bf16.msra.mxu0 %v21913_v43  ;;  %v21994_v60 = vld [vmem:[%s22566_s24 + $0x3da0] ss:$8 sps:$4 sm:$0xff]   ;;  %v21999_v43 = vld [vmem:[%s22566_s24 + $0x3c94] ss:$8 sps:$4 sm:$0xff]  }
 0x818   : > { %16116 = vmatpush1.bf16.msra.mxu1 %v21916_v56  ;;  %16074 = vmatprep.subr.bf16.mxu0 %v21921_v51  ;;  %v22002_v56 = vld [vmem:[%s22566_s24 + $0x3d94] ss:$8 sps:$4 sm:$0xff]   ;;  %v21997_v51 = vld [vmem:[%s22566_s24 + $0x3c90] ss:$8 sps:$4 sm:$0xff]  }
 0x819   : > { %16117 = vmatprep.subr.bf16.mxu1 %v21924_v50  ;;  %16104 = vmatprep.mubr.bf16.mxu0 %v16828_v10  ;;  %v22000_v50 = vld [vmem:[%s22566_s24 + $0x3d90] ss:$8 sps:$4 sm:$0xff]   ;;  %v22005_v10 = vld [vmem:[%s22566_s24 + $0x3c84] ss:$8 sps:$4 sm:$0xff]  }
 0x81a   : > { %16147 = vmatprep.mubr.bf16.mxu1 %v16830_v46  ;;  %v22008_v46 = vld [vmem:[%s22566_s24 + $0x3d84] ss:$8 sps:$4 sm:$0xff]  }
 0x81b   : > { %16075 = vmatpush1.bf16.msra.mxu0 %v21919_v29  ;;  %v22003_v29 = vld [vmem:[%s22566_s24 + $0x3c80] ss:$8 sps:$4 sm:$0xff]  }
 0x81c   : > { %16118 = vmatpush1.bf16.msra.mxu1 %v21922_v45  ;;  %16076 = vmatprep.subr.bf16.mxu0 %v21927_v6  ;;  %v22006_v45 = vld [vmem:[%s22566_s24 + $0x3d80] ss:$8 sps:$4 sm:$0xff]   ;;  %v22011_v6 = vld [vmem:[%s22566_s24 + $0x3e74] ss:$8 sps:$4 sm:$0xff]  }
 0x81d   : > { %16119 = vmatprep.subr.bf16.mxu1 %v21930_v44  ;;  %v22014_v44 = vld [vmem:[%s22566_s24 + $0x3f74] ss:$8 sps:$4 sm:$0xff]  }
 0x81f   : > { %16077 = vmatpush1.bf16.msra.mxu0 %v21925_v7  ;;  %v25373_v7 = vld [vmem:[%s22634_s29 + $0x1f0] sm:$0xff] }
 0x820   : > { %16120 = vmatpush1.bf16.msra.mxu1 %v21928_v17  ;;  %16078 = vmatprep.subr.bf16.mxu0 %v21933_v19  ;;  %v16827_v17 = vcombine.low %v25289_v36, %v25296_v28  ;;  %v16829_v19 = vcombine.low %v25299_v40, %v25302_v22  ;;  %v22017_v36 = vld [vmem:[%s22566_s24 + $0x3e64] ss:$8 sps:$4 sm:$0xff]  }
 0x821   : > { %16121 = vmatprep.subr.bf16.mxu1 %v21936_v30  ;;  %v25380_v30 = vld [vmem:[%s22634_s29 + $0x7f0] sm:$0xff]  ;;  %v22020_v28 = vld [vmem:[%s22566_s24 + $0x3f64] ss:$8 sps:$4 sm:$0xff]  }
 0x822   : > { %v16832_v40 = vcombine.high %v25373_v7, %v25380_v30 }
 0x823   : > { %16079 = vmatpush1.bf16.msra.mxu0 %v21931_v38  ;;  %v25383_v38 = vld [vmem:[%s22634_s29 + $0x1f8] sm:$0xff] }
 0x824   : > { %16122 = vmatpush1.bf16.msra.mxu1 %v21934_v9  ;;  %16080 = vmatprep.subr.bf16.mxu0 %v21939_v8  ;;  %v25386_v9 = vld [vmem:[%s22634_s29 + $0x7f8] sm:$0xff] }
 0x825   : > { %16123 = vmatprep.subr.bf16.mxu1 %v21942_v14  ;;  %v22009_v8 = vld [vmem:[%s22566_s24 + $0x3e70] ss:$8 sps:$4 sm:$0xff]   ;;  %v16834_v22 = vcombine.high %v25383_v38, %v25386_v9 }
 0x826   : > { %v22012_v14 = vld [vmem:[%s22566_s24 + $0x3f70] ss:$8 sps:$4 sm:$0xff]  }
 0x827   : > { %16081 = vmatpush1.bf16.msra.mxu0 %v21937_v39  ;;  %v22015_v39 = vld [vmem:[%s22566_s24 + $0x3e60] ss:$8 sps:$4 sm:$0xff]  }
 0x828   : > { %16124 = vmatpush1.bf16.msra.mxu1 %v21940_v11  ;;  %16082 = vmatprep.subr.bf16.mxu0 %v21945_v48  ;;  %v22018_v11 = vld [vmem:[%s22566_s24 + $0x3f60] ss:$8 sps:$4 sm:$0xff]   ;;  %v22023_v48 = vld [vmem:[%s22566_s24 + $0x3e54] ss:$8 sps:$4 sm:$0xff]  }
 0x829   : > { %16125 = vmatprep.subr.bf16.mxu1 %v21948_v20  ;;  %v22026_v20 = vld [vmem:[%s22566_s24 + $0x3f54] ss:$8 sps:$4 sm:$0xff]  }
 0x82b   : > { %16083 = vmatpush1.bf16.msra.mxu0 %v21943_v42  ;;  %v22021_v42 = vld [vmem:[%s22566_s24 + $0x3e50] ss:$8 sps:$4 sm:$0xff]  }
 0x82c   : > { %16126 = vmatpush1.bf16.msra.mxu1 %v21946_v41  ;;  %16084 = vmatprep.subr.bf16.mxu0 %v21951_v33  ;;  %v22024_v41 = vld [vmem:[%s22566_s24 + $0x3f50] ss:$8 sps:$4 sm:$0xff]   ;;  %v22029_v33 = vld [vmem:[%s22566_s24 + $0x3e44] ss:$8 sps:$4 sm:$0xff]  }
 0x82d   : > { %16127 = vmatprep.subr.bf16.mxu1 %v21954_v5  ;;  %v22032_v5 = vld [vmem:[%s22566_s24 + $0x3f44] ss:$8 sps:$4 sm:$0xff]  }
 0x82f   : > { %16085 = vmatpush1.bf16.msra.mxu0 %v21949_v59  ;;  %v22027_v59 = vld [vmem:[%s22566_s24 + $0x3e40] ss:$8 sps:$4 sm:$0xff]  }
 0x830   : > { %16128 = vmatpush1.bf16.msra.mxu1 %v21952_v21  ;;  %16086 = vmatprep.subr.bf16.mxu0 %v21957_v63  ;;  %v22030_v21 = vld [vmem:[%s22566_s24 + $0x3f40] ss:$8 sps:$4 sm:$0xff]   ;;  %v22035_v63 = vld [vmem:[%s22566_s24 + $0x3e34] ss:$8 sps:$4 sm:$0xff]  }
 0x831   : > { %16129 = vmatprep.subr.bf16.mxu1 %v21960_v3  ;;  %v22038_v3 = vld [vmem:[%s22566_s24 + $0x3f34] ss:$8 sps:$4 sm:$0xff]  }
 0x833   : > { %16087 = vmatpush1.bf16.msra.mxu0 %v21955_v13  ;;  %v22033_v13 = vld [vmem:[%s22566_s24 + $0x3e30] ss:$8 sps:$4 sm:$0xff]  }
 0x834   : > { %16130 = vmatpush1.bf16.msra.mxu1 %v21958_v31  ;;  %16088 = vmatprep.subr.bf16.mxu0 %v21963_v53  ;;  %v22036_v31 = vld [vmem:[%s22566_s24 + $0x3f30] ss:$8 sps:$4 sm:$0xff]   ;;  %v22041_v53 = vld [vmem:[%s22566_s24 + $0x3e24] ss:$8 sps:$4 sm:$0xff]  }
 0x835   : > { %16131 = vmatprep.subr.bf16.mxu1 %v21966_v34  ;;  %v22044_v34 = vld [vmem:[%s22566_s24 + $0x3f24] ss:$8 sps:$4 sm:$0xff]  }
 0x837   : > { %16089 = vmatpush2.bf16.msra.mxu0 %v21961_v61  ;;  %v22039_v61 = vld [vmem:[%s22566_s24 + $0x3e20] ss:$8 sps:$4 sm:$0xff]  }
 0x838   : > { %16132 = vmatpush2.bf16.msra.mxu1 %v21964_v49  ;;  %16090 = vmatprep.subr.bf16.mxu0 %v21969_v47  ;;  %v22042_v49 = vld [vmem:[%s22566_s24 + $0x3f20] ss:$8 sps:$4 sm:$0xff]   ;;  %v22047_v47 = vld [vmem:[%s22566_s24 + $0x3e14] ss:$8 sps:$4 sm:$0xff]  }
 0x839   : > { %16133 = vmatprep.subr.bf16.mxu1 %v21972_v16  ;;  %v22050_v16 = vld [vmem:[%s22566_s24 + $0x3f14] ss:$8 sps:$4 sm:$0xff]  }
 0x83b   : > { %16091 = vmatpush2.bf16.msra.mxu0 %v21967_v24  ;;  %v22045_v24 = vld [vmem:[%s22566_s24 + $0x3e10] ss:$8 sps:$4 sm:$0xff]  }
 0x83c   : > { %16134 = vmatpush2.bf16.msra.mxu1 %v21970_v37  ;;  %16092 = vmatprep.subr.bf16.mxu0 %v21975_v55  ;;  %v22048_v37 = vld [vmem:[%s22566_s24 + $0x3f10] ss:$8 sps:$4 sm:$0xff]   ;;  %v22053_v55 = vld [vmem:[%s22566_s24 + $0x3e04] ss:$8 sps:$4 sm:$0xff]  }
 0x83d   : > { %16135 = vmatprep.subr.bf16.mxu1 %v21978_v27  ;;  %v22056_v27 = vld [vmem:[%s22566_s24 + $0x3f04] ss:$8 sps:$4 sm:$0xff]  }
 0x83f   : > { %16093 = vmatpush2.bf16.msra.mxu0 %v21973_v18  ;;  %v22051_v18 = vld [vmem:[%s22566_s24 + $0x3e00] ss:$8 sps:$4 sm:$0xff]  }
 0x840   : > { %16136 = vmatpush2.bf16.msra.mxu1 %v21976_v58  ;;  %16094 = vmatprep.subr.bf16.mxu0 %v21981_v32  ;;  %v22054_v58 = vld [vmem:[%s22566_s24 + $0x3f00] ss:$8 sps:$4 sm:$0xff]   ;;  %v22059_v32 = vld [vmem:[%s22566_s24 + $0x3ef4] ss:$8 sps:$4 sm:$0xff]  }
 0x841   : > { %16137 = vmatprep.subr.bf16.mxu1 %v21984_v2  ;;  %v22062_v2 = vld [vmem:[%s22566_s24 + $0x3ff4] ss:$8 sps:$4 sm:$0xff]  }
 0x843   : > { %16095 = vmatpush2.bf16.msra.mxu0 %v21979_v4  ;;  %v22057_v4 = vld [vmem:[%s22566_s24 + $0x3ef0] ss:$8 sps:$4 sm:$0xff]  }
 0x844   : > { %16138 = vmatpush2.bf16.msra.mxu1 %v21982_v15  ;;  %16096 = vmatprep.subr.bf16.mxu0 %v21987_v23  ;;  %v22060_v15 = vld [vmem:[%s22566_s24 + $0x3ff0] ss:$8 sps:$4 sm:$0xff]   ;;  %v22065_v23 = vld [vmem:[%s22566_s24 + $0x3ee4] ss:$8 sps:$4 sm:$0xff]  }
 0x845   : > { %16139 = vmatprep.subr.bf16.mxu1 %v21990_v52  ;;  %v22068_v52 = vld [vmem:[%s22566_s24 + $0x3fe4] ss:$8 sps:$4 sm:$0xff]  }
 0x847   : > { %16097 = vmatpush2.bf16.msra.mxu0 %v21985_v57  ;;  %v22063_v57 = vld [vmem:[%s22566_s24 + $0x3ee0] ss:$8 sps:$4 sm:$0xff]  }
 0x848   : > { %16140 = vmatpush2.bf16.msra.mxu1 %v21988_v1  ;;  %16098 = vmatprep.subr.bf16.mxu0 %v21993_v0  ;;  %v22066_v1 = vld [vmem:[%s22566_s24 + $0x3fe0] ss:$8 sps:$4 sm:$0xff]   ;;  %v22071_v0 = vld [vmem:[%s22566_s24 + $0x3ed4] ss:$8 sps:$4 sm:$0xff]  }
 0x849   : > { %16141 = vmatprep.subr.bf16.mxu1 %v21996_v62  ;;  %v22074_v62 = vld [vmem:[%s22566_s24 + $0x3fd4] ss:$8 sps:$4 sm:$0xff]  }
 0x84b   : > { %16099 = vmatpush2.bf16.msra.mxu0 %v21991_v26  ;;  %v22069_v26 = vld [vmem:[%s22566_s24 + $0x3ed0] ss:$8 sps:$4 sm:$0xff]  }
 0x84c   : > { %16142 = vmatpush2.bf16.msra.mxu1 %v21994_v60  ;;  %16100 = vmatprep.subr.bf16.mxu0 %v21999_v43  ;;  %v22072_v60 = vld [vmem:[%s22566_s24 + $0x3fd0] ss:$8 sps:$4 sm:$0xff]   ;;  %v22077_v43 = vld [vmem:[%s22566_s24 + $0x3ec4] ss:$8 sps:$4 sm:$0xff]  }
 0x84d   : > { %16143 = vmatprep.subr.bf16.mxu1 %v22002_v56  ;;  %v22080_v56 = vld [vmem:[%s22566_s24 + $0x3fc4] ss:$8 sps:$4 sm:$0xff]  }
 0x84f   : > { %16101 = vmatpush2.bf16.msra.mxu0 %v21997_v51  ;;  %v22075_v51 = vld [vmem:[%s22566_s24 + $0x3ec0] ss:$8 sps:$4 sm:$0xff]  }
 0x850   : > { %16144 = vmatpush2.bf16.msra.mxu1 %v22000_v50  ;;  %16102 = vmatprep.subr.bf16.mxu0 %v22005_v10  ;;  %v22078_v50 = vld [vmem:[%s22566_s24 + $0x3fc0] ss:$8 sps:$4 sm:$0xff]   ;;  %v22083_v10 = vld [vmem:[%s22566_s24 + $0x3eb4] ss:$8 sps:$4 sm:$0xff]  }
 0x851   : > { %16145 = vmatprep.subr.bf16.mxu1 %v22008_v46  ;;  %v22086_v46 = vld [vmem:[%s22566_s24 + $0x3fb4] ss:$8 sps:$4 sm:$0xff]  }
 0x853   : > { %16103 = vmatpush2.bf16.msra.mxu0 %v22003_v29  ;;  %v22081_v29 = vld [vmem:[%s22566_s24 + $0x3eb0] ss:$8 sps:$4 sm:$0xff]  }
 0x854   : > { %16146 = vmatpush2.bf16.msra.mxu1 %v22006_v45  ;;  %16158 = vmatprep.subr.bf16.mxu0 %v22011_v6  ;;  %v22084_v45 = vld [vmem:[%s22566_s24 + $0x3fb0] ss:$8 sps:$4 sm:$0xff]   ;;  %v25442_v6 = vpop.f32.mrf.mxu0 }
 0x855   : > { %16201 = vmatprep.subr.bf16.mxu1 %v22014_v44  ;;  %v25444_v44 = vpop.f32.mrf.mxu1 }
 0x856   : > { %16105 = vmatmul.mubr.bf16.vlgmr.msra.gmra.mxu0 %v16827_v17  ;;  %v22089_v17 = vld [vmem:[%s22566_s24 + $0x3ea4] ss:$8 sps:$4 sm:$0xff]  }
 0x857   : > { %16148 = vmatmul.mubr.bf16.vlgmr.msra.gmra.mxu1 %v16829_v19  ;;  %16159 = vmatpush1.bf16.msra.mxu0 %v22009_v8  ;;  %v22092_v19 = vld [vmem:[%s22566_s24 + $0x3fa4] ss:$8 sps:$4 sm:$0xff]   ;;  %v22087_v8 = vld [vmem:[%s22566_s24 + $0x3ea0] ss:$8 sps:$4 sm:$0xff]  }
 0x858   : > { %16202 = vmatpush1.bf16.msra.mxu1 %v22012_v14  ;;  %16160 = vmatprep.subr.bf16.mxu0 %v22017_v36  ;;  %v22090_v14 = vld [vmem:[%s22566_s24 + $0x3fa0] ss:$8 sps:$4 sm:$0xff]   ;;  %v25450_v36 = vpop.f32.mrf.mxu0 }
 0x859   : > { %16203 = vmatprep.subr.bf16.mxu1 %v22020_v28  ;;  %16190 = vmatprep.mubr.bf16.mxu0 %v16832_v40  ;;  %v25452_v28 = vpop.f32.mrf.mxu1  ;;  %v22095_v40 = vld [vmem:[%s22566_s24 + $0x3e94] ss:$8 sps:$4 sm:$0xff]  }
 0x85a   : > { %16233 = vmatprep.mubr.bf16.mxu1 %v16834_v22  ;;  %v22098_v22 = vld [vmem:[%s22566_s24 + $0x3f94] ss:$8 sps:$4 sm:$0xff]  }
 0x85b   : > { %16161 = vmatpush1.bf16.msra.mxu0 %v22015_v39  ;;  %v22093_v39 = vld [vmem:[%s22566_s24 + $0x3e90] ss:$8 sps:$4 sm:$0xff]  }
 0x85c   : > { %16204 = vmatpush1.bf16.msra.mxu1 %v22018_v11  ;;  %16162 = vmatprep.subr.bf16.mxu0 %v22023_v48  ;;  %v22096_v11 = vld [vmem:[%s22566_s24 + $0x3f90] ss:$8 sps:$4 sm:$0xff]   ;;  %v25458_v48 = vpop.f32.mrf.mxu0 }
 0x85d   : > { %16205 = vmatprep.subr.bf16.mxu1 %v22026_v20  ;;  %v25460_v20 = vpop.f32.mrf.mxu1 }
 0x85f   : > { %16163 = vmatpush1.bf16.msra.mxu0 %v22021_v42  ;;  %v22101_v42 = vld [vmem:[%s22566_s24 + $0x3e84] ss:$8 sps:$4 sm:$0xff]  }
 0x860   : > { %16206 = vmatpush1.bf16.msra.mxu1 %v22024_v41  ;;  %16164 = vmatprep.subr.bf16.mxu0 %v22029_v33  ;;  %v22104_v41 = vld [vmem:[%s22566_s24 + $0x3f84] ss:$8 sps:$4 sm:$0xff]   ;;  %v22099_v33 = vld [vmem:[%s22566_s24 + $0x3e80] ss:$8 sps:$4 sm:$0xff]  }
 0x861   : > { %16207 = vmatprep.subr.bf16.mxu1 %v22032_v5  ;;  %v22102_v5 = vld [vmem:[%s22566_s24 + $0x3f80] ss:$8 sps:$4 sm:$0xff]  }
 0x863   : > { %16165 = vmatpush1.bf16.msra.mxu0 %v22027_v59  ;;  %v25466_v59 = vpop.f32.mrf.mxu0 }
 0x864   : > { %16208 = vmatpush1.bf16.msra.mxu1 %v22030_v21  ;;  %16166 = vmatprep.subr.bf16.mxu0 %v22035_v63  ;;  %v25468_v21 = vpop.f32.mrf.mxu1 }
 0x865   : > { %16209 = vmatprep.subr.bf16.mxu1 %v22038_v3  ;;  %v25470_v63 = vpop.f32.mrf.mxu0 }
 0x866   : > { %v25472_v3 = vpop.f32.mrf.mxu1 }
 0x867   : > { %16167 = vmatpush1.bf16.msra.mxu0 %v22033_v13  ;;  %v16831_v13 = vcombine.low %v25373_v7, %v25380_v30 }
 0x868   : > { %16210 = vmatpush1.bf16.msra.mxu1 %v22036_v31  ;;  %16168 = vmatprep.subr.bf16.mxu0 %v22041_v53  ;;  %v16833_v31 = vcombine.low %v25383_v38, %v25386_v9  ;;  %v25478_v53 = vpop.f32.mrf.mxu0 }
 0x869   : > { %16211 = vmatprep.subr.bf16.mxu1 %v22044_v34  ;;  %v25480_v34 = vpop.f32.mrf.mxu1 }
 0x86b   : > { %16169 = vmatpush1.bf16.msra.mxu0 %v22039_v61  ;;  %v25482_v61 = vpop.f32.mrf.mxu0 }
 0x86c   : > { %16212 = vmatpush1.bf16.msra.mxu1 %v22042_v49  ;;  %16170 = vmatprep.subr.bf16.mxu0 %v22047_v47  ;;  %v25484_v49 = vpop.f32.mrf.mxu1 }
 0x86d   : > { %16213 = vmatprep.subr.bf16.mxu1 %v22050_v16  ;;  %v25486_v47 = vpop.f32.mrf.mxu0 }
 0x86e   : > { %v25488_v16 = vpop.f32.mrf.mxu1 }
 0x86f   : > { %16171 = vmatpush1.bf16.msra.mxu0 %v22045_v24  ;;  %v25490_v7 = vpop.f32.mrf.mxu0 }
 0x870   : > { %16214 = vmatpush1.bf16.msra.mxu1 %v22048_v37  ;;  %16172 = vmatprep.subr.bf16.mxu0 %v22053_v55  ;;  %v25492_v30 = vpop.f32.mrf.mxu1 }
 0x871   : > { %16215 = vmatprep.subr.bf16.mxu1 %v22056_v27  ;;  %v25494_v38 = vpop.f32.mrf.mxu0 }
 0x872   : > { %v25496_v9 = vpop.f32.mrf.mxu1 }
 0x873   : > { %16173 = vmatpush1.bf16.msra.mxu0 %v22051_v18  ;;  %v25498_v24 = vpop.f32.mrf.mxu0 }
 0x874   : > { %16216 = vmatpush1.bf16.msra.mxu1 %v22054_v58  ;;  %16174 = vmatprep.subr.bf16.mxu0 %v22059_v32  ;;  %v25500_v37 = vpop.f32.mrf.mxu1 }
 0x875   : > { %16217 = vmatprep.subr.bf16.mxu1 %v22062_v2  ;;  %v25502_v55 = vpop.f32.mrf.mxu0 }
 0x876   : > { %v25504_v27 = vpop.f32.mrf.mxu1 }
 0x877   : > { %16175 = vmatpush2.bf16.msra.mxu0 %v22057_v4  ;;  %v25506_v18 = vpop.f32.mrf.mxu0 }
 0x878   : > { %16218 = vmatpush2.bf16.msra.mxu1 %v22060_v15  ;;  %16176 = vmatprep.subr.bf16.mxu0 %v22065_v23  ;;  %v25508_v58 = vpop.f32.mrf.mxu1 }
 0x879   : > { %16219 = vmatprep.subr.bf16.mxu1 %v22068_v52  ;;  %v25510_v32 = vpop.f32.mrf.mxu0 }
 0x87a   : > { %v25512_v2 = vpop.f32.mrf.mxu1 }
 0x87b   : > { %16177 = vmatpush2.bf16.msra.mxu0 %v22063_v57  ;;  %v25514_v4 = vpop.f32.mrf.mxu0 }
 0x87c   : > { %16220 = vmatpush2.bf16.msra.mxu1 %v22066_v1  ;;  %16178 = vmatprep.subr.bf16.mxu0 %v22071_v0  ;;  %v25516_v15 = vpop.f32.mrf.mxu1 }
 0x87d   : > { %16221 = vmatprep.subr.bf16.mxu1 %v22074_v62  ;;  %v25518_v23 = vpop.f32.mrf.mxu0 }
 0x87e   : > { %v25520_v52 = vpop.f32.mrf.mxu1 }
 0x87f   : > { %16179 = vmatpush2.bf16.msra.mxu0 %v22069_v26  ;;  %v25522_v57 = vpop.f32.mrf.mxu0 }
 0x880   : > { %16222 = vmatpush2.bf16.msra.mxu1 %v22072_v60  ;;  %16180 = vmatprep.subr.bf16.mxu0 %v22077_v43  ;;  %v25524_v1 = vpop.f32.mrf.mxu1 }
 0x881   : > { %16223 = vmatprep.subr.bf16.mxu1 %v22080_v56  ;;  %v25526_v0 = vpop.f32.mrf.mxu0 }
 0x882   : > { %v25528_v62 = vpop.f32.mrf.mxu1 }
 0x883   : > { %16181 = vmatpush2.bf16.msra.mxu0 %v22075_v51  ;;  %v25530_v26 = vpop.f32.mrf.mxu0 }
 0x884   : > { %16224 = vmatpush2.bf16.msra.mxu1 %v22078_v50  ;;  %16182 = vmatprep.subr.bf16.mxu0 %v22083_v10  ;;  %v25532_v60 = vpop.f32.mrf.mxu1 }
 0x885   : > { %16225 = vmatprep.subr.bf16.mxu1 %v22086_v46  ;;  %v25534_v43 = vpop.f32.mrf.mxu0 }
 0x886   : > { %v25536_v56 = vpop.f32.mrf.mxu1 }
 0x887   : > { %16183 = vmatpush2.bf16.msra.mxu0 %v22081_v29  ;;  %v25538_v51 = vpop.f32.mrf.mxu0 }
 0x888   : > { %16226 = vmatpush2.bf16.msra.mxu1 %v22084_v45  ;;  %16184 = vmatprep.subr.bf16.mxu0 %v22089_v17  ;;  %v25540_v50 = vpop.f32.mrf.mxu1 }
 0x889   : > { %16227 = vmatprep.subr.bf16.mxu1 %v22092_v19  ;;  %v25542_v10 = vpop.f32.mrf.mxu0 }
 0x88a   : > { %v25544_v46 = vpop.f32.mrf.mxu1 }
 0x88b   : > { %16185 = vmatpush2.bf16.msra.mxu0 %v22087_v8  ;;  %v25546_v29 = vpop.f32.mrf.mxu0 }
 0x88c   : > { %16228 = vmatpush2.bf16.msra.mxu1 %v22090_v14  ;;  %16186 = vmatprep.subr.bf16.mxu0 %v22095_v40  ;;  %v25548_v45 = vpop.f32.mrf.mxu1 }
 0x88d   : > { %16229 = vmatprep.subr.bf16.mxu1 %v22098_v22  ;;  %v25550_v17 = vpop.f32.mrf.mxu0 }
 0x88e   : > { %v25552_v19 = vpop.f32.mrf.mxu1 }
 0x88f   : > { %16187 = vmatpush2.bf16.msra.mxu0 %v22093_v39  ;;  %25791 = vst [vmem:[#allocation18_spill] sm:$0xff] %v25552_v19  ;;  %v25554_v8 = vpop.f32.mrf.mxu0 }
 0x890   : > { %16230 = vmatpush2.bf16.msra.mxu1 %v22096_v11  ;;  %16188 = vmatprep.subr.bf16.mxu0 %v22101_v42  ;;  %v25556_v14 = vpop.f32.mrf.mxu1 }
 0x891   : > { %16231 = vmatprep.subr.bf16.mxu1 %v22104_v41  ;;  %25792 = vst [vmem:[#allocation19_spill] sm:$0xff] %v25556_v14  ;;  %v25558_v40 = vpop.f32.mrf.mxu0 }
 0x892   : > { %v25560_v22 = vpop.f32.mrf.mxu1 }
 0x893   : > { %16189 = vmatpush2.bf16.msra.mxu0 %v22099_v33  ;;  %25793 = vst [vmem:[#allocation20_spill] sm:$0xff] %v25560_v22  ;;  %v25562_v39 = vpop.f32.mrf.mxu0 }
 0x894   : > { %16232 = vmatpush2.bf16.msra.mxu1 %v22102_v5  ;;  %25794 = vst [vmem:[#allocation21_spill] sm:$0xff] %v25562_v39  ;;  %v25564_v11 = vpop.f32.mrf.mxu1 }
 0x895   : > { %25795 = vst [vmem:[#allocation22_spill] sm:$0xff] %v25564_v11  ;;  %v25566_v42 = vpop.f32.mrf.mxu0 }
 0x896   : > { %16191 = vmatmul.mubr.bf16.vlgmr.msra.gmra.mxu0 %v16831_v13  ;;  %25796 = vst [vmem:[#allocation23_spill] sm:$0xff] %v25566_v42  ;;  %v25568_v41 = vpop.f32.mrf.mxu1 }
 0x897   : > { %16234 = vmatmul.mubr.bf16.vlgmr.msra.gmra.mxu1 %v16833_v31  ;;  %25797 = vst [vmem:[#allocation24_spill] sm:$0xff] %v25568_v41  ;;  %v25570_v33 = vpop.f32.mrf.mxu0 }
 0x898   : > { %25798 = vst [vmem:[#allocation25_spill] sm:$0xff] %v25570_v33  ;;  %v25572_v5 = vpop.f32.mrf.mxu1 }
 0x899   : > { %25799 = vst [vmem:[#allocation26_spill] sm:$0xff] %v25572_v5  ;;  %v25574_v13 = vpop.f32.mrf.mxu0 }
 0x89a   : > { %25800 = vst [vmem:[#allocation27_spill] sm:$0xff] %v25574_v13  ;;  %v25576_v31 = vpop.f32.mrf.mxu1 }
 0x89b   : > { %25801 = vst [vmem:[#allocation28_spill] sm:$0xff] %v25576_v31  ;;  %v25578_v14 = vpop.f32.mrf.mxu0  ;;  %v14903_v31 = vadd.f32 %v25442_v6, %v24381_v54  ;;  %v14909_v54 = vadd.f32 %v25466_v59, %v24394_v35 }
 0x89c   : > { %v25580_v19 = vpop.f32.mrf.mxu1 }
 0x89d   : > { %25802 = vst [vmem:[#allocation29_spill] sm:$0xff] %v25580_v19  ;;  %v25582_v22 = vpop.f32.mrf.mxu0  ;;  %v14905_v19 = vadd.f32 %v25450_v36, %v24384_v25 }
 0x89e   : > { %25803 = vst [vmem:[#allocation30_spill] sm:$0xff] %v25582_v22  ;;  %v25584_v39 = vpop.f32.mrf.mxu1 }
 0x89f   : > { %25804 = vst [vmem:[#allocation31_spill] sm:$0xff] %v25584_v39  ;;  %v25586_v11 = vpop.f32.mrf.mxu0 }
 0x8a0   : > { %v25588_v42 = vpop.f32.mrf.mxu1 }
 0x8a1   : > { %25805 = vst [vmem:[#allocation32_spill] sm:$0xff] %v25588_v42  ;;  %v25590_v41 = vpop.f32.mrf.mxu0  ;;  %v14946_v42 = vadd.f32 %v25444_v44, %v14903_v31 }
 0x8a2   : > { %25806 = vst [vmem:[#allocation33_spill] sm:$0xff] %v25590_v41  ;;  %v25592_v33 = vpop.f32.mrf.mxu1  ;;  %v14907_v41 = vadd.f32 %v25458_v48, %v24391_v12  ;;  %v14952_v12 = vadd.f32 %v25468_v21, %v14909_v54 }
 0x8a3   : > { %25807 = vst [vmem:[#allocation34_spill] sm:$0xff] %v25592_v33  ;;  %v25594_v5 = vpop.f32.mrf.mxu0  ;;  %v14989_v25 = vadd.f32 %v25470_v63, %v14946_v42 }
 0x8a4   : > { %25808 = vst [vmem:[#allocation35_spill] sm:$0xff] %v25594_v5  ;;  %v25596_v13 = vpop.f32.mrf.mxu1  ;;  %v14950_v6 = vadd.f32 %v25460_v20, %v14907_v41  ;;  %v14995_v35 = vadd.f32 %v25486_v47, %v14952_v12 }
 0x8a5   : > { %25809 = vst [vmem:[#allocation36_spill] sm:$0xff] %v25596_v13  ;;  %v25602_v22 = vpop.f32.mrf.mxu0  ;;  %v14948_v13 = vadd.f32 %v25452_v28, %v14905_v19  ;;  %v15032_v48 = vadd.f32 %v25472_v3, %v14989_v25 }
 0x8a6   : > { %v25604_v39 = vpop.f32.mrf.mxu1  ;;  %v14993_v31 = vadd.f32 %v25482_v61, %v14950_v6  ;;  %v15038_v21 = vadd.f32 %v25488_v16, %v14995_v35 }
 0x8a7   : > { %25810 = vst [vmem:[#allocation37_spill] sm:$0xff] %v25604_v39  ;;  %v25609_v33 = vpop.f32.mrf.mxu0  ;;  %v14991_v36 = vadd.f32 %v25478_v53, %v14948_v13  ;;  %v15075_v59 = vadd.f32 %v25490_v7, %v15032_v48 }
 0x8a8   : > { %v25611_v5 = vpop.f32.mrf.mxu1  ;;  %v15036_v53 = vadd.f32 %v25484_v49, %v14993_v31  ;;  %v15081_v7 = vadd.f32 %v25502_v55, %v15038_v21 }
 0x8a9   : > { %v25619_v39 = vpop.f32.mrf.mxu0  ;;  %v15034_v28 = vadd.f32 %v25480_v34, %v14991_v36  ;;  %v15118_v3 = vadd.f32 %v25492_v30, %v15075_v59 }
 0x8aa   : > { %v25621_v44 = vpop.f32.mrf.mxu1  ;;  %v15079_v61 = vadd.f32 %v25498_v24, %v15036_v53 }
 0x8ab   : > { %v25629_v63 = vpop.f32.mrf.mxu0  ;;  %v15077_v19 = vadd.f32 %v25494_v38, %v15034_v28  ;;  %v15161_v41 = vadd.f32 %v25506_v18, %v15118_v3  ;;  %v15124_v38 = vadd.f32 %v25504_v27, %v15081_v7 }
 0x8ac   : > { %v25631_v20 = vpop.f32.mrf.mxu1  ;;  %v15122_v16 = vadd.f32 %v25500_v37, %v15079_v61 }
 0x8ad   : > { %v25638_v42 = vpop.f32.mrf.mxu0  ;;  %v15120_v47 = vadd.f32 %v25496_v9, %v15077_v19  ;;  %v15204_v24 = vadd.f32 %v25508_v58, %v15161_v41  ;;  %v15167_v18 = vadd.f32 %v25518_v23, %v15124_v38  ;;  %v25811_v19 = vld [vmem:[#allocation18_spill] sm:$0xff] }
 0x8ae   : > { %v25640_v34 = vpop.f32.mrf.mxu1  ;;  %v15165_v54 = vadd.f32 %v25514_v4, %v15122_v16 }
 0x8af   : > { %v25645_v13 = vpop.f32.mrf.mxu0  ;;  %v15163_v30 = vadd.f32 %v25510_v32, %v15120_v47  ;;  %v15247_v6 = vadd.f32 %v25522_v57, %v15204_v24  ;;  %v15210_v58 = vadd.f32 %v25520_v52, %v15167_v18  ;;  %v25818_v24 = vld [vmem:[#allocation27_spill] sm:$0xff] }
 0x8b0   : > { %v25647_v49 = vpop.f32.mrf.mxu1  ;;  %v15208_v37 = vadd.f32 %v25516_v15, %v15165_v54 }
 0x8b1   : > { %v25654_v25 = vpop.f32.mrf.mxu0  ;;  %v15206_v55 = vadd.f32 %v25512_v2, %v15163_v30  ;;  %v15290_v4 = vadd.f32 %v25524_v1, %v15247_v6  ;;  %v15253_v23 = vadd.f32 %v25534_v43, %v15210_v58  ;;  %v25817_v30 = vld [vmem:[#allocation22_spill] sm:$0xff] }
 0x8b2   : > { %v25656_v9 = vpop.f32.mrf.mxu1  ;;  %v15251_v12 = vadd.f32 %v25530_v26, %v15208_v37  ;;  %v25820_v6 = vld [vmem:[#allocation26_spill] sm:$0xff] }
 0x8b3   : > { %v15249_v32 = vadd.f32 %v25526_v0, %v15206_v55  ;;  %v25663_v36 = vpop.f32.mrf.mxu0  ;;  %v15333_v57 = vadd.f32 %v25538_v51, %v15290_v4  ;;  %v15296_v1 = vadd.f32 %v25536_v56, %v15253_v23  ;;  %v25812_v56 = vld [vmem:[#allocation19_spill] sm:$0xff]  ;;  %v25819_v55 = vld [vmem:[#allocation24_spill] sm:$0xff]  ;;  %v25822_v23 = vld [vmem:[#allocation30_spill] sm:$0xff] }
 0x8b4   : > { %v25665_v27 = vpop.f32.mrf.mxu1  ;;  %v15294_v0 = vadd.f32 %v25532_v60, %v15251_v12  ;;  %v25821_v12 = vld [vmem:[#allocation28_spill] sm:$0xff] }
 0x8b5   : > { %v15292_v2 = vadd.f32 %v25528_v62, %v15249_v32  ;;  %v25673_v48 = vpop.f32.mrf.mxu0  ;;  %v15376_v62 = vadd.f32 %v25540_v50, %v15333_v57  ;;  %v15339_v51 = vadd.f32 %v25550_v17, %v15296_v1  ;;  %v25813_v50 = vld [vmem:[#allocation21_spill] sm:$0xff]  ;;  %v25815_v17 = vld [vmem:[#allocation23_spill] sm:$0xff] }
 0x8b6   : > { %v25675_v15 = vpop.f32.mrf.mxu1  ;;  %v15337_v26 = vadd.f32 %v25546_v29, %v15294_v0 }
 0x8b7   : > { %v15335_v31 = vadd.f32 %v25542_v10, %v15292_v2  ;;  %v25679_v28 = vpop.f32.mrf.mxu0  ;;  %v15419_v35 = vadd.f32 %v25554_v8, %v15376_v62  ;;  %v15382_v21 = vadd.f32 %v25811_v19, %v15339_v51  ;;  %v25816_v8 = vld [vmem:[#allocation25_spill] sm:$0xff] }
 0x8b8   : > { %v25681_v52 = vpop.f32.mrf.mxu1  ;;  %v15380_v10 = vadd.f32 %v25548_v45, %v15337_v26  ;;  %v25824_v62 = vld [vmem:[#allocation33_spill] sm:$0xff] }
 0x8b9   : > { %v15378_v43 = vadd.f32 %v25544_v46, %v15335_v31  ;;  %v15850_v59 = vpop.f32.mrf.mxu0  ;;  %v15462_v3 = vadd.f32 %v25812_v56, %v15419_v35  ;;  %v25814_v46 = vld [vmem:[#allocation20_spill] sm:$0xff]  ;;  %v15425_v41 = vadd.f32 %v25815_v17, %v15382_v21  ;;  %v25823_v31 = vld [vmem:[#allocation29_spill] sm:$0xff]  ;;  %v25825_v35 = vld [vmem:[#allocation31_spill] sm:$0xff] }
 0x8ba   : > { %v25689_v60 = vpop.f32.mrf.mxu1  ;;  %v15423_v61 = vadd.f32 %v25813_v50, %v15380_v10  ;;  %v25827_v21 = vld [vmem:[#allocation35_spill] sm:$0xff]  ;;  %v25828_v56 = vld [vmem:[#allocation34_spill] sm:$0xff] }
 0x8bb   : > { %v15421_v53 = vadd.f32 %v25558_v40, %v15378_v43  ;;  %v15852_v29 = vpop.f32.mrf.mxu0  ;;  %v15505_v16 = vadd.f32 %v25816_v8, %v15462_v3  ;;  %v15468_v18 = vadd.f32 %v25819_v55, %v15425_v41  ;;  %v25830_v8 = vld [vmem:[#allocation37_spill] sm:$0xff] }
 0x8bc   : > { %v15895_v47 = vpop.f32.mrf.mxu1  ;;  %v15466_v38 = vadd.f32 %v25817_v30, %v15423_v61 }
 0x8bd   : > { %v15464_v7 = vadd.f32 %v25814_v46, %v15421_v53  ;;  %v15854_v54 = vpop.f32.mrf.mxu0  ;;  %v15548_v37 = vadd.f32 %v25820_v6, %v15505_v16  ;;  %v15511_v57 = vadd.f32 %v25822_v23, %v15468_v18  ;;  %v25826_v53 = vld [vmem:[#allocation32_spill] sm:$0xff] }
 0x8be   : > { %v15897_v40 = vpop.f32.mrf.mxu1  ;;  %v15509_v32 = vadd.f32 %v25578_v14, %v15466_v38 }
 0x8bf   : > { %v15507_v45 = vadd.f32 %v25818_v24, %v15464_v7  ;;  %v15934_v58 = vpop.f32.mrf.mxu0  ;;  %v15591_v0 = vadd.f32 %v25586_v11, %v15548_v37  ;;  %v15554_v10 = vadd.f32 %v25825_v35, %v15511_v57  ;;  %v25829_v7 = vld [vmem:[#allocation36_spill] sm:$0xff] }
 0x8c0   : > { %v15977_v4 = vpop.f32.mrf.mxu1  ;;  %v15552_v1 = vadd.f32 %v25823_v31, %v15509_v32 }
 0x8c1   : > { %v15550_v2 = vadd.f32 %v25821_v12, %v15507_v45  ;;  %v15936_v43 = vpop.f32.mrf.mxu0  ;;  %v15634_v19 = vadd.f32 %v25826_v53, %v15591_v0  ;;  %v15597_v50 = vadd.f32 %v25602_v22, %v15554_v10 }
 0x8c2   : > { %v15979_v51 = vpop.f32.mrf.mxu1  ;;  %v15595_v14 = vadd.f32 %v25827_v21, %v15552_v1 }
 0x8c3   : > { %v15593_v26 = vadd.f32 %v25824_v62, %v15550_v2  ;;  %v15677_v61 = vadd.f32 %v25609_v33, %v15634_v19  ;;  %v15938_v46 = vpop.f32.mrf.mxu0  ;;  %v15640_v16 = vadd.f32 %v25830_v8, %v15597_v50 }
 0x8c4   : > { %v15981_v11 = vpop.f32.mrf.mxu1  ;;  %v15638_v17 = vadd.f32 %v25829_v7, %v15595_v14 }
 0x8c5   : > { %v15636_v3 = vadd.f32 %v25828_v56, %v15593_v26  ;;  %v15720_v30 = vadd.f32 %v25611_v5, %v15677_v61  ;;  %v15940_v24 = vpop.f32.mrf.mxu0  ;;  %v15683_v22 = vadd.f32 %v25638_v42, %v15640_v16 }
 0x8c6   : > { %v15681_v38 = vadd.f32 %v25629_v63, %v15638_v17  ;;  %v15983_v45 = vpop.f32.mrf.mxu1 }
 0x8c7   : > { %v15679_v41 = vadd.f32 %v25619_v39, %v15636_v3  ;;  %v15763_v33 = vadd.f32 %v25645_v13, %v15720_v30  ;;  %v15726_v32 = vadd.f32 %v25640_v34, %v15683_v22 }
 0x8c8   : > { %v15724_v37 = vadd.f32 %v25631_v20, %v15681_v38  ;;  %v560_v38 = vld [vmem:[#allocation2 + $0x10] sm:$0xff] }
 0x8c9   : > { %v15722_v55 = vadd.f32 %v25621_v44, %v15679_v41  ;;  %v15806_v5 = vadd.f32 %v25647_v49, %v15763_v33  ;;  %v15769_v42 = vadd.f32 %v25673_v48, %v15726_v32 }
 0x8ca   : > { %v15767_v63 = vadd.f32 %v25663_v36, %v15724_v37 }
 0x8cb   : > { %v15765_v39 = vadd.f32 %v25654_v25, %v15722_v55  ;;  %v15849_v13 = vadd.f32 %v25679_v28, %v15806_v5  ;;  %v15812_v25 = vadd.f32 %v25675_v15, %v15769_v42 }
 0x8cc   : > { %v15810_v23 = vadd.f32 %v25665_v27, %v15767_v63 }
 0x8cd   : > { %v15808_v44 = vadd.f32 %v25656_v9, %v15765_v39  ;;  %v15892_v34 = vadd.f32 %v25681_v52, %v15849_v13  ;;  %v15855_v31 = vadd.f32 %v15854_v54, %v15812_v25 }
 0x8ce   : > { %v15853_v49 = vadd.f32 %v15852_v29, %v15810_v23  ;;  %v563_v23 = vld [vmem:[#allocation2 + $0x8] sm:$0xff] }
 0x8cf   : > { %v15851_v57 = vadd.f32 %v15850_v59, %v15808_v44  ;;  %v15935_v1 = vadd.f32 %v15934_v58, %v15892_v34  ;;  %v15898_v10 = vadd.f32 %v15897_v40, %v15855_v31 }
 0x8d0   : > { %v15896_v26 = vadd.f32 %v15895_v47, %v15853_v49 }
 0x8d1   : > { %v15894_v36 = vadd.f32 %v25689_v60, %v15851_v57  ;;  %v15978_v27 = vadd.f32 %v15977_v4, %v15935_v1  ;;  %v15941_v19 = vadd.f32 %v15940_v24, %v15898_v10 }
 0x8d2   : > { %v15939_v59 = vadd.f32 %v15938_v46, %v15896_v26 }
 0x8d3   : > { %v15937_v48 = vadd.f32 %v15936_v43, %v15894_v36  ;;  %v15984_v56 = vadd.f32 %v15983_v45, %v15941_v19 }
 0x8d4   : > { %v15982_v52 = vadd.f32 %v15981_v11, %v15939_v59 }
 0x8d5   : > { %v15980_v53 = vadd.f32 %v15979_v51, %v15937_v48 }
 0x8d6   : > { %v16020_v18 = vpop.f32.mrf.mxu0 }
 0x8d7   : > { %v16063_v6 = vpop.f32.mrf.mxu1  ;;  %v16021_v21 = vadd.f32 %v16020_v18, %v15978_v27  ;;  %v561_v18 = vld [vmem:[#allocation2] sm:$0xff] }
 0x8d8   : > { %v16022_v12 = vpop.f32.mrf.mxu0 }
 0x8d9   : > { %v16065_v2 = vpop.f32.mrf.mxu1  ;;  %v16023_v29 = vadd.f32 %v16022_v12, %v15980_v53  ;;  %v16064_v60 = vadd.f32 %v16063_v6, %v16021_v21  ;;  %v562_v12 = vld [vmem:[#allocation2 + $0x18] sm:$0xff] }
 0x8da   : > { %v16024_v20 = vpop.f32.mrf.mxu0 }
 0x8db   : > { %v16067_v0 = vpop.f32.mrf.mxu1  ;;  %v16025_v54 = vadd.f32 %v16024_v20, %v15982_v52  ;;  %v16066_v50 = vadd.f32 %v16065_v2, %v16023_v29 }
 0x8dc   : > { %v16026_v62 = vpop.f32.mrf.mxu0 }
 0x8dd   : > { %v16069_v9 = vpop.f32.mrf.mxu1  ;;  %v16027_v47 = vadd.f32 %v16026_v62, %v15984_v56  ;;  %v16068_v61 = vadd.f32 %v16067_v0, %v16025_v54 }
 0x8df   : > { %v16070_v46 = vadd.f32 %v16069_v9, %v16027_v47 }
 0x916   : > { %v16106_v35 = vpop.f32.mrf.mxu0 }
 0x917   : > { %v16149_v28 = vpop.f32.mrf.mxu1  ;;  %v16107_v43 = vadd.f32 %v16106_v35, %v16064_v60 }
 0x918   : > { %v16108_v15 = vpop.f32.mrf.mxu0 }
 0x919   : > { %v16151_v14 = vpop.f32.mrf.mxu1  ;;  %v16109_v7 = vadd.f32 %v16108_v15, %v16066_v50  ;;  %v16150_v51 = vadd.f32 %v16149_v28, %v16107_v43 }
 0x91a   : > { %v16110_v58 = vpop.f32.mrf.mxu0 }
 0x91b   : > { %v16153_v3 = vpop.f32.mrf.mxu1  ;;  %v16111_v17 = vadd.f32 %v16110_v58, %v16068_v61  ;;  %v16152_v16 = vadd.f32 %v16151_v14, %v16109_v7 }
 0x91c   : > { %v16112_v40 = vpop.f32.mrf.mxu0 }
 0x91d   : > { %v16155_v4 = vpop.f32.mrf.mxu1  ;;  %v16113_v11 = vadd.f32 %v16112_v40, %v16070_v46  ;;  %v16154_v55 = vadd.f32 %v16153_v3, %v16111_v17 }
 0x91f   : > { %v16156_v39 = vadd.f32 %v16155_v4, %v16113_v11 }
 0x956   : > { %v16192_v41 = vpop.f32.mrf.mxu0 }
 0x957   : > { %v16235_v8 = vpop.f32.mrf.mxu1  ;;  %v16193_v30 = vadd.f32 %v16192_v41, %v16150_v51 }
 0x958   : > { %v16194_v24 = vpop.f32.mrf.mxu0 }
 0x959   : > { %v16237_v45 = vpop.f32.mrf.mxu1  ;;  %v16236_v22 = vadd.f32 %v16235_v8, %v16193_v30  ;;  %v16195_v33 = vadd.f32 %v16194_v24, %v16152_v16 }
 0x95a   : > { %v16196_v6 = vpop.f32.mrf.mxu0 }
 0x95b   : > { %v16239_v37 = vpop.f32.mrf.mxu1  ;;  %v16244_v32 = vadd.f32 %v16236_v22, %v560_v38  ;;  %v16238_v5 = vadd.f32 %v16237_v45, %v16195_v33  ;;  %v16197_v63 = vadd.f32 %v16196_v6, %v16154_v55 }
 0x95c   : > { %v16198_v2 = vpop.f32.mrf.mxu0 }
 0x95d   : > { %16248 = vst [vmem:[#allocation2 + $0x10] sm:$0xff] %v16244_v32  ;;  %v16245_v44 = vadd.f32 %v16238_v5, %v561_v18  ;;  %v16240_v42 = vadd.f32 %v16239_v37, %v16197_v63  ;;  %v16199_v13 = vadd.f32 %v16198_v2, %v16156_v39  ;;  %v16241_v57 = vpop.f32.mrf.mxu1 }
 0x95f   : > { %16249 = vst [vmem:[#allocation2] sm:$0xff] %v16245_v44  ;;  %v16246_v20 = vadd.f32 %v16240_v42, %v562_v12  ;;  %v16242_v0 = vadd.f32 %v16241_v57, %v16199_v13  ;;  %16255 = sbr.rel (%p18883_p10) target bundleno = 2943 (0xb7f), region = 92 }
 0x961   : > { %16250 = vst [vmem:[#allocation2 + $0x18] sm:$0xff] %v16246_v20  ;;  %v16247_v25 = vadd.f32 %v16242_v0, %v563_v23 }
 0x963   : > { %16251 = vst [vmem:[#allocation2 + $0x8] sm:$0xff] %v16247_v25 }
 0x964   : > { %v16260_v34 = vld [vmem:[%s25763_s2] sm:$0xff]  ;;  %v22350_v36 = vmov 0   ;;  %v16342_v31 = vld [vmem:[#allocation8 + $0xf0] sm:$0xff]  ;;  %v16341_v1 = vld [vmem:[#allocation8 + $0xe8] sm:$0xff] }
 0x965   : > { %v16343_v49 = vld [vmem:[#allocation8 + $0xf8] sm:$0xff]  ;;  %22105 = vset.pattern.permute.xlu0 %v22350_v36  ;;  %v16340_v62 = vld [vmem:[#allocation8 + $0xe0] sm:$0xff]  ;;  %v16338_v48 = vld [vmem:[#allocation8 + $0xd0] sm:$0xff] }
 0x966   : > { %16388 = vmatprep.subr.mxu0 %v16343_v49  ;;  %16265 = vperm.xlu0 %22105, %v16260_v34   ;;  %v16339_v9 = vld [vmem:[#allocation8 + $0xd8] sm:$0xff]  ;;  %v16261_v26 = vld [vmem:[%s25763_s2 + $0x8] sm:$0xff]  ;;  %v16334_v27 = vld [vmem:[#allocation8 + $0xb0] sm:$0xff] }
 0x967   : > { %16389 = vmatpush1.msra.mxu0 %v16342_v31  ;;  %v16337_v35 = vld [vmem:[#allocation8 + $0xc8] sm:$0xff]  ;;  %v16336_v28 = vld [vmem:[#allocation8 + $0xc0] sm:$0xff]  ;;  %v16335_v10 = vld [vmem:[#allocation8 + $0xb8] sm:$0xff] }
 0x968   : > { %16390 = vmatprep.subr.mxu0 %v16341_v1  ;;  %v16333_v59 = vld [vmem:[#allocation8 + $0xa8] sm:$0xff]  ;;  %v16332_v53 = vld [vmem:[#allocation8 + $0xa0] sm:$0xff]  ;;  %v16331_v19 = vld [vmem:[#allocation8 + $0x98] sm:$0xff] }
 0x969   : > { %16391 = vmatpush1.msra.mxu0 %v16340_v62  ;;  %v16330_v21 = vld [vmem:[#allocation8 + $0x90] sm:$0xff]  ;;  %v16329_v15 = vld [vmem:[#allocation8 + $0x88] sm:$0xff]  ;;  %v16328_v14 = vld [vmem:[#allocation8 + $0x80] sm:$0xff] }
 0x96a   : > { %16392 = vmatprep.subr.mxu0 %v16339_v9  ;;  %16270 = vperm.xlu0 %22105, %v16261_v26   ;;  %v16327_v52 = vld [vmem:[#allocation8 + $0x78] sm:$0xff]  ;;  %v16326_v29 = vld [vmem:[#allocation8 + $0x70] sm:$0xff]  ;;  %v16325_v56 = vld [vmem:[#allocation8 + $0x68] sm:$0xff] }
 0x96b   : > { %16393 = vmatpush1.msra.mxu0 %v16338_v48  ;;  %v16324_v60 = vld [vmem:[#allocation8 + $0x60] sm:$0xff]  ;;  %v16323_v54 = vld [vmem:[#allocation8 + $0x58] sm:$0xff]  ;;  %v16322_v58 = vld [vmem:[#allocation8 + $0x50] sm:$0xff] }
 0x96c   : > { %16394 = vmatprep.subr.mxu0 %v16337_v35  ;;  %v16321_v3 = vld [vmem:[#allocation8 + $0x48] sm:$0xff]  ;;  %v16320_v50 = vld [vmem:[#allocation8 + $0x40] sm:$0xff]  ;;  %v16319_v47 = vld [vmem:[#allocation8 + $0x38] sm:$0xff] }
 0x96d   : > { %16395 = vmatpush1.msra.mxu0 %v16336_v28  ;;  %v16318_v43 = vld [vmem:[#allocation8 + $0x30] sm:$0xff]  ;;  %v16317_v61 = vld [vmem:[#allocation8 + $0x28] sm:$0xff]  ;;  %v16500_v7 = vld [vmem:[#allocation11 + $0xf8] sm:$0xff] }
 0x96e   : > { %16396 = vmatprep.subr.mxu0 %v16335_v10  ;;  %v16484_v40 = vld [vmem:[#allocation11 + $0x78] sm:$0xff]  ;;  %v16499_v4 = vld [vmem:[#allocation11 + $0xf0] sm:$0xff]  ;;  %18889 = vmatprep.subr.mxu1 %v16500_v7  ;;  %v16498_v41 = vld [vmem:[#allocation11 + $0xe8] sm:$0xff] }
 0x96f   : > { %16397 = vmatpush1.msra.mxu0 %v16334_v27  ;;  %v16316_v46 = vld [vmem:[#allocation8 + $0x20] sm:$0xff]  ;;  %v16483_v51 = vld [vmem:[#allocation11 + $0x70] sm:$0xff]  ;;  %18890 = vmatpush3.msra.mxu1 %v16484_v40  ;;  %v16482_v16 = vld [vmem:[#allocation11 + $0x68] sm:$0xff] }
 0x970   : > { %16398 = vmatprep.subr.mxu0 %v16333_v59  ;;  %v16315_v17 = vld [vmem:[#allocation8 + $0x18] sm:$0xff]  ;;  %v16314_v8 = vld [vmem:[#allocation8 + $0x10] sm:$0xff]  ;;  %18891 = vmatprep.subr.mxu1 %v16499_v4  ;;  %v16313_v11 = vld [vmem:[#allocation8 + $0x8] sm:$0xff] }
 0x971   : > { %16399 = vmatpush1.msra.mxu0 %v16332_v53  ;;  %18892 = vmatpush3.msra.mxu1 %v16483_v51  ;;  %v16497_v30 = vld [vmem:[#allocation11 + $0xe0] sm:$0xff]  ;;  %v16375_v45 = vld [vmem:[#allocation8 + $0x1f8] sm:$0xff]  ;;  %v16374_v22 = vld [vmem:[#allocation8 + $0x1f0] sm:$0xff] }
 0x972   : > { %16400 = vmatprep.subr.mxu0 %v16331_v19  ;;  %v16312_v38 = vld [vmem:[#allocation8] sm:$0xff]  ;;  %18893 = vmatprep.subr.mxu1 %v16498_v41  ;;  %v16373_v18 = vld [vmem:[#allocation8 + $0x1e8] sm:$0xff]  ;;  %v16495_v6 = vld [vmem:[#allocation11 + $0xd0] sm:$0xff] }
 0x973   : > { %16401 = vmatpush1.msra.mxu0 %v16330_v21  ;;  %v16481_v24 = vld [vmem:[#allocation11 + $0x60] sm:$0xff]  ;;  %18894 = vmatpush3.msra.mxu1 %v16482_v16  ;;  %v16496_v55 = vld [vmem:[#allocation11 + $0xd8] sm:$0xff]  ;;  %v16479_v39 = vld [vmem:[#allocation11 + $0x50] sm:$0xff] }
 0x974   : > { %16402 = vmatprep.subr.mxu0 %v16329_v15  ;;  %18895 = vmatprep.subr.mxu1 %v16497_v30  ;;  %v16480_v33 = vld [vmem:[#allocation11 + $0x58] sm:$0xff]  ;;  %v16494_v5 = vld [vmem:[#allocation11 + $0xc8] sm:$0xff]  ;;  %v16493_v44 = vld [vmem:[#allocation11 + $0xc0] sm:$0xff] }
 0x975   : > { %16403 = vmatpush1.msra.mxu0 %v16328_v14  ;;  %18896 = vmatpush3.msra.mxu1 %v16481_v24  ;;  %v16372_v37 = vld [vmem:[#allocation8 + $0x1e0] sm:$0xff]  ;;  %v16371_v32 = vld [vmem:[#allocation8 + $0x1d8] sm:$0xff]  ;;  %v16370_v63 = vld [vmem:[#allocation8 + $0x1d0] sm:$0xff] }
 0x976   : > { %16404 = vmatprep.subr.mxu0 %v16327_v52  ;;  %18897 = vmatprep.subr.mxu1 %v16496_v55  ;;  %v16478_v12 = vld [vmem:[#allocation11 + $0x48] sm:$0xff]  ;;  %v16368_v42 = vld [vmem:[#allocation8 + $0x1c0] sm:$0xff]  ;;  %v16367_v23 = vld [vmem:[#allocation8 + $0x1b8] sm:$0xff] }
 0x977   : > { %16405 = vmatpush1.msra.mxu0 %v16326_v29  ;;  %18898 = vmatpush3.msra.mxu1 %v16480_v33  ;;  %v16369_v2 = vld [vmem:[#allocation8 + $0x1c8] sm:$0xff]  ;;  %v16492_v57 = vld [vmem:[#allocation11 + $0xb8] sm:$0xff]  ;;  %v16366_v20 = vld [vmem:[#allocation8 + $0x1b0] sm:$0xff] }
 0x978   : > { %16406 = vmatprep.subr.mxu0 %v16325_v56  ;;  %18899 = vmatprep.subr.mxu1 %v16495_v6  ;;  %v16477_v13 = vld [vmem:[#allocation11 + $0x40] sm:$0xff]  ;;  %v16476_v0 = vld [vmem:[#allocation11 + $0x38] sm:$0xff]  ;;  %v16491_v34 = vld [vmem:[#allocation11 + $0xb0] sm:$0xff] }
 0x979   : > { %16407 = vmatpush1.msra.mxu0 %v16324_v60  ;;  %18900 = vmatpush3.msra.mxu1 %v16479_v39  ;;  %v16365_v25 = vld [vmem:[#allocation8 + $0x1a8] sm:$0xff]  ;;  %v16364_v49 = vld [vmem:[#allocation8 + $0x1a0] sm:$0xff]  ;;  %v16475_v36 = vld [vmem:[#allocation11 + $0x30] sm:$0xff] }
 0x97a   : > { %16408 = vmatprep.subr.mxu0 %v16323_v54  ;;  %18901 = vmatprep.subr.mxu1 %v16494_v5  ;;  %v16363_v31 = vld [vmem:[#allocation8 + $0x198] sm:$0xff]  ;;  %v16490_v1 = vld [vmem:[#allocation11 + $0xa8] sm:$0xff]  ;;  %v16489_v48 = vld [vmem:[#allocation11 + $0xa0] sm:$0xff] }
 0x97b   : > { %16409 = vmatpush1.msra.mxu0 %v16322_v58  ;;  %18902 = vmatpush3.msra.mxu1 %v16478_v12  ;;  %v16362_v62 = vld [vmem:[#allocation8 + $0x190] sm:$0xff]  ;;  %v16361_v26 = vld [vmem:[#allocation8 + $0x188] sm:$0xff]  ;;  %v16360_v35 = vld [vmem:[#allocation8 + $0x180] sm:$0xff] }
 0x97c   : > { %16410 = vmatprep.subr.mxu0 %v16321_v3  ;;  %18903 = vmatprep.subr.mxu1 %v16493_v44  ;;  %v16474_v9 = vld [vmem:[#allocation11 + $0x28] sm:$0xff]  ;;  %v16473_v28 = vld [vmem:[#allocation11 + $0x20] sm:$0xff]  ;;  %v16359_v10 = vld [vmem:[#allocation8 + $0x178] sm:$0xff] }
 0x97d   : > { %16411 = vmatpush1.msra.mxu0 %v16320_v50  ;;  %18904 = vmatpush3.msra.mxu1 %v16477_v13  ;;  %v16358_v27 = vld [vmem:[#allocation8 + $0x170] sm:$0xff]  ;;  %v16357_v59 = vld [vmem:[#allocation8 + $0x168] sm:$0xff]  ;;  %v16356_v53 = vld [vmem:[#allocation8 + $0x160] sm:$0xff] }
 0x97e   : > { %16412 = vmatprep.subr.mxu0 %v16319_v47  ;;  %18905 = vmatprep.subr.mxu1 %v16492_v57  ;;  %v16355_v19 = vld [vmem:[#allocation8 + $0x158] sm:$0xff]  ;;  %v16354_v21 = vld [vmem:[#allocation8 + $0x150] sm:$0xff]  ;;  %v16353_v15 = vld [vmem:[#allocation8 + $0x148] sm:$0xff]  ;;  %v16274_v47 = vlaneseq }
 0x97f   : > { %16413 = vmatpush1.msra.mxu0 %v16318_v43  ;;  %18906 = vmatpush3.msra.mxu1 %v16476_v0  ;;  %v16352_v14 = vld [vmem:[#allocation8 + $0x140] sm:$0xff]  ;;  %v16351_v52 = vld [vmem:[#allocation8 + $0x138] sm:$0xff]  ;;  %v16350_v29 = vld [vmem:[#allocation8 + $0x130] sm:$0xff] }
 0x980   : > { %16414 = vmatprep.subr.mxu0 %v16317_v61  ;;  %18907 = vmatprep.subr.mxu1 %v16491_v34  ;;  %v16349_v56 = vld [vmem:[#allocation8 + $0x128] sm:$0xff]  ;;  %v16348_v60 = vld [vmem:[#allocation8 + $0x120] sm:$0xff]  ;;  %v16347_v54 = vld [vmem:[#allocation8 + $0x118] sm:$0xff]  ;;  %v16275_v43 = vshrl.u32 %v16274_v47, 7 }
 0x981   : > { %16415 = vmatpush1.msra.mxu0 %v16316_v46  ;;  %18908 = vmatpush3.msra.mxu1 %v16475_v36  ;;  %v16346_v58 = vld [vmem:[#allocation8 + $0x110] sm:$0xff]  ;;  %v16345_v3 = vld [vmem:[#allocation8 + $0x108] sm:$0xff]  ;;  %v16344_v50 = vld [vmem:[#allocation8 + $0x100] sm:$0xff] }
 0x982   : > { %16416 = vmatprep.subr.mxu0 %v16315_v17  ;;  %18909 = vmatprep.subr.mxu1 %v16490_v1  ;;  %v16276_v61 = vsub.s32 0, %v16275_v43  ;;  %v16280_v7 = vsub.s32 1, %v16275_v43  ;;  %v16262_v40 = vld [vmem:[#allocation5] sm:$0x3]  ;;  %v16292_v51 = vld [vmem:[#allocation7] sm:$0x3] }
 0x983   : > { %16417 = vmatpush1.msra.mxu0 %v16314_v8  ;;  %18910 = vmatpush3.msra.mxu1 %v16474_v9  ;;  %v16256_v41 = vld [vmem:[#allocation2 + $0x10] sm:$0xff]  ;;  %v16257_v8 = vld [vmem:[#allocation2] sm:$0xff]  ;;  %v16259_v33 = vld [vmem:[#allocation2 + $0x8] sm:$0xff] }
 0x984   : > { %16418 = vmatprep.subr.mxu0 %v16313_v11  ;;  %18911 = vmatprep.subr.mxu1 %v16489_v48  ;;  %v16277_v4 = vrot.slane %v16262_v40, %v16276_v61  ;;  %v16281_v46 = vrot.slane %v16262_v40, %v16280_v7  ;;  %v16297_v30 = vrot.slane %v16292_v51, %v16276_v61  ;;  %v16472_v57 = vld [vmem:[#allocation11 + $0x18] sm:$0xff]  ;;  %v16471_v0 = vld [vmem:[#allocation11 + $0x10] sm:$0xff]  ;;  %v16470_v34 = vld [vmem:[#allocation11 + $0x8] sm:$0xff] }
 0x985   : > { %16419 = vmatpush1.msra.mxu0 %v16312_v38  ;;  %18912 = vmatpush3.msra.mxu1 %v16473_v28  ;;  %v16301_v38 = vrot.slane %v16292_v51, %v16280_v7  ;;  %v16469_v36 = vld [vmem:[#allocation11] sm:$0xff] }
 0x986   : > { %16420 = vmatprep.subr.mxu0 %v16375_v45 }
 0x987   : > { %16421 = vmatpush2.msra.mxu0 %v16374_v22  ;;  %v16258_v22 = vld [vmem:[#allocation2 + $0x18] sm:$0xff] }
 0x988   : > { %16422 = vmatprep.subr.mxu0 %v16373_v18 }
 0x989   : > { %16423 = vmatpush2.msra.mxu0 %v16372_v37 }
 0x98a   : > { %16424 = vmatprep.subr.mxu0 %v16371_v32 }
 0x98b   : > { %16425 = vmatpush2.msra.mxu0 %v16370_v63 }
 0x98c   : > { %16426 = vmatprep.subr.mxu0 %v16369_v2 }
 0x98d   : > { %16427 = vmatpush2.msra.mxu0 %v16368_v42 }
 0x98e   : > { %16428 = vmatprep.subr.mxu0 %v16367_v23  ;;  %v16488_v23 = vld [vmem:[#allocation11 + $0x98] sm:$0xff] }
 0x98f   : > { %16429 = vmatpush2.msra.mxu0 %v16366_v20  ;;  %18913 = vmatprep.subr.mxu1 %v16488_v23  ;;  %v16487_v20 = vld [vmem:[#allocation11 + $0x90] sm:$0xff] }
 0x990   : > { %16430 = vmatprep.subr.mxu0 %v16365_v25  ;;  %18914 = vmatpush3.msra.mxu1 %v16472_v57  ;;  %v16486_v25 = vld [vmem:[#allocation11 + $0x88] sm:$0xff] }
 0x991   : > { %16431 = vmatpush2.msra.mxu0 %v16364_v49  ;;  %18915 = vmatprep.subr.mxu1 %v16487_v20  ;;  %v16485_v49 = vld [vmem:[#allocation11 + $0x80] sm:$0xff] }
 0x992   : > { %16432 = vmatprep.subr.mxu0 %v16363_v31  ;;  %18916 = vmatpush3.msra.mxu1 %v16471_v0  ;;  %v16376_v31 = vld [vmem:[#allocation10] sm:$0x3] }
 0x993   : > { %16433 = vmatpush2.msra.mxu0 %v16362_v62  ;;  %18917 = vmatprep.subr.mxu1 %v16486_v25  ;;  %v16381_v1 = vrot.slane %v16376_v31, %v16276_v61  ;;  %v16385_v62 = vrot.slane %v16376_v31, %v16280_v7 }
 0x994   : > { %16434 = vmatprep.subr.mxu0 %v16361_v26  ;;  %18918 = vmatpush3.msra.mxu1 %v16470_v34 }
 0x995   : > { %16435 = vmatpush2.msra.mxu0 %v16360_v35  ;;  %18919 = vmatprep.subr.mxu1 %v16485_v49 }
 0x996   : > { %16436 = vmatprep.subr.mxu0 %v16359_v10  ;;  %18920 = vmatpush3.msra.mxu1 %v16469_v36 }
 0x997   : > { %16437 = vmatpush2.msra.mxu0 %v16358_v27 }
 0x998   : > { %16438 = vmatprep.subr.mxu0 %v16357_v59 }
 0x999   : > { %16439 = vmatpush2.msra.mxu0 %v16356_v53 }
 0x99a   : > { %16440 = vmatprep.subr.mxu0 %v16355_v19 }
 0x99b   : > { %16441 = vmatpush2.msra.mxu0 %v16354_v21 }
 0x99c   : > { %16442 = vmatprep.subr.mxu0 %v16353_v15 }
 0x99d   : > { %16443 = vmatpush2.msra.mxu0 %v16352_v14 }
 0x99e   : > { %16444 = vmatprep.subr.mxu0 %v16351_v52  ;;  %v18884_v52 = vld [vmem:[#allocation13] ss:$0 sm:$0xff] }
 0x99f   : > { %16445 = vmatpush2.msra.mxu0 %v16350_v29 }
 0x9a0   : > { %16446 = vmatprep.subr.mxu0 %v16349_v56 }
 0x9a1   : > { %16447 = vmatpush2.msra.mxu0 %v16348_v60 }
 0x9a2   : > { %16448 = vmatprep.subr.mxu0 %v16347_v54 }
 0x9a3   : > { %16449 = vmatpush2.msra.mxu0 %v16346_v58 }
 0x9a4   : > { %16450 = vmatprep.subr.mxu0 %v16345_v3 }
 0x9a5   : > { %16451 = vmatpush2.msra.mxu0 %v16344_v50 }
 0x9e1   : > { %v16266_v17 = vpop.permute.xlu0 %16265 }
 0x9e2   : > { %v16284_v16 = vmul.f32 %v16277_v4, %v16266_v17  ;;  %v16285_v11 = vmul.f32 %v16281_v46, %v16266_v17 }
 0x9e4   : > { %v16288_v24 = vadd.f32 %v16284_v16, %v16256_v41  ;;  %v16289_v45 = vadd.f32 %v16285_v11, %v16257_v8 }
 0x9e5   : > { %v16271_v55 = vpop.permute.xlu0 %16270 }
 0x9e6   : > { %v16286_v18 = vmul.f32 %v16277_v4, %v16271_v55  ;;  %v16287_v6 = vmul.f32 %v16281_v46, %v16271_v55  ;;  %v16305_v37 = vadd.f32 %v16301_v38, %v16289_v45  ;;  %v16304_v39 = vadd.f32 %v16297_v30, %v16288_v24 }
 0x9e8   : > { %v16290_v32 = vadd.f32 %v16286_v18, %v16258_v22  ;;  %v16291_v5 = vadd.f32 %v16287_v6, %v16259_v33  ;;  %v16309_v63 = vmax.f32 %v16305_v37, 0.0  ;;  %v16308_v12 = vmax.f32 %v16304_v39, 0.0 }
 0x9ea   : > { %16452 = vmatprep.mubr.f32.mxu0 %v16309_v63  ;;  %v16307_v2 = vadd.f32 %v16301_v38, %v16291_v5  ;;  %v16306_v44 = vadd.f32 %v16297_v30, %v16290_v32 }
 0x9eb   : > { %16453 = vmatmul.mubr.f32.vlgmr.msra.gmra.mxu0 %v16308_v12 }
 0x9ec   : > { %v16311_v42 = vmax.f32 %v16307_v2, 0.0  ;;  %v16310_v13 = vmax.f32 %v16306_v44, 0.0 }
 0x9ee   : > { %16458 = vmatprep.mubr.f32.mxu0 %v16311_v42 }
 0x9ef   : > { %16459 = vmatmul.mubr.f32.gmra.mxu0 %v16310_v13 }
 0xaab   : > { %v16454_v9 = vpop.f32.mrf.mxu0 }
 0xaac   : > { %v16455_v26 = vadd.f32 %v16454_v9, %v16381_v1 }
 0xaad   : > { %v16456_v48 = vpop.f32.mrf.mxu0 }
 0xaae   : > { %v16457_v35 = vadd.f32 %v16456_v48, %v16385_v62  ;;  %v16465_v27 = vmax.f32 %v16455_v26, 0.0 }
 0xaaf   : > { %v16460_v28 = vpop.f32.mrf.mxu0 }
 0xab0   : > { %v16466_v10 = vmax.f32 %v16457_v35, 0.0  ;;  %v16461_v59 = vadd.f32 %v16460_v28, %v16381_v1 }
 0xab1   : > { %v16462_v53 = vpop.f32.mrf.mxu0 }
 0xab2   : > { %v16463_v19 = vadd.f32 %v16462_v53, %v16385_v62  ;;  %16572 = vmatprep.mubr.f32.mxu1 %v16466_v10  ;;  %v16467_v15 = vmax.f32 %v16461_v59, 0.0 }
 0xab3   : > { %16573 = vmatmul.mubr.f32.vlgmr.msra.gmra.mxu1 %v16465_v27 }
 0xab4   : > { %v16468_v21 = vmax.f32 %v16463_v19, 0.0 }
 0xab6   : > { %16577 = vmatprep.mubr.f32.mxu1 %v16468_v21 }
 0xab7   : > { %16578 = vmatmul.mubr.f32.gmra.mxu1 %v16467_v15 }
 0xb73   : > { %v18921_v14 = vpop.f32.mrf.mxu1 }
 0xb75   : > { %v18922_v29 = vpop.f32.mrf.mxu1 }
 0xb76   : > { %v18923_v56 = vadd.f32 %v18922_v29, %v18921_v14 }
 0xb77   : > { %v18924_v60 = vpop.f32.mrf.mxu1 }
 0xb78   : > { %v16575_v54 = vadd.f32 %v18923_v56, %v18884_v52 }
 0xb79   : > { %v18925_v58 = vpop.f32.mrf.mxu1 }
 0xb7a   : > { %16583 = vst [vmem:[%s25770_s9] sm:$0xff] %v16575_v54  ;;  %v18926_v3 = vadd.f32 %v18925_v58, %v18924_v60 }
 0xb7c   : > { %v16580_v50 = vadd.f32 %v18926_v3, %v18884_v52 }
 0xb7e   : > { %16584 = vst [vmem:[%s25770_s9 + $0x8] sm:$0xff] %v16580_v50 }
 0xb7f PF: > { %p22_p12 = scmp.ge.s32.totalorder %s22506_s22, 5   ;;  %s25831_s30 = smov %s22328_s10 }
 0xb80   : > { %s25832_s10 = smov %s22332_s11  ;;  %s25833_s11 = smov %s22518_s13 }
 0xb81   : > { %s25834_s12 = smov %s22506_s22  ;;  %24 = sbr.rel (!%p22_p12) target bundleno = 6 (0x6), region = 125 }
 0xb86   :  { %16596 = vsyncpa [#allocation4], 1 }
 0xb87   :  { %16598 = vsyncpa [#allocation4 + $0x1], 1 }
 0xb88   :  { %16599 = vsyncpa [#allocation6], 1 }
 0xb89   :  { %16600 = vsyncpa [#allocation9], 1 }
 0xb8a   :  { %16601 = vsyncpa [#allocation12], 1 }

</bundles_post_ra>
